<compile_context>
chip_gen: v6e
topology: v6e:2x2x1
jax: 0.10.0
libtpu: 0.0.40
codegen_flags: <defaults>
</compile_context>

<pallas_src>
import numpy as np

import jax
import jax.numpy as jnp
from jax.experimental import pallas as pl
from jax.experimental.pallas import tpu as pltpu

_SELU_ALPHA = 1.6732632423543772
_SELU_SCALE = 1.0507009873554805

# tap order k = kh*3 + kw  (dy = kh-1, dx = kw-1), matching w.reshape(9, ...)
_TAPS = [(dy, dx) for dy in (-1, 0, 1) for dx in (-1, 0, 1)]


def _selu(x):
    return _SELU_SCALE * jnp.where(x > 0, x, _SELU_ALPHA * (jnp.exp(x) - 1.0))


def _apply_act(x, act):
    if act == "selu":
        return _selu(x)
    if act == "tanh":
        return jnp.tanh(x)
    return x


# ------------------- precomputed constant matrices (host) -------------------

def _shift_mats(H, W):
    """(9, HW, HW) 0/1 matrices: x_tap = x @ S[k] = masked SAME-padding shift."""
    HW = H * W
    S = np.zeros((9, HW, HW), np.float32)
    for k, (dy, dx) in enumerate(_TAPS):
        for y in range(H):
            for x in range(W):
                yy, xx = y + dy, x + dx
                if 0 <= yy < H and 0 <= xx < W:
                    S[k, yy * W + xx, y * W + x] = 1.0
    return S


def _tap_masks(H, W):
    """(9, 1, HW) 0/1 validity masks for the roll-based tap shift."""
    HW = H * W
    m = np.zeros((9, 1, HW), np.float32)
    for k, (dy, dx) in enumerate(_TAPS):
        for y in range(H):
            for x in range(W):
                if 0 <= y + dy < H and 0 <= x + dx < W:
                    m[k, 0, y * W + x] = 1.0
    return m


def _upsample_mat(H, W):
    """(HW, 4HW) 0/1 matrix implementing nearest-neighbour 2x upsample."""
    U = np.zeros((H * W, 4 * H * W), np.float32)
    W2 = 2 * W
    for yp in range(2 * H):
        for xp in range(2 * W):
            U[(yp // 2) * W + (xp // 2), yp * W2 + xp] = 1.0
    return U


# ----------------------------- fused forward --------------------------------

def decoder_forward_pallas(x, params, cfg):
    B, T, E = x.shape
    BT = B * T
    C0, H0, W0 = cfg["cnn_in_shape"]
    channels = tuple(int(cfg["base_channels"] // m) for m in cfg["channels_mult"])
    out_c, out_h, out_w = cfg["out_shape"]
    F = cfg["mlp_feedforward_dim"]
    HW0 = H0 * W0
    HW_out = out_h * out_w

    # ------------------ static per-stage metadata ------------------
    stage_meta = []
    h_cur, w_cur = H0, W0
    cin = C0
    for si, cout in enumerate(channels):
        if si > 0:
            h_cur, w_cur = h_cur * 2, w_cur * 2
        p = params["demb"] if si == 0 else params["blocks"][si - 1]
        stage_meta.append(dict(
            upsample=(si > 0), cin=cin, cout=cout, H=h_cur, W=w_cur,
            has_skip=("ws" in p), post_act=("selu" if si == 0 else "none"),
            use_smat=(h_cur * w_cur < 128)))
        cin = cout
    assert (h_cur, w_cur) == (out_h, out_w), \
        "Must have correct amount of residual blocks to upscale."

    # ------------------ operand list (kernel consumes in this order) --------
    operands = []
    in_specs = []

    def add_full(a):
        a = jnp.asarray(a, jnp.float32)
        operands.append(a)
        in_specs.append(pl.BlockSpec(a.shape, lambda i, nd=a.ndim: (0,) * nd))

    x3 = x.reshape(BT, 1, E).astype(jnp.float32)
    operands.append(x3)
    in_specs.append(pl.BlockSpec((1, 1, E), lambda i: (i, 0, 0)))

    add_full(params["mlp_w1"])                                   # (E, F)
    add_full(params["mlp_b1"].reshape(1, F))                     # (1, F)
    # re-pack layer-2 weight so the kernel produces the image directly in the
    # internal (channels, H*W) layout:  w2r[c, f, p] = w2[f, c*HW0 + p]
    add_full(params["mlp_w2"].reshape(F, C0, HW0).transpose(1, 0, 2))
    add_full(params["mlp_b2"].reshape(C0, HW0))

    for si, meta in enumerate(stage_meta):
        p = params["demb"] if si == 0 else params["blocks"][si - 1]
        ci, co = meta["cin"], meta["cout"]
        if meta["upsample"]:
            add_full(_upsample_mat(meta["H"] // 2, meta["W"] // 2))
        add_full(jnp.transpose(p["w1"].reshape(9, ci, co), (0, 2, 1)))  # (9,co,ci)
        add_full(p["b1"].reshape(co, 1))
        add_full(jnp.transpose(p["w2"].reshape(9, co, co), (0, 2, 1)))  # (9,co,co)
        add_full(p["b2"].reshape(co, 1))
        if meta["has_skip"]:
            add_full(p["ws"].T)                                         # (co, ci)
            add_full(p["bs"].reshape(co, 1))
        if meta["use_smat"]:
            add_full(_shift_mats(meta["H"], meta["W"]))                 # (9,HW,HW)
        else:
            add_full(_tap_masks(meta["H"], meta["W"]))                  # (9,1,HW)

    add_full(params["proj_w"].T)                                        # (out_c, C_last)
    add_full(params["proj_b"].reshape(out_c, 1))

    # ------------------ kernel body (one image per grid step) ---------------
    def kernel(*refs):
        o_ref = refs[-1]
        it = iter(refs[:-1])
        x_ref = next(it)
        w1_ref, b1_ref, w2r_ref, b2r_ref = next(it), next(it), next(it), next(it)

        # --- MLP: linear -> SELU -> linear, then mlp_act (SELU) ---
        xv = x_ref[0]                                                   # (1, E)
        h1 = _selu(jnp.dot(xv, w1_ref[...],
                           preferred_element_type=jnp.float32) + b1_ref[...])
        # assemble the (C0, HW0) image row by row (outer-product placement,
        # avoids in-kernel reshape/concat of tiny sub-tile pieces)
        chan = jax.lax.broadcasted_iota(jnp.int32, (C0, 1), 0)
        h = jnp.zeros((C0, HW0), jnp.float32)
        for c in range(C0):
            row = jnp.dot(h1, w2r_ref[c], preferred_element_type=jnp.float32)
            h = h + jnp.where(chan == c, 1.0, 0.0) * row
        h = _selu(h + b2r_ref[...])                                     # (C0, HW0)

        # --- residual trunk ---
        for meta in stage_meta:
            if meta["upsample"]:
                u_ref = next(it)
                h = jnp.dot(h, u_ref[...], preferred_element_type=jnp.float32)
            w1t, bb1, w2t, bb2 = next(it), next(it), next(it), next(it)
            if meta["has_skip"]:
                wst, bst = next(it), next(it)
            shift_ref = next(it)
            Wd = meta["W"]
            HW = meta["H"] * meta["W"]
            use_smat = meta["use_smat"]
            cout = meta["cout"]

            def conv3x3(xin, wt_ref, b_ref, act):
                acc = jnp.zeros((cout, HW), jnp.float32)
                for k, (dy, dx) in enumerate(_TAPS):
                    d = dy * Wd + dx
                    if use_smat:
                        xs = jnp.dot(xin, shift_ref[k],
                                     preferred_element_type=jnp.float32)
                    elif d == 0:
                        xs = xin
                    else:
                        xs = jnp.roll(xin, -d, axis=1) * shift_ref[k]
                    acc = acc + jnp.dot(wt_ref[k], xs,
                                        preferred_element_type=jnp.float32)
                return _apply_act(acc + b_ref[...], act)

            t = conv3x3(h, w1t, bb1, "selu")
            t = conv3x3(t, w2t, bb2, "none")
            if meta["has_skip"]:
                skip = jnp.dot(wst[...], h,
                               preferred_element_type=jnp.float32) + bst[...]
            else:
                skip = h
            h = _apply_act(t + skip, meta["post_act"])

        # --- 1x1 proj + tanh, lane-dense (out_c, H*W) store ---
        pwt, pb = next(it), next(it)
        out = jnp.tanh(jnp.dot(pwt[...], h,
                               preferred_element_type=jnp.float32) + pb[...])
        o_ref[0] = out.astype(o_ref.dtype)

    # ------------------ cost estimate (advisory) -----------------------------
    flops = 2 * E * F + 2 * F * C0 * HW0
    transc = F + C0 * HW0
    for meta in stage_meta:
        ci, co, HW = meta["cin"], meta["cout"], meta["H"] * meta["W"]
        if meta["upsample"]:
            flops += 2 * ci * (HW // 4) * HW
        if meta["use_smat"]:
            flops += 2 * 9 * (ci + co) * HW * HW
        flops += 2 * 9 * ci * co * HW + 2 * 9 * co * co * HW
        if meta["has_skip"]:
            flops += 2 * ci * co * HW
        transc += 2 * co * HW
    flops += 2 * channels[-1] * out_c * HW_out
    transc += out_c * HW_out
    bytes_accessed = sum(int(o.size) * o.dtype.itemsize for o in operands)
    bytes_accessed += BT * out_c * HW_out * 4
    cost = pl.CostEstimate(flops=int(BT * flops),
                           transcendentals=int(BT * transc),
                           bytes_accessed=int(bytes_accessed))

    out = pl.pallas_call(
        kernel,
        out_shape=jax.ShapeDtypeStruct((BT, out_c, HW_out), jnp.float32),
        grid=(BT,),
        in_specs=in_specs,
        out_specs=pl.BlockSpec((1, out_c, HW_out), lambda i: (i, 0, 0)),
        compiler_params=pltpu.CompilerParams(
            dimension_semantics=("parallel",)),
        cost_estimate=cost,
    )(*operands)

    return out.reshape(B, T, out_c, out_h, out_w)


# ------------------------- pure-JAX reference --------------------------------

def _ref_mm(a, b, bias, act="none"):
    return _apply_act(a @ b + bias[None, :], act)


def _conv3x3_ref(x, w, b, act):
    bn, h, wd, cin = x.shape
    cout = w.shape[-1]
    xp = jnp.pad(x, ((0, 0), (1, 1), (1, 1), (0, 0)))
    patches = [xp[:, kh:kh + h, kw:kw + wd, :] for kh in range(3) for kw in range(3)]
    a = jnp.concatenate(patches, axis=-1).reshape(bn * h * wd, 9 * cin)
    return _ref_mm(a, w.reshape(9 * cin, cout), b, act).reshape(bn, h, wd, cout)


def _conv1x1_ref(x, w, b, act):
    bn, h, wd, cin = x.shape
    cout = w.shape[-1]
    return _ref_mm(x.reshape(-1, cin), w, b, act).reshape(bn, h, wd, cout)


def _resblock_ref(x, p, post_act):
    h = _conv3x3_ref(x, p["w1"], p["b1"], "selu")
    h = _conv3x3_ref(h, p["w2"], p["b2"], "none")
    skip = _conv1x1_ref(x, p["ws"], p["bs"], "none") if "ws" in p else x
    return _apply_act(h + skip, post_act)


def decoder_reference(x, params, cfg):
    b, t, e = x.shape
    c, hh, ww = cfg["cnn_in_shape"]
    h = _ref_mm(x.reshape(b * t, e), params["mlp_w1"], params["mlp_b1"], "selu")
    h = _ref_mm(h, params["mlp_w2"], params["mlp_b2"], "selu")
    h = jnp.transpose(h.reshape(b * t, c, hh, ww), (0, 2, 3, 1))      # NHWC
    h = _resblock_ref(h, params["demb"], "selu")
    for p in params["blocks"]:
        h = jnp.repeat(jnp.repeat(h, 2, axis=1), 2, axis=2)
        h = _resblock_ref(h, p, "none")
    out = _conv1x1_ref(h, params["proj_w"], params["proj_b"], "tanh")
    out = jnp.transpose(out, (0, 3, 1, 2))                            # NCHW
    co, ho, wo = out.shape[1:]
    return out.reshape(b, t, co, ho, wo)


# ------------------------------ param init ----------------------------------

def _init_linear(key, fin, fout):
    k1, k2 = jax.random.split(key)
    w = jax.random.normal(k1, (fin, fout), jnp.float32) / jnp.sqrt(fin)
    b = 0.01 * jax.random.normal(k2, (fout,), jnp.float32)
    return w, b


def _init_conv3x3(key, cin, cout):
    k1, k2 = jax.random.split(key)
    w = jax.random.normal(k1, (3, 3, cin, cout), jnp.float32) / jnp.sqrt(9 * cin)
    b = 0.01 * jax.random.normal(k2, (cout,), jnp.float32)
    return w, b


def _init_resblock(key, cin, cout):
    k1, k2, k3 = jax.random.split(key, 3)
    p = {}
    p["w1"], p["b1"] = _init_conv3x3(k1, cin, cout)
    p["w2"], p["b2"] = _init_conv3x3(k2, cout, cout)
    if cin != cout:
        ka, kb = jax.random.split(k3)
        p["ws"] = jax.random.normal(ka, (cin, cout), jnp.float32) / jnp.sqrt(cin)
        p["bs"] = 0.01 * jax.random.normal(kb, (cout,), jnp.float32)
    return p


def init_decoder(key, cfg):
    channels = tuple(int(cfg["base_channels"] // m) for m in cfg["channels_mult"])
    c_in, hh, ww = cfg["cnn_in_shape"]
    out_c, out_h, out_w = cfg["out_shape"]
    mult = 2 ** (len(channels) - 1)
    assert (hh * mult, ww * mult) == (out_h, out_w), \
        "Must have correct amount of residual blocks to upscale."
    keys = jax.random.split(key, 4 + len(channels))
    params = {}
    params["mlp_w1"], params["mlp_b1"] = _init_linear(
        keys[0], cfg["in_size"], cfg["mlp_feedforward_dim"])
    params["mlp_w2"], params["mlp_b2"] = _init_linear(
        keys[1], cfg["mlp_feedforward_dim"], c_in * hh * ww)
    params["demb"] = _init_resblock(keys[2], c_in, channels[0])
    params["blocks"] = [
        _init_resblock(keys[3 + i], channels[i], channels[i + 1])
        for i in range(len(channels) - 1)
    ]
    params["proj_w"], params["proj_b"] = _init_linear(
        keys[3 + len(channels) - 1], channels[-1], out_c)
    return params


# --------------------------------- main --------------------------------------

if __name__ == "__main__":
    cfg = dict(
        in_size=32,
        cnn_in_shape=(4, 4, 4),          # (C, H, W) of the CNN trunk input
        base_channels=16,
        channels_mult=(1, 2, 4, 2),      # -> channels (16, 8, 4, 8): 3 upsample blocks
        out_shape=(3, 32, 32),
        mlp_feedforward_dim=32,
    )
    key = jax.random.PRNGKey(0)
    kx, kp = jax.random.split(key)
    x = jax.random.normal(kx, (2, 2, cfg["in_size"]), jnp.float32)   # (B, T, E)
    params = init_decoder(kp, cfg)

    fwd = jax.jit(lambda xx, pp: decoder_forward_pallas(xx, pp, cfg))
    out = jax.block_until_ready(fwd(x, params))
    ref = jax.block_until_ready(decoder_reference(x, params, cfg))

    assert out.shape == (2, 2, 3, 32, 32), out.shape
    assert bool(jnp.all(jnp.isfinite(out)))
    err = float(jnp.max(jnp.abs(out - ref)))
    assert err < 2e-2, err
    print("KERNEL_OK")
</pallas_src>

<mosaic_0001>
module attributes {stable_mosaic.version = 11 : i64} {
  func.func @kernel(%arg0: i32, %arg1: memref<1x1x32xf32, #tpu.memory_space<vmem>>, %arg2: memref<32x32xf32, #tpu.memory_space<vmem>>, %arg3: memref<1x32xf32, #tpu.memory_space<vmem>>, %arg4: memref<4x32x16xf32, #tpu.memory_space<vmem>>, %arg5: memref<4x16xf32, #tpu.memory_space<vmem>>, %arg6: memref<9x16x4xf32, #tpu.memory_space<vmem>>, %arg7: memref<16x1xf32, #tpu.memory_space<vmem>>, %arg8: memref<9x16x16xf32, #tpu.memory_space<vmem>>, %arg9: memref<16x1xf32, #tpu.memory_space<vmem>>, %arg10: memref<16x4xf32, #tpu.memory_space<vmem>>, %arg11: memref<16x1xf32, #tpu.memory_space<vmem>>, %arg12: memref<9x16x16xf32, #tpu.memory_space<vmem>>, %arg13: memref<16x64xf32, #tpu.memory_space<vmem>>, %arg14: memref<9x8x16xf32, #tpu.memory_space<vmem>>, %arg15: memref<8x1xf32, #tpu.memory_space<vmem>>, %arg16: memref<9x8x8xf32, #tpu.memory_space<vmem>>, %arg17: memref<8x1xf32, #tpu.memory_space<vmem>>, %arg18: memref<8x16xf32, #tpu.memory_space<vmem>>, %arg19: memref<8x1xf32, #tpu.memory_space<vmem>>, %arg20: memref<9x64x64xf32, #tpu.memory_space<vmem>>, %arg21: memref<64x256xf32, #tpu.memory_space<vmem>>, %arg22: memref<9x4x8xf32, #tpu.memory_space<vmem>>, %arg23: memref<4x1xf32, #tpu.memory_space<vmem>>, %arg24: memref<9x4x4xf32, #tpu.memory_space<vmem>>, %arg25: memref<4x1xf32, #tpu.memory_space<vmem>>, %arg26: memref<4x8xf32, #tpu.memory_space<vmem>>, %arg27: memref<4x1xf32, #tpu.memory_space<vmem>>, %arg28: memref<9x1x256xf32, #tpu.memory_space<vmem>>, %arg29: memref<256x1024xf32, #tpu.memory_space<vmem>>, %arg30: memref<9x8x4xf32, #tpu.memory_space<vmem>>, %arg31: memref<8x1xf32, #tpu.memory_space<vmem>>, %arg32: memref<9x8x8xf32, #tpu.memory_space<vmem>>, %arg33: memref<8x1xf32, #tpu.memory_space<vmem>>, %arg34: memref<8x4xf32, #tpu.memory_space<vmem>>, %arg35: memref<8x1xf32, #tpu.memory_space<vmem>>, %arg36: memref<9x1x1024xf32, #tpu.memory_space<vmem>>, %arg37: memref<3x8xf32, #tpu.memory_space<vmem>>, %arg38: memref<3x1xf32, #tpu.memory_space<vmem>>, %arg39: memref<1x3x1024xf32, #tpu.memory_space<vmem>>) attributes {dimension_semantics = [#tpu.dimension_semantics<parallel>], iteration_bounds = array<i64: 4>, scalar_prefetch = 0 : i64, scratch_operands = 0 : i64, tpu.core_type = #tpu.core_type<tc>, window_params = [{transform_indices = @transform_0, window_bounds = array<i64: 1, 1, 32>}, {pipeline_mode = #tpu.pipeline_mode<synchronous>, transform_indices = @transform_1, window_bounds = array<i64: 32, 32>}, {pipeline_mode = #tpu.pipeline_mode<synchronous>, transform_indices = @transform_2, window_bounds = array<i64: 1, 32>}, {pipeline_mode = #tpu.pipeline_mode<synchronous>, transform_indices = @transform_3, window_bounds = array<i64: 4, 32, 16>}, {pipeline_mode = #tpu.pipeline_mode<synchronous>, transform_indices = @transform_4, window_bounds = array<i64: 4, 16>}, {pipeline_mode = #tpu.pipeline_mode<synchronous>, transform_indices = @transform_5, window_bounds = array<i64: 9, 16, 4>}, {pipeline_mode = #tpu.pipeline_mode<synchronous>, transform_indices = @transform_6, window_bounds = array<i64: 16, 1>}, {pipeline_mode = #tpu.pipeline_mode<synchronous>, transform_indices = @transform_7, window_bounds = array<i64: 9, 16, 16>}, {pipeline_mode = #tpu.pipeline_mode<synchronous>, transform_indices = @transform_8, window_bounds = array<i64: 16, 1>}, {pipeline_mode = #tpu.pipeline_mode<synchronous>, transform_indices = @transform_9, window_bounds = array<i64: 16, 4>}, {pipeline_mode = #tpu.pipeline_mode<synchronous>, transform_indices = @transform_10, window_bounds = array<i64: 16, 1>}, {pipeline_mode = #tpu.pipeline_mode<synchronous>, transform_indices = @transform_11, window_bounds = array<i64: 9, 16, 16>}, {pipeline_mode = #tpu.pipeline_mode<synchronous>, transform_indices = @transform_12, window_bounds = array<i64: 16, 64>}, {pipeline_mode = #tpu.pipeline_mode<synchronous>, transform_indices = @transform_13, window_bounds = array<i64: 9, 8, 16>}, {pipeline_mode = #tpu.pipeline_mode<synchronous>, transform_indices = @transform_14, window_bounds = array<i64: 8, 1>}, {pipeline_mode = #tpu.pipeline_mode<synchronous>, transform_indices = @transform_15, window_bounds = array<i64: 9, 8, 8>}, {pipeline_mode = #tpu.pipeline_mode<synchronous>, transform_indices = @transform_16, window_bounds = array<i64: 8, 1>}, {pipeline_mode = #tpu.pipeline_mode<synchronous>, transform_indices = @transform_17, window_bounds = array<i64: 8, 16>}, {pipeline_mode = #tpu.pipeline_mode<synchronous>, transform_indices = @transform_18, window_bounds = array<i64: 8, 1>}, {pipeline_mode = #tpu.pipeline_mode<synchronous>, transform_indices = @transform_19, window_bounds = array<i64: 9, 64, 64>}, {pipeline_mode = #tpu.pipeline_mode<synchronous>, transform_indices = @transform_20, window_bounds = array<i64: 64, 256>}, {pipeline_mode = #tpu.pipeline_mode<synchronous>, transform_indices = @transform_21, window_bounds = array<i64: 9, 4, 8>}, {pipeline_mode = #tpu.pipeline_mode<synchronous>, transform_indices = @transform_22, window_bounds = array<i64: 4, 1>}, {pipeline_mode = #tpu.pipeline_mode<synchronous>, transform_indices = @transform_23, window_bounds = array<i64: 9, 4, 4>}, {pipeline_mode = #tpu.pipeline_mode<synchronous>, transform_indices = @transform_24, window_bounds = array<i64: 4, 1>}, {pipeline_mode = #tpu.pipeline_mode<synchronous>, transform_indices = @transform_25, window_bounds = array<i64: 4, 8>}, {pipeline_mode = #tpu.pipeline_mode<synchronous>, transform_indices = @transform_26, window_bounds = array<i64: 4, 1>}, {pipeline_mode = #tpu.pipeline_mode<synchronous>, transform_indices = @transform_27, window_bounds = array<i64: 9, 1, 256>}, {pipeline_mode = #tpu.pipeline_mode<synchronous>, transform_indices = @transform_28, window_bounds = array<i64: 256, 1024>}, {pipeline_mode = #tpu.pipeline_mode<synchronous>, transform_indices = @transform_29, window_bounds = array<i64: 9, 8, 4>}, {pipeline_mode = #tpu.pipeline_mode<synchronous>, transform_indices = @transform_30, window_bounds = array<i64: 8, 1>}, {pipeline_mode = #tpu.pipeline_mode<synchronous>, transform_indices = @transform_31, window_bounds = array<i64: 9, 8, 8>}, {pipeline_mode = #tpu.pipeline_mode<synchronous>, transform_indices = @transform_32, window_bounds = array<i64: 8, 1>}, {pipeline_mode = #tpu.pipeline_mode<synchronous>, transform_indices = @transform_33, window_bounds = array<i64: 8, 4>}, {pipeline_mode = #tpu.pipeline_mode<synchronous>, transform_indices = @transform_34, window_bounds = array<i64: 8, 1>}, {pipeline_mode = #tpu.pipeline_mode<synchronous>, transform_indices = @transform_35, window_bounds = array<i64: 9, 1, 1024>}, {pipeline_mode = #tpu.pipeline_mode<synchronous>, transform_indices = @transform_36, window_bounds = array<i64: 3, 8>}, {pipeline_mode = #tpu.pipeline_mode<synchronous>, transform_indices = @transform_37, window_bounds = array<i64: 3, 1>}, {transform_indices = @transform_38, window_bounds = array<i64: 1, 3, 1024>}]} {
    %c0 = arith.constant 0 : index
    %c0_0 = arith.constant 0 : index
    %c0_1 = arith.constant 0 : index
    %0 = vector.load %arg1[%c0, %c0_0, %c0_1] : memref<1x1x32xf32, #tpu.memory_space<vmem>>, vector<1x1x32xf32>
    %1 = vector.shape_cast %0 : vector<1x1x32xf32> to vector<1x32xf32>
    %c0_2 = arith.constant 0 : index
    %c0_3 = arith.constant 0 : index
    %2 = vector.load %arg2[%c0_2, %c0_3] : memref<32x32xf32, #tpu.memory_space<vmem>>, vector<32x32xf32>
    %cst = arith.constant dense<0.000000e+00> : vector<1x32xf32>
    %3 = tpu.matmul %1, %2, %cst {dimension_numbers = #tpu.dot_dimension_numbers<[1], [0], [0], [1], [0, 0, 1, 1], [], []>} : vector<1x32xf32>, vector<32x32xf32>, vector<1x32xf32> -> vector<1x32xf32>
    %c0_4 = arith.constant 0 : index
    %c0_5 = arith.constant 0 : index
    %4 = vector.load %arg3[%c0_4, %c0_5] : memref<1x32xf32, #tpu.memory_space<vmem>>, vector<1x32xf32>
    %5 = arith.addf %3, %4 : vector<1x32xf32>
    %cst_6 = arith.constant 0.000000e+00 : f32
    %6 = vector.broadcast %cst_6 : f32 to vector<1x32xf32>
    %7 = arith.cmpf ogt, %5, %6 : vector<1x32xf32>
    %8 = math.exp %5 : vector<1x32xf32>
    %cst_7 = arith.constant 1.000000e+00 : f32
    %9 = vector.broadcast %cst_7 : f32 to vector<1x32xf32>
    %10 = arith.subf %8, %9 : vector<1x32xf32>
    %cst_8 = arith.constant 1.67326319 : f32
    %11 = vector.broadcast %cst_8 : f32 to vector<1x32xf32>
    %12 = arith.mulf %11, %10 : vector<1x32xf32>
    %13 = arith.select %7, %5, %12 : vector<1x32xi1>, vector<1x32xf32>
    %cst_9 = arith.constant 1.05070102 : f32
    %14 = vector.broadcast %cst_9 : f32 to vector<1x32xf32>
    %15 = arith.mulf %14, %13 : vector<1x32xf32>
    %16 = tpu.iota {dimensions = array<i32: 0>} : vector<4x1xi32>
    %cst_10 = arith.constant 0.000000e+00 : f32
    %17 = vector.broadcast %cst_10 : f32 to vector<4x16xf32>
    %c0_11 = arith.constant 0 : index
    %c0_12 = arith.constant 0 : index
    %c0_13 = arith.constant 0 : index
    %18 = vector.load %arg4[%c0_11, %c0_12, %c0_13] : memref<4x32x16xf32, #tpu.memory_space<vmem>>, vector<1x32x16xf32>
    %19 = vector.shape_cast %18 : vector<1x32x16xf32> to vector<32x16xf32>
    %cst_14 = arith.constant dense<0.000000e+00> : vector<1x16xf32>
    %20 = tpu.matmul %15, %19, %cst_14 {dimension_numbers = #tpu.dot_dimension_numbers<[1], [0], [0], [1], [0, 0, 1, 1], [], []>} : vector<1x32xf32>, vector<32x16xf32>, vector<1x16xf32> -> vector<1x16xf32>
    %c0_i32 = arith.constant 0 : i32
    %21 = vector.broadcast %c0_i32 : i32 to vector<4x1xi32>
    %22 = arith.cmpi eq, %16, %21 : vector<4x1xi32>
    %cst_15 = arith.constant 1.000000e+00 : f32
    %cst_16 = arith.constant 0.000000e+00 : f32
    %23 = vector.broadcast %cst_15 : f32 to vector<4x1xf32>
    %24 = vector.broadcast %cst_16 : f32 to vector<4x1xf32>
    %25 = arith.select %22, %23, %24 : vector<4x1xi1>, vector<4x1xf32>
    %26 = vector.broadcast %25 : vector<4x1xf32> to vector<4x16xf32>
    %27 = vector.broadcast %20 : vector<1x16xf32> to vector<4x16xf32>
    %28 = arith.mulf %26, %27 : vector<4x16xf32>
    %29 = arith.addf %17, %28 : vector<4x16xf32>
    %c1 = arith.constant 1 : index
    %c0_17 = arith.constant 0 : index
    %c0_18 = arith.constant 0 : index
    %30 = vector.load %arg4[%c1, %c0_17, %c0_18] : memref<4x32x16xf32, #tpu.memory_space<vmem>>, vector<1x32x16xf32>
    %31 = vector.shape_cast %30 : vector<1x32x16xf32> to vector<32x16xf32>
    %cst_19 = arith.constant dense<0.000000e+00> : vector<1x16xf32>
    %32 = tpu.matmul %15, %31, %cst_19 {dimension_numbers = #tpu.dot_dimension_numbers<[1], [0], [0], [1], [0, 0, 1, 1], [], []>} : vector<1x32xf32>, vector<32x16xf32>, vector<1x16xf32> -> vector<1x16xf32>
    %c1_i32 = arith.constant 1 : i32
    %33 = vector.broadcast %c1_i32 : i32 to vector<4x1xi32>
    %34 = arith.cmpi eq, %16, %33 : vector<4x1xi32>
    %cst_20 = arith.constant 1.000000e+00 : f32
    %cst_21 = arith.constant 0.000000e+00 : f32
    %35 = vector.broadcast %cst_20 : f32 to vector<4x1xf32>
    %36 = vector.broadcast %cst_21 : f32 to vector<4x1xf32>
    %37 = arith.select %34, %35, %36 : vector<4x1xi1>, vector<4x1xf32>
    %38 = vector.broadcast %37 : vector<4x1xf32> to vector<4x16xf32>
    %39 = vector.broadcast %32 : vector<1x16xf32> to vector<4x16xf32>
    %40 = arith.mulf %38, %39 : vector<4x16xf32>
    %41 = arith.addf %29, %40 : vector<4x16xf32>
    %c2 = arith.constant 2 : index
    %c0_22 = arith.constant 0 : index
    %c0_23 = arith.constant 0 : index
    %42 = vector.load %arg4[%c2, %c0_22, %c0_23] : memref<4x32x16xf32, #tpu.memory_space<vmem>>, vector<1x32x16xf32>
    %43 = vector.shape_cast %42 : vector<1x32x16xf32> to vector<32x16xf32>
    %cst_24 = arith.constant dense<0.000000e+00> : vector<1x16xf32>
    %44 = tpu.matmul %15, %43, %cst_24 {dimension_numbers = #tpu.dot_dimension_numbers<[1], [0], [0], [1], [0, 0, 1, 1], [], []>} : vector<1x32xf32>, vector<32x16xf32>, vector<1x16xf32> -> vector<1x16xf32>
    %c2_i32 = arith.constant 2 : i32
    %45 = vector.broadcast %c2_i32 : i32 to vector<4x1xi32>
    %46 = arith.cmpi eq, %16, %45 : vector<4x1xi32>
    %cst_25 = arith.constant 1.000000e+00 : f32
    %cst_26 = arith.constant 0.000000e+00 : f32
    %47 = vector.broadcast %cst_25 : f32 to vector<4x1xf32>
    %48 = vector.broadcast %cst_26 : f32 to vector<4x1xf32>
    %49 = arith.select %46, %47, %48 : vector<4x1xi1>, vector<4x1xf32>
    %50 = vector.broadcast %49 : vector<4x1xf32> to vector<4x16xf32>
    %51 = vector.broadcast %44 : vector<1x16xf32> to vector<4x16xf32>
    %52 = arith.mulf %50, %51 : vector<4x16xf32>
    %53 = arith.addf %41, %52 : vector<4x16xf32>
    %c3 = arith.constant 3 : index
    %c0_27 = arith.constant 0 : index
    %c0_28 = arith.constant 0 : index
    %54 = vector.load %arg4[%c3, %c0_27, %c0_28] : memref<4x32x16xf32, #tpu.memory_space<vmem>>, vector<1x32x16xf32>
    %55 = vector.shape_cast %54 : vector<1x32x16xf32> to vector<32x16xf32>
    %cst_29 = arith.constant dense<0.000000e+00> : vector<1x16xf32>
    %56 = tpu.matmul %15, %55, %cst_29 {dimension_numbers = #tpu.dot_dimension_numbers<[1], [0], [0], [1], [0, 0, 1, 1], [], []>} : vector<1x32xf32>, vector<32x16xf32>, vector<1x16xf32> -> vector<1x16xf32>
    %c3_i32 = arith.constant 3 : i32
    %57 = vector.broadcast %c3_i32 : i32 to vector<4x1xi32>
    %58 = arith.cmpi eq, %16, %57 : vector<4x1xi32>
    %cst_30 = arith.constant 1.000000e+00 : f32
    %cst_31 = arith.constant 0.000000e+00 : f32
    %59 = vector.broadcast %cst_30 : f32 to vector<4x1xf32>
    %60 = vector.broadcast %cst_31 : f32 to vector<4x1xf32>
    %61 = arith.select %58, %59, %60 : vector<4x1xi1>, vector<4x1xf32>
    %62 = vector.broadcast %61 : vector<4x1xf32> to vector<4x16xf32>
    %63 = vector.broadcast %56 : vector<1x16xf32> to vector<4x16xf32>
    %64 = arith.mulf %62, %63 : vector<4x16xf32>
    %65 = arith.addf %53, %64 : vector<4x16xf32>
    %c0_32 = arith.constant 0 : index
    %c0_33 = arith.constant 0 : index
    %66 = vector.load %arg5[%c0_32, %c0_33] : memref<4x16xf32, #tpu.memory_space<vmem>>, vector<4x16xf32>
    %67 = arith.addf %65, %66 : vector<4x16xf32>
    %cst_34 = arith.constant 0.000000e+00 : f32
    %68 = vector.broadcast %cst_34 : f32 to vector<4x16xf32>
    %69 = arith.cmpf ogt, %67, %68 : vector<4x16xf32>
    %70 = math.exp %67 : vector<4x16xf32>
    %cst_35 = arith.constant 1.000000e+00 : f32
    %71 = vector.broadcast %cst_35 : f32 to vector<4x16xf32>
    %72 = arith.subf %70, %71 : vector<4x16xf32>
    %cst_36 = arith.constant 1.67326319 : f32
    %73 = vector.broadcast %cst_36 : f32 to vector<4x16xf32>
    %74 = arith.mulf %73, %72 : vector<4x16xf32>
    %75 = arith.select %69, %67, %74 : vector<4x16xi1>, vector<4x16xf32>
    %cst_37 = arith.constant 1.05070102 : f32
    %76 = vector.broadcast %cst_37 : f32 to vector<4x16xf32>
    %77 = arith.mulf %76, %75 : vector<4x16xf32>
    %cst_38 = arith.constant 0.000000e+00 : f32
    %78 = vector.broadcast %cst_38 : f32 to vector<16x16xf32>
    %c0_39 = arith.constant 0 : index
    %c0_40 = arith.constant 0 : index
    %c0_41 = arith.constant 0 : index
    %79 = vector.load %arg12[%c0_39, %c0_40, %c0_41] : memref<9x16x16xf32, #tpu.memory_space<vmem>>, vector<1x16x16xf32>
    %80 = vector.shape_cast %79 : vector<1x16x16xf32> to vector<16x16xf32>
    %cst_42 = arith.constant dense<0.000000e+00> : vector<4x16xf32>
    %81 = tpu.matmul %77, %80, %cst_42 {dimension_numbers = #tpu.dot_dimension_numbers<[1], [0], [0], [1], [0, 0, 1, 1], [], []>} : vector<4x16xf32>, vector<16x16xf32>, vector<4x16xf32> -> vector<4x16xf32>
    %c0_43 = arith.constant 0 : index
    %c0_44 = arith.constant 0 : index
    %c0_45 = arith.constant 0 : index
    %82 = vector.load %arg6[%c0_43, %c0_44, %c0_45] : memref<9x16x4xf32, #tpu.memory_space<vmem>>, vector<1x16x4xf32>
    %83 = vector.shape_cast %82 : vector<1x16x4xf32> to vector<16x4xf32>
    %cst_46 = arith.constant dense<0.000000e+00> : vector<16x16xf32>
    %84 = tpu.matmul %83, %81, %cst_46 {dimension_numbers = #tpu.dot_dimension_numbers<[1], [0], [0], [1], [0, 0, 1, 1], [], []>} : vector<16x4xf32>, vector<4x16xf32>, vector<16x16xf32> -> vector<16x16xf32>
    %85 = arith.addf %78, %84 : vector<16x16xf32>
    %c1_47 = arith.constant 1 : index
    %c0_48 = arith.constant 0 : index
    %c0_49 = arith.constant 0 : index
    %86 = vector.load %arg12[%c1_47, %c0_48, %c0_49] : memref<9x16x16xf32, #tpu.memory_space<vmem>>, vector<1x16x16xf32>
    %87 = vector.shape_cast %86 : vector<1x16x16xf32> to vector<16x16xf32>
    %cst_50 = arith.constant dense<0.000000e+00> : vector<4x16xf32>
    %88 = tpu.matmul %77, %87, %cst_50 {dimension_numbers = #tpu.dot_dimension_numbers<[1], [0], [0], [1], [0, 0, 1, 1], [], []>} : vector<4x16xf32>, vector<16x16xf32>, vector<4x16xf32> -> vector<4x16xf32>
    %c1_51 = arith.constant 1 : index
    %c0_52 = arith.constant 0 : index
    %c0_53 = arith.constant 0 : index
    %89 = vector.load %arg6[%c1_51, %c0_52, %c0_53] : memref<9x16x4xf32, #tpu.memory_space<vmem>>, vector<1x16x4xf32>
    %90 = vector.shape_cast %89 : vector<1x16x4xf32> to vector<16x4xf32>
    %cst_54 = arith.constant dense<0.000000e+00> : vector<16x16xf32>
    %91 = tpu.matmul %90, %88, %cst_54 {dimension_numbers = #tpu.dot_dimension_numbers<[1], [0], [0], [1], [0, 0, 1, 1], [], []>} : vector<16x4xf32>, vector<4x16xf32>, vector<16x16xf32> -> vector<16x16xf32>
    %92 = arith.addf %85, %91 : vector<16x16xf32>
    %c2_55 = arith.constant 2 : index
    %c0_56 = arith.constant 0 : index
    %c0_57 = arith.constant 0 : index
    %93 = vector.load %arg12[%c2_55, %c0_56, %c0_57] : memref<9x16x16xf32, #tpu.memory_space<vmem>>, vector<1x16x16xf32>
    %94 = vector.shape_cast %93 : vector<1x16x16xf32> to vector<16x16xf32>
    %cst_58 = arith.constant dense<0.000000e+00> : vector<4x16xf32>
    %95 = tpu.matmul %77, %94, %cst_58 {dimension_numbers = #tpu.dot_dimension_numbers<[1], [0], [0], [1], [0, 0, 1, 1], [], []>} : vector<4x16xf32>, vector<16x16xf32>, vector<4x16xf32> -> vector<4x16xf32>
    %c2_59 = arith.constant 2 : index
    %c0_60 = arith.constant 0 : index
    %c0_61 = arith.constant 0 : index
    %96 = vector.load %arg6[%c2_59, %c0_60, %c0_61] : memref<9x16x4xf32, #tpu.memory_space<vmem>>, vector<1x16x4xf32>
    %97 = vector.shape_cast %96 : vector<1x16x4xf32> to vector<16x4xf32>
    %cst_62 = arith.constant dense<0.000000e+00> : vector<16x16xf32>
    %98 = tpu.matmul %97, %95, %cst_62 {dimension_numbers = #tpu.dot_dimension_numbers<[1], [0], [0], [1], [0, 0, 1, 1], [], []>} : vector<16x4xf32>, vector<4x16xf32>, vector<16x16xf32> -> vector<16x16xf32>
    %99 = arith.addf %92, %98 : vector<16x16xf32>
    %c3_63 = arith.constant 3 : index
    %c0_64 = arith.constant 0 : index
    %c0_65 = arith.constant 0 : index
    %100 = vector.load %arg12[%c3_63, %c0_64, %c0_65] : memref<9x16x16xf32, #tpu.memory_space<vmem>>, vector<1x16x16xf32>
    %101 = vector.shape_cast %100 : vector<1x16x16xf32> to vector<16x16xf32>
    %cst_66 = arith.constant dense<0.000000e+00> : vector<4x16xf32>
    %102 = tpu.matmul %77, %101, %cst_66 {dimension_numbers = #tpu.dot_dimension_numbers<[1], [0], [0], [1], [0, 0, 1, 1], [], []>} : vector<4x16xf32>, vector<16x16xf32>, vector<4x16xf32> -> vector<4x16xf32>
    %c3_67 = arith.constant 3 : index
    %c0_68 = arith.constant 0 : index
    %c0_69 = arith.constant 0 : index
    %103 = vector.load %arg6[%c3_67, %c0_68, %c0_69] : memref<9x16x4xf32, #tpu.memory_space<vmem>>, vector<1x16x4xf32>
    %104 = vector.shape_cast %103 : vector<1x16x4xf32> to vector<16x4xf32>
    %cst_70 = arith.constant dense<0.000000e+00> : vector<16x16xf32>
    %105 = tpu.matmul %104, %102, %cst_70 {dimension_numbers = #tpu.dot_dimension_numbers<[1], [0], [0], [1], [0, 0, 1, 1], [], []>} : vector<16x4xf32>, vector<4x16xf32>, vector<16x16xf32> -> vector<16x16xf32>
    %106 = arith.addf %99, %105 : vector<16x16xf32>
    %c4 = arith.constant 4 : index
    %c0_71 = arith.constant 0 : index
    %c0_72 = arith.constant 0 : index
    %107 = vector.load %arg12[%c4, %c0_71, %c0_72] : memref<9x16x16xf32, #tpu.memory_space<vmem>>, vector<1x16x16xf32>
    %108 = vector.shape_cast %107 : vector<1x16x16xf32> to vector<16x16xf32>
    %cst_73 = arith.constant dense<0.000000e+00> : vector<4x16xf32>
    %109 = tpu.matmul %77, %108, %cst_73 {dimension_numbers = #tpu.dot_dimension_numbers<[1], [0], [0], [1], [0, 0, 1, 1], [], []>} : vector<4x16xf32>, vector<16x16xf32>, vector<4x16xf32> -> vector<4x16xf32>
    %c4_74 = arith.constant 4 : index
    %c0_75 = arith.constant 0 : index
    %c0_76 = arith.constant 0 : index
    %110 = vector.load %arg6[%c4_74, %c0_75, %c0_76] : memref<9x16x4xf32, #tpu.memory_space<vmem>>, vector<1x16x4xf32>
    %111 = vector.shape_cast %110 : vector<1x16x4xf32> to vector<16x4xf32>
    %cst_77 = arith.constant dense<0.000000e+00> : vector<16x16xf32>
    %112 = tpu.matmul %111, %109, %cst_77 {dimension_numbers = #tpu.dot_dimension_numbers<[1], [0], [0], [1], [0, 0, 1, 1], [], []>} : vector<16x4xf32>, vector<4x16xf32>, vector<16x16xf32> -> vector<16x16xf32>
    %113 = arith.addf %106, %112 : vector<16x16xf32>
    %c5 = arith.constant 5 : index
    %c0_78 = arith.constant 0 : index
    %c0_79 = arith.constant 0 : index
    %114 = vector.load %arg12[%c5, %c0_78, %c0_79] : memref<9x16x16xf32, #tpu.memory_space<vmem>>, vector<1x16x16xf32>
    %115 = vector.shape_cast %114 : vector<1x16x16xf32> to vector<16x16xf32>
    %cst_80 = arith.constant dense<0.000000e+00> : vector<4x16xf32>
    %116 = tpu.matmul %77, %115, %cst_80 {dimension_numbers = #tpu.dot_dimension_numbers<[1], [0], [0], [1], [0, 0, 1, 1], [], []>} : vector<4x16xf32>, vector<16x16xf32>, vector<4x16xf32> -> vector<4x16xf32>
    %c5_81 = arith.constant 5 : index
    %c0_82 = arith.constant 0 : index
    %c0_83 = arith.constant 0 : index
    %117 = vector.load %arg6[%c5_81, %c0_82, %c0_83] : memref<9x16x4xf32, #tpu.memory_space<vmem>>, vector<1x16x4xf32>
    %118 = vector.shape_cast %117 : vector<1x16x4xf32> to vector<16x4xf32>
    %cst_84 = arith.constant dense<0.000000e+00> : vector<16x16xf32>
    %119 = tpu.matmul %118, %116, %cst_84 {dimension_numbers = #tpu.dot_dimension_numbers<[1], [0], [0], [1], [0, 0, 1, 1], [], []>} : vector<16x4xf32>, vector<4x16xf32>, vector<16x16xf32> -> vector<16x16xf32>
    %120 = arith.addf %113, %119 : vector<16x16xf32>
    %c6 = arith.constant 6 : index
    %c0_85 = arith.constant 0 : index
    %c0_86 = arith.constant 0 : index
    %121 = vector.load %arg12[%c6, %c0_85, %c0_86] : memref<9x16x16xf32, #tpu.memory_space<vmem>>, vector<1x16x16xf32>
    %122 = vector.shape_cast %121 : vector<1x16x16xf32> to vector<16x16xf32>
    %cst_87 = arith.constant dense<0.000000e+00> : vector<4x16xf32>
    %123 = tpu.matmul %77, %122, %cst_87 {dimension_numbers = #tpu.dot_dimension_numbers<[1], [0], [0], [1], [0, 0, 1, 1], [], []>} : vector<4x16xf32>, vector<16x16xf32>, vector<4x16xf32> -> vector<4x16xf32>
    %c6_88 = arith.constant 6 : index
    %c0_89 = arith.constant 0 : index
    %c0_90 = arith.constant 0 : index
    %124 = vector.load %arg6[%c6_88, %c0_89, %c0_90] : memref<9x16x4xf32, #tpu.memory_space<vmem>>, vector<1x16x4xf32>
    %125 = vector.shape_cast %124 : vector<1x16x4xf32> to vector<16x4xf32>
    %cst_91 = arith.constant dense<0.000000e+00> : vector<16x16xf32>
    %126 = tpu.matmul %125, %123, %cst_91 {dimension_numbers = #tpu.dot_dimension_numbers<[1], [0], [0], [1], [0, 0, 1, 1], [], []>} : vector<16x4xf32>, vector<4x16xf32>, vector<16x16xf32> -> vector<16x16xf32>
    %127 = arith.addf %120, %126 : vector<16x16xf32>
    %c7 = arith.constant 7 : index
    %c0_92 = arith.constant 0 : index
    %c0_93 = arith.constant 0 : index
    %128 = vector.load %arg12[%c7, %c0_92, %c0_93] : memref<9x16x16xf32, #tpu.memory_space<vmem>>, vector<1x16x16xf32>
    %129 = vector.shape_cast %128 : vector<1x16x16xf32> to vector<16x16xf32>
    %cst_94 = arith.constant dense<0.000000e+00> : vector<4x16xf32>
    %130 = tpu.matmul %77, %129, %cst_94 {dimension_numbers = #tpu.dot_dimension_numbers<[1], [0], [0], [1], [0, 0, 1, 1], [], []>} : vector<4x16xf32>, vector<16x16xf32>, vector<4x16xf32> -> vector<4x16xf32>
    %c7_95 = arith.constant 7 : index
    %c0_96 = arith.constant 0 : index
    %c0_97 = arith.constant 0 : index
    %131 = vector.load %arg6[%c7_95, %c0_96, %c0_97] : memref<9x16x4xf32, #tpu.memory_space<vmem>>, vector<1x16x4xf32>
    %132 = vector.shape_cast %131 : vector<1x16x4xf32> to vector<16x4xf32>
    %cst_98 = arith.constant dense<0.000000e+00> : vector<16x16xf32>
    %133 = tpu.matmul %132, %130, %cst_98 {dimension_numbers = #tpu.dot_dimension_numbers<[1], [0], [0], [1], [0, 0, 1, 1], [], []>} : vector<16x4xf32>, vector<4x16xf32>, vector<16x16xf32> -> vector<16x16xf32>
    %134 = arith.addf %127, %133 : vector<16x16xf32>
    %c8 = arith.constant 8 : index
    %c0_99 = arith.constant 0 : index
    %c0_100 = arith.constant 0 : index
    %135 = vector.load %arg12[%c8, %c0_99, %c0_100] : memref<9x16x16xf32, #tpu.memory_space<vmem>>, vector<1x16x16xf32>
    %136 = vector.shape_cast %135 : vector<1x16x16xf32> to vector<16x16xf32>
    %cst_101 = arith.constant dense<0.000000e+00> : vector<4x16xf32>
    %137 = tpu.matmul %77, %136, %cst_101 {dimension_numbers = #tpu.dot_dimension_numbers<[1], [0], [0], [1], [0, 0, 1, 1], [], []>} : vector<4x16xf32>, vector<16x16xf32>, vector<4x16xf32> -> vector<4x16xf32>
    %c8_102 = arith.constant 8 : index
    %c0_103 = arith.constant 0 : index
    %c0_104 = arith.constant 0 : index
    %138 = vector.load %arg6[%c8_102, %c0_103, %c0_104] : memref<9x16x4xf32, #tpu.memory_space<vmem>>, vector<1x16x4xf32>
    %139 = vector.shape_cast %138 : vector<1x16x4xf32> to vector<16x4xf32>
    %cst_105 = arith.constant dense<0.000000e+00> : vector<16x16xf32>
    %140 = tpu.matmul %139, %137, %cst_105 {dimension_numbers = #tpu.dot_dimension_numbers<[1], [0], [0], [1], [0, 0, 1, 1], [], []>} : vector<16x4xf32>, vector<4x16xf32>, vector<16x16xf32> -> vector<16x16xf32>
    %141 = arith.addf %134, %140 : vector<16x16xf32>
    %c0_106 = arith.constant 0 : index
    %c0_107 = arith.constant 0 : index
    %142 = vector.load %arg7[%c0_106, %c0_107] : memref<16x1xf32, #tpu.memory_space<vmem>>, vector<16x1xf32>
    %143 = vector.broadcast %142 : vector<16x1xf32> to vector<16x16xf32>
    %144 = arith.addf %141, %143 : vector<16x16xf32>
    %cst_108 = arith.constant 0.000000e+00 : f32
    %145 = vector.broadcast %cst_108 : f32 to vector<16x16xf32>
    %146 = arith.cmpf ogt, %144, %145 : vector<16x16xf32>
    %147 = math.exp %144 : vector<16x16xf32>
    %cst_109 = arith.constant 1.000000e+00 : f32
    %148 = vector.broadcast %cst_109 : f32 to vector<16x16xf32>
    %149 = arith.subf %147, %148 : vector<16x16xf32>
    %cst_110 = arith.constant 1.67326319 : f32
    %150 = vector.broadcast %cst_110 : f32 to vector<16x16xf32>
    %151 = arith.mulf %150, %149 : vector<16x16xf32>
    %152 = arith.select %146, %144, %151 : vector<16x16xi1>, vector<16x16xf32>
    %cst_111 = arith.constant 1.05070102 : f32
    %153 = vector.broadcast %cst_111 : f32 to vector<16x16xf32>
    %154 = arith.mulf %153, %152 : vector<16x16xf32>
    %cst_112 = arith.constant 0.000000e+00 : f32
    %155 = vector.broadcast %cst_112 : f32 to vector<16x16xf32>
    %c0_113 = arith.constant 0 : index
    %c0_114 = arith.constant 0 : index
    %c0_115 = arith.constant 0 : index
    %156 = vector.load %arg12[%c0_113, %c0_114, %c0_115] : memref<9x16x16xf32, #tpu.memory_space<vmem>>, vector<1x16x16xf32>
    %157 = vector.shape_cast %156 : vector<1x16x16xf32> to vector<16x16xf32>
    %cst_116 = arith.constant dense<0.000000e+00> : vector<16x16xf32>
    %158 = tpu.matmul %154, %157, %cst_116 {dimension_numbers = #tpu.dot_dimension_numbers<[1], [0], [0], [1], [0, 0, 1, 1], [], []>} : vector<16x16xf32>, vector<16x16xf32>, vector<16x16xf32> -> vector<16x16xf32>
    %c0_117 = arith.constant 0 : index
    %c0_118 = arith.constant 0 : index
    %c0_119 = arith.constant 0 : index
    %159 = vector.load %arg8[%c0_117, %c0_118, %c0_119] : memref<9x16x16xf32, #tpu.memory_space<vmem>>, vector<1x16x16xf32>
    %160 = vector.shape_cast %159 : vector<1x16x16xf32> to vector<16x16xf32>
    %cst_120 = arith.constant dense<0.000000e+00> : vector<16x16xf32>
    %161 = tpu.matmul %160, %158, %cst_120 {dimension_numbers = #tpu.dot_dimension_numbers<[1], [0], [0], [1], [0, 0, 1, 1], [], []>} : vector<16x16xf32>, vector<16x16xf32>, vector<16x16xf32> -> vector<16x16xf32>
    %162 = arith.addf %155, %161 : vector<16x16xf32>
    %c1_121 = arith.constant 1 : index
    %c0_122 = arith.constant 0 : index
    %c0_123 = arith.constant 0 : index
    %163 = vector.load %arg12[%c1_121, %c0_122, %c0_123] : memref<9x16x16xf32, #tpu.memory_space<vmem>>, vector<1x16x16xf32>
    %164 = vector.shape_cast %163 : vector<1x16x16xf32> to vector<16x16xf32>
    %cst_124 = arith.constant dense<0.000000e+00> : vector<16x16xf32>
    %165 = tpu.matmul %154, %164, %cst_124 {dimension_numbers = #tpu.dot_dimension_numbers<[1], [0], [0], [1], [0, 0, 1, 1], [], []>} : vector<16x16xf32>, vector<16x16xf32>, vector<16x16xf32> -> vector<16x16xf32>
    %c1_125 = arith.constant 1 : index
    %c0_126 = arith.constant 0 : index
    %c0_127 = arith.constant 0 : index
    %166 = vector.load %arg8[%c1_125, %c0_126, %c0_127] : memref<9x16x16xf32, #tpu.memory_space<vmem>>, vector<1x16x16xf32>
    %167 = vector.shape_cast %166 : vector<1x16x16xf32> to vector<16x16xf32>
    %cst_128 = arith.constant dense<0.000000e+00> : vector<16x16xf32>
    %168 = tpu.matmul %167, %165, %cst_128 {dimension_numbers = #tpu.dot_dimension_numbers<[1], [0], [0], [1], [0, 0, 1, 1], [], []>} : vector<16x16xf32>, vector<16x16xf32>, vector<16x16xf32> -> vector<16x16xf32>
    %169 = arith.addf %162, %168 : vector<16x16xf32>
    %c2_129 = arith.constant 2 : index
    %c0_130 = arith.constant 0 : index
    %c0_131 = arith.constant 0 : index
    %170 = vector.load %arg12[%c2_129, %c0_130, %c0_131] : memref<9x16x16xf32, #tpu.memory_space<vmem>>, vector<1x16x16xf32>
    %171 = vector.shape_cast %170 : vector<1x16x16xf32> to vector<16x16xf32>
    %cst_132 = arith.constant dense<0.000000e+00> : vector<16x16xf32>
    %172 = tpu.matmul %154, %171, %cst_132 {dimension_numbers = #tpu.dot_dimension_numbers<[1], [0], [0], [1], [0, 0, 1, 1], [], []>} : vector<16x16xf32>, vector<16x16xf32>, vector<16x16xf32> -> vector<16x16xf32>
    %c2_133 = arith.constant 2 : index
    %c0_134 = arith.constant 0 : index
    %c0_135 = arith.constant 0 : index
    %173 = vector.load %arg8[%c2_133, %c0_134, %c0_135] : memref<9x16x16xf32, #tpu.memory_space<vmem>>, vector<1x16x16xf32>
    %174 = vector.shape_cast %173 : vector<1x16x16xf32> to vector<16x16xf32>
    %cst_136 = arith.constant dense<0.000000e+00> : vector<16x16xf32>
    %175 = tpu.matmul %174, %172, %cst_136 {dimension_numbers = #tpu.dot_dimension_numbers<[1], [0], [0], [1], [0, 0, 1, 1], [], []>} : vector<16x16xf32>, vector<16x16xf32>, vector<16x16xf32> -> vector<16x16xf32>
    %176 = arith.addf %169, %175 : vector<16x16xf32>
    %c3_137 = arith.constant 3 : index
    %c0_138 = arith.constant 0 : index
    %c0_139 = arith.constant 0 : index
    %177 = vector.load %arg12[%c3_137, %c0_138, %c0_139] : memref<9x16x16xf32, #tpu.memory_space<vmem>>, vector<1x16x16xf32>
    %178 = vector.shape_cast %177 : vector<1x16x16xf32> to vector<16x16xf32>
    %cst_140 = arith.constant dense<0.000000e+00> : vector<16x16xf32>
    %179 = tpu.matmul %154, %178, %cst_140 {dimension_numbers = #tpu.dot_dimension_numbers<[1], [0], [0], [1], [0, 0, 1, 1], [], []>} : vector<16x16xf32>, vector<16x16xf32>, vector<16x16xf32> -> vector<16x16xf32>
    %c3_141 = arith.constant 3 : index
    %c0_142 = arith.constant 0 : index
    %c0_143 = arith.constant 0 : index
    %180 = vector.load %arg8[%c3_141, %c0_142, %c0_143] : memref<9x16x16xf32, #tpu.memory_space<vmem>>, vector<1x16x16xf32>
    %181 = vector.shape_cast %180 : vector<1x16x16xf32> to vector<16x16xf32>
    %cst_144 = arith.constant dense<0.000000e+00> : vector<16x16xf32>
    %182 = tpu.matmul %181, %179, %cst_144 {dimension_numbers = #tpu.dot_dimension_numbers<[1], [0], [0], [1], [0, 0, 1, 1], [], []>} : vector<16x16xf32>, vector<16x16xf32>, vector<16x16xf32> -> vector<16x16xf32>
    %183 = arith.addf %176, %182 : vector<16x16xf32>
    %c4_145 = arith.constant 4 : index
    %c0_146 = arith.constant 0 : index
    %c0_147 = arith.constant 0 : index
    %184 = vector.load %arg12[%c4_145, %c0_146, %c0_147] : memref<9x16x16xf32, #tpu.memory_space<vmem>>, vector<1x16x16xf32>
    %185 = vector.shape_cast %184 : vector<1x16x16xf32> to vector<16x16xf32>
    %cst_148 = arith.constant dense<0.000000e+00> : vector<16x16xf32>
    %186 = tpu.matmul %154, %185, %cst_148 {dimension_numbers = #tpu.dot_dimension_numbers<[1], [0], [0], [1], [0, 0, 1, 1], [], []>} : vector<16x16xf32>, vector<16x16xf32>, vector<16x16xf32> -> vector<16x16xf32>
    %c4_149 = arith.constant 4 : index
    %c0_150 = arith.constant 0 : index
    %c0_151 = arith.constant 0 : index
    %187 = vector.load %arg8[%c4_149, %c0_150, %c0_151] : memref<9x16x16xf32, #tpu.memory_space<vmem>>, vector<1x16x16xf32>
    %188 = vector.shape_cast %187 : vector<1x16x16xf32> to vector<16x16xf32>
    %cst_152 = arith.constant dense<0.000000e+00> : vector<16x16xf32>
    %189 = tpu.matmul %188, %186, %cst_152 {dimension_numbers = #tpu.dot_dimension_numbers<[1], [0], [0], [1], [0, 0, 1, 1], [], []>} : vector<16x16xf32>, vector<16x16xf32>, vector<16x16xf32> -> vector<16x16xf32>
    %190 = arith.addf %183, %189 : vector<16x16xf32>
    %c5_153 = arith.constant 5 : index
    %c0_154 = arith.constant 0 : index
    %c0_155 = arith.constant 0 : index
    %191 = vector.load %arg12[%c5_153, %c0_154, %c0_155] : memref<9x16x16xf32, #tpu.memory_space<vmem>>, vector<1x16x16xf32>
    %192 = vector.shape_cast %191 : vector<1x16x16xf32> to vector<16x16xf32>
    %cst_156 = arith.constant dense<0.000000e+00> : vector<16x16xf32>
    %193 = tpu.matmul %154, %192, %cst_156 {dimension_numbers = #tpu.dot_dimension_numbers<[1], [0], [0], [1], [0, 0, 1, 1], [], []>} : vector<16x16xf32>, vector<16x16xf32>, vector<16x16xf32> -> vector<16x16xf32>
    %c5_157 = arith.constant 5 : index
    %c0_158 = arith.constant 0 : index
    %c0_159 = arith.constant 0 : index
    %194 = vector.load %arg8[%c5_157, %c0_158, %c0_159] : memref<9x16x16xf32, #tpu.memory_space<vmem>>, vector<1x16x16xf32>
    %195 = vector.shape_cast %194 : vector<1x16x16xf32> to vector<16x16xf32>
    %cst_160 = arith.constant dense<0.000000e+00> : vector<16x16xf32>
    %196 = tpu.matmul %195, %193, %cst_160 {dimension_numbers = #tpu.dot_dimension_numbers<[1], [0], [0], [1], [0, 0, 1, 1], [], []>} : vector<16x16xf32>, vector<16x16xf32>, vector<16x16xf32> -> vector<16x16xf32>
    %197 = arith.addf %190, %196 : vector<16x16xf32>
    %c6_161 = arith.constant 6 : index
    %c0_162 = arith.constant 0 : index
    %c0_163 = arith.constant 0 : index
    %198 = vector.load %arg12[%c6_161, %c0_162, %c0_163] : memref<9x16x16xf32, #tpu.memory_space<vmem>>, vector<1x16x16xf32>
    %199 = vector.shape_cast %198 : vector<1x16x16xf32> to vector<16x16xf32>
    %cst_164 = arith.constant dense<0.000000e+00> : vector<16x16xf32>
    %200 = tpu.matmul %154, %199, %cst_164 {dimension_numbers = #tpu.dot_dimension_numbers<[1], [0], [0], [1], [0, 0, 1, 1], [], []>} : vector<16x16xf32>, vector<16x16xf32>, vector<16x16xf32> -> vector<16x16xf32>
    %c6_165 = arith.constant 6 : index
    %c0_166 = arith.constant 0 : index
    %c0_167 = arith.constant 0 : index
    %201 = vector.load %arg8[%c6_165, %c0_166, %c0_167] : memref<9x16x16xf32, #tpu.memory_space<vmem>>, vector<1x16x16xf32>
    %202 = vector.shape_cast %201 : vector<1x16x16xf32> to vector<16x16xf32>
    %cst_168 = arith.constant dense<0.000000e+00> : vector<16x16xf32>
    %203 = tpu.matmul %202, %200, %cst_168 {dimension_numbers = #tpu.dot_dimension_numbers<[1], [0], [0], [1], [0, 0, 1, 1], [], []>} : vector<16x16xf32>, vector<16x16xf32>, vector<16x16xf32> -> vector<16x16xf32>
    %204 = arith.addf %197, %203 : vector<16x16xf32>
    %c7_169 = arith.constant 7 : index
    %c0_170 = arith.constant 0 : index
    %c0_171 = arith.constant 0 : index
    %205 = vector.load %arg12[%c7_169, %c0_170, %c0_171] : memref<9x16x16xf32, #tpu.memory_space<vmem>>, vector<1x16x16xf32>
    %206 = vector.shape_cast %205 : vector<1x16x16xf32> to vector<16x16xf32>
    %cst_172 = arith.constant dense<0.000000e+00> : vector<16x16xf32>
    %207 = tpu.matmul %154, %206, %cst_172 {dimension_numbers = #tpu.dot_dimension_numbers<[1], [0], [0], [1], [0, 0, 1, 1], [], []>} : vector<16x16xf32>, vector<16x16xf32>, vector<16x16xf32> -> vector<16x16xf32>
    %c7_173 = arith.constant 7 : index
    %c0_174 = arith.constant 0 : index
    %c0_175 = arith.constant 0 : index
    %208 = vector.load %arg8[%c7_173, %c0_174, %c0_175] : memref<9x16x16xf32, #tpu.memory_space<vmem>>, vector<1x16x16xf32>
    %209 = vector.shape_cast %208 : vector<1x16x16xf32> to vector<16x16xf32>
    %cst_176 = arith.constant dense<0.000000e+00> : vector<16x16xf32>
    %210 = tpu.matmul %209, %207, %cst_176 {dimension_numbers = #tpu.dot_dimension_numbers<[1], [0], [0], [1], [0, 0, 1, 1], [], []>} : vector<16x16xf32>, vector<16x16xf32>, vector<16x16xf32> -> vector<16x16xf32>
    %211 = arith.addf %204, %210 : vector<16x16xf32>
    %c8_177 = arith.constant 8 : index
    %c0_178 = arith.constant 0 : index
    %c0_179 = arith.constant 0 : index
    %212 = vector.load %arg12[%c8_177, %c0_178, %c0_179] : memref<9x16x16xf32, #tpu.memory_space<vmem>>, vector<1x16x16xf32>
    %213 = vector.shape_cast %212 : vector<1x16x16xf32> to vector<16x16xf32>
    %cst_180 = arith.constant dense<0.000000e+00> : vector<16x16xf32>
    %214 = tpu.matmul %154, %213, %cst_180 {dimension_numbers = #tpu.dot_dimension_numbers<[1], [0], [0], [1], [0, 0, 1, 1], [], []>} : vector<16x16xf32>, vector<16x16xf32>, vector<16x16xf32> -> vector<16x16xf32>
    %c8_181 = arith.constant 8 : index
    %c0_182 = arith.constant 0 : index
    %c0_183 = arith.constant 0 : index
    %215 = vector.load %arg8[%c8_181, %c0_182, %c0_183] : memref<9x16x16xf32, #tpu.memory_space<vmem>>, vector<1x16x16xf32>
    %216 = vector.shape_cast %215 : vector<1x16x16xf32> to vector<16x16xf32>
    %cst_184 = arith.constant dense<0.000000e+00> : vector<16x16xf32>
    %217 = tpu.matmul %216, %214, %cst_184 {dimension_numbers = #tpu.dot_dimension_numbers<[1], [0], [0], [1], [0, 0, 1, 1], [], []>} : vector<16x16xf32>, vector<16x16xf32>, vector<16x16xf32> -> vector<16x16xf32>
    %218 = arith.addf %211, %217 : vector<16x16xf32>
    %c0_185 = arith.constant 0 : index
    %c0_186 = arith.constant 0 : index
    %219 = vector.load %arg9[%c0_185, %c0_186] : memref<16x1xf32, #tpu.memory_space<vmem>>, vector<16x1xf32>
    %220 = vector.broadcast %219 : vector<16x1xf32> to vector<16x16xf32>
    %221 = arith.addf %218, %220 : vector<16x16xf32>
    %c0_187 = arith.constant 0 : index
    %c0_188 = arith.constant 0 : index
    %222 = vector.load %arg10[%c0_187, %c0_188] : memref<16x4xf32, #tpu.memory_space<vmem>>, vector<16x4xf32>
    %cst_189 = arith.constant dense<0.000000e+00> : vector<16x16xf32>
    %223 = tpu.matmul %222, %77, %cst_189 {dimension_numbers = #tpu.dot_dimension_numbers<[1], [0], [0], [1], [0, 0, 1, 1], [], []>} : vector<16x4xf32>, vector<4x16xf32>, vector<16x16xf32> -> vector<16x16xf32>
    %c0_190 = arith.constant 0 : index
    %c0_191 = arith.constant 0 : index
    %224 = vector.load %arg11[%c0_190, %c0_191] : memref<16x1xf32, #tpu.memory_space<vmem>>, vector<16x1xf32>
    %225 = vector.broadcast %224 : vector<16x1xf32> to vector<16x16xf32>
    %226 = arith.addf %223, %225 : vector<16x16xf32>
    %227 = arith.addf %221, %226 : vector<16x16xf32>
    %cst_192 = arith.constant 0.000000e+00 : f32
    %228 = vector.broadcast %cst_192 : f32 to vector<16x16xf32>
    %229 = arith.cmpf ogt, %227, %228 : vector<16x16xf32>
    %230 = math.exp %227 : vector<16x16xf32>
    %cst_193 = arith.constant 1.000000e+00 : f32
    %231 = vector.broadcast %cst_193 : f32 to vector<16x16xf32>
    %232 = arith.subf %230, %231 : vector<16x16xf32>
    %cst_194 = arith.constant 1.67326319 : f32
    %233 = vector.broadcast %cst_194 : f32 to vector<16x16xf32>
    %234 = arith.mulf %233, %232 : vector<16x16xf32>
    %235 = arith.select %229, %227, %234 : vector<16x16xi1>, vector<16x16xf32>
    %cst_195 = arith.constant 1.05070102 : f32
    %236 = vector.broadcast %cst_195 : f32 to vector<16x16xf32>
    %237 = arith.mulf %236, %235 : vector<16x16xf32>
    %c0_196 = arith.constant 0 : index
    %c0_197 = arith.constant 0 : index
    %238 = vector.load %arg13[%c0_196, %c0_197] : memref<16x64xf32, #tpu.memory_space<vmem>>, vector<16x64xf32>
    %cst_198 = arith.constant dense<0.000000e+00> : vector<16x64xf32>
    %239 = tpu.matmul %237, %238, %cst_198 {dimension_numbers = #tpu.dot_dimension_numbers<[1], [0], [0], [1], [0, 0, 1, 1], [], []>} : vector<16x16xf32>, vector<16x64xf32>, vector<16x64xf32> -> vector<16x64xf32>
    %cst_199 = arith.constant 0.000000e+00 : f32
    %240 = vector.broadcast %cst_199 : f32 to vector<8x64xf32>
    %c0_200 = arith.constant 0 : index
    %c0_201 = arith.constant 0 : index
    %c0_202 = arith.constant 0 : index
    %241 = vector.load %arg20[%c0_200, %c0_201, %c0_202] : memref<9x64x64xf32, #tpu.memory_space<vmem>>, vector<1x64x64xf32>
    %242 = vector.shape_cast %241 : vector<1x64x64xf32> to vector<64x64xf32>
    %cst_203 = arith.constant dense<0.000000e+00> : vector<16x64xf32>
    %243 = tpu.matmul %239, %242, %cst_203 {dimension_numbers = #tpu.dot_dimension_numbers<[1], [0], [0], [1], [0, 0, 1, 1], [], []>} : vector<16x64xf32>, vector<64x64xf32>, vector<16x64xf32> -> vector<16x64xf32>
    %c0_204 = arith.constant 0 : index
    %c0_205 = arith.constant 0 : index
    %c0_206 = arith.constant 0 : index
    %244 = vector.load %arg14[%c0_204, %c0_205, %c0_206] : memref<9x8x16xf32, #tpu.memory_space<vmem>>, vector<1x8x16xf32>
    %245 = vector.shape_cast %244 : vector<1x8x16xf32> to vector<8x16xf32>
    %cst_207 = arith.constant dense<0.000000e+00> : vector<8x64xf32>
    %246 = tpu.matmul %245, %243, %cst_207 {dimension_numbers = #tpu.dot_dimension_numbers<[1], [0], [0], [1], [0, 0, 1, 1], [], []>} : vector<8x16xf32>, vector<16x64xf32>, vector<8x64xf32> -> vector<8x64xf32>
    %247 = arith.addf %240, %246 : vector<8x64xf32>
    %c1_208 = arith.constant 1 : index
    %c0_209 = arith.constant 0 : index
    %c0_210 = arith.constant 0 : index
    %248 = vector.load %arg20[%c1_208, %c0_209, %c0_210] : memref<9x64x64xf32, #tpu.memory_space<vmem>>, vector<1x64x64xf32>
    %249 = vector.shape_cast %248 : vector<1x64x64xf32> to vector<64x64xf32>
    %cst_211 = arith.constant dense<0.000000e+00> : vector<16x64xf32>
    %250 = tpu.matmul %239, %249, %cst_211 {dimension_numbers = #tpu.dot_dimension_numbers<[1], [0], [0], [1], [0, 0, 1, 1], [], []>} : vector<16x64xf32>, vector<64x64xf32>, vector<16x64xf32> -> vector<16x64xf32>
    %c1_212 = arith.constant 1 : index
    %c0_213 = arith.constant 0 : index
    %c0_214 = arith.constant 0 : index
    %251 = vector.load %arg14[%c1_212, %c0_213, %c0_214] : memref<9x8x16xf32, #tpu.memory_space<vmem>>, vector<1x8x16xf32>
    %252 = vector.shape_cast %251 : vector<1x8x16xf32> to vector<8x16xf32>
    %cst_215 = arith.constant dense<0.000000e+00> : vector<8x64xf32>
    %253 = tpu.matmul %252, %250, %cst_215 {dimension_numbers = #tpu.dot_dimension_numbers<[1], [0], [0], [1], [0, 0, 1, 1], [], []>} : vector<8x16xf32>, vector<16x64xf32>, vector<8x64xf32> -> vector<8x64xf32>
    %254 = arith.addf %247, %253 : vector<8x64xf32>
    %c2_216 = arith.constant 2 : index
    %c0_217 = arith.constant 0 : index
    %c0_218 = arith.constant 0 : index
    %255 = vector.load %arg20[%c2_216, %c0_217, %c0_218] : memref<9x64x64xf32, #tpu.memory_space<vmem>>, vector<1x64x64xf32>
    %256 = vector.shape_cast %255 : vector<1x64x64xf32> to vector<64x64xf32>
    %cst_219 = arith.constant dense<0.000000e+00> : vector<16x64xf32>
    %257 = tpu.matmul %239, %256, %cst_219 {dimension_numbers = #tpu.dot_dimension_numbers<[1], [0], [0], [1], [0, 0, 1, 1], [], []>} : vector<16x64xf32>, vector<64x64xf32>, vector<16x64xf32> -> vector<16x64xf32>
    %c2_220 = arith.constant 2 : index
    %c0_221 = arith.constant 0 : index
    %c0_222 = arith.constant 0 : index
    %258 = vector.load %arg14[%c2_220, %c0_221, %c0_222] : memref<9x8x16xf32, #tpu.memory_space<vmem>>, vector<1x8x16xf32>
    %259 = vector.shape_cast %258 : vector<1x8x16xf32> to vector<8x16xf32>
    %cst_223 = arith.constant dense<0.000000e+00> : vector<8x64xf32>
    %260 = tpu.matmul %259, %257, %cst_223 {dimension_numbers = #tpu.dot_dimension_numbers<[1], [0], [0], [1], [0, 0, 1, 1], [], []>} : vector<8x16xf32>, vector<16x64xf32>, vector<8x64xf32> -> vector<8x64xf32>
    %261 = arith.addf %254, %260 : vector<8x64xf32>
    %c3_224 = arith.constant 3 : index
    %c0_225 = arith.constant 0 : index
    %c0_226 = arith.constant 0 : index
    %262 = vector.load %arg20[%c3_224, %c0_225, %c0_226] : memref<9x64x64xf32, #tpu.memory_space<vmem>>, vector<1x64x64xf32>
    %263 = vector.shape_cast %262 : vector<1x64x64xf32> to vector<64x64xf32>
    %cst_227 = arith.constant dense<0.000000e+00> : vector<16x64xf32>
    %264 = tpu.matmul %239, %263, %cst_227 {dimension_numbers = #tpu.dot_dimension_numbers<[1], [0], [0], [1], [0, 0, 1, 1], [], []>} : vector<16x64xf32>, vector<64x64xf32>, vector<16x64xf32> -> vector<16x64xf32>
    %c3_228 = arith.constant 3 : index
    %c0_229 = arith.constant 0 : index
    %c0_230 = arith.constant 0 : index
    %265 = vector.load %arg14[%c3_228, %c0_229, %c0_230] : memref<9x8x16xf32, #tpu.memory_space<vmem>>, vector<1x8x16xf32>
    %266 = vector.shape_cast %265 : vector<1x8x16xf32> to vector<8x16xf32>
    %cst_231 = arith.constant dense<0.000000e+00> : vector<8x64xf32>
    %267 = tpu.matmul %266, %264, %cst_231 {dimension_numbers = #tpu.dot_dimension_numbers<[1], [0], [0], [1], [0, 0, 1, 1], [], []>} : vector<8x16xf32>, vector<16x64xf32>, vector<8x64xf32> -> vector<8x64xf32>
    %268 = arith.addf %261, %267 : vector<8x64xf32>
    %c4_232 = arith.constant 4 : index
    %c0_233 = arith.constant 0 : index
    %c0_234 = arith.constant 0 : index
    %269 = vector.load %arg20[%c4_232, %c0_233, %c0_234] : memref<9x64x64xf32, #tpu.memory_space<vmem>>, vector<1x64x64xf32>
    %270 = vector.shape_cast %269 : vector<1x64x64xf32> to vector<64x64xf32>
    %cst_235 = arith.constant dense<0.000000e+00> : vector<16x64xf32>
    %271 = tpu.matmul %239, %270, %cst_235 {dimension_numbers = #tpu.dot_dimension_numbers<[1], [0], [0], [1], [0, 0, 1, 1], [], []>} : vector<16x64xf32>, vector<64x64xf32>, vector<16x64xf32> -> vector<16x64xf32>
    %c4_236 = arith.constant 4 : index
    %c0_237 = arith.constant 0 : index
    %c0_238 = arith.constant 0 : index
    %272 = vector.load %arg14[%c4_236, %c0_237, %c0_238] : memref<9x8x16xf32, #tpu.memory_space<vmem>>, vector<1x8x16xf32>
    %273 = vector.shape_cast %272 : vector<1x8x16xf32> to vector<8x16xf32>
    %cst_239 = arith.constant dense<0.000000e+00> : vector<8x64xf32>
    %274 = tpu.matmul %273, %271, %cst_239 {dimension_numbers = #tpu.dot_dimension_numbers<[1], [0], [0], [1], [0, 0, 1, 1], [], []>} : vector<8x16xf32>, vector<16x64xf32>, vector<8x64xf32> -> vector<8x64xf32>
    %275 = arith.addf %268, %274 : vector<8x64xf32>
    %c5_240 = arith.constant 5 : index
    %c0_241 = arith.constant 0 : index
    %c0_242 = arith.constant 0 : index
    %276 = vector.load %arg20[%c5_240, %c0_241, %c0_242] : memref<9x64x64xf32, #tpu.memory_space<vmem>>, vector<1x64x64xf32>
    %277 = vector.shape_cast %276 : vector<1x64x64xf32> to vector<64x64xf32>
    %cst_243 = arith.constant dense<0.000000e+00> : vector<16x64xf32>
    %278 = tpu.matmul %239, %277, %cst_243 {dimension_numbers = #tpu.dot_dimension_numbers<[1], [0], [0], [1], [0, 0, 1, 1], [], []>} : vector<16x64xf32>, vector<64x64xf32>, vector<16x64xf32> -> vector<16x64xf32>
    %c5_244 = arith.constant 5 : index
    %c0_245 = arith.constant 0 : index
    %c0_246 = arith.constant 0 : index
    %279 = vector.load %arg14[%c5_244, %c0_245, %c0_246] : memref<9x8x16xf32, #tpu.memory_space<vmem>>, vector<1x8x16xf32>
    %280 = vector.shape_cast %279 : vector<1x8x16xf32> to vector<8x16xf32>
    %cst_247 = arith.constant dense<0.000000e+00> : vector<8x64xf32>
    %281 = tpu.matmul %280, %278, %cst_247 {dimension_numbers = #tpu.dot_dimension_numbers<[1], [0], [0], [1], [0, 0, 1, 1], [], []>} : vector<8x16xf32>, vector<16x64xf32>, vector<8x64xf32> -> vector<8x64xf32>
    %282 = arith.addf %275, %281 : vector<8x64xf32>
    %c6_248 = arith.constant 6 : index
    %c0_249 = arith.constant 0 : index
    %c0_250 = arith.constant 0 : index
    %283 = vector.load %arg20[%c6_248, %c0_249, %c0_250] : memref<9x64x64xf32, #tpu.memory_space<vmem>>, vector<1x64x64xf32>
    %284 = vector.shape_cast %283 : vector<1x64x64xf32> to vector<64x64xf32>
    %cst_251 = arith.constant dense<0.000000e+00> : vector<16x64xf32>
    %285 = tpu.matmul %239, %284, %cst_251 {dimension_numbers = #tpu.dot_dimension_numbers<[1], [0], [0], [1], [0, 0, 1, 1], [], []>} : vector<16x64xf32>, vector<64x64xf32>, vector<16x64xf32> -> vector<16x64xf32>
    %c6_252 = arith.constant 6 : index
    %c0_253 = arith.constant 0 : index
    %c0_254 = arith.constant 0 : index
    %286 = vector.load %arg14[%c6_252, %c0_253, %c0_254] : memref<9x8x16xf32, #tpu.memory_space<vmem>>, vector<1x8x16xf32>
    %287 = vector.shape_cast %286 : vector<1x8x16xf32> to vector<8x16xf32>
    %cst_255 = arith.constant dense<0.000000e+00> : vector<8x64xf32>
    %288 = tpu.matmul %287, %285, %cst_255 {dimension_numbers = #tpu.dot_dimension_numbers<[1], [0], [0], [1], [0, 0, 1, 1], [], []>} : vector<8x16xf32>, vector<16x64xf32>, vector<8x64xf32> -> vector<8x64xf32>
    %289 = arith.addf %282, %288 : vector<8x64xf32>
    %c7_256 = arith.constant 7 : index
    %c0_257 = arith.constant 0 : index
    %c0_258 = arith.constant 0 : index
    %290 = vector.load %arg20[%c7_256, %c0_257, %c0_258] : memref<9x64x64xf32, #tpu.memory_space<vmem>>, vector<1x64x64xf32>
    %291 = vector.shape_cast %290 : vector<1x64x64xf32> to vector<64x64xf32>
    %cst_259 = arith.constant dense<0.000000e+00> : vector<16x64xf32>
    %292 = tpu.matmul %239, %291, %cst_259 {dimension_numbers = #tpu.dot_dimension_numbers<[1], [0], [0], [1], [0, 0, 1, 1], [], []>} : vector<16x64xf32>, vector<64x64xf32>, vector<16x64xf32> -> vector<16x64xf32>
    %c7_260 = arith.constant 7 : index
    %c0_261 = arith.constant 0 : index
    %c0_262 = arith.constant 0 : index
    %293 = vector.load %arg14[%c7_260, %c0_261, %c0_262] : memref<9x8x16xf32, #tpu.memory_space<vmem>>, vector<1x8x16xf32>
    %294 = vector.shape_cast %293 : vector<1x8x16xf32> to vector<8x16xf32>
    %cst_263 = arith.constant dense<0.000000e+00> : vector<8x64xf32>
    %295 = tpu.matmul %294, %292, %cst_263 {dimension_numbers = #tpu.dot_dimension_numbers<[1], [0], [0], [1], [0, 0, 1, 1], [], []>} : vector<8x16xf32>, vector<16x64xf32>, vector<8x64xf32> -> vector<8x64xf32>
    %296 = arith.addf %289, %295 : vector<8x64xf32>
    %c8_264 = arith.constant 8 : index
    %c0_265 = arith.constant 0 : index
    %c0_266 = arith.constant 0 : index
    %297 = vector.load %arg20[%c8_264, %c0_265, %c0_266] : memref<9x64x64xf32, #tpu.memory_space<vmem>>, vector<1x64x64xf32>
    %298 = vector.shape_cast %297 : vector<1x64x64xf32> to vector<64x64xf32>
    %cst_267 = arith.constant dense<0.000000e+00> : vector<16x64xf32>
    %299 = tpu.matmul %239, %298, %cst_267 {dimension_numbers = #tpu.dot_dimension_numbers<[1], [0], [0], [1], [0, 0, 1, 1], [], []>} : vector<16x64xf32>, vector<64x64xf32>, vector<16x64xf32> -> vector<16x64xf32>
    %c8_268 = arith.constant 8 : index
    %c0_269 = arith.constant 0 : index
    %c0_270 = arith.constant 0 : index
    %300 = vector.load %arg14[%c8_268, %c0_269, %c0_270] : memref<9x8x16xf32, #tpu.memory_space<vmem>>, vector<1x8x16xf32>
    %301 = vector.shape_cast %300 : vector<1x8x16xf32> to vector<8x16xf32>
    %cst_271 = arith.constant dense<0.000000e+00> : vector<8x64xf32>
    %302 = tpu.matmul %301, %299, %cst_271 {dimension_numbers = #tpu.dot_dimension_numbers<[1], [0], [0], [1], [0, 0, 1, 1], [], []>} : vector<8x16xf32>, vector<16x64xf32>, vector<8x64xf32> -> vector<8x64xf32>
    %303 = arith.addf %296, %302 : vector<8x64xf32>
    %c0_272 = arith.constant 0 : index
    %c0_273 = arith.constant 0 : index
    %304 = vector.load %arg15[%c0_272, %c0_273] : memref<8x1xf32, #tpu.memory_space<vmem>>, vector<8x1xf32>
    %305 = vector.broadcast %304 : vector<8x1xf32> to vector<8x64xf32>
    %306 = arith.addf %303, %305 : vector<8x64xf32>
    %cst_274 = arith.constant 0.000000e+00 : f32
    %307 = vector.broadcast %cst_274 : f32 to vector<8x64xf32>
    %308 = arith.cmpf ogt, %306, %307 : vector<8x64xf32>
    %309 = math.exp %306 : vector<8x64xf32>
    %cst_275 = arith.constant 1.000000e+00 : f32
    %310 = vector.broadcast %cst_275 : f32 to vector<8x64xf32>
    %311 = arith.subf %309, %310 : vector<8x64xf32>
    %cst_276 = arith.constant 1.67326319 : f32
    %312 = vector.broadcast %cst_276 : f32 to vector<8x64xf32>
    %313 = arith.mulf %312, %311 : vector<8x64xf32>
    %314 = arith.select %308, %306, %313 : vector<8x64xi1>, vector<8x64xf32>
    %cst_277 = arith.constant 1.05070102 : f32
    %315 = vector.broadcast %cst_277 : f32 to vector<8x64xf32>
    %316 = arith.mulf %315, %314 : vector<8x64xf32>
    %cst_278 = arith.constant 0.000000e+00 : f32
    %317 = vector.broadcast %cst_278 : f32 to vector<8x64xf32>
    %c0_279 = arith.constant 0 : index
    %c0_280 = arith.constant 0 : index
    %c0_281 = arith.constant 0 : index
    %318 = vector.load %arg20[%c0_279, %c0_280, %c0_281] : memref<9x64x64xf32, #tpu.memory_space<vmem>>, vector<1x64x64xf32>
    %319 = vector.shape_cast %318 : vector<1x64x64xf32> to vector<64x64xf32>
    %cst_282 = arith.constant dense<0.000000e+00> : vector<8x64xf32>
    %320 = tpu.matmul %316, %319, %cst_282 {dimension_numbers = #tpu.dot_dimension_numbers<[1], [0], [0], [1], [0, 0, 1, 1], [], []>} : vector<8x64xf32>, vector<64x64xf32>, vector<8x64xf32> -> vector<8x64xf32>
    %c0_283 = arith.constant 0 : index
    %c0_284 = arith.constant 0 : index
    %c0_285 = arith.constant 0 : index
    %321 = vector.load %arg16[%c0_283, %c0_284, %c0_285] : memref<9x8x8xf32, #tpu.memory_space<vmem>>, vector<1x8x8xf32>
    %322 = vector.shape_cast %321 : vector<1x8x8xf32> to vector<8x8xf32>
    %cst_286 = arith.constant dense<0.000000e+00> : vector<8x64xf32>
    %323 = tpu.matmul %322, %320, %cst_286 {dimension_numbers = #tpu.dot_dimension_numbers<[1], [0], [0], [1], [0, 0, 1, 1], [], []>} : vector<8x8xf32>, vector<8x64xf32>, vector<8x64xf32> -> vector<8x64xf32>
    %324 = arith.addf %317, %323 : vector<8x64xf32>
    %c1_287 = arith.constant 1 : index
    %c0_288 = arith.constant 0 : index
    %c0_289 = arith.constant 0 : index
    %325 = vector.load %arg20[%c1_287, %c0_288, %c0_289] : memref<9x64x64xf32, #tpu.memory_space<vmem>>, vector<1x64x64xf32>
    %326 = vector.shape_cast %325 : vector<1x64x64xf32> to vector<64x64xf32>
    %cst_290 = arith.constant dense<0.000000e+00> : vector<8x64xf32>
    %327 = tpu.matmul %316, %326, %cst_290 {dimension_numbers = #tpu.dot_dimension_numbers<[1], [0], [0], [1], [0, 0, 1, 1], [], []>} : vector<8x64xf32>, vector<64x64xf32>, vector<8x64xf32> -> vector<8x64xf32>
    %c1_291 = arith.constant 1 : index
    %c0_292 = arith.constant 0 : index
    %c0_293 = arith.constant 0 : index
    %328 = vector.load %arg16[%c1_291, %c0_292, %c0_293] : memref<9x8x8xf32, #tpu.memory_space<vmem>>, vector<1x8x8xf32>
    %329 = vector.shape_cast %328 : vector<1x8x8xf32> to vector<8x8xf32>
    %cst_294 = arith.constant dense<0.000000e+00> : vector<8x64xf32>
    %330 = tpu.matmul %329, %327, %cst_294 {dimension_numbers = #tpu.dot_dimension_numbers<[1], [0], [0], [1], [0, 0, 1, 1], [], []>} : vector<8x8xf32>, vector<8x64xf32>, vector<8x64xf32> -> vector<8x64xf32>
    %331 = arith.addf %324, %330 : vector<8x64xf32>
    %c2_295 = arith.constant 2 : index
    %c0_296 = arith.constant 0 : index
    %c0_297 = arith.constant 0 : index
    %332 = vector.load %arg20[%c2_295, %c0_296, %c0_297] : memref<9x64x64xf32, #tpu.memory_space<vmem>>, vector<1x64x64xf32>
    %333 = vector.shape_cast %332 : vector<1x64x64xf32> to vector<64x64xf32>
    %cst_298 = arith.constant dense<0.000000e+00> : vector<8x64xf32>
    %334 = tpu.matmul %316, %333, %cst_298 {dimension_numbers = #tpu.dot_dimension_numbers<[1], [0], [0], [1], [0, 0, 1, 1], [], []>} : vector<8x64xf32>, vector<64x64xf32>, vector<8x64xf32> -> vector<8x64xf32>
    %c2_299 = arith.constant 2 : index
    %c0_300 = arith.constant 0 : index
    %c0_301 = arith.constant 0 : index
    %335 = vector.load %arg16[%c2_299, %c0_300, %c0_301] : memref<9x8x8xf32, #tpu.memory_space<vmem>>, vector<1x8x8xf32>
    %336 = vector.shape_cast %335 : vector<1x8x8xf32> to vector<8x8xf32>
    %cst_302 = arith.constant dense<0.000000e+00> : vector<8x64xf32>
    %337 = tpu.matmul %336, %334, %cst_302 {dimension_numbers = #tpu.dot_dimension_numbers<[1], [0], [0], [1], [0, 0, 1, 1], [], []>} : vector<8x8xf32>, vector<8x64xf32>, vector<8x64xf32> -> vector<8x64xf32>
    %338 = arith.addf %331, %337 : vector<8x64xf32>
    %c3_303 = arith.constant 3 : index
    %c0_304 = arith.constant 0 : index
    %c0_305 = arith.constant 0 : index
    %339 = vector.load %arg20[%c3_303, %c0_304, %c0_305] : memref<9x64x64xf32, #tpu.memory_space<vmem>>, vector<1x64x64xf32>
    %340 = vector.shape_cast %339 : vector<1x64x64xf32> to vector<64x64xf32>
    %cst_306 = arith.constant dense<0.000000e+00> : vector<8x64xf32>
    %341 = tpu.matmul %316, %340, %cst_306 {dimension_numbers = #tpu.dot_dimension_numbers<[1], [0], [0], [1], [0, 0, 1, 1], [], []>} : vector<8x64xf32>, vector<64x64xf32>, vector<8x64xf32> -> vector<8x64xf32>
    %c3_307 = arith.constant 3 : index
    %c0_308 = arith.constant 0 : index
    %c0_309 = arith.constant 0 : index
    %342 = vector.load %arg16[%c3_307, %c0_308, %c0_309] : memref<9x8x8xf32, #tpu.memory_space<vmem>>, vector<1x8x8xf32>
    %343 = vector.shape_cast %342 : vector<1x8x8xf32> to vector<8x8xf32>
    %cst_310 = arith.constant dense<0.000000e+00> : vector<8x64xf32>
    %344 = tpu.matmul %343, %341, %cst_310 {dimension_numbers = #tpu.dot_dimension_numbers<[1], [0], [0], [1], [0, 0, 1, 1], [], []>} : vector<8x8xf32>, vector<8x64xf32>, vector<8x64xf32> -> vector<8x64xf32>
    %345 = arith.addf %338, %344 : vector<8x64xf32>
    %c4_311 = arith.constant 4 : index
    %c0_312 = arith.constant 0 : index
    %c0_313 = arith.constant 0 : index
    %346 = vector.load %arg20[%c4_311, %c0_312, %c0_313] : memref<9x64x64xf32, #tpu.memory_space<vmem>>, vector<1x64x64xf32>
    %347 = vector.shape_cast %346 : vector<1x64x64xf32> to vector<64x64xf32>
    %cst_314 = arith.constant dense<0.000000e+00> : vector<8x64xf32>
    %348 = tpu.matmul %316, %347, %cst_314 {dimension_numbers = #tpu.dot_dimension_numbers<[1], [0], [0], [1], [0, 0, 1, 1], [], []>} : vector<8x64xf32>, vector<64x64xf32>, vector<8x64xf32> -> vector<8x64xf32>
    %c4_315 = arith.constant 4 : index
    %c0_316 = arith.constant 0 : index
    %c0_317 = arith.constant 0 : index
    %349 = vector.load %arg16[%c4_315, %c0_316, %c0_317] : memref<9x8x8xf32, #tpu.memory_space<vmem>>, vector<1x8x8xf32>
    %350 = vector.shape_cast %349 : vector<1x8x8xf32> to vector<8x8xf32>
    %cst_318 = arith.constant dense<0.000000e+00> : vector<8x64xf32>
    %351 = tpu.matmul %350, %348, %cst_318 {dimension_numbers = #tpu.dot_dimension_numbers<[1], [0], [0], [1], [0, 0, 1, 1], [], []>} : vector<8x8xf32>, vector<8x64xf32>, vector<8x64xf32> -> vector<8x64xf32>
    %352 = arith.addf %345, %351 : vector<8x64xf32>
    %c5_319 = arith.constant 5 : index
    %c0_320 = arith.constant 0 : index
    %c0_321 = arith.constant 0 : index
    %353 = vector.load %arg20[%c5_319, %c0_320, %c0_321] : memref<9x64x64xf32, #tpu.memory_space<vmem>>, vector<1x64x64xf32>
    %354 = vector.shape_cast %353 : vector<1x64x64xf32> to vector<64x64xf32>
    %cst_322 = arith.constant dense<0.000000e+00> : vector<8x64xf32>
    %355 = tpu.matmul %316, %354, %cst_322 {dimension_numbers = #tpu.dot_dimension_numbers<[1], [0], [0], [1], [0, 0, 1, 1], [], []>} : vector<8x64xf32>, vector<64x64xf32>, vector<8x64xf32> -> vector<8x64xf32>
    %c5_323 = arith.constant 5 : index
    %c0_324 = arith.constant 0 : index
    %c0_325 = arith.constant 0 : index
    %356 = vector.load %arg16[%c5_323, %c0_324, %c0_325] : memref<9x8x8xf32, #tpu.memory_space<vmem>>, vector<1x8x8xf32>
    %357 = vector.shape_cast %356 : vector<1x8x8xf32> to vector<8x8xf32>
    %cst_326 = arith.constant dense<0.000000e+00> : vector<8x64xf32>
    %358 = tpu.matmul %357, %355, %cst_326 {dimension_numbers = #tpu.dot_dimension_numbers<[1], [0], [0], [1], [0, 0, 1, 1], [], []>} : vector<8x8xf32>, vector<8x64xf32>, vector<8x64xf32> -> vector<8x64xf32>
    %359 = arith.addf %352, %358 : vector<8x64xf32>
    %c6_327 = arith.constant 6 : index
    %c0_328 = arith.constant 0 : index
    %c0_329 = arith.constant 0 : index
    %360 = vector.load %arg20[%c6_327, %c0_328, %c0_329] : memref<9x64x64xf32, #tpu.memory_space<vmem>>, vector<1x64x64xf32>
    %361 = vector.shape_cast %360 : vector<1x64x64xf32> to vector<64x64xf32>
    %cst_330 = arith.constant dense<0.000000e+00> : vector<8x64xf32>
    %362 = tpu.matmul %316, %361, %cst_330 {dimension_numbers = #tpu.dot_dimension_numbers<[1], [0], [0], [1], [0, 0, 1, 1], [], []>} : vector<8x64xf32>, vector<64x64xf32>, vector<8x64xf32> -> vector<8x64xf32>
    %c6_331 = arith.constant 6 : index
    %c0_332 = arith.constant 0 : index
    %c0_333 = arith.constant 0 : index
    %363 = vector.load %arg16[%c6_331, %c0_332, %c0_333] : memref<9x8x8xf32, #tpu.memory_space<vmem>>, vector<1x8x8xf32>
    %364 = vector.shape_cast %363 : vector<1x8x8xf32> to vector<8x8xf32>
    %cst_334 = arith.constant dense<0.000000e+00> : vector<8x64xf32>
    %365 = tpu.matmul %364, %362, %cst_334 {dimension_numbers = #tpu.dot_dimension_numbers<[1], [0], [0], [1], [0, 0, 1, 1], [], []>} : vector<8x8xf32>, vector<8x64xf32>, vector<8x64xf32> -> vector<8x64xf32>
    %366 = arith.addf %359, %365 : vector<8x64xf32>
    %c7_335 = arith.constant 7 : index
    %c0_336 = arith.constant 0 : index
    %c0_337 = arith.constant 0 : index
    %367 = vector.load %arg20[%c7_335, %c0_336, %c0_337] : memref<9x64x64xf32, #tpu.memory_space<vmem>>, vector<1x64x64xf32>
    %368 = vector.shape_cast %367 : vector<1x64x64xf32> to vector<64x64xf32>
    %cst_338 = arith.constant dense<0.000000e+00> : vector<8x64xf32>
    %369 = tpu.matmul %316, %368, %cst_338 {dimension_numbers = #tpu.dot_dimension_numbers<[1], [0], [0], [1], [0, 0, 1, 1], [], []>} : vector<8x64xf32>, vector<64x64xf32>, vector<8x64xf32> -> vector<8x64xf32>
    %c7_339 = arith.constant 7 : index
    %c0_340 = arith.constant 0 : index
    %c0_341 = arith.constant 0 : index
    %370 = vector.load %arg16[%c7_339, %c0_340, %c0_341] : memref<9x8x8xf32, #tpu.memory_space<vmem>>, vector<1x8x8xf32>
    %371 = vector.shape_cast %370 : vector<1x8x8xf32> to vector<8x8xf32>
    %cst_342 = arith.constant dense<0.000000e+00> : vector<8x64xf32>
    %372 = tpu.matmul %371, %369, %cst_342 {dimension_numbers = #tpu.dot_dimension_numbers<[1], [0], [0], [1], [0, 0, 1, 1], [], []>} : vector<8x8xf32>, vector<8x64xf32>, vector<8x64xf32> -> vector<8x64xf32>
    %373 = arith.addf %366, %372 : vector<8x64xf32>
    %c8_343 = arith.constant 8 : index
    %c0_344 = arith.constant 0 : index
    %c0_345 = arith.constant 0 : index
    %374 = vector.load %arg20[%c8_343, %c0_344, %c0_345] : memref<9x64x64xf32, #tpu.memory_space<vmem>>, vector<1x64x64xf32>
    %375 = vector.shape_cast %374 : vector<1x64x64xf32> to vector<64x64xf32>
    %cst_346 = arith.constant dense<0.000000e+00> : vector<8x64xf32>
    %376 = tpu.matmul %316, %375, %cst_346 {dimension_numbers = #tpu.dot_dimension_numbers<[1], [0], [0], [1], [0, 0, 1, 1], [], []>} : vector<8x64xf32>, vector<64x64xf32>, vector<8x64xf32> -> vector<8x64xf32>
    %c8_347 = arith.constant 8 : index
    %c0_348 = arith.constant 0 : index
    %c0_349 = arith.constant 0 : index
    %377 = vector.load %arg16[%c8_347, %c0_348, %c0_349] : memref<9x8x8xf32, #tpu.memory_space<vmem>>, vector<1x8x8xf32>
    %378 = vector.shape_cast %377 : vector<1x8x8xf32> to vector<8x8xf32>
    %cst_350 = arith.constant dense<0.000000e+00> : vector<8x64xf32>
    %379 = tpu.matmul %378, %376, %cst_350 {dimension_numbers = #tpu.dot_dimension_numbers<[1], [0], [0], [1], [0, 0, 1, 1], [], []>} : vector<8x8xf32>, vector<8x64xf32>, vector<8x64xf32> -> vector<8x64xf32>
    %380 = arith.addf %373, %379 : vector<8x64xf32>
    %c0_351 = arith.constant 0 : index
    %c0_352 = arith.constant 0 : index
    %381 = vector.load %arg17[%c0_351, %c0_352] : memref<8x1xf32, #tpu.memory_space<vmem>>, vector<8x1xf32>
    %382 = vector.broadcast %381 : vector<8x1xf32> to vector<8x64xf32>
    %383 = arith.addf %380, %382 : vector<8x64xf32>
    %c0_353 = arith.constant 0 : index
    %c0_354 = arith.constant 0 : index
    %384 = vector.load %arg18[%c0_353, %c0_354] : memref<8x16xf32, #tpu.memory_space<vmem>>, vector<8x16xf32>
    %cst_355 = arith.constant dense<0.000000e+00> : vector<8x64xf32>
    %385 = tpu.matmul %384, %239, %cst_355 {dimension_numbers = #tpu.dot_dimension_numbers<[1], [0], [0], [1], [0, 0, 1, 1], [], []>} : vector<8x16xf32>, vector<16x64xf32>, vector<8x64xf32> -> vector<8x64xf32>
    %c0_356 = arith.constant 0 : index
    %c0_357 = arith.constant 0 : index
    %386 = vector.load %arg19[%c0_356, %c0_357] : memref<8x1xf32, #tpu.memory_space<vmem>>, vector<8x1xf32>
    %387 = vector.broadcast %386 : vector<8x1xf32> to vector<8x64xf32>
    %388 = arith.addf %385, %387 : vector<8x64xf32>
    %389 = arith.addf %383, %388 : vector<8x64xf32>
    %c0_358 = arith.constant 0 : index
    %c0_359 = arith.constant 0 : index
    %390 = vector.load %arg21[%c0_358, %c0_359] : memref<64x256xf32, #tpu.memory_space<vmem>>, vector<64x256xf32>
    %cst_360 = arith.constant dense<0.000000e+00> : vector<8x256xf32>
    %391 = tpu.matmul %389, %390, %cst_360 {dimension_numbers = #tpu.dot_dimension_numbers<[1], [0], [0], [1], [0, 0, 1, 1], [], []>} : vector<8x64xf32>, vector<64x256xf32>, vector<8x256xf32> -> vector<8x256xf32>
    %cst_361 = arith.constant 0.000000e+00 : f32
    %392 = vector.broadcast %cst_361 : f32 to vector<4x256xf32>
    %393 = vector.extract_strided_slice %391 {offsets = [0, 239], sizes = [8, 17], strides = [1, 1]} : vector<8x256xf32> to vector<8x17xf32>
    %394 = vector.extract_strided_slice %391 {offsets = [0, 0], sizes = [8, 239], strides = [1, 1]} : vector<8x256xf32> to vector<8x239xf32>
    %395 = tpu.concatenate %393, %394 in 1 : vector<8x17xf32>, vector<8x239xf32> -> vector<8x256xf32>
    %c0_362 = arith.constant 0 : index
    %c0_363 = arith.constant 0 : index
    %c0_364 = arith.constant 0 : index
    %396 = vector.load %arg28[%c0_362, %c0_363, %c0_364] : memref<9x1x256xf32, #tpu.memory_space<vmem>>, vector<1x1x256xf32>
    %397 = vector.shape_cast %396 : vector<1x1x256xf32> to vector<1x256xf32>
    %398 = vector.broadcast %397 : vector<1x256xf32> to vector<8x256xf32>
    %399 = arith.mulf %395, %398 : vector<8x256xf32>
    %c0_365 = arith.constant 0 : index
    %c0_366 = arith.constant 0 : index
    %c0_367 = arith.constant 0 : index
    %400 = vector.load %arg22[%c0_365, %c0_366, %c0_367] : memref<9x4x8xf32, #tpu.memory_space<vmem>>, vector<1x4x8xf32>
    %401 = vector.shape_cast %400 : vector<1x4x8xf32> to vector<4x8xf32>
    %cst_368 = arith.constant dense<0.000000e+00> : vector<4x256xf32>
    %402 = tpu.matmul %401, %399, %cst_368 {dimension_numbers = #tpu.dot_dimension_numbers<[1], [0], [0], [1], [0, 0, 1, 1], [], []>} : vector<4x8xf32>, vector<8x256xf32>, vector<4x256xf32> -> vector<4x256xf32>
    %403 = arith.addf %392, %402 : vector<4x256xf32>
    %404 = vector.extract_strided_slice %391 {offsets = [0, 240], sizes = [8, 16], strides = [1, 1]} : vector<8x256xf32> to vector<8x16xf32>
    %405 = vector.extract_strided_slice %391 {offsets = [0, 0], sizes = [8, 240], strides = [1, 1]} : vector<8x256xf32> to vector<8x240xf32>
    %406 = tpu.concatenate %404, %405 in 1 : vector<8x16xf32>, vector<8x240xf32> -> vector<8x256xf32>
    %c1_369 = arith.constant 1 : index
    %c0_370 = arith.constant 0 : index
    %c0_371 = arith.constant 0 : index
    %407 = vector.load %arg28[%c1_369, %c0_370, %c0_371] : memref<9x1x256xf32, #tpu.memory_space<vmem>>, vector<1x1x256xf32>
    %408 = vector.shape_cast %407 : vector<1x1x256xf32> to vector<1x256xf32>
    %409 = vector.broadcast %408 : vector<1x256xf32> to vector<8x256xf32>
    %410 = arith.mulf %406, %409 : vector<8x256xf32>
    %c1_372 = arith.constant 1 : index
    %c0_373 = arith.constant 0 : index
    %c0_374 = arith.constant 0 : index
    %411 = vector.load %arg22[%c1_372, %c0_373, %c0_374] : memref<9x4x8xf32, #tpu.memory_space<vmem>>, vector<1x4x8xf32>
    %412 = vector.shape_cast %411 : vector<1x4x8xf32> to vector<4x8xf32>
    %cst_375 = arith.constant dense<0.000000e+00> : vector<4x256xf32>
    %413 = tpu.matmul %412, %410, %cst_375 {dimension_numbers = #tpu.dot_dimension_numbers<[1], [0], [0], [1], [0, 0, 1, 1], [], []>} : vector<4x8xf32>, vector<8x256xf32>, vector<4x256xf32> -> vector<4x256xf32>
    %414 = arith.addf %403, %413 : vector<4x256xf32>
    %415 = vector.extract_strided_slice %391 {offsets = [0, 241], sizes = [8, 15], strides = [1, 1]} : vector<8x256xf32> to vector<8x15xf32>
    %416 = vector.extract_strided_slice %391 {offsets = [0, 0], sizes = [8, 241], strides = [1, 1]} : vector<8x256xf32> to vector<8x241xf32>
    %417 = tpu.concatenate %415, %416 in 1 : vector<8x15xf32>, vector<8x241xf32> -> vector<8x256xf32>
    %c2_376 = arith.constant 2 : index
    %c0_377 = arith.constant 0 : index
    %c0_378 = arith.constant 0 : index
    %418 = vector.load %arg28[%c2_376, %c0_377, %c0_378] : memref<9x1x256xf32, #tpu.memory_space<vmem>>, vector<1x1x256xf32>
    %419 = vector.shape_cast %418 : vector<1x1x256xf32> to vector<1x256xf32>
    %420 = vector.broadcast %419 : vector<1x256xf32> to vector<8x256xf32>
    %421 = arith.mulf %417, %420 : vector<8x256xf32>
    %c2_379 = arith.constant 2 : index
    %c0_380 = arith.constant 0 : index
    %c0_381 = arith.constant 0 : index
    %422 = vector.load %arg22[%c2_379, %c0_380, %c0_381] : memref<9x4x8xf32, #tpu.memory_space<vmem>>, vector<1x4x8xf32>
    %423 = vector.shape_cast %422 : vector<1x4x8xf32> to vector<4x8xf32>
    %cst_382 = arith.constant dense<0.000000e+00> : vector<4x256xf32>
    %424 = tpu.matmul %423, %421, %cst_382 {dimension_numbers = #tpu.dot_dimension_numbers<[1], [0], [0], [1], [0, 0, 1, 1], [], []>} : vector<4x8xf32>, vector<8x256xf32>, vector<4x256xf32> -> vector<4x256xf32>
    %425 = arith.addf %414, %424 : vector<4x256xf32>
    %426 = vector.extract_strided_slice %391 {offsets = [0, 255], sizes = [8, 1], strides = [1, 1]} : vector<8x256xf32> to vector<8x1xf32>
    %427 = vector.extract_strided_slice %391 {offsets = [0, 0], sizes = [8, 255], strides = [1, 1]} : vector<8x256xf32> to vector<8x255xf32>
    %428 = tpu.concatenate %426, %427 in 1 : vector<8x1xf32>, vector<8x255xf32> -> vector<8x256xf32>
    %c3_383 = arith.constant 3 : index
    %c0_384 = arith.constant 0 : index
    %c0_385 = arith.constant 0 : index
    %429 = vector.load %arg28[%c3_383, %c0_384, %c0_385] : memref<9x1x256xf32, #tpu.memory_space<vmem>>, vector<1x1x256xf32>
    %430 = vector.shape_cast %429 : vector<1x1x256xf32> to vector<1x256xf32>
    %431 = vector.broadcast %430 : vector<1x256xf32> to vector<8x256xf32>
    %432 = arith.mulf %428, %431 : vector<8x256xf32>
    %c3_386 = arith.constant 3 : index
    %c0_387 = arith.constant 0 : index
    %c0_388 = arith.constant 0 : index
    %433 = vector.load %arg22[%c3_386, %c0_387, %c0_388] : memref<9x4x8xf32, #tpu.memory_space<vmem>>, vector<1x4x8xf32>
    %434 = vector.shape_cast %433 : vector<1x4x8xf32> to vector<4x8xf32>
    %cst_389 = arith.constant dense<0.000000e+00> : vector<4x256xf32>
    %435 = tpu.matmul %434, %432, %cst_389 {dimension_numbers = #tpu.dot_dimension_numbers<[1], [0], [0], [1], [0, 0, 1, 1], [], []>} : vector<4x8xf32>, vector<8x256xf32>, vector<4x256xf32> -> vector<4x256xf32>
    %436 = arith.addf %425, %435 : vector<4x256xf32>
    %c4_390 = arith.constant 4 : index
    %c0_391 = arith.constant 0 : index
    %c0_392 = arith.constant 0 : index
    %437 = vector.load %arg22[%c4_390, %c0_391, %c0_392] : memref<9x4x8xf32, #tpu.memory_space<vmem>>, vector<1x4x8xf32>
    %438 = vector.shape_cast %437 : vector<1x4x8xf32> to vector<4x8xf32>
    %cst_393 = arith.constant dense<0.000000e+00> : vector<4x256xf32>
    %439 = tpu.matmul %438, %391, %cst_393 {dimension_numbers = #tpu.dot_dimension_numbers<[1], [0], [0], [1], [0, 0, 1, 1], [], []>} : vector<4x8xf32>, vector<8x256xf32>, vector<4x256xf32> -> vector<4x256xf32>
    %440 = arith.addf %436, %439 : vector<4x256xf32>
    %441 = vector.extract_strided_slice %391 {offsets = [0, 1], sizes = [8, 255], strides = [1, 1]} : vector<8x256xf32> to vector<8x255xf32>
    %442 = vector.extract_strided_slice %391 {offsets = [0, 0], sizes = [8, 1], strides = [1, 1]} : vector<8x256xf32> to vector<8x1xf32>
    %443 = tpu.concatenate %441, %442 in 1 : vector<8x255xf32>, vector<8x1xf32> -> vector<8x256xf32>
    %c5_394 = arith.constant 5 : index
    %c0_395 = arith.constant 0 : index
    %c0_396 = arith.constant 0 : index
    %444 = vector.load %arg28[%c5_394, %c0_395, %c0_396] : memref<9x1x256xf32, #tpu.memory_space<vmem>>, vector<1x1x256xf32>
    %445 = vector.shape_cast %444 : vector<1x1x256xf32> to vector<1x256xf32>
    %446 = vector.broadcast %445 : vector<1x256xf32> to vector<8x256xf32>
    %447 = arith.mulf %443, %446 : vector<8x256xf32>
    %c5_397 = arith.constant 5 : index
    %c0_398 = arith.constant 0 : index
    %c0_399 = arith.constant 0 : index
    %448 = vector.load %arg22[%c5_397, %c0_398, %c0_399] : memref<9x4x8xf32, #tpu.memory_space<vmem>>, vector<1x4x8xf32>
    %449 = vector.shape_cast %448 : vector<1x4x8xf32> to vector<4x8xf32>
    %cst_400 = arith.constant dense<0.000000e+00> : vector<4x256xf32>
    %450 = tpu.matmul %449, %447, %cst_400 {dimension_numbers = #tpu.dot_dimension_numbers<[1], [0], [0], [1], [0, 0, 1, 1], [], []>} : vector<4x8xf32>, vector<8x256xf32>, vector<4x256xf32> -> vector<4x256xf32>
    %451 = arith.addf %440, %450 : vector<4x256xf32>
    %452 = vector.extract_strided_slice %391 {offsets = [0, 15], sizes = [8, 241], strides = [1, 1]} : vector<8x256xf32> to vector<8x241xf32>
    %453 = vector.extract_strided_slice %391 {offsets = [0, 0], sizes = [8, 15], strides = [1, 1]} : vector<8x256xf32> to vector<8x15xf32>
    %454 = tpu.concatenate %452, %453 in 1 : vector<8x241xf32>, vector<8x15xf32> -> vector<8x256xf32>
    %c6_401 = arith.constant 6 : index
    %c0_402 = arith.constant 0 : index
    %c0_403 = arith.constant 0 : index
    %455 = vector.load %arg28[%c6_401, %c0_402, %c0_403] : memref<9x1x256xf32, #tpu.memory_space<vmem>>, vector<1x1x256xf32>
    %456 = vector.shape_cast %455 : vector<1x1x256xf32> to vector<1x256xf32>
    %457 = vector.broadcast %456 : vector<1x256xf32> to vector<8x256xf32>
    %458 = arith.mulf %454, %457 : vector<8x256xf32>
    %c6_404 = arith.constant 6 : index
    %c0_405 = arith.constant 0 : index
    %c0_406 = arith.constant 0 : index
    %459 = vector.load %arg22[%c6_404, %c0_405, %c0_406] : memref<9x4x8xf32, #tpu.memory_space<vmem>>, vector<1x4x8xf32>
    %460 = vector.shape_cast %459 : vector<1x4x8xf32> to vector<4x8xf32>
    %cst_407 = arith.constant dense<0.000000e+00> : vector<4x256xf32>
    %461 = tpu.matmul %460, %458, %cst_407 {dimension_numbers = #tpu.dot_dimension_numbers<[1], [0], [0], [1], [0, 0, 1, 1], [], []>} : vector<4x8xf32>, vector<8x256xf32>, vector<4x256xf32> -> vector<4x256xf32>
    %462 = arith.addf %451, %461 : vector<4x256xf32>
    %463 = vector.extract_strided_slice %391 {offsets = [0, 16], sizes = [8, 240], strides = [1, 1]} : vector<8x256xf32> to vector<8x240xf32>
    %464 = vector.extract_strided_slice %391 {offsets = [0, 0], sizes = [8, 16], strides = [1, 1]} : vector<8x256xf32> to vector<8x16xf32>
    %465 = tpu.concatenate %463, %464 in 1 : vector<8x240xf32>, vector<8x16xf32> -> vector<8x256xf32>
    %c7_408 = arith.constant 7 : index
    %c0_409 = arith.constant 0 : index
    %c0_410 = arith.constant 0 : index
    %466 = vector.load %arg28[%c7_408, %c0_409, %c0_410] : memref<9x1x256xf32, #tpu.memory_space<vmem>>, vector<1x1x256xf32>
    %467 = vector.shape_cast %466 : vector<1x1x256xf32> to vector<1x256xf32>
    %468 = vector.broadcast %467 : vector<1x256xf32> to vector<8x256xf32>
    %469 = arith.mulf %465, %468 : vector<8x256xf32>
    %c7_411 = arith.constant 7 : index
    %c0_412 = arith.constant 0 : index
    %c0_413 = arith.constant 0 : index
    %470 = vector.load %arg22[%c7_411, %c0_412, %c0_413] : memref<9x4x8xf32, #tpu.memory_space<vmem>>, vector<1x4x8xf32>
    %471 = vector.shape_cast %470 : vector<1x4x8xf32> to vector<4x8xf32>
    %cst_414 = arith.constant dense<0.000000e+00> : vector<4x256xf32>
    %472 = tpu.matmul %471, %469, %cst_414 {dimension_numbers = #tpu.dot_dimension_numbers<[1], [0], [0], [1], [0, 0, 1, 1], [], []>} : vector<4x8xf32>, vector<8x256xf32>, vector<4x256xf32> -> vector<4x256xf32>
    %473 = arith.addf %462, %472 : vector<4x256xf32>
    %474 = vector.extract_strided_slice %391 {offsets = [0, 17], sizes = [8, 239], strides = [1, 1]} : vector<8x256xf32> to vector<8x239xf32>
    %475 = vector.extract_strided_slice %391 {offsets = [0, 0], sizes = [8, 17], strides = [1, 1]} : vector<8x256xf32> to vector<8x17xf32>
    %476 = tpu.concatenate %474, %475 in 1 : vector<8x239xf32>, vector<8x17xf32> -> vector<8x256xf32>
    %c8_415 = arith.constant 8 : index
    %c0_416 = arith.constant 0 : index
    %c0_417 = arith.constant 0 : index
    %477 = vector.load %arg28[%c8_415, %c0_416, %c0_417] : memref<9x1x256xf32, #tpu.memory_space<vmem>>, vector<1x1x256xf32>
    %478 = vector.shape_cast %477 : vector<1x1x256xf32> to vector<1x256xf32>
    %479 = vector.broadcast %478 : vector<1x256xf32> to vector<8x256xf32>
    %480 = arith.mulf %476, %479 : vector<8x256xf32>
    %c8_418 = arith.constant 8 : index
    %c0_419 = arith.constant 0 : index
    %c0_420 = arith.constant 0 : index
    %481 = vector.load %arg22[%c8_418, %c0_419, %c0_420] : memref<9x4x8xf32, #tpu.memory_space<vmem>>, vector<1x4x8xf32>
    %482 = vector.shape_cast %481 : vector<1x4x8xf32> to vector<4x8xf32>
    %cst_421 = arith.constant dense<0.000000e+00> : vector<4x256xf32>
    %483 = tpu.matmul %482, %480, %cst_421 {dimension_numbers = #tpu.dot_dimension_numbers<[1], [0], [0], [1], [0, 0, 1, 1], [], []>} : vector<4x8xf32>, vector<8x256xf32>, vector<4x256xf32> -> vector<4x256xf32>
    %484 = arith.addf %473, %483 : vector<4x256xf32>
    %c0_422 = arith.constant 0 : index
    %c0_423 = arith.constant 0 : index
    %485 = vector.load %arg23[%c0_422, %c0_423] : memref<4x1xf32, #tpu.memory_space<vmem>>, vector<4x1xf32>
    %486 = vector.broadcast %485 : vector<4x1xf32> to vector<4x256xf32>
    %487 = arith.addf %484, %486 : vector<4x256xf32>
    %cst_424 = arith.constant 0.000000e+00 : f32
    %488 = vector.broadcast %cst_424 : f32 to vector<4x256xf32>
    %489 = arith.cmpf ogt, %487, %488 : vector<4x256xf32>
    %490 = math.exp %487 : vector<4x256xf32>
    %cst_425 = arith.constant 1.000000e+00 : f32
    %491 = vector.broadcast %cst_425 : f32 to vector<4x256xf32>
    %492 = arith.subf %490, %491 : vector<4x256xf32>
    %cst_426 = arith.constant 1.67326319 : f32
    %493 = vector.broadcast %cst_426 : f32 to vector<4x256xf32>
    %494 = arith.mulf %493, %492 : vector<4x256xf32>
    %495 = arith.select %489, %487, %494 : vector<4x256xi1>, vector<4x256xf32>
    %cst_427 = arith.constant 1.05070102 : f32
    %496 = vector.broadcast %cst_427 : f32 to vector<4x256xf32>
    %497 = arith.mulf %496, %495 : vector<4x256xf32>
    %cst_428 = arith.constant 0.000000e+00 : f32
    %498 = vector.broadcast %cst_428 : f32 to vector<4x256xf32>
    %499 = vector.extract_strided_slice %497 {offsets = [0, 239], sizes = [4, 17], strides = [1, 1]} : vector<4x256xf32> to vector<4x17xf32>
    %500 = vector.extract_strided_slice %497 {offsets = [0, 0], sizes = [4, 239], strides = [1, 1]} : vector<4x256xf32> to vector<4x239xf32>
    %501 = tpu.concatenate %499, %500 in 1 : vector<4x17xf32>, vector<4x239xf32> -> vector<4x256xf32>
    %c0_429 = arith.constant 0 : index
    %c0_430 = arith.constant 0 : index
    %c0_431 = arith.constant 0 : index
    %502 = vector.load %arg28[%c0_429, %c0_430, %c0_431] : memref<9x1x256xf32, #tpu.memory_space<vmem>>, vector<1x1x256xf32>
    %503 = vector.shape_cast %502 : vector<1x1x256xf32> to vector<1x256xf32>
    %504 = vector.broadcast %503 : vector<1x256xf32> to vector<4x256xf32>
    %505 = arith.mulf %501, %504 : vector<4x256xf32>
    %c0_432 = arith.constant 0 : index
    %c0_433 = arith.constant 0 : index
    %c0_434 = arith.constant 0 : index
    %506 = vector.load %arg24[%c0_432, %c0_433, %c0_434] : memref<9x4x4xf32, #tpu.memory_space<vmem>>, vector<1x4x4xf32>
    %507 = vector.shape_cast %506 : vector<1x4x4xf32> to vector<4x4xf32>
    %cst_435 = arith.constant dense<0.000000e+00> : vector<4x256xf32>
    %508 = tpu.matmul %507, %505, %cst_435 {dimension_numbers = #tpu.dot_dimension_numbers<[1], [0], [0], [1], [0, 0, 1, 1], [], []>} : vector<4x4xf32>, vector<4x256xf32>, vector<4x256xf32> -> vector<4x256xf32>
    %509 = arith.addf %498, %508 : vector<4x256xf32>
    %510 = vector.extract_strided_slice %497 {offsets = [0, 240], sizes = [4, 16], strides = [1, 1]} : vector<4x256xf32> to vector<4x16xf32>
    %511 = vector.extract_strided_slice %497 {offsets = [0, 0], sizes = [4, 240], strides = [1, 1]} : vector<4x256xf32> to vector<4x240xf32>
    %512 = tpu.concatenate %510, %511 in 1 : vector<4x16xf32>, vector<4x240xf32> -> vector<4x256xf32>
    %c1_436 = arith.constant 1 : index
    %c0_437 = arith.constant 0 : index
    %c0_438 = arith.constant 0 : index
    %513 = vector.load %arg28[%c1_436, %c0_437, %c0_438] : memref<9x1x256xf32, #tpu.memory_space<vmem>>, vector<1x1x256xf32>
    %514 = vector.shape_cast %513 : vector<1x1x256xf32> to vector<1x256xf32>
    %515 = vector.broadcast %514 : vector<1x256xf32> to vector<4x256xf32>
    %516 = arith.mulf %512, %515 : vector<4x256xf32>
    %c1_439 = arith.constant 1 : index
    %c0_440 = arith.constant 0 : index
    %c0_441 = arith.constant 0 : index
    %517 = vector.load %arg24[%c1_439, %c0_440, %c0_441] : memref<9x4x4xf32, #tpu.memory_space<vmem>>, vector<1x4x4xf32>
    %518 = vector.shape_cast %517 : vector<1x4x4xf32> to vector<4x4xf32>
    %cst_442 = arith.constant dense<0.000000e+00> : vector<4x256xf32>
    %519 = tpu.matmul %518, %516, %cst_442 {dimension_numbers = #tpu.dot_dimension_numbers<[1], [0], [0], [1], [0, 0, 1, 1], [], []>} : vector<4x4xf32>, vector<4x256xf32>, vector<4x256xf32> -> vector<4x256xf32>
    %520 = arith.addf %509, %519 : vector<4x256xf32>
    %521 = vector.extract_strided_slice %497 {offsets = [0, 241], sizes = [4, 15], strides = [1, 1]} : vector<4x256xf32> to vector<4x15xf32>
    %522 = vector.extract_strided_slice %497 {offsets = [0, 0], sizes = [4, 241], strides = [1, 1]} : vector<4x256xf32> to vector<4x241xf32>
    %523 = tpu.concatenate %521, %522 in 1 : vector<4x15xf32>, vector<4x241xf32> -> vector<4x256xf32>
    %c2_443 = arith.constant 2 : index
    %c0_444 = arith.constant 0 : index
    %c0_445 = arith.constant 0 : index
    %524 = vector.load %arg28[%c2_443, %c0_444, %c0_445] : memref<9x1x256xf32, #tpu.memory_space<vmem>>, vector<1x1x256xf32>
    %525 = vector.shape_cast %524 : vector<1x1x256xf32> to vector<1x256xf32>
    %526 = vector.broadcast %525 : vector<1x256xf32> to vector<4x256xf32>
    %527 = arith.mulf %523, %526 : vector<4x256xf32>
    %c2_446 = arith.constant 2 : index
    %c0_447 = arith.constant 0 : index
    %c0_448 = arith.constant 0 : index
    %528 = vector.load %arg24[%c2_446, %c0_447, %c0_448] : memref<9x4x4xf32, #tpu.memory_space<vmem>>, vector<1x4x4xf32>
    %529 = vector.shape_cast %528 : vector<1x4x4xf32> to vector<4x4xf32>
    %cst_449 = arith.constant dense<0.000000e+00> : vector<4x256xf32>
    %530 = tpu.matmul %529, %527, %cst_449 {dimension_numbers = #tpu.dot_dimension_numbers<[1], [0], [0], [1], [0, 0, 1, 1], [], []>} : vector<4x4xf32>, vector<4x256xf32>, vector<4x256xf32> -> vector<4x256xf32>
    %531 = arith.addf %520, %530 : vector<4x256xf32>
    %532 = vector.extract_strided_slice %497 {offsets = [0, 255], sizes = [4, 1], strides = [1, 1]} : vector<4x256xf32> to vector<4x1xf32>
    %533 = vector.extract_strided_slice %497 {offsets = [0, 0], sizes = [4, 255], strides = [1, 1]} : vector<4x256xf32> to vector<4x255xf32>
    %534 = tpu.concatenate %532, %533 in 1 : vector<4x1xf32>, vector<4x255xf32> -> vector<4x256xf32>
    %c3_450 = arith.constant 3 : index
    %c0_451 = arith.constant 0 : index
    %c0_452 = arith.constant 0 : index
    %535 = vector.load %arg28[%c3_450, %c0_451, %c0_452] : memref<9x1x256xf32, #tpu.memory_space<vmem>>, vector<1x1x256xf32>
    %536 = vector.shape_cast %535 : vector<1x1x256xf32> to vector<1x256xf32>
    %537 = vector.broadcast %536 : vector<1x256xf32> to vector<4x256xf32>
    %538 = arith.mulf %534, %537 : vector<4x256xf32>
    %c3_453 = arith.constant 3 : index
    %c0_454 = arith.constant 0 : index
    %c0_455 = arith.constant 0 : index
    %539 = vector.load %arg24[%c3_453, %c0_454, %c0_455] : memref<9x4x4xf32, #tpu.memory_space<vmem>>, vector<1x4x4xf32>
    %540 = vector.shape_cast %539 : vector<1x4x4xf32> to vector<4x4xf32>
    %cst_456 = arith.constant dense<0.000000e+00> : vector<4x256xf32>
    %541 = tpu.matmul %540, %538, %cst_456 {dimension_numbers = #tpu.dot_dimension_numbers<[1], [0], [0], [1], [0, 0, 1, 1], [], []>} : vector<4x4xf32>, vector<4x256xf32>, vector<4x256xf32> -> vector<4x256xf32>
    %542 = arith.addf %531, %541 : vector<4x256xf32>
    %c4_457 = arith.constant 4 : index
    %c0_458 = arith.constant 0 : index
    %c0_459 = arith.constant 0 : index
    %543 = vector.load %arg24[%c4_457, %c0_458, %c0_459] : memref<9x4x4xf32, #tpu.memory_space<vmem>>, vector<1x4x4xf32>
    %544 = vector.shape_cast %543 : vector<1x4x4xf32> to vector<4x4xf32>
    %cst_460 = arith.constant dense<0.000000e+00> : vector<4x256xf32>
    %545 = tpu.matmul %544, %497, %cst_460 {dimension_numbers = #tpu.dot_dimension_numbers<[1], [0], [0], [1], [0, 0, 1, 1], [], []>} : vector<4x4xf32>, vector<4x256xf32>, vector<4x256xf32> -> vector<4x256xf32>
    %546 = arith.addf %542, %545 : vector<4x256xf32>
    %547 = vector.extract_strided_slice %497 {offsets = [0, 1], sizes = [4, 255], strides = [1, 1]} : vector<4x256xf32> to vector<4x255xf32>
    %548 = vector.extract_strided_slice %497 {offsets = [0, 0], sizes = [4, 1], strides = [1, 1]} : vector<4x256xf32> to vector<4x1xf32>
    %549 = tpu.concatenate %547, %548 in 1 : vector<4x255xf32>, vector<4x1xf32> -> vector<4x256xf32>
    %c5_461 = arith.constant 5 : index
    %c0_462 = arith.constant 0 : index
    %c0_463 = arith.constant 0 : index
    %550 = vector.load %arg28[%c5_461, %c0_462, %c0_463] : memref<9x1x256xf32, #tpu.memory_space<vmem>>, vector<1x1x256xf32>
    %551 = vector.shape_cast %550 : vector<1x1x256xf32> to vector<1x256xf32>
    %552 = vector.broadcast %551 : vector<1x256xf32> to vector<4x256xf32>
    %553 = arith.mulf %549, %552 : vector<4x256xf32>
    %c5_464 = arith.constant 5 : index
    %c0_465 = arith.constant 0 : index
    %c0_466 = arith.constant 0 : index
    %554 = vector.load %arg24[%c5_464, %c0_465, %c0_466] : memref<9x4x4xf32, #tpu.memory_space<vmem>>, vector<1x4x4xf32>
    %555 = vector.shape_cast %554 : vector<1x4x4xf32> to vector<4x4xf32>
    %cst_467 = arith.constant dense<0.000000e+00> : vector<4x256xf32>
    %556 = tpu.matmul %555, %553, %cst_467 {dimension_numbers = #tpu.dot_dimension_numbers<[1], [0], [0], [1], [0, 0, 1, 1], [], []>} : vector<4x4xf32>, vector<4x256xf32>, vector<4x256xf32> -> vector<4x256xf32>
    %557 = arith.addf %546, %556 : vector<4x256xf32>
    %558 = vector.extract_strided_slice %497 {offsets = [0, 15], sizes = [4, 241], strides = [1, 1]} : vector<4x256xf32> to vector<4x241xf32>
    %559 = vector.extract_strided_slice %497 {offsets = [0, 0], sizes = [4, 15], strides = [1, 1]} : vector<4x256xf32> to vector<4x15xf32>
    %560 = tpu.concatenate %558, %559 in 1 : vector<4x241xf32>, vector<4x15xf32> -> vector<4x256xf32>
    %c6_468 = arith.constant 6 : index
    %c0_469 = arith.constant 0 : index
    %c0_470 = arith.constant 0 : index
    %561 = vector.load %arg28[%c6_468, %c0_469, %c0_470] : memref<9x1x256xf32, #tpu.memory_space<vmem>>, vector<1x1x256xf32>
    %562 = vector.shape_cast %561 : vector<1x1x256xf32> to vector<1x256xf32>
    %563 = vector.broadcast %562 : vector<1x256xf32> to vector<4x256xf32>
    %564 = arith.mulf %560, %563 : vector<4x256xf32>
    %c6_471 = arith.constant 6 : index
    %c0_472 = arith.constant 0 : index
    %c0_473 = arith.constant 0 : index
    %565 = vector.load %arg24[%c6_471, %c0_472, %c0_473] : memref<9x4x4xf32, #tpu.memory_space<vmem>>, vector<1x4x4xf32>
    %566 = vector.shape_cast %565 : vector<1x4x4xf32> to vector<4x4xf32>
    %cst_474 = arith.constant dense<0.000000e+00> : vector<4x256xf32>
    %567 = tpu.matmul %566, %564, %cst_474 {dimension_numbers = #tpu.dot_dimension_numbers<[1], [0], [0], [1], [0, 0, 1, 1], [], []>} : vector<4x4xf32>, vector<4x256xf32>, vector<4x256xf32> -> vector<4x256xf32>
    %568 = arith.addf %557, %567 : vector<4x256xf32>
    %569 = vector.extract_strided_slice %497 {offsets = [0, 16], sizes = [4, 240], strides = [1, 1]} : vector<4x256xf32> to vector<4x240xf32>
    %570 = vector.extract_strided_slice %497 {offsets = [0, 0], sizes = [4, 16], strides = [1, 1]} : vector<4x256xf32> to vector<4x16xf32>
    %571 = tpu.concatenate %569, %570 in 1 : vector<4x240xf32>, vector<4x16xf32> -> vector<4x256xf32>
    %c7_475 = arith.constant 7 : index
    %c0_476 = arith.constant 0 : index
    %c0_477 = arith.constant 0 : index
    %572 = vector.load %arg28[%c7_475, %c0_476, %c0_477] : memref<9x1x256xf32, #tpu.memory_space<vmem>>, vector<1x1x256xf32>
    %573 = vector.shape_cast %572 : vector<1x1x256xf32> to vector<1x256xf32>
    %574 = vector.broadcast %573 : vector<1x256xf32> to vector<4x256xf32>
    %575 = arith.mulf %571, %574 : vector<4x256xf32>
    %c7_478 = arith.constant 7 : index
    %c0_479 = arith.constant 0 : index
    %c0_480 = arith.constant 0 : index
    %576 = vector.load %arg24[%c7_478, %c0_479, %c0_480] : memref<9x4x4xf32, #tpu.memory_space<vmem>>, vector<1x4x4xf32>
    %577 = vector.shape_cast %576 : vector<1x4x4xf32> to vector<4x4xf32>
    %cst_481 = arith.constant dense<0.000000e+00> : vector<4x256xf32>
    %578 = tpu.matmul %577, %575, %cst_481 {dimension_numbers = #tpu.dot_dimension_numbers<[1], [0], [0], [1], [0, 0, 1, 1], [], []>} : vector<4x4xf32>, vector<4x256xf32>, vector<4x256xf32> -> vector<4x256xf32>
    %579 = arith.addf %568, %578 : vector<4x256xf32>
    %580 = vector.extract_strided_slice %497 {offsets = [0, 17], sizes = [4, 239], strides = [1, 1]} : vector<4x256xf32> to vector<4x239xf32>
    %581 = vector.extract_strided_slice %497 {offsets = [0, 0], sizes = [4, 17], strides = [1, 1]} : vector<4x256xf32> to vector<4x17xf32>
    %582 = tpu.concatenate %580, %581 in 1 : vector<4x239xf32>, vector<4x17xf32> -> vector<4x256xf32>
    %c8_482 = arith.constant 8 : index
    %c0_483 = arith.constant 0 : index
    %c0_484 = arith.constant 0 : index
    %583 = vector.load %arg28[%c8_482, %c0_483, %c0_484] : memref<9x1x256xf32, #tpu.memory_space<vmem>>, vector<1x1x256xf32>
    %584 = vector.shape_cast %583 : vector<1x1x256xf32> to vector<1x256xf32>
    %585 = vector.broadcast %584 : vector<1x256xf32> to vector<4x256xf32>
    %586 = arith.mulf %582, %585 : vector<4x256xf32>
    %c8_485 = arith.constant 8 : index
    %c0_486 = arith.constant 0 : index
    %c0_487 = arith.constant 0 : index
    %587 = vector.load %arg24[%c8_485, %c0_486, %c0_487] : memref<9x4x4xf32, #tpu.memory_space<vmem>>, vector<1x4x4xf32>
    %588 = vector.shape_cast %587 : vector<1x4x4xf32> to vector<4x4xf32>
    %cst_488 = arith.constant dense<0.000000e+00> : vector<4x256xf32>
    %589 = tpu.matmul %588, %586, %cst_488 {dimension_numbers = #tpu.dot_dimension_numbers<[1], [0], [0], [1], [0, 0, 1, 1], [], []>} : vector<4x4xf32>, vector<4x256xf32>, vector<4x256xf32> -> vector<4x256xf32>
    %590 = arith.addf %579, %589 : vector<4x256xf32>
    %c0_489 = arith.constant 0 : index
    %c0_490 = arith.constant 0 : index
    %591 = vector.load %arg25[%c0_489, %c0_490] : memref<4x1xf32, #tpu.memory_space<vmem>>, vector<4x1xf32>
    %592 = vector.broadcast %591 : vector<4x1xf32> to vector<4x256xf32>
    %593 = arith.addf %590, %592 : vector<4x256xf32>
    %c0_491 = arith.constant 0 : index
    %c0_492 = arith.constant 0 : index
    %594 = vector.load %arg26[%c0_491, %c0_492] : memref<4x8xf32, #tpu.memory_space<vmem>>, vector<4x8xf32>
    %cst_493 = arith.constant dense<0.000000e+00> : vector<4x256xf32>
    %595 = tpu.matmul %594, %391, %cst_493 {dimension_numbers = #tpu.dot_dimension_numbers<[1], [0], [0], [1], [0, 0, 1, 1], [], []>} : vector<4x8xf32>, vector<8x256xf32>, vector<4x256xf32> -> vector<4x256xf32>
    %c0_494 = arith.constant 0 : index
    %c0_495 = arith.constant 0 : index
    %596 = vector.load %arg27[%c0_494, %c0_495] : memref<4x1xf32, #tpu.memory_space<vmem>>, vector<4x1xf32>
    %597 = vector.broadcast %596 : vector<4x1xf32> to vector<4x256xf32>
    %598 = arith.addf %595, %597 : vector<4x256xf32>
    %599 = arith.addf %593, %598 : vector<4x256xf32>
    %c0_496 = arith.constant 0 : index
    %c0_497 = arith.constant 0 : index
    %600 = vector.load %arg29[%c0_496, %c0_497] : memref<256x1024xf32, #tpu.memory_space<vmem>>, vector<256x1024xf32>
    %cst_498 = arith.constant dense<0.000000e+00> : vector<4x1024xf32>
    %601 = tpu.matmul %599, %600, %cst_498 {dimension_numbers = #tpu.dot_dimension_numbers<[1], [0], [0], [1], [0, 0, 1, 1], [], []>} : vector<4x256xf32>, vector<256x1024xf32>, vector<4x1024xf32> -> vector<4x1024xf32>
    %cst_499 = arith.constant 0.000000e+00 : f32
    %602 = vector.broadcast %cst_499 : f32 to vector<8x1024xf32>
    %603 = vector.extract_strided_slice %601 {offsets = [0, 991], sizes = [4, 33], strides = [1, 1]} : vector<4x1024xf32> to vector<4x33xf32>
    %604 = vector.extract_strided_slice %601 {offsets = [0, 0], sizes = [4, 991], strides = [1, 1]} : vector<4x1024xf32> to vector<4x991xf32>
    %605 = tpu.concatenate %603, %604 in 1 : vector<4x33xf32>, vector<4x991xf32> -> vector<4x1024xf32>
    %c0_500 = arith.constant 0 : index
    %c0_501 = arith.constant 0 : index
    %c0_502 = arith.constant 0 : index
    %606 = vector.load %arg36[%c0_500, %c0_501, %c0_502] : memref<9x1x1024xf32, #tpu.memory_space<vmem>>, vector<1x1x1024xf32>
    %607 = vector.shape_cast %606 : vector<1x1x1024xf32> to vector<1x1024xf32>
    %608 = vector.broadcast %607 : vector<1x1024xf32> to vector<4x1024xf32>
    %609 = arith.mulf %605, %608 : vector<4x1024xf32>
    %c0_503 = arith.constant 0 : index
    %c0_504 = arith.constant 0 : index
    %c0_505 = arith.constant 0 : index
    %610 = vector.load %arg30[%c0_503, %c0_504, %c0_505] : memref<9x8x4xf32, #tpu.memory_space<vmem>>, vector<1x8x4xf32>
    %611 = vector.shape_cast %610 : vector<1x8x4xf32> to vector<8x4xf32>
    %cst_506 = arith.constant dense<0.000000e+00> : vector<8x1024xf32>
    %612 = tpu.matmul %611, %609, %cst_506 {dimension_numbers = #tpu.dot_dimension_numbers<[1], [0], [0], [1], [0, 0, 1, 1], [], []>} : vector<8x4xf32>, vector<4x1024xf32>, vector<8x1024xf32> -> vector<8x1024xf32>
    %613 = arith.addf %602, %612 : vector<8x1024xf32>
    %614 = vector.extract_strided_slice %601 {offsets = [0, 992], sizes = [4, 32], strides = [1, 1]} : vector<4x1024xf32> to vector<4x32xf32>
    %615 = vector.extract_strided_slice %601 {offsets = [0, 0], sizes = [4, 992], strides = [1, 1]} : vector<4x1024xf32> to vector<4x992xf32>
    %616 = tpu.concatenate %614, %615 in 1 : vector<4x32xf32>, vector<4x992xf32> -> vector<4x1024xf32>
    %c1_507 = arith.constant 1 : index
    %c0_508 = arith.constant 0 : index
    %c0_509 = arith.constant 0 : index
    %617 = vector.load %arg36[%c1_507, %c0_508, %c0_509] : memref<9x1x1024xf32, #tpu.memory_space<vmem>>, vector<1x1x1024xf32>
    %618 = vector.shape_cast %617 : vector<1x1x1024xf32> to vector<1x1024xf32>
    %619 = vector.broadcast %618 : vector<1x1024xf32> to vector<4x1024xf32>
    %620 = arith.mulf %616, %619 : vector<4x1024xf32>
    %c1_510 = arith.constant 1 : index
    %c0_511 = arith.constant 0 : index
    %c0_512 = arith.constant 0 : index
    %621 = vector.load %arg30[%c1_510, %c0_511, %c0_512] : memref<9x8x4xf32, #tpu.memory_space<vmem>>, vector<1x8x4xf32>
    %622 = vector.shape_cast %621 : vector<1x8x4xf32> to vector<8x4xf32>
    %cst_513 = arith.constant dense<0.000000e+00> : vector<8x1024xf32>
    %623 = tpu.matmul %622, %620, %cst_513 {dimension_numbers = #tpu.dot_dimension_numbers<[1], [0], [0], [1], [0, 0, 1, 1], [], []>} : vector<8x4xf32>, vector<4x1024xf32>, vector<8x1024xf32> -> vector<8x1024xf32>
    %624 = arith.addf %613, %623 : vector<8x1024xf32>
    %625 = vector.extract_strided_slice %601 {offsets = [0, 993], sizes = [4, 31], strides = [1, 1]} : vector<4x1024xf32> to vector<4x31xf32>
    %626 = vector.extract_strided_slice %601 {offsets = [0, 0], sizes = [4, 993], strides = [1, 1]} : vector<4x1024xf32> to vector<4x993xf32>
    %627 = tpu.concatenate %625, %626 in 1 : vector<4x31xf32>, vector<4x993xf32> -> vector<4x1024xf32>
    %c2_514 = arith.constant 2 : index
    %c0_515 = arith.constant 0 : index
    %c0_516 = arith.constant 0 : index
    %628 = vector.load %arg36[%c2_514, %c0_515, %c0_516] : memref<9x1x1024xf32, #tpu.memory_space<vmem>>, vector<1x1x1024xf32>
    %629 = vector.shape_cast %628 : vector<1x1x1024xf32> to vector<1x1024xf32>
    %630 = vector.broadcast %629 : vector<1x1024xf32> to vector<4x1024xf32>
    %631 = arith.mulf %627, %630 : vector<4x1024xf32>
    %c2_517 = arith.constant 2 : index
    %c0_518 = arith.constant 0 : index
    %c0_519 = arith.constant 0 : index
    %632 = vector.load %arg30[%c2_517, %c0_518, %c0_519] : memref<9x8x4xf32, #tpu.memory_space<vmem>>, vector<1x8x4xf32>
    %633 = vector.shape_cast %632 : vector<1x8x4xf32> to vector<8x4xf32>
    %cst_520 = arith.constant dense<0.000000e+00> : vector<8x1024xf32>
    %634 = tpu.matmul %633, %631, %cst_520 {dimension_numbers = #tpu.dot_dimension_numbers<[1], [0], [0], [1], [0, 0, 1, 1], [], []>} : vector<8x4xf32>, vector<4x1024xf32>, vector<8x1024xf32> -> vector<8x1024xf32>
    %635 = arith.addf %624, %634 : vector<8x1024xf32>
    %636 = vector.extract_strided_slice %601 {offsets = [0, 1023], sizes = [4, 1], strides = [1, 1]} : vector<4x1024xf32> to vector<4x1xf32>
    %637 = vector.extract_strided_slice %601 {offsets = [0, 0], sizes = [4, 1023], strides = [1, 1]} : vector<4x1024xf32> to vector<4x1023xf32>
    %638 = tpu.concatenate %636, %637 in 1 : vector<4x1xf32>, vector<4x1023xf32> -> vector<4x1024xf32>
    %c3_521 = arith.constant 3 : index
    %c0_522 = arith.constant 0 : index
    %c0_523 = arith.constant 0 : index
    %639 = vector.load %arg36[%c3_521, %c0_522, %c0_523] : memref<9x1x1024xf32, #tpu.memory_space<vmem>>, vector<1x1x1024xf32>
    %640 = vector.shape_cast %639 : vector<1x1x1024xf32> to vector<1x1024xf32>
    %641 = vector.broadcast %640 : vector<1x1024xf32> to vector<4x1024xf32>
    %642 = arith.mulf %638, %641 : vector<4x1024xf32>
    %c3_524 = arith.constant 3 : index
    %c0_525 = arith.constant 0 : index
    %c0_526 = arith.constant 0 : index
    %643 = vector.load %arg30[%c3_524, %c0_525, %c0_526] : memref<9x8x4xf32, #tpu.memory_space<vmem>>, vector<1x8x4xf32>
    %644 = vector.shape_cast %643 : vector<1x8x4xf32> to vector<8x4xf32>
    %cst_527 = arith.constant dense<0.000000e+00> : vector<8x1024xf32>
    %645 = tpu.matmul %644, %642, %cst_527 {dimension_numbers = #tpu.dot_dimension_numbers<[1], [0], [0], [1], [0, 0, 1, 1], [], []>} : vector<8x4xf32>, vector<4x1024xf32>, vector<8x1024xf32> -> vector<8x1024xf32>
    %646 = arith.addf %635, %645 : vector<8x1024xf32>
    %c4_528 = arith.constant 4 : index
    %c0_529 = arith.constant 0 : index
    %c0_530 = arith.constant 0 : index
    %647 = vector.load %arg30[%c4_528, %c0_529, %c0_530] : memref<9x8x4xf32, #tpu.memory_space<vmem>>, vector<1x8x4xf32>
    %648 = vector.shape_cast %647 : vector<1x8x4xf32> to vector<8x4xf32>
    %cst_531 = arith.constant dense<0.000000e+00> : vector<8x1024xf32>
    %649 = tpu.matmul %648, %601, %cst_531 {dimension_numbers = #tpu.dot_dimension_numbers<[1], [0], [0], [1], [0, 0, 1, 1], [], []>} : vector<8x4xf32>, vector<4x1024xf32>, vector<8x1024xf32> -> vector<8x1024xf32>
    %650 = arith.addf %646, %649 : vector<8x1024xf32>
    %651 = vector.extract_strided_slice %601 {offsets = [0, 1], sizes = [4, 1023], strides = [1, 1]} : vector<4x1024xf32> to vector<4x1023xf32>
    %652 = vector.extract_strided_slice %601 {offsets = [0, 0], sizes = [4, 1], strides = [1, 1]} : vector<4x1024xf32> to vector<4x1xf32>
    %653 = tpu.concatenate %651, %652 in 1 : vector<4x1023xf32>, vector<4x1xf32> -> vector<4x1024xf32>
    %c5_532 = arith.constant 5 : index
    %c0_533 = arith.constant 0 : index
    %c0_534 = arith.constant 0 : index
    %654 = vector.load %arg36[%c5_532, %c0_533, %c0_534] : memref<9x1x1024xf32, #tpu.memory_space<vmem>>, vector<1x1x1024xf32>
    %655 = vector.shape_cast %654 : vector<1x1x1024xf32> to vector<1x1024xf32>
    %656 = vector.broadcast %655 : vector<1x1024xf32> to vector<4x1024xf32>
    %657 = arith.mulf %653, %656 : vector<4x1024xf32>
    %c5_535 = arith.constant 5 : index
    %c0_536 = arith.constant 0 : index
    %c0_537 = arith.constant 0 : index
    %658 = vector.load %arg30[%c5_535, %c0_536, %c0_537] : memref<9x8x4xf32, #tpu.memory_space<vmem>>, vector<1x8x4xf32>
    %659 = vector.shape_cast %658 : vector<1x8x4xf32> to vector<8x4xf32>
    %cst_538 = arith.constant dense<0.000000e+00> : vector<8x1024xf32>
    %660 = tpu.matmul %659, %657, %cst_538 {dimension_numbers = #tpu.dot_dimension_numbers<[1], [0], [0], [1], [0, 0, 1, 1], [], []>} : vector<8x4xf32>, vector<4x1024xf32>, vector<8x1024xf32> -> vector<8x1024xf32>
    %661 = arith.addf %650, %660 : vector<8x1024xf32>
    %662 = vector.extract_strided_slice %601 {offsets = [0, 31], sizes = [4, 993], strides = [1, 1]} : vector<4x1024xf32> to vector<4x993xf32>
    %663 = vector.extract_strided_slice %601 {offsets = [0, 0], sizes = [4, 31], strides = [1, 1]} : vector<4x1024xf32> to vector<4x31xf32>
    %664 = tpu.concatenate %662, %663 in 1 : vector<4x993xf32>, vector<4x31xf32> -> vector<4x1024xf32>
    %c6_539 = arith.constant 6 : index
    %c0_540 = arith.constant 0 : index
    %c0_541 = arith.constant 0 : index
    %665 = vector.load %arg36[%c6_539, %c0_540, %c0_541] : memref<9x1x1024xf32, #tpu.memory_space<vmem>>, vector<1x1x1024xf32>
    %666 = vector.shape_cast %665 : vector<1x1x1024xf32> to vector<1x1024xf32>
    %667 = vector.broadcast %666 : vector<1x1024xf32> to vector<4x1024xf32>
    %668 = arith.mulf %664, %667 : vector<4x1024xf32>
    %c6_542 = arith.constant 6 : index
    %c0_543 = arith.constant 0 : index
    %c0_544 = arith.constant 0 : index
    %669 = vector.load %arg30[%c6_542, %c0_543, %c0_544] : memref<9x8x4xf32, #tpu.memory_space<vmem>>, vector<1x8x4xf32>
    %670 = vector.shape_cast %669 : vector<1x8x4xf32> to vector<8x4xf32>
    %cst_545 = arith.constant dense<0.000000e+00> : vector<8x1024xf32>
    %671 = tpu.matmul %670, %668, %cst_545 {dimension_numbers = #tpu.dot_dimension_numbers<[1], [0], [0], [1], [0, 0, 1, 1], [], []>} : vector<8x4xf32>, vector<4x1024xf32>, vector<8x1024xf32> -> vector<8x1024xf32>
    %672 = arith.addf %661, %671 : vector<8x1024xf32>
    %673 = vector.extract_strided_slice %601 {offsets = [0, 32], sizes = [4, 992], strides = [1, 1]} : vector<4x1024xf32> to vector<4x992xf32>
    %674 = vector.extract_strided_slice %601 {offsets = [0, 0], sizes = [4, 32], strides = [1, 1]} : vector<4x1024xf32> to vector<4x32xf32>
    %675 = tpu.concatenate %673, %674 in 1 : vector<4x992xf32>, vector<4x32xf32> -> vector<4x1024xf32>
    %c7_546 = arith.constant 7 : index
    %c0_547 = arith.constant 0 : index
    %c0_548 = arith.constant 0 : index
    %676 = vector.load %arg36[%c7_546, %c0_547, %c0_548] : memref<9x1x1024xf32, #tpu.memory_space<vmem>>, vector<1x1x1024xf32>
    %677 = vector.shape_cast %676 : vector<1x1x1024xf32> to vector<1x1024xf32>
    %678 = vector.broadcast %677 : vector<1x1024xf32> to vector<4x1024xf32>
    %679 = arith.mulf %675, %678 : vector<4x1024xf32>
    %c7_549 = arith.constant 7 : index
    %c0_550 = arith.constant 0 : index
    %c0_551 = arith.constant 0 : index
    %680 = vector.load %arg30[%c7_549, %c0_550, %c0_551] : memref<9x8x4xf32, #tpu.memory_space<vmem>>, vector<1x8x4xf32>
    %681 = vector.shape_cast %680 : vector<1x8x4xf32> to vector<8x4xf32>
    %cst_552 = arith.constant dense<0.000000e+00> : vector<8x1024xf32>
    %682 = tpu.matmul %681, %679, %cst_552 {dimension_numbers = #tpu.dot_dimension_numbers<[1], [0], [0], [1], [0, 0, 1, 1], [], []>} : vector<8x4xf32>, vector<4x1024xf32>, vector<8x1024xf32> -> vector<8x1024xf32>
    %683 = arith.addf %672, %682 : vector<8x1024xf32>
    %684 = vector.extract_strided_slice %601 {offsets = [0, 33], sizes = [4, 991], strides = [1, 1]} : vector<4x1024xf32> to vector<4x991xf32>
    %685 = vector.extract_strided_slice %601 {offsets = [0, 0], sizes = [4, 33], strides = [1, 1]} : vector<4x1024xf32> to vector<4x33xf32>
    %686 = tpu.concatenate %684, %685 in 1 : vector<4x991xf32>, vector<4x33xf32> -> vector<4x1024xf32>
    %c8_553 = arith.constant 8 : index
    %c0_554 = arith.constant 0 : index
    %c0_555 = arith.constant 0 : index
    %687 = vector.load %arg36[%c8_553, %c0_554, %c0_555] : memref<9x1x1024xf32, #tpu.memory_space<vmem>>, vector<1x1x1024xf32>
    %688 = vector.shape_cast %687 : vector<1x1x1024xf32> to vector<1x1024xf32>
    %689 = vector.broadcast %688 : vector<1x1024xf32> to vector<4x1024xf32>
    %690 = arith.mulf %686, %689 : vector<4x1024xf32>
    %c8_556 = arith.constant 8 : index
    %c0_557 = arith.constant 0 : index
    %c0_558 = arith.constant 0 : index
    %691 = vector.load %arg30[%c8_556, %c0_557, %c0_558] : memref<9x8x4xf32, #tpu.memory_space<vmem>>, vector<1x8x4xf32>
    %692 = vector.shape_cast %691 : vector<1x8x4xf32> to vector<8x4xf32>
    %cst_559 = arith.constant dense<0.000000e+00> : vector<8x1024xf32>
    %693 = tpu.matmul %692, %690, %cst_559 {dimension_numbers = #tpu.dot_dimension_numbers<[1], [0], [0], [1], [0, 0, 1, 1], [], []>} : vector<8x4xf32>, vector<4x1024xf32>, vector<8x1024xf32> -> vector<8x1024xf32>
    %694 = arith.addf %683, %693 : vector<8x1024xf32>
    %c0_560 = arith.constant 0 : index
    %c0_561 = arith.constant 0 : index
    %695 = vector.load %arg31[%c0_560, %c0_561] : memref<8x1xf32, #tpu.memory_space<vmem>>, vector<8x1xf32>
    %696 = vector.broadcast %695 : vector<8x1xf32> to vector<8x1024xf32>
    %697 = arith.addf %694, %696 : vector<8x1024xf32>
    %cst_562 = arith.constant 0.000000e+00 : f32
    %698 = vector.broadcast %cst_562 : f32 to vector<8x1024xf32>
    %699 = arith.cmpf ogt, %697, %698 : vector<8x1024xf32>
    %700 = math.exp %697 : vector<8x1024xf32>
    %cst_563 = arith.constant 1.000000e+00 : f32
    %701 = vector.broadcast %cst_563 : f32 to vector<8x1024xf32>
    %702 = arith.subf %700, %701 : vector<8x1024xf32>
    %cst_564 = arith.constant 1.67326319 : f32
    %703 = vector.broadcast %cst_564 : f32 to vector<8x1024xf32>
    %704 = arith.mulf %703, %702 : vector<8x1024xf32>
    %705 = arith.select %699, %697, %704 : vector<8x1024xi1>, vector<8x1024xf32>
    %cst_565 = arith.constant 1.05070102 : f32
    %706 = vector.broadcast %cst_565 : f32 to vector<8x1024xf32>
    %707 = arith.mulf %706, %705 : vector<8x1024xf32>
    %cst_566 = arith.constant 0.000000e+00 : f32
    %708 = vector.broadcast %cst_566 : f32 to vector<8x1024xf32>
    %709 = vector.extract_strided_slice %707 {offsets = [0, 991], sizes = [8, 33], strides = [1, 1]} : vector<8x1024xf32> to vector<8x33xf32>
    %710 = vector.extract_strided_slice %707 {offsets = [0, 0], sizes = [8, 991], strides = [1, 1]} : vector<8x1024xf32> to vector<8x991xf32>
    %711 = tpu.concatenate %709, %710 in 1 : vector<8x33xf32>, vector<8x991xf32> -> vector<8x1024xf32>
    %c0_567 = arith.constant 0 : index
    %c0_568 = arith.constant 0 : index
    %c0_569 = arith.constant 0 : index
    %712 = vector.load %arg36[%c0_567, %c0_568, %c0_569] : memref<9x1x1024xf32, #tpu.memory_space<vmem>>, vector<1x1x1024xf32>
    %713 = vector.shape_cast %712 : vector<1x1x1024xf32> to vector<1x1024xf32>
    %714 = vector.broadcast %713 : vector<1x1024xf32> to vector<8x1024xf32>
    %715 = arith.mulf %711, %714 : vector<8x1024xf32>
    %c0_570 = arith.constant 0 : index
    %c0_571 = arith.constant 0 : index
    %c0_572 = arith.constant 0 : index
    %716 = vector.load %arg32[%c0_570, %c0_571, %c0_572] : memref<9x8x8xf32, #tpu.memory_space<vmem>>, vector<1x8x8xf32>
    %717 = vector.shape_cast %716 : vector<1x8x8xf32> to vector<8x8xf32>
    %cst_573 = arith.constant dense<0.000000e+00> : vector<8x1024xf32>
    %718 = tpu.matmul %717, %715, %cst_573 {dimension_numbers = #tpu.dot_dimension_numbers<[1], [0], [0], [1], [0, 0, 1, 1], [], []>} : vector<8x8xf32>, vector<8x1024xf32>, vector<8x1024xf32> -> vector<8x1024xf32>
    %719 = arith.addf %708, %718 : vector<8x1024xf32>
    %720 = vector.extract_strided_slice %707 {offsets = [0, 992], sizes = [8, 32], strides = [1, 1]} : vector<8x1024xf32> to vector<8x32xf32>
    %721 = vector.extract_strided_slice %707 {offsets = [0, 0], sizes = [8, 992], strides = [1, 1]} : vector<8x1024xf32> to vector<8x992xf32>
    %722 = tpu.concatenate %720, %721 in 1 : vector<8x32xf32>, vector<8x992xf32> -> vector<8x1024xf32>
    %c1_574 = arith.constant 1 : index
    %c0_575 = arith.constant 0 : index
    %c0_576 = arith.constant 0 : index
    %723 = vector.load %arg36[%c1_574, %c0_575, %c0_576] : memref<9x1x1024xf32, #tpu.memory_space<vmem>>, vector<1x1x1024xf32>
    %724 = vector.shape_cast %723 : vector<1x1x1024xf32> to vector<1x1024xf32>
    %725 = vector.broadcast %724 : vector<1x1024xf32> to vector<8x1024xf32>
    %726 = arith.mulf %722, %725 : vector<8x1024xf32>
    %c1_577 = arith.constant 1 : index
    %c0_578 = arith.constant 0 : index
    %c0_579 = arith.constant 0 : index
    %727 = vector.load %arg32[%c1_577, %c0_578, %c0_579] : memref<9x8x8xf32, #tpu.memory_space<vmem>>, vector<1x8x8xf32>
    %728 = vector.shape_cast %727 : vector<1x8x8xf32> to vector<8x8xf32>
    %cst_580 = arith.constant dense<0.000000e+00> : vector<8x1024xf32>
    %729 = tpu.matmul %728, %726, %cst_580 {dimension_numbers = #tpu.dot_dimension_numbers<[1], [0], [0], [1], [0, 0, 1, 1], [], []>} : vector<8x8xf32>, vector<8x1024xf32>, vector<8x1024xf32> -> vector<8x1024xf32>
    %730 = arith.addf %719, %729 : vector<8x1024xf32>
    %731 = vector.extract_strided_slice %707 {offsets = [0, 993], sizes = [8, 31], strides = [1, 1]} : vector<8x1024xf32> to vector<8x31xf32>
    %732 = vector.extract_strided_slice %707 {offsets = [0, 0], sizes = [8, 993], strides = [1, 1]} : vector<8x1024xf32> to vector<8x993xf32>
    %733 = tpu.concatenate %731, %732 in 1 : vector<8x31xf32>, vector<8x993xf32> -> vector<8x1024xf32>
    %c2_581 = arith.constant 2 : index
    %c0_582 = arith.constant 0 : index
    %c0_583 = arith.constant 0 : index
    %734 = vector.load %arg36[%c2_581, %c0_582, %c0_583] : memref<9x1x1024xf32, #tpu.memory_space<vmem>>, vector<1x1x1024xf32>
    %735 = vector.shape_cast %734 : vector<1x1x1024xf32> to vector<1x1024xf32>
    %736 = vector.broadcast %735 : vector<1x1024xf32> to vector<8x1024xf32>
    %737 = arith.mulf %733, %736 : vector<8x1024xf32>
    %c2_584 = arith.constant 2 : index
    %c0_585 = arith.constant 0 : index
    %c0_586 = arith.constant 0 : index
    %738 = vector.load %arg32[%c2_584, %c0_585, %c0_586] : memref<9x8x8xf32, #tpu.memory_space<vmem>>, vector<1x8x8xf32>
    %739 = vector.shape_cast %738 : vector<1x8x8xf32> to vector<8x8xf32>
    %cst_587 = arith.constant dense<0.000000e+00> : vector<8x1024xf32>
    %740 = tpu.matmul %739, %737, %cst_587 {dimension_numbers = #tpu.dot_dimension_numbers<[1], [0], [0], [1], [0, 0, 1, 1], [], []>} : vector<8x8xf32>, vector<8x1024xf32>, vector<8x1024xf32> -> vector<8x1024xf32>
    %741 = arith.addf %730, %740 : vector<8x1024xf32>
    %742 = vector.extract_strided_slice %707 {offsets = [0, 1023], sizes = [8, 1], strides = [1, 1]} : vector<8x1024xf32> to vector<8x1xf32>
    %743 = vector.extract_strided_slice %707 {offsets = [0, 0], sizes = [8, 1023], strides = [1, 1]} : vector<8x1024xf32> to vector<8x1023xf32>
    %744 = tpu.concatenate %742, %743 in 1 : vector<8x1xf32>, vector<8x1023xf32> -> vector<8x1024xf32>
    %c3_588 = arith.constant 3 : index
    %c0_589 = arith.constant 0 : index
    %c0_590 = arith.constant 0 : index
    %745 = vector.load %arg36[%c3_588, %c0_589, %c0_590] : memref<9x1x1024xf32, #tpu.memory_space<vmem>>, vector<1x1x1024xf32>
    %746 = vector.shape_cast %745 : vector<1x1x1024xf32> to vector<1x1024xf32>
    %747 = vector.broadcast %746 : vector<1x1024xf32> to vector<8x1024xf32>
    %748 = arith.mulf %744, %747 : vector<8x1024xf32>
    %c3_591 = arith.constant 3 : index
    %c0_592 = arith.constant 0 : index
    %c0_593 = arith.constant 0 : index
    %749 = vector.load %arg32[%c3_591, %c0_592, %c0_593] : memref<9x8x8xf32, #tpu.memory_space<vmem>>, vector<1x8x8xf32>
    %750 = vector.shape_cast %749 : vector<1x8x8xf32> to vector<8x8xf32>
    %cst_594 = arith.constant dense<0.000000e+00> : vector<8x1024xf32>
    %751 = tpu.matmul %750, %748, %cst_594 {dimension_numbers = #tpu.dot_dimension_numbers<[1], [0], [0], [1], [0, 0, 1, 1], [], []>} : vector<8x8xf32>, vector<8x1024xf32>, vector<8x1024xf32> -> vector<8x1024xf32>
    %752 = arith.addf %741, %751 : vector<8x1024xf32>
    %c4_595 = arith.constant 4 : index
    %c0_596 = arith.constant 0 : index
    %c0_597 = arith.constant 0 : index
    %753 = vector.load %arg32[%c4_595, %c0_596, %c0_597] : memref<9x8x8xf32, #tpu.memory_space<vmem>>, vector<1x8x8xf32>
    %754 = vector.shape_cast %753 : vector<1x8x8xf32> to vector<8x8xf32>
    %cst_598 = arith.constant dense<0.000000e+00> : vector<8x1024xf32>
    %755 = tpu.matmul %754, %707, %cst_598 {dimension_numbers = #tpu.dot_dimension_numbers<[1], [0], [0], [1], [0, 0, 1, 1], [], []>} : vector<8x8xf32>, vector<8x1024xf32>, vector<8x1024xf32> -> vector<8x1024xf32>
    %756 = arith.addf %752, %755 : vector<8x1024xf32>
    %757 = vector.extract_strided_slice %707 {offsets = [0, 1], sizes = [8, 1023], strides = [1, 1]} : vector<8x1024xf32> to vector<8x1023xf32>
    %758 = vector.extract_strided_slice %707 {offsets = [0, 0], sizes = [8, 1], strides = [1, 1]} : vector<8x1024xf32> to vector<8x1xf32>
    %759 = tpu.concatenate %757, %758 in 1 : vector<8x1023xf32>, vector<8x1xf32> -> vector<8x1024xf32>
    %c5_599 = arith.constant 5 : index
    %c0_600 = arith.constant 0 : index
    %c0_601 = arith.constant 0 : index
    %760 = vector.load %arg36[%c5_599, %c0_600, %c0_601] : memref<9x1x1024xf32, #tpu.memory_space<vmem>>, vector<1x1x1024xf32>
    %761 = vector.shape_cast %760 : vector<1x1x1024xf32> to vector<1x1024xf32>
    %762 = vector.broadcast %761 : vector<1x1024xf32> to vector<8x1024xf32>
    %763 = arith.mulf %759, %762 : vector<8x1024xf32>
    %c5_602 = arith.constant 5 : index
    %c0_603 = arith.constant 0 : index
    %c0_604 = arith.constant 0 : index
    %764 = vector.load %arg32[%c5_602, %c0_603, %c0_604] : memref<9x8x8xf32, #tpu.memory_space<vmem>>, vector<1x8x8xf32>
    %765 = vector.shape_cast %764 : vector<1x8x8xf32> to vector<8x8xf32>
    %cst_605 = arith.constant dense<0.000000e+00> : vector<8x1024xf32>
    %766 = tpu.matmul %765, %763, %cst_605 {dimension_numbers = #tpu.dot_dimension_numbers<[1], [0], [0], [1], [0, 0, 1, 1], [], []>} : vector<8x8xf32>, vector<8x1024xf32>, vector<8x1024xf32> -> vector<8x1024xf32>
    %767 = arith.addf %756, %766 : vector<8x1024xf32>
    %768 = vector.extract_strided_slice %707 {offsets = [0, 31], sizes = [8, 993], strides = [1, 1]} : vector<8x1024xf32> to vector<8x993xf32>
    %769 = vector.extract_strided_slice %707 {offsets = [0, 0], sizes = [8, 31], strides = [1, 1]} : vector<8x1024xf32> to vector<8x31xf32>
    %770 = tpu.concatenate %768, %769 in 1 : vector<8x993xf32>, vector<8x31xf32> -> vector<8x1024xf32>
    %c6_606 = arith.constant 6 : index
    %c0_607 = arith.constant 0 : index
    %c0_608 = arith.constant 0 : index
    %771 = vector.load %arg36[%c6_606, %c0_607, %c0_608] : memref<9x1x1024xf32, #tpu.memory_space<vmem>>, vector<1x1x1024xf32>
    %772 = vector.shape_cast %771 : vector<1x1x1024xf32> to vector<1x1024xf32>
    %773 = vector.broadcast %772 : vector<1x1024xf32> to vector<8x1024xf32>
    %774 = arith.mulf %770, %773 : vector<8x1024xf32>
    %c6_609 = arith.constant 6 : index
    %c0_610 = arith.constant 0 : index
    %c0_611 = arith.constant 0 : index
    %775 = vector.load %arg32[%c6_609, %c0_610, %c0_611] : memref<9x8x8xf32, #tpu.memory_space<vmem>>, vector<1x8x8xf32>
    %776 = vector.shape_cast %775 : vector<1x8x8xf32> to vector<8x8xf32>
    %cst_612 = arith.constant dense<0.000000e+00> : vector<8x1024xf32>
    %777 = tpu.matmul %776, %774, %cst_612 {dimension_numbers = #tpu.dot_dimension_numbers<[1], [0], [0], [1], [0, 0, 1, 1], [], []>} : vector<8x8xf32>, vector<8x1024xf32>, vector<8x1024xf32> -> vector<8x1024xf32>
    %778 = arith.addf %767, %777 : vector<8x1024xf32>
    %779 = vector.extract_strided_slice %707 {offsets = [0, 32], sizes = [8, 992], strides = [1, 1]} : vector<8x1024xf32> to vector<8x992xf32>
    %780 = vector.extract_strided_slice %707 {offsets = [0, 0], sizes = [8, 32], strides = [1, 1]} : vector<8x1024xf32> to vector<8x32xf32>
    %781 = tpu.concatenate %779, %780 in 1 : vector<8x992xf32>, vector<8x32xf32> -> vector<8x1024xf32>
    %c7_613 = arith.constant 7 : index
    %c0_614 = arith.constant 0 : index
    %c0_615 = arith.constant 0 : index
    %782 = vector.load %arg36[%c7_613, %c0_614, %c0_615] : memref<9x1x1024xf32, #tpu.memory_space<vmem>>, vector<1x1x1024xf32>
    %783 = vector.shape_cast %782 : vector<1x1x1024xf32> to vector<1x1024xf32>
    %784 = vector.broadcast %783 : vector<1x1024xf32> to vector<8x1024xf32>
    %785 = arith.mulf %781, %784 : vector<8x1024xf32>
    %c7_616 = arith.constant 7 : index
    %c0_617 = arith.constant 0 : index
    %c0_618 = arith.constant 0 : index
    %786 = vector.load %arg32[%c7_616, %c0_617, %c0_618] : memref<9x8x8xf32, #tpu.memory_space<vmem>>, vector<1x8x8xf32>
    %787 = vector.shape_cast %786 : vector<1x8x8xf32> to vector<8x8xf32>
    %cst_619 = arith.constant dense<0.000000e+00> : vector<8x1024xf32>
    %788 = tpu.matmul %787, %785, %cst_619 {dimension_numbers = #tpu.dot_dimension_numbers<[1], [0], [0], [1], [0, 0, 1, 1], [], []>} : vector<8x8xf32>, vector<8x1024xf32>, vector<8x1024xf32> -> vector<8x1024xf32>
    %789 = arith.addf %778, %788 : vector<8x1024xf32>
    %790 = vector.extract_strided_slice %707 {offsets = [0, 33], sizes = [8, 991], strides = [1, 1]} : vector<8x1024xf32> to vector<8x991xf32>
    %791 = vector.extract_strided_slice %707 {offsets = [0, 0], sizes = [8, 33], strides = [1, 1]} : vector<8x1024xf32> to vector<8x33xf32>
    %792 = tpu.concatenate %790, %791 in 1 : vector<8x991xf32>, vector<8x33xf32> -> vector<8x1024xf32>
    %c8_620 = arith.constant 8 : index
    %c0_621 = arith.constant 0 : index
    %c0_622 = arith.constant 0 : index
    %793 = vector.load %arg36[%c8_620, %c0_621, %c0_622] : memref<9x1x1024xf32, #tpu.memory_space<vmem>>, vector<1x1x1024xf32>
    %794 = vector.shape_cast %793 : vector<1x1x1024xf32> to vector<1x1024xf32>
    %795 = vector.broadcast %794 : vector<1x1024xf32> to vector<8x1024xf32>
    %796 = arith.mulf %792, %795 : vector<8x1024xf32>
    %c8_623 = arith.constant 8 : index
    %c0_624 = arith.constant 0 : index
    %c0_625 = arith.constant 0 : index
    %797 = vector.load %arg32[%c8_623, %c0_624, %c0_625] : memref<9x8x8xf32, #tpu.memory_space<vmem>>, vector<1x8x8xf32>
    %798 = vector.shape_cast %797 : vector<1x8x8xf32> to vector<8x8xf32>
    %cst_626 = arith.constant dense<0.000000e+00> : vector<8x1024xf32>
    %799 = tpu.matmul %798, %796, %cst_626 {dimension_numbers = #tpu.dot_dimension_numbers<[1], [0], [0], [1], [0, 0, 1, 1], [], []>} : vector<8x8xf32>, vector<8x1024xf32>, vector<8x1024xf32> -> vector<8x1024xf32>
    %800 = arith.addf %789, %799 : vector<8x1024xf32>
    %c0_627 = arith.constant 0 : index
    %c0_628 = arith.constant 0 : index
    %801 = vector.load %arg33[%c0_627, %c0_628] : memref<8x1xf32, #tpu.memory_space<vmem>>, vector<8x1xf32>
    %802 = vector.broadcast %801 : vector<8x1xf32> to vector<8x1024xf32>
    %803 = arith.addf %800, %802 : vector<8x1024xf32>
    %c0_629 = arith.constant 0 : index
    %c0_630 = arith.constant 0 : index
    %804 = vector.load %arg34[%c0_629, %c0_630] : memref<8x4xf32, #tpu.memory_space<vmem>>, vector<8x4xf32>
    %cst_631 = arith.constant dense<0.000000e+00> : vector<8x1024xf32>
    %805 = tpu.matmul %804, %601, %cst_631 {dimension_numbers = #tpu.dot_dimension_numbers<[1], [0], [0], [1], [0, 0, 1, 1], [], []>} : vector<8x4xf32>, vector<4x1024xf32>, vector<8x1024xf32> -> vector<8x1024xf32>
    %c0_632 = arith.constant 0 : index
    %c0_633 = arith.constant 0 : index
    %806 = vector.load %arg35[%c0_632, %c0_633] : memref<8x1xf32, #tpu.memory_space<vmem>>, vector<8x1xf32>
    %807 = vector.broadcast %806 : vector<8x1xf32> to vector<8x1024xf32>
    %808 = arith.addf %805, %807 : vector<8x1024xf32>
    %809 = arith.addf %803, %808 : vector<8x1024xf32>
    %c0_634 = arith.constant 0 : index
    %c0_635 = arith.constant 0 : index
    %810 = vector.load %arg37[%c0_634, %c0_635] : memref<3x8xf32, #tpu.memory_space<vmem>>, vector<3x8xf32>
    %cst_636 = arith.constant dense<0.000000e+00> : vector<3x1024xf32>
    %811 = tpu.matmul %810, %809, %cst_636 {dimension_numbers = #tpu.dot_dimension_numbers<[1], [0], [0], [1], [0, 0, 1, 1], [], []>} : vector<3x8xf32>, vector<8x1024xf32>, vector<3x1024xf32> -> vector<3x1024xf32>
    %c0_637 = arith.constant 0 : index
    %c0_638 = arith.constant 0 : index
    %812 = vector.load %arg38[%c0_637, %c0_638] : memref<3x1xf32, #tpu.memory_space<vmem>>, vector<3x1xf32>
    %813 = vector.broadcast %812 : vector<3x1xf32> to vector<3x1024xf32>
    %814 = arith.addf %811, %813 : vector<3x1024xf32>
    %815 = math.tanh %814 : vector<3x1024xf32>
    %c0_639 = arith.constant 0 : index
    %c0_640 = arith.constant 0 : index
    %c0_641 = arith.constant 0 : index
    %816 = vector.load %arg39[%c0_639, %c0_640, %c0_641] : memref<1x3x1024xf32, #tpu.memory_space<vmem>>, vector<1x3x1024xf32>
    %817 = vector.shape_cast %816 : vector<1x3x1024xf32> to vector<3x1024xf32>
    %818 = vector.shape_cast %815 : vector<3x1024xf32> to vector<1x3x1024xf32>
    tpu.vector_store %arg39[%c0_639, %c0_640, %c0_641], %818 {strides = array<i32>} : memref<1x3x1024xf32, #tpu.memory_space<vmem>>, vector<1x3x1024xf32>,
    return
  }
  func.func @transform_0(%arg0: i32) -> (i32, i32, i32) {
    %c0_i32 = arith.constant 0 : i32
    %c0_i32_0 = arith.constant 0 : i32
    %c0_i32_1 = arith.constant 0 : i32
    return %arg0, %c0_i32, %c0_i32_0 : i32, i32, i32
  }
  func.func @transform_1(%arg0: i32) -> (i32, i32) {
    %c0_i32 = arith.constant 0 : i32
    %c0_i32_0 = arith.constant 0 : i32
    %c0_i32_1 = arith.constant 0 : i32
    return %c0_i32, %c0_i32_0 : i32, i32
  }
  func.func @transform_2(%arg0: i32) -> (i32, i32) {
    %c0_i32 = arith.constant 0 : i32
    %c0_i32_0 = arith.constant 0 : i32
    %c0_i32_1 = arith.constant 0 : i32
    return %c0_i32, %c0_i32_0 : i32, i32
  }
  func.func @transform_3(%arg0: i32) -> (i32, i32, i32) {
    %c0_i32 = arith.constant 0 : i32
    %c0_i32_0 = arith.constant 0 : i32
    %c0_i32_1 = arith.constant 0 : i32
    %c0_i32_2 = arith.constant 0 : i32
    return %c0_i32, %c0_i32_0, %c0_i32_1 : i32, i32, i32
  }
  func.func @transform_4(%arg0: i32) -> (i32, i32) {
    %c0_i32 = arith.constant 0 : i32
    %c0_i32_0 = arith.constant 0 : i32
    %c0_i32_1 = arith.constant 0 : i32
    return %c0_i32, %c0_i32_0 : i32, i32
  }
  func.func @transform_5(%arg0: i32) -> (i32, i32, i32) {
    %c0_i32 = arith.constant 0 : i32
    %c0_i32_0 = arith.constant 0 : i32
    %c0_i32_1 = arith.constant 0 : i32
    %c0_i32_2 = arith.constant 0 : i32
    return %c0_i32, %c0_i32_0, %c0_i32_1 : i32, i32, i32
  }
  func.func @transform_6(%arg0: i32) -> (i32, i32) {
    %c0_i32 = arith.constant 0 : i32
    %c0_i32_0 = arith.constant 0 : i32
    %c0_i32_1 = arith.constant 0 : i32
    return %c0_i32, %c0_i32_0 : i32, i32
  }
  func.func @transform_7(%arg0: i32) -> (i32, i32, i32) {
    %c0_i32 = arith.constant 0 : i32
    %c0_i32_0 = arith.constant 0 : i32
    %c0_i32_1 = arith.constant 0 : i32
    %c0_i32_2 = arith.constant 0 : i32
    return %c0_i32, %c0_i32_0, %c0_i32_1 : i32, i32, i32
  }
  func.func @transform_8(%arg0: i32) -> (i32, i32) {
    %c0_i32 = arith.constant 0 : i32
    %c0_i32_0 = arith.constant 0 : i32
    %c0_i32_1 = arith.constant 0 : i32
    return %c0_i32, %c0_i32_0 : i32, i32
  }
  func.func @transform_9(%arg0: i32) -> (i32, i32) {
    %c0_i32 = arith.constant 0 : i32
    %c0_i32_0 = arith.constant 0 : i32
    %c0_i32_1 = arith.constant 0 : i32
    return %c0_i32, %c0_i32_0 : i32, i32
  }
  func.func @transform_10(%arg0: i32) -> (i32, i32) {
    %c0_i32 = arith.constant 0 : i32
    %c0_i32_0 = arith.constant 0 : i32
    %c0_i32_1 = arith.constant 0 : i32
    return %c0_i32, %c0_i32_0 : i32, i32
  }
  func.func @transform_11(%arg0: i32) -> (i32, i32, i32) {
    %c0_i32 = arith.constant 0 : i32
    %c0_i32_0 = arith.constant 0 : i32
    %c0_i32_1 = arith.constant 0 : i32
    %c0_i32_2 = arith.constant 0 : i32
    return %c0_i32, %c0_i32_0, %c0_i32_1 : i32, i32, i32
  }
  func.func @transform_12(%arg0: i32) -> (i32, i32) {
    %c0_i32 = arith.constant 0 : i32
    %c0_i32_0 = arith.constant 0 : i32
    %c0_i32_1 = arith.constant 0 : i32
    return %c0_i32, %c0_i32_0 : i32, i32
  }
  func.func @transform_13(%arg0: i32) -> (i32, i32, i32) {
    %c0_i32 = arith.constant 0 : i32
    %c0_i32_0 = arith.constant 0 : i32
    %c0_i32_1 = arith.constant 0 : i32
    %c0_i32_2 = arith.constant 0 : i32
    return %c0_i32, %c0_i32_0, %c0_i32_1 : i32, i32, i32
  }
  func.func @transform_14(%arg0: i32) -> (i32, i32) {
    %c0_i32 = arith.constant 0 : i32
    %c0_i32_0 = arith.constant 0 : i32
    %c0_i32_1 = arith.constant 0 : i32
    return %c0_i32, %c0_i32_0 : i32, i32
  }
  func.func @transform_15(%arg0: i32) -> (i32, i32, i32) {
    %c0_i32 = arith.constant 0 : i32
    %c0_i32_0 = arith.constant 0 : i32
    %c0_i32_1 = arith.constant 0 : i32
    %c0_i32_2 = arith.constant 0 : i32
    return %c0_i32, %c0_i32_0, %c0_i32_1 : i32, i32, i32
  }
  func.func @transform_16(%arg0: i32) -> (i32, i32) {
    %c0_i32 = arith.constant 0 : i32
    %c0_i32_0 = arith.constant 0 : i32
    %c0_i32_1 = arith.constant 0 : i32
    return %c0_i32, %c0_i32_0 : i32, i32
  }
  func.func @transform_17(%arg0: i32) -> (i32, i32) {
    %c0_i32 = arith.constant 0 : i32
    %c0_i32_0 = arith.constant 0 : i32
    %c0_i32_1 = arith.constant 0 : i32
    return %c0_i32, %c0_i32_0 : i32, i32
  }
  func.func @transform_18(%arg0: i32) -> (i32, i32) {
    %c0_i32 = arith.constant 0 : i32
    %c0_i32_0 = arith.constant 0 : i32
    %c0_i32_1 = arith.constant 0 : i32
    return %c0_i32, %c0_i32_0 : i32, i32
  }
  func.func @transform_19(%arg0: i32) -> (i32, i32, i32) {
    %c0_i32 = arith.constant 0 : i32
    %c0_i32_0 = arith.constant 0 : i32
    %c0_i32_1 = arith.constant 0 : i32
    %c0_i32_2 = arith.constant 0 : i32
    return %c0_i32, %c0_i32_0, %c0_i32_1 : i32, i32, i32
  }
  func.func @transform_20(%arg0: i32) -> (i32, i32) {
    %c0_i32 = arith.constant 0 : i32
    %c0_i32_0 = arith.constant 0 : i32
    %c0_i32_1 = arith.constant 0 : i32
    return %c0_i32, %c0_i32_0 : i32, i32
  }
  func.func @transform_21(%arg0: i32) -> (i32, i32, i32) {
    %c0_i32 = arith.constant 0 : i32
    %c0_i32_0 = arith.constant 0 : i32
    %c0_i32_1 = arith.constant 0 : i32
    %c0_i32_2 = arith.constant 0 : i32
    return %c0_i32, %c0_i32_0, %c0_i32_1 : i32, i32, i32
  }
  func.func @transform_22(%arg0: i32) -> (i32, i32) {
    %c0_i32 = arith.constant 0 : i32
    %c0_i32_0 = arith.constant 0 : i32
    %c0_i32_1 = arith.constant 0 : i32
    return %c0_i32, %c0_i32_0 : i32, i32
  }
  func.func @transform_23(%arg0: i32) -> (i32, i32, i32) {
    %c0_i32 = arith.constant 0 : i32
    %c0_i32_0 = arith.constant 0 : i32
    %c0_i32_1 = arith.constant 0 : i32
    %c0_i32_2 = arith.constant 0 : i32
    return %c0_i32, %c0_i32_0, %c0_i32_1 : i32, i32, i32
  }
  func.func @transform_24(%arg0: i32) -> (i32, i32) {
    %c0_i32 = arith.constant 0 : i32
    %c0_i32_0 = arith.constant 0 : i32
    %c0_i32_1 = arith.constant 0 : i32
    return %c0_i32, %c0_i32_0 : i32, i32
  }
  func.func @transform_25(%arg0: i32) -> (i32, i32) {
    %c0_i32 = arith.constant 0 : i32
    %c0_i32_0 = arith.constant 0 : i32
    %c0_i32_1 = arith.constant 0 : i32
    return %c0_i32, %c0_i32_0 : i32, i32
  }
  func.func @transform_26(%arg0: i32) -> (i32, i32) {
    %c0_i32 = arith.constant 0 : i32
    %c0_i32_0 = arith.constant 0 : i32
    %c0_i32_1 = arith.constant 0 : i32
    return %c0_i32, %c0_i32_0 : i32, i32
  }
  func.func @transform_27(%arg0: i32) -> (i32, i32, i32) {
    %c0_i32 = arith.constant 0 : i32
    %c0_i32_0 = arith.constant 0 : i32
    %c0_i32_1 = arith.constant 0 : i32
    %c0_i32_2 = arith.constant 0 : i32
    return %c0_i32, %c0_i32_0, %c0_i32_1 : i32, i32, i32
  }
  func.func @transform_28(%arg0: i32) -> (i32, i32) {
    %c0_i32 = arith.constant 0 : i32
    %c0_i32_0 = arith.constant 0 : i32
    %c0_i32_1 = arith.constant 0 : i32
    return %c0_i32, %c0_i32_0 : i32, i32
  }
  func.func @transform_29(%arg0: i32) -> (i32, i32, i32) {
    %c0_i32 = arith.constant 0 : i32
    %c0_i32_0 = arith.constant 0 : i32
    %c0_i32_1 = arith.constant 0 : i32
    %c0_i32_2 = arith.constant 0 : i32
    return %c0_i32, %c0_i32_0, %c0_i32_1 : i32, i32, i32
  }
  func.func @transform_30(%arg0: i32) -> (i32, i32) {
    %c0_i32 = arith.constant 0 : i32
    %c0_i32_0 = arith.constant 0 : i32
    %c0_i32_1 = arith.constant 0 : i32
    return %c0_i32, %c0_i32_0 : i32, i32
  }
  func.func @transform_31(%arg0: i32) -> (i32, i32, i32) {
    %c0_i32 = arith.constant 0 : i32
    %c0_i32_0 = arith.constant 0 : i32
    %c0_i32_1 = arith.constant 0 : i32
    %c0_i32_2 = arith.constant 0 : i32
    return %c0_i32, %c0_i32_0, %c0_i32_1 : i32, i32, i32
  }
  func.func @transform_32(%arg0: i32) -> (i32, i32) {
    %c0_i32 = arith.constant 0 : i32
    %c0_i32_0 = arith.constant 0 : i32
    %c0_i32_1 = arith.constant 0 : i32
    return %c0_i32, %c0_i32_0 : i32, i32
  }
  func.func @transform_33(%arg0: i32) -> (i32, i32) {
    %c0_i32 = arith.constant 0 : i32
    %c0_i32_0 = arith.constant 0 : i32
    %c0_i32_1 = arith.constant 0 : i32
    return %c0_i32, %c0_i32_0 : i32, i32
  }
  func.func @transform_34(%arg0: i32) -> (i32, i32) {
    %c0_i32 = arith.constant 0 : i32
    %c0_i32_0 = arith.constant 0 : i32
    %c0_i32_1 = arith.constant 0 : i32
    return %c0_i32, %c0_i32_0 : i32, i32
  }
  func.func @transform_35(%arg0: i32) -> (i32, i32, i32) {
    %c0_i32 = arith.constant 0 : i32
    %c0_i32_0 = arith.constant 0 : i32
    %c0_i32_1 = arith.constant 0 : i32
    %c0_i32_2 = arith.constant 0 : i32
    return %c0_i32, %c0_i32_0, %c0_i32_1 : i32, i32, i32
  }
  func.func @transform_36(%arg0: i32) -> (i32, i32) {
    %c0_i32 = arith.constant 0 : i32
    %c0_i32_0 = arith.constant 0 : i32
    %c0_i32_1 = arith.constant 0 : i32
    return %c0_i32, %c0_i32_0 : i32, i32
  }
  func.func @transform_37(%arg0: i32) -> (i32, i32) {
    %c0_i32 = arith.constant 0 : i32
    %c0_i32_0 = arith.constant 0 : i32
    %c0_i32_1 = arith.constant 0 : i32
    return %c0_i32, %c0_i32_0 : i32, i32
  }
  func.func @transform_38(%arg0: i32) -> (i32, i32, i32) {
    %c0_i32 = arith.constant 0 : i32
    %c0_i32_0 = arith.constant 0 : i32
    %c0_i32_1 = arith.constant 0 : i32
    return %arg0, %c0_i32, %c0_i32_0 : i32, i32, i32
  }
}

</mosaic_0001>

<bundles_post_ra>
// kernel: _lambda_.1
= control target key start
LH: loop header
LB: loop body
LE: loop exit
PB: predicated region body
PF: predicated region fallthrough
CT: control target
= control target key end

     0   :  { %s19763_s6 = smov 1   ;;  %s19764_s10 = smov 2   ;;  %s23107_s0 = inlined_call_operand.smem [shape: u32[39], index: -1, kind: input, shape index: {}] }
   0x1   :  { %s19840_s5 = sld [smem:[%s23107_s0]]   ;;  %s19765_s14 = smov 3  }
   0x2   :  { %s19845_s9 = sld [smem:[%s23107_s0 + %s19763_s6]]   ;;  %s19766_s18 = smov 4  }
   0x3   :  { %s19850_s13 = sld [smem:[%s23107_s0 + %s19764_s10]]   ;;  %s19767_s22 = smov 5  }
   0x4   :  { %s19855_s17 = sld [smem:[%s23107_s0 + %s19765_s14]]   ;;  %s19768_s26 = smov 6  }
   0x5   :  { %s19860_s21 = sld [smem:[%s23107_s0 + %s19766_s18]]   ;;  %s19769_s30 = smov 7  }
   0x6   :  { %s19865_s25 = sld [smem:[%s23107_s0 + %s19767_s22]]   ;;  %s19770_s4 = smov 8  }
   0x7   :  { %23234 = sst [smem:[#allocation20_spill]] %s19840_s5  ;;  %s19771_s10 = smov 9  }
   0x8   :  { %23235 = sst [smem:[#allocation21_spill]] %s19845_s9  ;;  %s19772_s15 = smov 10  }
   0x9   :  { %23236 = sst [smem:[#allocation22_spill]] %s19850_s13  ;;  %s19773_s20 = smov 11  }
   0xa   :  { %s19870_s29 = sld [smem:[%s23107_s0 + %s19768_s26]]   ;;  %s19774_s26 = smov 12  }
   0xb   :  { %s19875_s3 = sld [smem:[%s23107_s0 + %s19769_s30]]   ;;  %s19775_s1 = smov 13  }
   0xc   :  { %s19880_s8 = sld [smem:[%s23107_s0 + %s19770_s4]]   ;;  %s19776_s7 = smov 14  }
   0xd   :  { %s19885_s14 = sld [smem:[%s23107_s0 + %s19771_s10]]   ;;  %s19778_s22 = smov 16  }
   0xe   :  { %s19890_s19 = sld [smem:[%s23107_s0 + %s19772_s15]]   ;;  %s19777_s15 = smov 15  }
   0xf   :  { %s19895_s24 = sld [smem:[%s23107_s0 + %s19773_s20]]   ;;  %s19779_s28 = smov 17  }
  0x10   :  { %s19900_s30 = sld [smem:[%s23107_s0 + %s19774_s26]]  }
  0x11   :  { %23237 = sst [smem:[#allocation23_spill]] %s19875_s3 }
  0x12   :  { %23238 = sst [smem:[#allocation24_spill]] %s19880_s8 }
  0x13   :  { %23239 = sst [smem:[#allocation25_spill]] %s19885_s14 }
  0x14   :  { %23240 = sst [smem:[#allocation26_spill]] %s19890_s19 }
  0x15   :  { %s19905_s6 = sld [smem:[%s23107_s0 + %s19775_s1]]  }
  0x16   :  { %s19910_s12 = sld [smem:[%s23107_s0 + %s19776_s7]]   ;;  %s19780_s7 = smov 18  }
  0x17   :  { %s19915_s20 = sld [smem:[%s23107_s0 + %s19777_s15]]   ;;  %s19781_s15 = smov 19  }
  0x18   :  { %s19920_s27 = sld [smem:[%s23107_s0 + %s19778_s22]]   ;;  %s19782_s22 = smov 20  }
  0x19   :  { %s19925_s4 = sld [smem:[%s23107_s0 + %s19779_s28]]   ;;  %s19783_s28 = smov 21  }
  0x1a   :  { %s19945_s19 = sld [smem:[%s23107_s0 + %s19783_s28]]   ;;  %s19787_s28 = smov 25  }
  0x1b   :  { %23241 = sst [smem:[#allocation27_spill]] %s19905_s6 }
  0x1c   :  { %23242 = sst [smem:[#allocation28_spill]] %s19910_s12 }
  0x1d   :  { %23243 = sst [smem:[#allocation29_spill]] %s19915_s20 }
  0x1e   :  { %23244 = sst [smem:[#allocation30_spill]] %s19920_s27 }
  0x1f   :  { %23245 = sst [smem:[#allocation31_spill]] %s19925_s4 }
  0x20   :  { %s19930_s6 = sld [smem:[%s23107_s0 + %s19780_s7]]   ;;  %s19784_s7 = smov 22  }
  0x21   :  { %s19935_s20 = sld [smem:[%s23107_s0 + %s19781_s15]]   ;;  %s19785_s15 = smov 23  }
  0x22   :  { %s19940_s27 = sld [smem:[%s23107_s0 + %s19782_s22]]   ;;  %s19786_s22 = smov 24  }
  0x23   :  { %23249 = sst [smem:[#allocation35_spill]] %s19945_s19 }
  0x24   :  { %s19950_s14 = sld [smem:[%s23107_s0 + %s19784_s7]]   ;;  %s19788_s7 = smov 26  }
  0x25   :  { %s19965_s19 = sld [smem:[%s23107_s0 + %s19787_s28]]   ;;  %s19791_s28 = smov 29  }
  0x26   :  { %23246 = sst [smem:[#allocation32_spill]] %s19930_s6 }
  0x27   :  { %23247 = sst [smem:[#allocation33_spill]] %s19935_s20 }
  0x28   :  { %23248 = sst [smem:[#allocation34_spill]] %s19940_s27 }
  0x29   :  { %s19955_s20 = sld [smem:[%s23107_s0 + %s19785_s15]]   ;;  %s19789_s15 = smov 27  }
  0x2a   :  { %23250 = sst [smem:[#allocation36_spill]] %s19950_s14 }
  0x2b   :  { %s19960_s27 = sld [smem:[%s23107_s0 + %s19786_s22]]   ;;  %s19790_s22 = smov 28  }
  0x2c   :  { %s19970_s14 = sld [smem:[%s23107_s0 + %s19788_s7]]   ;;  %s19792_s7 = smov 30  }
  0x2d   :  { %s19985_s3 = sld [smem:[%s23107_s0 + %s19791_s28]]   ;;  %s19795_s28 = smov 33  }
  0x2f   :  { %23251 = sst [smem:[#allocation37_spill]] %s19955_s20 }
  0x30   :  { %s19975_s20 = sld [smem:[%s23107_s0 + %s19789_s15]]   ;;  %s19793_s15 = smov 31  }
  0x31   :  { %23252 = sst [smem:[#allocation38_spill]] %s19960_s27 }
  0x32   :  { %23253 = sst [smem:[#allocation39_spill]] %s19970_s14 }
  0x33   :  { %s19980_s27 = sld [smem:[%s23107_s0 + %s19790_s22]]   ;;  %s19794_s22 = smov 32  }
  0x34   :  { %23255 = sst [smem:[#allocation41_spill]] %s19985_s3 }
  0x35   :  { %s19990_s14 = sld [smem:[%s23107_s0 + %s19792_s7]]   ;;  %s19796_s7 = smov 34  }
  0x36   :  { %23254 = sst [smem:[#allocation40_spill]] %s19975_s20 }
  0x37   :  { %s19995_s6 = sld [smem:[%s23107_s0 + %s19793_s15]]   ;;  %s19797_s15 = smov 35  }
  0x38   :  { %s20000_s12 = sld [smem:[%s23107_s0 + %s19794_s22]]   ;;  %s19798_s22 = smov 36  }
  0x39   :  { %s20005_s3 = sld [smem:[%s23107_s0 + %s19795_s28]]   ;;  %s19799_s28 = smov 37  }
  0x3b   :  { %23256 = sst [smem:[#allocation42_spill]] %s19990_s14 }
  0x3c   :  { %s20010_s14 = sld [smem:[%s23107_s0 + %s19796_s7]]   ;;  %s19800_s7 = smov 38  }
  0x3d   :  { %23257 = sst [smem:[#allocation43_spill]] %s19995_s6 }
  0x3e   :  { %23258 = sst [smem:[#allocation44_spill]] %s20000_s12 }
  0x3f   :  { %23259 = sst [smem:[#allocation45_spill]] %s20005_s3 }
  0x40   :  { %s20015_s6 = sld [smem:[%s23107_s0 + %s19797_s15]]  }
  0x41   :  { %s20020_s12 = sld [smem:[%s23107_s0 + %s19798_s22]]  }
  0x42   :  { %23260 = sst [smem:[#allocation46_spill]] %s20010_s14 }
  0x43   :  { %s20025_s3 = sld [smem:[%s23107_s0 + %s19799_s28]]  }
  0x44   :  { %s20030_s14 = sld [smem:[%s23107_s0 + %s19800_s7]]  }
  0x4a   :  { %23261 = sst [smem:[#allocation47_spill]] %s20030_s14 }
  0x4b   :  { %82 = vsyncpa [#allocation3], 0 }
  0x4c   :  { %84 = vsyncpa [#allocation3 + $0x1], 0 }
  0x4d   :  { %85 = vsyncpa [#allocation5], 0 }
  0x4e   :  { %86 = vsyncpa [#allocation8], 0 }
  0x4f   :  { %87 = vsyncpa [#allocation11], 0 }
  0x50   :  { %88 = vsyncpa [#allocation14], 0  ;;  %s20032_s15 = smov 0   ;;  %s20034_s16 = smov 0  }
  0x51   :  { %s20036_s18 = smov 0   ;;  %s20038_s22 = smov 0  }
  0x52 LB: > { %s23262_s9 = sld [smem:[#allocation21_spill]]  ;;  %s19801_s0 = smov [#allocation4]   ;;  %s19757_s18 = sphi %s20036_s18, %s23504_s18   ;;  %s19753_s16 = sphi %s20034_s16, %s23503_s16   ;;  %s19749_s15 = sphi %s20032_s15, %s23502_s15   ;;  %s19761_s22 = sphi %s20038_s22, %s23505_s22  }
  0x53   : > { %s23263_s8 = sld [smem:[#allocation24_spill]]  ;;  %s944_s23 = sshll.u32 %s19801_s0, 4  ;;  %s945_s23 = int_to_ptr.vmem [resolvable:$true] %s944_s23 }
  0x54   : > { %s23264_s5 = sld [smem:[#allocation20_spill]]  ;;  %s20053_s26 = sadd.s32 4294967295, %s19761_s22  }
  0x55   : > { %p17598_p0 = scmp.ge.s32.totalorder %s19761_s22, 1  ;;  %p23119_p1 = scmp.eq.s32.totalorder %s20053_s26, 0 }
  0x56   : > { %p928_p2 = scmp.lt.s32.totalorder %s19761_s22, 5  ;;  %s19802_s1 = smov [#allocation7]  }
  0x57   : > { %s1007_s2 = sshll.u32 %s19802_s1, 4  ;;  %s19803_s7 = smov [#allocation10]   ;;  %s1008_s2 = int_to_ptr.vmem [resolvable:$true] %s1007_s2 }
  0x58   : > { %p20058_p3 = pnand %p17598_p0, %p928_p2  ;;  %s1052_s10 = sshll.u32 %s19803_s7, 4  ;;  %s20070_s10 = int_to_ptr.vmem [resolvable:$true] %s1052_s10 }
  0x59   : > { %s19512_s14 = scalar_lea.vmem %s945_s23, 16  ;;  %s19519_s1 = scalar_lea.vmem %s945_s23, 32 }
  0x5a   : > { %s23265_s28 = scalar_select %p20058_p3, 1, 0 }
  0x5b   : > { %p19308_p4 = pneg %p20058_p3  ;;  %p19513_p7 = scmp.ne.s32.totalorder %s945_s23, %s19512_s14 }
  0x5c   : > { %p19520_p10 = scmp.lt.s32.totalorder %s945_s23, %s945_s23  ;;  %p19521_p11 = scmp.lt.s32.totalorder %s19519_s1, %s19512_s14 }
  0x5d   : > { %p20066_p5 = pnand %p19308_p4, %p23119_p1 }
  0x5e   : > { %p19522_p12 = por %p19521_p11, %p19520_p10 }
  0x5f   : > { %p20074_p6 = pneg %p20066_p5 }
  0x61   : > { %p19515_p8 = pnand %p19513_p7, %p20074_p6 }
  0x63   : > { %p19516_p9 = pneg %p19515_p8 }
  0x65   : > { %p19523_p13 = pnand %p19522_p12, %p19516_p9 }
  0x67   : > { %19526 = shalt.err (!%p19523_p13)
}
  0x68   : > { %s23268_s13 = sld [smem:[#allocation22_spill]]  ;;  %s19538_s7 = scalar_lea.vmem %s1008_s2, 128 }
  0x69   : > { %p19539_p0 = scmp.ne.s32.totalorder %s1008_s2, %s19538_s7  ;;  %p19546_p1 = scmp.lt.s32.totalorder %s1008_s2, %s1008_s2 }
  0x6a   : > { %p19547_p3 = scmp.lt.s32.totalorder %s19538_s7, %s19538_s7 }
  0x6b   : > { %p19541_p2 = pnand %p19539_p0, %p20074_p6 }
  0x6c   : > { %p19548_p7 = por %p19547_p3, %p19546_p1 }
  0x6d   : > { %p19542_p4 = pneg %p19541_p2 }
  0x6e   : > { %19311 = dma.hbm_to_vmem [thread:$0]  (!%p20066_p5), %s23268_s13, 16, %s945_s23, [#allocation5]  }
  0x6f   : > { %p19549_p8 = pnand %p19548_p7, %p19542_p4 }
  0x71   : > { %19552 = shalt.err (!%p19549_p8)
}
  0x72   : > { %s23269_s4 = sld [smem:[#allocation31_spill]]  ;;  %s19564_s14 = scalar_lea.vmem %s20070_s10, 288 }
  0x73   : > { %p19565_p9 = scmp.ne.s32.totalorder %s20070_s10, %s19564_s14  ;;  %p19572_p12 = scmp.lt.s32.totalorder %s20070_s10, %s20070_s10 }
  0x74   : > { %p19573_p13 = scmp.lt.s32.totalorder %s19564_s14, %s19564_s14 }
  0x75   : > { %p19567_p10 = pnand %p19565_p9, %p20074_p6 }
  0x76   : > { %p19574_p0 = por %p19573_p13, %p19572_p12 }
  0x77   : > { %p19568_p11 = pneg %p19567_p10 }
  0x78   : > { %19317 = dma.hbm_to_vmem [thread:$0]  (!%p20066_p5), %s23269_s4, 128, %s1008_s2, [#allocation8]  }
  0x79   : > { %p19575_p1 = pnand %p19574_p0, %p19568_p11 }
  0x7b   : > { %19578 = shalt.err (!%p19575_p1)
}
  0x7c   : > { %s19804_s23 = smov 32   ;;  %s23270_s20 = sld [smem:[#allocation40_spill]] }
  0x7d   : > { %s19805_s1 = smov 2   ;;  %s19806_s2 = smov [#allocation6]  }
  0x7e   : > { %s981_s7 = sshll.u32 %s19806_s2, 4  ;;  %s982_s7 = int_to_ptr.vmem [resolvable:$true] %s981_s7 }
  0x7f   : > { %s19590_s4 = scalar_lea.vmem %s982_s7, 256  ;;  %p19598_p7 = scmp.lt.s32.totalorder %s982_s7, %s982_s7 }
  0x80   : > { %p19591_p3 = scmp.ne.s32.totalorder %s982_s7, %s19590_s4  ;;  %p19599_p8 = scmp.lt.s32.totalorder %s19590_s4, %s19590_s4 }
  0x82   : > { %19323 = dma.hbm_to_vmem [thread:$0]  (!%p20066_p5), %s23270_s20, 288, %s20070_s10, [#allocation11], %s19804_s23, %s19804_s23, %s19805_s1  }
  0x83   : > { %p19593_p2 = pnand %p19591_p3, %p20074_p6  ;;  %p19600_p9 = por %p19599_p8, %p19598_p7 }
  0x85   : > { %p19594_p4 = pneg %p19593_p2 }
  0x87   : > { %p19601_p10 = pnand %p19600_p9, %p19594_p4 }
  0x89   : > { %19604 = shalt.err (!%p19601_p10)
}
  0x8a   : > { %s19807_s14 = smov 128   ;;  %s19808_s13 = smov 8  }
  0x8b   : > { %19314 = dma.hbm_to_vmem [thread:$0]  (!%p20066_p5), %s19900_s30, 256, %s982_s7, [#allocation5], %s19807_s14, %s19807_s14, %s19808_s13  }
  0x8c   : > { %s19809_s10 = smov [#allocation9]   ;;  %s19810_s1 = smov [#allocation12]  }
  0x8d   : > { %s1039_s23 = sshll.u32 %s19809_s10, 4  ;;  %s1065_s2 = sshll.u32 %s19810_s1, 4  ;;  %s1040_s23 = int_to_ptr.vmem [resolvable:$true] %s1039_s23  ;;  %s1066_s2 = int_to_ptr.vmem [resolvable:$true] %s1065_s2 }
  0x8e   : > { %s19616_s20 = scalar_lea.vmem %s1040_s23, 64  ;;  %p19624_p0 = scmp.lt.s32.totalorder %s1040_s23, %s1040_s23 }
  0x8f   : > { %p19617_p11 = scmp.ne.s32.totalorder %s1040_s23, %s19616_s20  ;;  %p19625_p1 = scmp.lt.s32.totalorder %s19616_s20, %s19616_s20 }
  0x91   : > { %p19619_p12 = pnand %p19617_p11, %p20074_p6  ;;  %p19626_p3 = por %p19625_p1, %p19624_p0 }
  0x93   : > { %p19620_p13 = pneg %p19619_p12 }
  0x95   : > { %p19627_p2 = pnand %p19626_p3, %p19620_p13 }
  0x97   : > { %19630 = shalt.err (!%p19627_p2)
}
  0x98   : > { %19320 = dma.hbm_to_vmem [thread:$0]  (!%p20066_p5), %s19965_s19, 64, %s1040_s23, [#allocation8]  }
  0x99   : > { %s19642_s13 = scalar_lea.vmem %s1066_s2, 32768  ;;  %p19650_p9 = scmp.lt.s32.totalorder %s1066_s2, %s1066_s2 }
  0x9a   : > { %p19643_p4 = scmp.ne.s32.totalorder %s1066_s2, %s19642_s13  ;;  %p19651_p10 = scmp.lt.s32.totalorder %s19642_s13, %s19642_s13 }
  0x9c   : > { %p19645_p7 = pnand %p19643_p4, %p20074_p6  ;;  %p19652_p11 = por %p19651_p10, %p19650_p9 }
  0x9e   : > { %p19646_p8 = pneg %p19645_p7 }
  0xa0   : > { %p19653_p12 = pnand %p19652_p11, %p19646_p8 }
  0xa2   : > { %19656 = shalt.err (!%p19653_p12)
}
  0xa3   : > { %s19811_s4 = smov 1024   ;;  %s19812_s20 = smov 64  }
  0xa4   : > { %19326 = dma.hbm_to_vmem [thread:$0]  (!%p20066_p5), %s19980_s27, 32768, %s1066_s2, [#allocation11], %s19811_s4, %s19811_s4, %s19812_s20  }
  0xa5   : > { %s19813_s7 = smov [#allocation13]  }
  0xa6   : > { %s1100_s14 = sshll.u32 %s19813_s7, 4  ;;  %s1101_s14 = int_to_ptr.vmem [resolvable:$true] %s1100_s14 }
  0xa7   : > { %s19668_s10 = scalar_lea.vmem %s1101_s14, 64  ;;  %p19676_p3 = scmp.lt.s32.totalorder %s1101_s14, %s1101_s14 }
  0xa8   : > { %p19669_p13 = scmp.ne.s32.totalorder %s1101_s14, %s19668_s10  ;;  %p19677_p2 = scmp.lt.s32.totalorder %s19668_s10, %s19668_s10 }
  0xaa   : > { %p19671_p0 = pnand %p19669_p13, %p20074_p6  ;;  %p19678_p4 = por %p19677_p2, %p19676_p3 }
  0xac   : > { %p19672_p1 = pneg %p19671_p0 }
  0xae   : > { %p19679_p7 = pnand %p19678_p4, %p19672_p1 }
  0xb0   : > { %19682 = shalt.err (!%p19679_p7)
}
  0xb1   : > { %19329 = dma.hbm_to_vmem [thread:$0]  (!%p20066_p5), %s20020_s12, 64, %s1101_s14, [#allocation14]  }
  0xb2   : > { %s20119_s0 = sadd.s32 1, %s19761_s22   ;;  %s101_s23 = sadd.s32 1, %s19757_s18 }
  0xb3   : > { %s98_s11 = ssub.s32 %s19761_s22, %s20119_s0  ;;  %p108_p8 = scmp.ne.s32.totalorder %s19757_s18, %s19753_s16 }
  0xb4   : > { %p99_p6 = scmp.eq.s32.totalorder %s98_s11, 0  ;;  %p109_p9 = scmp.eq.s32.totalorder %s19761_s22, 0 }
  0xb5   : > { %p114_p10 = scmp.ne.s32.totalorder %s19753_s16, %s19749_s15  ;;  %p23271_p12 = scmp.eq.s32.totalorder %s20053_s26, 0 }
  0xb6   : > { %s20130_s1 = scalar_select %p99_p6, %s19757_s18, %s101_s23  }
  0xb7   : > { %p110_p11 = por %p109_p9, %p108_p8  ;;  %p20134_p13 = por %p23271_p12, %p114_p10 }
  0xb8   : > { %p19341_p5 = scmp.lt.s32.totalorder %s19761_s22, 4  ;;  %s1114_s13 = sand.u32 1, %s19757_s18  }
  0xb9   : > { %s23272_s2 = scalar_select %p20134_p13, 1, 0 }
  0xba   : > { %s17607_s4 = sshll.u32 %s19761_s22, 4  ;;  %s1117_s20 = scalar_lea.vmem [#allocation2], %s1114_s13 }
  0xbb   : > { %s1124_s7 = sshll.u32 %s1117_s20, 4  ;;  %s20142_s14 = scalar_lea.hbm %s23264_s5, %s17607_s4  ;;  %s1125_s7 = int_to_ptr.vmem [resolvable:$true] %s1124_s7 }
  0xbc   : > { %p20144_p0 = pnand %p19341_p5, %p110_p11  ;;  %s1115_s10 = scalar_lea.sflag [#allocation3], %s1114_s13 }
  0xbd   : > { %s19683_s11 = scalar_lea.hbm %s20142_s14, 16  ;;  %s19688_s22 = scalar_lea.hbm %s23264_s5, 64 }
  0xbe   : > { %s23273_s15 = scalar_select %p20144_p0, 1, 0 }
  0xbf   : > { %p19684_p1 = scmp.ne.s32.totalorder %s20142_s14, %s19683_s11  ;;  %p19685_p3 = pneg %p20144_p0 }
  0xc0   : > { %p19689_p7 = scmp.lt.s32.totalorder %s20142_s14, %s23264_s5  ;;  %p19690_p6 = scmp.lt.s32.totalorder %s19688_s22, %s19683_s11 }
  0xc1   : > { %p19686_p2 = pnand %p19685_p3, %p19684_p1 }
  0xc2   : > { %p19691_p8 = por %p19690_p6, %p19689_p7 }
  0xc3   : > { %p19687_p4 = pneg %p19686_p2 }
  0xc5   : > { %p19692_p9 = pnand %p19691_p8, %p19687_p4 }
  0xc7   : > { %19695 = shalt.err (!%p19692_p9)
}
  0xc8   : > { %s19696_s23 = scalar_lea.vmem %s1125_s7, 16  ;;  %s19814_s4 = smov [#allocation2]  }
  0xc9   : > { %p19697_p10 = scmp.ne.s32.totalorder %s1125_s7, %s19696_s23  ;;  %s19701_s20 = sshll.u32 %s19814_s4, 4  ;;  %s19702_s20 = int_to_ptr.vmem [resolvable:$false] %s19701_s20 }
  0xca   : > { %s19703_s13 = scalar_lea.vmem %s19702_s20, 32  ;;  %p19704_p5 = scmp.lt.s32.totalorder %s1125_s7, %s19702_s20 }
  0xcb   : > { %p19699_p11 = pnand %p19697_p10, %p19685_p3  ;;  %p19705_p13 = scmp.lt.s32.totalorder %s19703_s13, %s19696_s23 }
  0xcd   : > { %p19700_p12 = pneg %p19699_p11  ;;  %p19706_p0 = por %p19705_p13, %p19704_p5 }
  0xcf   : > { %p19707_p1 = pnand %p19706_p0, %p19700_p12 }
  0xd1   : > { %19710 = shalt.err (!%p19707_p1)
}
  0xd2   : > { %p23274_p2 = scmp.ne.s32.totalorder %s23273_s15, 0  ;;  %p23275_p4 = scmp.ne.s32.totalorder %s23265_s28, 0 }
  0xd4   : > { %19333 = dma.hbm_to_vmem [thread:$0]  (!%p23274_p2), %s20142_s14, 16, %s1125_s7, %s1115_s10  }
  0xd5   : > { %1133 = sbr.rel (%p23275_p4) target bundleno = 8211 (0x2013), region = 172 }
  0xda   : > { %s1135_s11 = sand.u32 1, %s19753_s16   ;;  %p23276_p3 = scmp.ne.s32.totalorder %s23272_s2, 0 }
  0xdb   : > { %s1136_s22 = scalar_lea.sflag [#allocation3], %s1135_s11  ;;  %s1138_s5 = scalar_lea.vmem [#allocation2], %s1135_s11 }
  0xdc   : > { %19728 = dma.done.wait (%p23276_p3), %s1136_s22, 16  }
  0xdd   : > { %19730 = vsyncadd (%p23276_p3), %s1136_s22, 4294967280  ;;  %p23277_p13 = scmp.eq.s32.totalorder %s20053_s26, 0 }
  0xdf   : > { %19732 = dma.done.wait (%p23277_p13), [#allocation5], 272   ;;  %p23278_p0 = pmov %p23277_p13 }
  0xe1   : > { %19734 = vsyncadd (%p23278_p0), [#allocation5], 4294967024  ;;  %p23279_p7 = pmov %p23278_p0 }
  0xe2   : > { %p23280_p6 = pmov %p23278_p0 }
  0xe3   : > { %19736 = dma.done.wait (%p23279_p7), [#allocation8], 192  }
  0xe4   : > { %19738 = vsyncadd (%p23280_p6), [#allocation8], 4294967104  ;;  %p23281_p8 = pmov %p23278_p0 }
  0xe5   : > { %p23282_p9 = pmov %p23278_p0 }
  0xe6   : > { %19740 = dma.done.wait (%p23281_p8), [#allocation11], 33056  }
  0xe7   : > { %19742 = vsyncadd (%p23282_p9), [#allocation11], 4294934240  ;;  %p23283_p10 = pmov %p23278_p0 }
  0xe8   : > { %p23284_p11 = pmov %p23278_p0 }
  0xe9   : > { %19744 = dma.done.wait (%p23283_p10), [#allocation14], 64  }
  0xea   : > { %19746 = vsyncadd (%p23284_p11), [#allocation14], 4294967232  ;;  %v23162_v0 = vmov 0.0   ;;  %vm19816_vm0 = vmmov 0   ;;  %v1267_v1 = vld [vmem:[%s23262_s9 + $0x18] sm:$0xff]  ;;  %v1266_v2 = vld [vmem:[%s23262_s9 + $0x10] sm:$0xff]  ;;  %v1350_v34 = vlaneseq }
  0xeb   : > { %18520 = vmatprep.subr.mxu0 %v23162_v0  ;;  %18528 = vmatprep.mubr.msk.f32.mxu0 %vm19816_vm0, %v23162_v0  ;;  %v1265_v3 = vld [vmem:[%s23262_s9 + $0x8] sm:$0xff]  ;;  %v1264_v4 = vld [vmem:[%s23262_s9] sm:$0xff]  ;;  %vm1269_vm1 = vcmask 261120   ;;  %v1355_v6 = vld [vmem:[%s19855_s17 + $0x18] sm:$0xff]  ;;  %vm1697_vm8 = vcmask 130048   ;;  %vm1849_vm9 = vcmask 31744  }
  0xec   : > { %18531 = vmatprep.subr.mxu1 %v23162_v0  ;;  %18539 = vmatprep.mubr.msk.f32.mxu1 %vm19816_vm0, %v23162_v0  ;;  %v1263_v5 = vld [vmem:[%s1138_s5] sm:$0x1]  ;;  %v17624_v7 = vld [vmem:[%s19855_s17 + $0x38] sm:$0xff]  ;;  %v1354_v8 = vld [vmem:[%s19855_s17 + $0x10] sm:$0xff]  ;;  %v20249_v35 = vshrl.u32 %v1350_v34, 7  ;;  %vm1856_vm10 = vcmask 1043456  }
  0xed   : > { %18521 = vmatpush3.msra.mxu0 %v1267_v1  ;;  %18532 = vmatpush3.msra.mxu1 %v1355_v6  ;;  %v17623_v9 = vld [vmem:[%s19855_s17 + $0x30] sm:$0xff]  ;;  %v1353_v10 = vld [vmem:[%s19855_s17 + $0x8] sm:$0xff]  ;;  %v1352_v12 = vld [vmem:[%s19855_s17] sm:$0xff]  ;;  %s23287_s5 = sld [smem:[#allocation28_spill]]  ;;  %vm4849_vm15 = vcmask 523264   ;;  %s19818_s13 = smov 127  }
  0xee   : > { %18522 = vmatprep.subr.mxu0 %v23162_v0  ;;  %18533 = vmatprep.subr.mxu1 %v23162_v0  ;;  %v17622_v11 = vld [vmem:[%s19855_s17 + $0x28] sm:$0xff]  ;;  %v17621_v13 = vld [vmem:[%s19855_s17 + $0x20] sm:$0xff]  ;;  %v17629_v24 = vld [vmem:[%s19855_s17 + $0x58] sm:$0xff]  ;;  %23285 = vst [vmem:[#allocation48_spill] sm:$0xff] %v20249_v35  ;;  %v20252_v37 = vsub.s32 0, %v20249_v35  ;;  %vm1429_vm3 = vcmp.eq.s32.totalorder %v20249_v35, 0 }
  0xef   : > { %18523 = vmatpush3.msra.mxu0 %v1266_v2  ;;  %18534 = vmatpush3.msra.mxu1 %v1354_v8  ;;  %v1268_v14 = vld [vmem:[#allocation4] sm:$0x1]  ;;  %v17634_v25 = vld [vmem:[%s19855_s17 + $0x78] sm:$0xff]  ;;  %v17628_v26 = vld [vmem:[%s19855_s17 + $0x50] sm:$0xff]  ;;  %vm1512_vm4 = vcmp.eq.s32.totalorder %v20249_v35, 1  ;;  %v1430_v43 = vsel %vm1429_vm3, 1.0, %v23162_v0 }
  0xf0   : > { %18524 = vmatprep.subr.mxu0 %v23162_v0  ;;  %18535 = vmatprep.subr.mxu1 %v23162_v0  ;;  %v17633_v27 = vld [vmem:[%s19855_s17 + $0x70] sm:$0xff]  ;;  %v17627_v28 = vld [vmem:[%s19855_s17 + $0x48] sm:$0xff]  ;;  %v17626_v30 = vld [vmem:[%s19855_s17 + $0x40] sm:$0xff]  ;;  %23286 = vst [vmem:[#allocation49_spill] sm:$0xff] %v20252_v37  ;;  %v1513_v44 = vsel %vm1512_vm4, 1.0, %v23162_v0  ;;  %vm1595_vm5 = vcmp.eq.s32.totalorder %v20249_v35, 2 }
  0xf1   : > { %18525 = vmatpush3.msra.mxu0 %v1265_v3  ;;  %18536 = vmatpush3.msra.mxu1 %v1353_v10  ;;  %v17632_v29 = vld [vmem:[%s19855_s17 + $0x68] sm:$0xff]  ;;  %v17631_v31 = vld [vmem:[%s19855_s17 + $0x60] sm:$0xff]  ;;  %vm1678_vm6 = vcmp.eq.s32.totalorder %v20249_v35, 3  ;;  %v1596_v48 = vsel %vm1595_vm5, 1.0, %v23162_v0  ;;  %v20275_v6 = vld [vmem:[%s19895_s24 + $0x10] sm:$0xff]  ;;  %s23288_s28 = sld [smem:[#allocation32_spill]] }
  0xf2   : > { %18526 = vmatprep.subr.mxu0 %v23162_v0  ;;  %18537 = vmatprep.subr.mxu1 %v23162_v0  ;;  %v20240_v32 = vld [vmem:[%s19895_s24 + $0x8] sm:$0xff]  ;;  %v20245_v33 = vld [vmem:[%s19895_s24] sm:$0xff]  ;;  %v1679_v52 = vsel %vm1678_vm6, 1.0, %v23162_v0  ;;  %s23289_s2 = sld [smem:[#allocation23_spill]]  ;;  %vm6444_vm3 = vcmask 64512   ;;  %s23141_s11 = smov 16  }
  0xf3   : > { %18527 = vmatpush3.msra.mxu0 %v1264_v4  ;;  %18538 = vmatpush3.msra.mxu1 %v1352_v12  ;;  %v1686_v59 = vld [vmem:[%s19860_s21] sm:$0xf]  ;;  %v1772_v10 = vld [vmem:[%s19865_s25 + $0x8] sm:$0xff]  ;;  %s23290_s7 = sld [smem:[#allocation25_spill]]  ;;  %s23143_s22 = smov 17   ;;  %vm7997_vm4 = vcmask 121856  }
  0xf4   : > { %18529 = vmatmul.mubr.msk.f32.vlgmr.msra.gmra.mxu0 %vm1269_vm1, %v1263_v5  ;;  %18542 = vmatprep.subr.mxu0 %v23162_v0  ;;  %v20270_v5 = vld [vmem:[%s19895_s24 + $0x18] sm:$0xff]  ;;  %v1771_v8 = vld [vmem:[%s19865_s25] sm:$0xff]  ;;  %v3154_v34 = vld [vmem:[%s19870_s29 + $0x8] sm:$0xff]  ;;  %s23291_s14 = sld [smem:[#allocation26_spill]]  ;;  %vm8280_vm5 = vcmask 1039360   ;;  %vm8100_vm6 = vcmask 7168  }
  0xf5   : > { %18550 = vmatprep.mubr.msk.f32.mxu0 %vm19816_vm0, %v23162_v0  ;;  %18543 = vmatpush3.msra.mxu0 %v17624_v7  ;;  %v17641_v7 = vld [vmem:[%s19865_s25 + $0x10] sm:$0xff]  ;;  %s23292_s15 = sld [smem:[#allocation30_spill]]  ;;  %s23337_s9 = smov 111  }
  0xf6   : > { %18544 = vmatprep.subr.mxu0 %v23162_v0  ;;  %18553 = vmatprep.subr.mxu1 %v23162_v0  ;;  %s23293_s10 = sld [smem:[#allocation33_spill]]  ;;  %p1258_p12 = scmp.lt.s32.totalorder %s20053_s26, 3 }
  0xf7   : > { %18545 = vmatpush3.msra.mxu0 %v17623_v9  ;;  %s23294_s23 = sld [smem:[#allocation27_spill]] }
  0xf8   : > { %18546 = vmatprep.subr.mxu0 %v23162_v0  ;;  %s23308_s4 = sld [smem:[#allocation29_spill]]  ;;  %s23507_s26 = smov (!%p1258_p12, %s20053_s26), 3 }
  0xf9   : > { %18547 = vmatpush3.msra.mxu0 %v17622_v11  ;;  %s23321_s20 = sld [smem:[#allocation34_spill]] }
  0xfa   : > { %18548 = vmatprep.subr.mxu0 %v23162_v0 }
  0xfb   : > { %18549 = vmatpush3.msra.mxu0 %v17621_v13  ;;  %v17642_v13 = vld [vmem:[%s19865_s25 + $0x18] sm:$0xff] }
  0xfc   : > { %18564 = vmatprep.subr.mxu0 %v23162_v0 }
 0x1b4   : > { %v1339_v15 = vpop.f32.mrf.mxu0 }
 0x1b5   : > { %v1340_v16 = vadd.f32 %v1339_v15, %v1268_v14  ;;  %v20295_v14 = vld [vmem:[%s19895_s24 + $0x28] sm:$0xff] }
 0x1b6   : > { %v18530_v17 = vpop.f32.mrf.mxu0 }
 0x1b7   : > { %v1344_v18 = vmul.f32 1.442695, %v1340_v16  ;;  %vm1343_vm2 = vcmp.gt.f32.partialorder %v1340_v16, 0.0  ;;  %v20308_v17 = vld [vmem:[%s19895_s24 + $0x38] sm:$0xff] }
 0x1b9   : > { %19451 = vpow2.f32 %v1344_v18  ;;  %v20315_v18 = vld [vmem:[%s19895_s24 + $0x30] sm:$0xff] }
 0x1c6   : > { %v19452_v19 = vpop.eup %19451 }
 0x1c7   : > { %v17619_v20 = vadd.f32 -1.0, %v19452_v19  ;;  %v20322_v19 = vld [vmem:[%s19895_s24 + $0x48] sm:$0xff] }
 0x1c9   : > { %v1347_v21 = vmul.f32 1.6732632, %v17619_v20  ;;  %v20329_v20 = vld [vmem:[%s19895_s24 + $0x40] sm:$0xff] }
 0x1cb   : > { %v1348_v22 = vsel %vm1343_vm2, %v1340_v16, %v1347_v21  ;;  %v20301_v16 = vld [vmem:[%s19895_s24 + $0x20] sm:$0xff]  ;;  %v20336_v21 = vld [vmem:[%s19895_s24 + $0x58] sm:$0xff] }
 0x1cc   : > { %v1349_v23 = vmul.f32 1.050701, %v1348_v22  ;;  %v20343_v22 = vld [vmem:[%s19895_s24 + $0x50] sm:$0xff] }
 0x1ce   : > { %18540 = vmatmul.mubr.msk.f32.vlgmr.msra.gmra.mxu1 %vm1269_vm1, %v1349_v23  ;;  %18551 = vmatmul.mubr.msk.f32.vlgmr.msra.gmra.mxu0 %vm1269_vm1, %v1349_v23 }
 0x1cf   : > { %18554 = vmatpush3.msra.mxu1 %v17629_v24  ;;  %18565 = vmatpush3.msra.mxu0 %v17634_v25  ;;  %v20357_v24 = vld [vmem:[%s19895_s24 + $0x60] sm:$0xff]  ;;  %v20364_v25 = vld [vmem:[%s19895_s24 + $0x78] sm:$0xff] }
 0x1d0   : > { %18555 = vmatprep.subr.mxu1 %v23162_v0  ;;  %18566 = vmatprep.subr.mxu0 %v23162_v0 }
 0x1d1   : > { %18556 = vmatpush3.msra.mxu1 %v17628_v26  ;;  %18567 = vmatpush3.msra.mxu0 %v17633_v27  ;;  %v20371_v26 = vld [vmem:[%s19895_s24 + $0x70] sm:$0xff]  ;;  %v20378_v27 = vld [vmem:[%s19895_s24 + $0x88] sm:$0xff] }
 0x1d2   : > { %18557 = vmatprep.subr.mxu1 %v23162_v0  ;;  %18568 = vmatprep.subr.mxu0 %v23162_v0 }
 0x1d3   : > { %18558 = vmatpush3.msra.mxu1 %v17627_v28  ;;  %18569 = vmatpush3.msra.mxu0 %v17632_v29  ;;  %v20385_v28 = vld [vmem:[%s19895_s24 + $0x80] sm:$0xff] }
 0x1d4   : > { %18559 = vmatprep.subr.mxu1 %v23162_v0  ;;  %18570 = vmatprep.subr.mxu0 %v23162_v0  ;;  %v17652_v29 = vld [vmem:[%s19865_s25 + $0x20] sm:$0xff] }
 0x1d5   : > { %18560 = vmatpush3.msra.mxu1 %v17626_v30  ;;  %18561 = vmatprep.mubr.msk.f32.mxu1 %vm19816_vm0, %v23162_v0  ;;  %v3153_v30 = vld [vmem:[%s19870_s29] sm:$0xff] }
 0x1d6   : > { %18571 = vmatpush3.msra.mxu0 %v17631_v31  ;;  %18572 = vmatprep.mubr.msk.f32.mxu0 %vm19816_vm0, %v23162_v0  ;;  %v19817_v31 = vmov 0  }
 0x1d7   : > { %18562 = vmatmul.mubr.msk.f32.vlgmr.msra.gmra.mxu1 %vm1269_vm1, %v1349_v23  ;;  %18573 = vmatmul.mubr.msk.f32.vlgmr.msra.gmra.mxu0 %vm1269_vm1, %v1349_v23  ;;  %v20350_v23 = vld [vmem:[%s19895_s24 + $0x68] sm:$0xff] }
 0x1d8   : > { %18575 = vmatprep.subr.mxu1 %v23162_v0  ;;  %18579 = vmatprep.mubr.msk.f32.mxu1 %vm19816_vm0, %v23162_v0 }
 0x1d9   : > { %18576 = vmatpush3.msra.mxu1 %v20240_v32  ;;  %18591 = vmatprep.mubr.msk.f32.mxu0 %vm1849_vm9, %v17641_v7 }
 0x1da   : > { %18577 = vmatprep.subr.mxu1 %v23162_v0  ;;  %19449 = vset.pattern.permute.xlu0 %v19817_v31 }
 0x1db   : > { %18578 = vmatpush3.msra.mxu1 %v20245_v33  ;;  %19450 = vset.pattern.permute.xlu1 %v19817_v31 }
 0x1dc   : > { %18582 = vmatprep.subr.mxu1 %v23162_v0  ;;  %3157 = vperm.xlu0 %19449, %v3153_v30  }
 0x1e0   : > { %3162 = vperm.xlu0 %19449, %v3154_v34  }
 0x28e   : > { %v1425_v36 = vpop.f32.mrf.mxu1  ;;  %v1508_v38 = vpop.f32.mrf.mxu0 }
 0x28f   : > { %v1434_v41 = vrot.slane %v1425_v36, %v20252_v37  ;;  %v1517_v42 = vrot.slane %v1508_v38, %v20252_v37  ;;  %v4632_v36 = vld [vmem:[%s23263_s8 + $0x8] sm:$0xff]  ;;  %v7621_v38 = vld [vmem:[%s23288_s28] sm:$0xff]  ;;  %s23323_s28 = sld [smem:[#allocation36_spill]] }
 0x290   : > { %v18541_v39 = vpop.f32.mrf.mxu1  ;;  %v18552_v40 = vpop.f32.mrf.mxu0  ;;  %4640 = vperm.xlu0 %19449, %v4632_v36  }
 0x291   : > { %v1435_v45 = vmul.f32 %v1434_v41, %v1430_v43  ;;  %v1518_v46 = vmul.f32 %v1517_v42, %v1513_v44  ;;  %v17653_v41 = vld [vmem:[%s19865_s25 + $0x28] sm:$0xff]  ;;  %v17660_v42 = vld [vmem:[%s19865_s25 + $0x30] sm:$0xff] }
 0x293   : > { %v1519_v55 = vadd.f32 %v1518_v46, %v1435_v45  ;;  %v17661_v45 = vld [vmem:[%s19865_s25 + $0x38] sm:$0xff]  ;;  %v17668_v46 = vld [vmem:[%s19865_s25 + $0x40] sm:$0xff] }
 0x297   : > { %v1591_v47 = vpop.f32.mrf.mxu1  ;;  %v1674_v49 = vpop.f32.mrf.mxu0 }
 0x298   : > { %v1600_v50 = vrot.slane %v1591_v47, %v20252_v37  ;;  %v1683_v51 = vrot.slane %v1674_v49, %v20252_v37  ;;  %v17669_v49 = vld [vmem:[%s19865_s25 + $0x48] sm:$0xff] }
 0x299   : > { %v18563_v53 = vpop.f32.mrf.mxu1  ;;  %v18574_v54 = vpop.f32.mrf.mxu0 }
 0x29a   : > { %v1601_v56 = vmul.f32 %v1600_v50, %v1596_v48  ;;  %v1684_v58 = vmul.f32 %v1683_v51, %v1679_v52  ;;  %v17676_v50 = vld [vmem:[%s19865_s25 + $0x50] sm:$0xff]  ;;  %v17677_v53 = vld [vmem:[%s19865_s25 + $0x58] sm:$0xff]  ;;  %v17684_v54 = vld [vmem:[%s19865_s25 + $0x60] sm:$0xff] }
 0x29c   : > { %v1602_v57 = vadd.f32 %v1601_v56, %v1519_v55 }
 0x29e   : > { %v1685_v60 = vadd.f32 %v1684_v58, %v1602_v57  ;;  %v17685_v57 = vld [vmem:[%s19865_s25 + $0x68] sm:$0xff]  ;;  %v17692_v58 = vld [vmem:[%s19865_s25 + $0x70] sm:$0xff] }
 0x2a0   : > { %v1687_v61 = vadd.f32 %v1686_v59, %v1685_v60 }
 0x2a2   : > { %v1689_v62 = vmul.f32 1.442695, %v1687_v61  ;;  %vm1688_vm7 = vcmp.gt.f32.partialorder %v1687_v61, 0.0 }
 0x2a4   : > { %19453 = vpow2.f32 %v1689_v62  ;;  %v17700_v62 = vld [vmem:[%s19865_s25 + $0x80] sm:$0xff] }
 0x2b1   : > { %v19454_v63 = vpop.eup %19453 }
 0x2b2   : > { %v17636_v1 = vadd.f32 -1.0, %v19454_v63 }
 0x2b4   : > { %v1692_v2 = vmul.f32 1.6732632, %v17636_v1 }
 0x2b6   : > { %v1693_v3 = vsel %vm1688_vm7, %v1687_v61, %v1692_v2  ;;  %v17693_v61 = vld [vmem:[%s19865_s25 + $0x78] sm:$0xff]  ;;  %v17701_v2 = vld [vmem:[%s19865_s25 + $0x88] sm:$0xff]  ;;  %vm8383_vm7 = vcmask 924672  }
 0x2b7   : > { %v20267_v4 = vmul.f32 1.050701, %v1693_v3 }
 0x2b9   : > { %18580 = vmatmul.mubr.msk.f32.vlgmr.msra.gmra.mxu1 %vm1697_vm8, %v20267_v4 }
 0x2ba   : > { %18583 = vmatpush3.msra.mxu1 %v20270_v5  ;;  %18586 = vmatprep.mubr.msk.f32.mxu1 %vm19816_vm0, %v23162_v0 }
 0x2bb   : > { %18584 = vmatprep.subr.mxu1 %v23162_v0 }
 0x2bc   : > { %18585 = vmatpush3.msra.mxu1 %v20275_v6 }
 0x2bd   : > { %18587 = vmatmul.mubr.msk.f32.vlgmr.msra.gmra.mxu1 %vm1697_vm8, %v20267_v4 }
 0x2be   : > { %18596 = vmatprep.mubr.msk.f32.mxu1 %vm1849_vm9, %v1771_v8 }
 0x379   : > { %v1767_v9 = vpop.f32.mrf.mxu1 }
 0x37a   : > { %18594 = vmatprep.subr.msk.mxu1 %vm1856_vm10, %v1767_v9 }
 0x37b   : > { %v18581_v11 = vpop.f32.mrf.mxu1  ;;  %18595 = vmatpush3.msk.msra.mxu1 %vm1856_vm10, %v1767_v9 }
 0x37c   : > { %18597 = vmatmul.mubr.msk.f32.vlgmr.msra.gmra.mxu1 %vm1849_vm9, %v1772_v10 }
 0x37d   : > { %v1842_v12 = vpop.f32.mrf.mxu1  ;;  %18608 = vmatprep.mubr.msk.f32.mxu1 %vm1849_vm9, %v17652_v29 }
 0x37e   : > { %18589 = vmatprep.subr.msk.mxu0 %vm1856_vm10, %v1842_v12 }
 0x37f   : > { %v18588_v15 = vpop.f32.mrf.mxu1  ;;  %18590 = vmatpush3.msk.msra.mxu0 %vm1856_vm10, %v1842_v12 }
 0x380   : > { %18592 = vmatmul.mubr.msk.f32.vlgmr.msra.gmra.mxu0 %vm1849_vm9, %v17642_v13  ;;  %18599 = vmatprep.subr.mxu0 %v23162_v0 }
 0x381   : > { %18600 = vmatpush3.msra.mxu0 %v20295_v14  ;;  %18603 = vmatprep.mubr.msk.f32.mxu0 %vm19816_vm0, %v23162_v0 }
 0x382   : > { %18601 = vmatprep.subr.mxu0 %v23162_v0 }
 0x383   : > { %18602 = vmatpush3.msra.mxu0 %v20301_v16 }
 0x384   : > { %18604 = vmatmul.mubr.msk.f32.vlgmr.msra.gmra.mxu0 %vm1697_vm8, %v20267_v4  ;;  %18611 = vmatprep.subr.mxu0 %v23162_v0 }
 0x385   : > { %18612 = vmatpush3.msra.mxu0 %v20308_v17  ;;  %18615 = vmatprep.mubr.msk.f32.mxu0 %vm19816_vm0, %v23162_v0 }
 0x386   : > { %18613 = vmatprep.subr.mxu0 %v23162_v0 }
 0x387   : > { %18614 = vmatpush3.msra.mxu0 %v20315_v18 }
 0x388   : > { %18616 = vmatmul.mubr.msk.f32.vlgmr.msra.gmra.mxu0 %vm1697_vm8, %v20267_v4  ;;  %18623 = vmatprep.subr.mxu0 %v23162_v0 }
 0x389   : > { %18624 = vmatpush3.msra.mxu0 %v20322_v19  ;;  %18627 = vmatprep.mubr.msk.f32.mxu0 %vm19816_vm0, %v23162_v0 }
 0x38a   : > { %18625 = vmatprep.subr.mxu0 %v23162_v0 }
 0x38b   : > { %18626 = vmatpush3.msra.mxu0 %v20329_v20 }
 0x38c   : > { %18628 = vmatmul.mubr.msk.f32.vlgmr.msra.gmra.mxu0 %vm1697_vm8, %v20267_v4  ;;  %18635 = vmatprep.subr.mxu0 %v23162_v0 }
 0x38d   : > { %18636 = vmatpush3.msra.mxu0 %v20336_v21  ;;  %18639 = vmatprep.mubr.msk.f32.mxu0 %vm19816_vm0, %v23162_v0 }
 0x38e   : > { %18637 = vmatprep.subr.mxu0 %v23162_v0 }
 0x38f   : > { %18638 = vmatpush3.msra.mxu0 %v20343_v22 }
 0x390   : > { %18640 = vmatmul.mubr.msk.f32.vlgmr.msra.gmra.mxu0 %vm1697_vm8, %v20267_v4  ;;  %18647 = vmatprep.subr.mxu0 %v23162_v0 }
 0x391   : > { %18648 = vmatpush3.msra.mxu0 %v20350_v23  ;;  %18651 = vmatprep.mubr.msk.f32.mxu0 %vm19816_vm0, %v23162_v0 }
 0x392   : > { %18649 = vmatprep.subr.mxu0 %v23162_v0 }
 0x393   : > { %18650 = vmatpush3.msra.mxu0 %v20357_v24 }
 0x394   : > { %18652 = vmatmul.mubr.msk.f32.vlgmr.msra.gmra.mxu0 %vm1697_vm8, %v20267_v4  ;;  %18659 = vmatprep.subr.mxu0 %v23162_v0 }
 0x395   : > { %18660 = vmatpush3.msra.mxu0 %v20364_v25  ;;  %18663 = vmatprep.mubr.msk.f32.mxu0 %vm19816_vm0, %v23162_v0 }
 0x396   : > { %18661 = vmatprep.subr.mxu0 %v23162_v0 }
 0x397   : > { %18662 = vmatpush3.msra.mxu0 %v20371_v26 }
 0x398   : > { %18664 = vmatmul.mubr.msk.f32.vlgmr.msra.gmra.mxu0 %vm1697_vm8, %v20267_v4  ;;  %18671 = vmatprep.subr.mxu0 %v23162_v0 }
 0x399   : > { %18672 = vmatpush3.msra.mxu0 %v20378_v27  ;;  %18675 = vmatprep.mubr.msk.f32.mxu0 %vm19816_vm0, %v23162_v0 }
 0x39a   : > { %18673 = vmatprep.subr.mxu0 %v23162_v0 }
 0x39b   : > { %18674 = vmatpush3.msra.mxu0 %v20385_v28 }
 0x39c   : > { %18676 = vmatmul.mubr.msk.f32.vlgmr.msra.gmra.mxu0 %vm1697_vm8, %v20267_v4  ;;  %18683 = vmatprep.subr.mxu0 %v20240_v32 }
 0x39d   : > { %18684 = vmatpush3.msra.mxu0 %v20240_v32  ;;  %v6284_v32 = vld [vmem:[%s23287_s5] sm:$0xff]  ;;  %s23145_s5 = smov 15  }
 0x39e   : > { %18685 = vmatprep.subr.mxu0 %v20245_v33  ;;  %6287 = vperm.xlu0 %19449, %v6284_v32  }
 0x39f   : > { %18686 = vmatpush3.msra.mxu0 %v20245_v33 }
 0x3a2   : > { %7624 = vperm.xlu0 %19449, %v7621_v38  }
 0x43c   : > { %v18598_v7 = vpop.f32.mrf.mxu1 }
 0x43e   : > { %v2010_v8 = vpop.f32.mrf.mxu1 }
 0x440   : > { %v20405_v33 = vpop.f32.mrf.mxu0 }
 0x441   : > { %v2016_v29 = vadd.f32 %v18598_v7, %v20405_v33 }
 0x442   : > { %v20407_v39 = vpop.f32.mrf.mxu0 }
 0x443   : > { %v2011_v31 = vadd.f32 %v2010_v8, %v20407_v39 }
 0x444   : > { %v2088_v40 = vpop.f32.mrf.mxu0 }
 0x445   : > { %18606 = vmatprep.subr.msk.mxu1 %vm1856_vm10, %v2088_v40 }
 0x446   : > { %v18605_v43 = vpop.f32.mrf.mxu0  ;;  %18607 = vmatpush3.msk.msra.mxu1 %vm1856_vm10, %v2088_v40 }
 0x447   : > { %18609 = vmatmul.mubr.msk.f32.vlgmr.msra.gmra.mxu1 %vm1849_vm9, %v17653_v41 }
 0x448   : > { %v2250_v44 = vpop.f32.mrf.mxu0  ;;  %18620 = vmatprep.mubr.msk.f32.mxu1 %vm1849_vm9, %v17660_v42 }
 0x449   : > { %18618 = vmatprep.subr.msk.mxu1 %vm1856_vm10, %v2250_v44 }
 0x44a   : > { %v18617_v47 = vpop.f32.mrf.mxu0  ;;  %18619 = vmatpush3.msk.msra.mxu1 %vm1856_vm10, %v2250_v44  ;;  %v3158_v44 = vpop.permute.xlu0 %3157 }
 0x44b   : > { %18621 = vmatmul.mubr.msk.f32.vlgmr.msra.gmra.mxu1 %vm1849_vm9, %v17661_v45 }
 0x44c   : > { %v2412_v48 = vpop.f32.mrf.mxu0  ;;  %18632 = vmatprep.mubr.msk.f32.mxu1 %vm1849_vm9, %v17668_v46 }
 0x44d   : > { %18630 = vmatprep.subr.msk.mxu1 %vm1856_vm10, %v2412_v48 }
 0x44e   : > { %v18629_v51 = vpop.f32.mrf.mxu0  ;;  %18631 = vmatpush3.msk.msra.mxu1 %vm1856_vm10, %v2412_v48 }
 0x44f   : > { %18633 = vmatmul.mubr.msk.f32.vlgmr.msra.gmra.mxu1 %vm1849_vm9, %v17669_v49 }
 0x450   : > { %v2574_v52 = vpop.f32.mrf.mxu0  ;;  %18644 = vmatprep.mubr.msk.f32.mxu1 %vm1849_vm9, %v17676_v50 }
 0x451   : > { %18642 = vmatprep.subr.msk.mxu1 %vm1856_vm10, %v2574_v52 }
 0x452   : > { %v18641_v55 = vpop.f32.mrf.mxu0  ;;  %18643 = vmatpush3.msk.msra.mxu1 %vm1856_vm10, %v2574_v52  ;;  %v3163_v52 = vpop.permute.xlu0 %3162 }
 0x453   : > { %18645 = vmatmul.mubr.msk.f32.vlgmr.msra.gmra.mxu1 %vm1849_vm9, %v17677_v53 }
 0x454   : > { %v2736_v56 = vpop.f32.mrf.mxu0  ;;  %18656 = vmatprep.mubr.msk.f32.mxu1 %vm1849_vm9, %v17684_v54 }
 0x455   : > { %18654 = vmatprep.subr.msk.mxu1 %vm1856_vm10, %v2736_v56 }
 0x456   : > { %v18653_v59 = vpop.f32.mrf.mxu0  ;;  %18655 = vmatpush3.msk.msra.mxu1 %vm1856_vm10, %v2736_v56 }
 0x457   : > { %18657 = vmatmul.mubr.msk.f32.vlgmr.msra.gmra.mxu1 %vm1849_vm9, %v17685_v57 }
 0x458   : > { %v2898_v60 = vpop.f32.mrf.mxu0  ;;  %18668 = vmatprep.mubr.msk.f32.mxu1 %vm1849_vm9, %v17692_v58 }
 0x459   : > { %18666 = vmatprep.subr.msk.mxu1 %vm1856_vm10, %v2898_v60 }
 0x45a   : > { %v18665_v63 = vpop.f32.mrf.mxu0  ;;  %18667 = vmatpush3.msk.msra.mxu1 %vm1856_vm10, %v2898_v60 }
 0x45b   : > { %18669 = vmatmul.mubr.msk.f32.vlgmr.msra.gmra.mxu1 %vm1849_vm9, %v17693_v61 }
 0x45c   : > { %v3060_v1 = vpop.f32.mrf.mxu0  ;;  %18680 = vmatprep.mubr.msk.f32.mxu1 %vm1849_vm9, %v17700_v62 }
 0x45d   : > { %18678 = vmatprep.subr.msk.mxu1 %vm1856_vm10, %v3060_v1 }
 0x45e   : > { %v18677_v3 = vpop.f32.mrf.mxu0  ;;  %18679 = vmatpush3.msk.msra.mxu1 %vm1856_vm10, %v3060_v1 }
 0x45f   : > { %18681 = vmatmul.mubr.msk.f32.vlgmr.msra.gmra.mxu1 %vm1849_vm9, %v17701_v2  ;;  %18690 = vmatprep.subr.mxu1 %v20270_v5 }
 0x460   : > { %18691 = vmatpush3.msra.mxu1 %v20270_v5 }
 0x461   : > { %18692 = vmatprep.subr.mxu1 %v20275_v6 }
 0x462   : > { %18693 = vmatpush3.msra.mxu1 %v20275_v6 }
 0x507   : > { %v18610_v9 = vpop.f32.mrf.mxu1 }
 0x508   : > { %v2180_v34 = vadd.f32 %v18610_v9, %v2016_v29  ;;  %v17711_v9 = vld [vmem:[%s23289_s2 + $0x10] sm:$0xff]  ;;  %v17712_v29 = vld [vmem:[%s23289_s2 + $0x18] sm:$0xff] }
 0x509   : > { %v2170_v10 = vpop.f32.mrf.mxu1 }
 0x50a   : > { %v2179_v5 = vadd.f32 %v2170_v10, %v2011_v31  ;;  %v3262_v10 = vld [vmem:[%s23289_s2] sm:$0xff]  ;;  %v17726_v31 = vld [vmem:[%s23289_s2 + $0x38] sm:$0xff] }
 0x50b   : > { %v18622_v11 = vpop.f32.mrf.mxu1 }
 0x50c   : > { %v2342_v32 = vadd.f32 %v18622_v11, %v2180_v34  ;;  %v17731_v34 = vld [vmem:[%s23289_s2 + $0x40] sm:$0xff] }
 0x50d   : > { %v2332_v12 = vpop.f32.mrf.mxu1 }
 0x50e   : > { %v2341_v40 = vadd.f32 %v2332_v12, %v2179_v5 }
 0x50f   : > { %v18634_v13 = vpop.f32.mrf.mxu1 }
 0x510   : > { %v2504_v6 = vadd.f32 %v18634_v13, %v2342_v32  ;;  %v17732_v32 = vld [vmem:[%s23289_s2 + $0x48] sm:$0xff] }
 0x511   : > { %v2494_v15 = vpop.f32.mrf.mxu1 }
 0x512   : > { %v2503_v42 = vadd.f32 %v2494_v15, %v2341_v40 }
 0x513   : > { %v18646_v30 = vpop.f32.mrf.mxu1 }
 0x514   : > { %v2666_v43 = vadd.f32 %v18646_v30, %v2504_v6  ;;  %v3263_v30 = vld [vmem:[%s23289_s2 + $0x8] sm:$0xff] }
 0x515   : > { %v2656_v36 = vpop.f32.mrf.mxu1 }
 0x516   : > { %v2665_v46 = vadd.f32 %v2656_v36, %v2503_v42  ;;  %v17743_v42 = vld [vmem:[%s23289_s2 + $0x60] sm:$0xff] }
 0x517   : > { %v18658_v38 = vpop.f32.mrf.mxu1 }
 0x518   : > { %v2828_v47 = vadd.f32 %v18658_v38, %v2666_v43  ;;  %v17737_v38 = vld [vmem:[%s23289_s2 + $0x50] sm:$0xff] }
 0x519   : > { %v2818_v41 = vpop.f32.mrf.mxu1 }
 0x51a   : > { %v2827_v49 = vadd.f32 %v2818_v41, %v2665_v46  ;;  %v17738_v41 = vld [vmem:[%s23289_s2 + $0x58] sm:$0xff]  ;;  %v17749_v46 = vld [vmem:[%s23289_s2 + $0x70] sm:$0xff] }
 0x51b   : > { %v18670_v45 = vpop.f32.mrf.mxu1 }
 0x51c   : > { %v2990_v33 = vadd.f32 %v18670_v45, %v2828_v47  ;;  %v17744_v45 = vld [vmem:[%s23289_s2 + $0x68] sm:$0xff] }
 0x51d   : > { %v2980_v48 = vpop.f32.mrf.mxu1 }
 0x51e   : > { %v2989_v51 = vadd.f32 %v2980_v48, %v2827_v49  ;;  %v17750_v49 = vld [vmem:[%s23289_s2 + $0x78] sm:$0xff] }
 0x51f   : > { %v18682_v50 = vpop.f32.mrf.mxu1 }
 0x520   : > { %v3152_v39 = vadd.f32 %v18682_v50, %v2990_v33  ;;  %v17755_v33 = vld [vmem:[%s23289_s2 + $0x80] sm:$0xff] }
 0x521   : > { %v3142_v53 = vpop.f32.mrf.mxu1 }
 0x522   : > { %v3166_v54 = vadd.f32 %v3163_v52, %v3152_v39  ;;  %v3151_v55 = vadd.f32 %v3142_v53, %v2989_v51  ;;  %v17756_v39 = vld [vmem:[%s23289_s2 + $0x88] sm:$0xff] }
 0x523   : > { %v4759_v52 = vld [vmem:[#allocation6 + $0x8] sm:$0xff]  ;;  %v4758_v53 = vld [vmem:[#allocation6] sm:$0xff] }
 0x524   : > { %v3171_v56 = vmul.f32 1.442695, %v3166_v54  ;;  %v3165_v57 = vadd.f32 %v3158_v44, %v3151_v55  ;;  %vm3168_vm11 = vcmp.gt.f32.partialorder %v3166_v54, 0.0  ;;  %v20579_v55 = vld [vmem:[%s23293_s10 + $0x78] sm:$0xff] }
 0x526   : > { %19455 = vpow2.f32 %v3171_v56  ;;  %v3169_v58 = vmul.f32 1.442695, %v3165_v57  ;;  %vm3167_vm12 = vcmp.gt.f32.partialorder %v3165_v57, 0.0  ;;  %v20584_v56 = vld [vmem:[%s23293_s10 + $0x30] sm:$0xff] }
 0x528   : > { %19457 = vpow2.f32 %v3169_v58  ;;  %v20594_v58 = vld [vmem:[%s23293_s10 + $0x20] sm:$0xff] }
 0x533   : > { %v19456_v59 = vpop.eup %19455 }
 0x534   : > { %v17706_v60 = vadd.f32 -1.0, %v19456_v59  ;;  %v20599_v59 = vld [vmem:[%s23293_s10 + $0x18] sm:$0xff] }
 0x535   : > { %v19458_v61 = vpop.eup %19457 }
 0x536   : > { %v3176_v62 = vmul.f32 1.6732632, %v17706_v60  ;;  %v17705_v63 = vadd.f32 -1.0, %v19458_v61  ;;  %v20604_v60 = vld [vmem:[%s23293_s10 + $0x10] sm:$0xff] }
 0x538   : > { %v3175_v1 = vmul.f32 1.6732632, %v17705_v63  ;;  %v3178_v2 = vsel %vm3168_vm11, %v3166_v54, %v3176_v62  ;;  %v20576_v54 = vld [vmem:[%s23293_s10 + $0x38] sm:$0xff]  ;;  %vm8486_vm11 = vcmask 916480  }
 0x539   : > { %v20457_v8 = vmul.f32 1.050701, %v3178_v2 }
 0x53a   : > { %v3177_v3 = vsel %vm3167_vm12, %v3165_v57, %v3175_v1  ;;  %v20589_v57 = vld [vmem:[%s23293_s10 + $0x28] sm:$0xff]  ;;  %vm8589_vm12 = vcmask 908288  }
 0x53b   : > { %v20455_v7 = vmul.f32 1.050701, %v3177_v3 }
 0x53d   : > { %18687 = vmatprep.mubr.msk.f32.mxu0 %vm1697_vm8, %v20455_v7  ;;  %18694 = vmatprep.mubr.msk.f32.mxu1 %vm1697_vm8, %v20455_v7 }
 0x53e   : > { %18688 = vmatmul.mubr.msk.f32.vlgmr.msra.gmra.mxu0 %vm1697_vm8, %v20457_v8  ;;  %18695 = vmatmul.mubr.msk.f32.vlgmr.msra.gmra.mxu1 %vm1697_vm8, %v20457_v8 }
 0x53f   : > { %18701 = vmatprep.mubr.msk.f32.mxu0 %vm1697_vm8, %v17711_v9  ;;  %18708 = vmatprep.mubr.msk.f32.mxu1 %vm1697_vm8, %v3262_v10 }
 0x5fe   : > { %v18689_v11 = vpop.f32.mrf.mxu0  ;;  %v18696_v12 = vpop.f32.mrf.mxu1 }
 0x5ff   : > { %18697 = vmatprep.subr.mxu0 %v18696_v12  ;;  %18704 = vmatprep.subr.mxu1 %v18689_v11 }
 0x600   : > { %v3253_v13 = vpop.f32.mrf.mxu0  ;;  %v3330_v15 = vpop.f32.mrf.mxu1  ;;  %18698 = vmatpush3.msra.mxu0 %v18696_v12  ;;  %18705 = vmatpush3.msra.mxu1 %v18689_v11 }
 0x601   : > { %18699 = vmatprep.subr.mxu0 %v3330_v15  ;;  %18706 = vmatprep.subr.mxu1 %v3253_v13 }
 0x602   : > { %18700 = vmatpush3.msra.mxu0 %v3330_v15  ;;  %18707 = vmatpush3.msra.mxu1 %v3253_v13 }
 0x603   : > { %18702 = vmatmul.mubr.msk.f32.vlgmr.msra.gmra.mxu0 %vm1697_vm8, %v17712_v29  ;;  %18709 = vmatmul.mubr.msk.f32.vlgmr.msra.gmra.mxu1 %vm1697_vm8, %v3263_v30 }
 0x604   : > { %18711 = vmatprep.subr.mxu0 %v20295_v14  ;;  %18715 = vmatprep.mubr.msk.f32.mxu0 %vm1697_vm8, %v20455_v7 }
 0x605   : > { %18712 = vmatpush3.msra.mxu0 %v20295_v14  ;;  %v17719_v14 = vld [vmem:[%s23289_s2 + $0x20] sm:$0xff] }
 0x606   : > { %18713 = vmatprep.subr.mxu0 %v20301_v16  ;;  %18722 = vmatprep.mubr.msk.f32.mxu1 %vm1697_vm8, %v17719_v14 }
 0x607   : > { %18714 = vmatpush3.msra.mxu0 %v20301_v16  ;;  %v4645_v16 = vld [vmem:[%s23290_s7] sm:$0xff] }
 0x608   : > { %18716 = vmatmul.mubr.msk.f32.vlgmr.msra.gmra.mxu0 %vm1697_vm8, %v20457_v8  ;;  %18725 = vmatprep.subr.mxu0 %v20308_v17 }
 0x609   : > { %18726 = vmatpush3.msra.mxu0 %v20308_v17  ;;  %18729 = vmatprep.mubr.msk.f32.mxu0 %vm1697_vm8, %v20455_v7  ;;  %v4646_v17 = vld [vmem:[%s23290_s7 + $0x8] sm:$0xff]  ;;  %s23333_s7 = smov 113  }
 0x60a   : > { %18727 = vmatprep.subr.mxu0 %v20315_v18 }
 0x60b   : > { %18728 = vmatpush3.msra.mxu0 %v20315_v18  ;;  %v4631_v18 = vld [vmem:[%s23263_s8] sm:$0xff] }
 0x60c   : > { %18730 = vmatmul.mubr.msk.f32.vlgmr.msra.gmra.mxu0 %vm1697_vm8, %v20457_v8  ;;  %18739 = vmatprep.subr.mxu0 %v20322_v19 }
 0x60d   : > { %18740 = vmatpush3.msra.mxu0 %v20322_v19  ;;  %18743 = vmatprep.mubr.msk.f32.mxu0 %vm1697_vm8, %v20455_v7  ;;  %v4647_v19 = vld [vmem:[%s23291_s14] sm:$0xff] }
 0x60e   : > { %18741 = vmatprep.subr.mxu0 %v20329_v20  ;;  %4635 = vperm.xlu1 %19450, %v4631_v18  }
 0x60f   : > { %18742 = vmatpush3.msra.mxu0 %v20329_v20  ;;  %v4648_v20 = vld [vmem:[%s23291_s14 + $0x8] sm:$0xff] }
 0x610   : > { %18744 = vmatmul.mubr.msk.f32.vlgmr.msra.gmra.mxu0 %vm1697_vm8, %v20457_v8  ;;  %18753 = vmatprep.subr.mxu0 %v20336_v21 }
 0x611   : > { %18754 = vmatpush3.msra.mxu0 %v20336_v21  ;;  %18757 = vmatprep.mubr.msk.f32.mxu0 %vm1697_vm8, %v20455_v7  ;;  %v7613_v21 = vld [vmem:[%s23292_s15] sm:$0xff]  ;;  %s23153_s15 = smov 1  }
 0x612   : > { %18755 = vmatprep.subr.mxu0 %v20343_v22  ;;  %4651 = vperm.xlu1 %19450, %v4647_v19  }
 0x613   : > { %18756 = vmatpush3.msra.mxu0 %v20343_v22 }
 0x614   : > { %18758 = vmatmul.mubr.msk.f32.vlgmr.msra.gmra.mxu0 %vm1697_vm8, %v20457_v8  ;;  %18767 = vmatprep.subr.mxu0 %v20350_v23 }
 0x615   : > { %18768 = vmatpush3.msra.mxu0 %v20350_v23  ;;  %18771 = vmatprep.mubr.msk.f32.mxu0 %vm1697_vm8, %v20455_v7 }
 0x616   : > { %18769 = vmatprep.subr.mxu0 %v20357_v24  ;;  %4656 = vperm.xlu1 %19450, %v4648_v20  }
 0x617   : > { %18770 = vmatpush3.msra.mxu0 %v20357_v24 }
 0x618   : > { %18772 = vmatmul.mubr.msk.f32.vlgmr.msra.gmra.mxu0 %vm1697_vm8, %v20457_v8  ;;  %18781 = vmatprep.subr.mxu0 %v20364_v25 }
 0x619   : > { %18782 = vmatpush3.msra.mxu0 %v20364_v25  ;;  %18785 = vmatprep.mubr.msk.f32.mxu0 %vm1697_vm8, %v20455_v7  ;;  %v17720_v25 = vld [vmem:[%s23289_s2 + $0x28] sm:$0xff] }
 0x61a   : > { %18783 = vmatprep.subr.mxu0 %v20371_v26  ;;  %7616 = vperm.xlu1 %19450, %v7613_v21  }
 0x61b   : > { %18784 = vmatpush3.msra.mxu0 %v20371_v26  ;;  %v17725_v26 = vld [vmem:[%s23289_s2 + $0x30] sm:$0xff]  ;;  %s23331_s2 = smov 15  }
 0x61c   : > { %18786 = vmatmul.mubr.msk.f32.vlgmr.msra.gmra.mxu0 %vm1697_vm8, %v20457_v8  ;;  %18795 = vmatprep.subr.mxu0 %v20378_v27 }
 0x61d   : > { %18796 = vmatpush3.msra.mxu0 %v20378_v27  ;;  %18799 = vmatprep.mubr.msk.f32.mxu0 %vm1697_vm8, %v20455_v7 }
 0x61e   : > { %18797 = vmatprep.subr.mxu0 %v20385_v28 }
 0x61f   : > { %18798 = vmatpush3.msra.mxu0 %v20385_v28 }
 0x620   : > { %18800 = vmatmul.mubr.msk.f32.vlgmr.msra.gmra.mxu0 %vm1697_vm8, %v20457_v8  ;;  %18809 = vmatprep.subr.msk.mxu0 %vm1856_vm10, %v20267_v4 }
 0x621   : > { %18810 = vmatpush3.msk.msra.mxu0 %vm1856_vm10, %v20267_v4  ;;  %18811 = vmatprep.mubr.msk.f32.mxu0 %vm1849_vm9, %v4645_v16 }
 0x622   : > { %18821 = vmatprep.subr.mxu0 %v20576_v54 }
 0x624   : > { %18812 = vmatmul.mubr.msk.f32.vlgmr.msra.gmra.mxu0 %vm1849_vm9, %v4646_v17 }
 0x625   : > { %18822 = vmatpush3.msra.mxu0 %v20576_v54 }
 0x626   : > { %18823 = vmatprep.subr.mxu0 %v20584_v56 }
 0x627   : > { %18824 = vmatpush3.msra.mxu0 %v20584_v56 }
 0x628   : > { %18825 = vmatprep.subr.mxu0 %v20589_v57 }
 0x629   : > { %18826 = vmatpush3.msra.mxu0 %v20589_v57 }
 0x62a   : > { %18827 = vmatprep.subr.mxu0 %v20594_v58 }
 0x62b   : > { %18828 = vmatpush3.msra.mxu0 %v20594_v58 }
 0x62c   : > { %18829 = vmatprep.subr.mxu0 %v20599_v59 }
 0x62d   : > { %18830 = vmatpush3.msra.mxu0 %v20599_v59 }
 0x62e   : > { %18831 = vmatprep.subr.mxu0 %v20604_v60 }
 0x62f   : > { %18832 = vmatpush3.msra.mxu0 %v20604_v60 }
 0x689   : > { %v4636_v13 = vpop.permute.xlu1 %4635 }
 0x68d   : > { %v4652_v21 = vpop.permute.xlu1 %4651 }
 0x6c3   : > { %v20545_v4 = vpop.f32.mrf.mxu0  ;;  %v18710_v61 = vpop.f32.mrf.mxu1 }
 0x6c4   : > { %v3501_v9 = vadd.f32 %v18710_v61, %v20545_v4 }
 0x6c5   : > { %v20547_v22 = vpop.f32.mrf.mxu0  ;;  %v3495_v62 = vpop.f32.mrf.mxu1 }
 0x6c6   : > { %v3496_v11 = vadd.f32 %v3495_v62, %v20547_v22 }
 0x6c8   : > { %v18717_v23 = vpop.f32.mrf.mxu0 }
 0x6c9   : > { %18718 = vmatprep.subr.mxu1 %v18717_v23 }
 0x6ca   : > { %v3570_v24 = vpop.f32.mrf.mxu0  ;;  %18719 = vmatpush3.msra.mxu1 %v18717_v23 }
 0x6cb   : > { %18720 = vmatprep.subr.mxu1 %v3570_v24 }
 0x6cc   : > { %18721 = vmatpush3.msra.mxu1 %v3570_v24  ;;  %v18731_v27 = vpop.f32.mrf.mxu0 }
 0x6cd   : > { %18723 = vmatmul.mubr.msk.f32.vlgmr.msra.gmra.mxu1 %vm1697_vm8, %v17720_v25  ;;  %18732 = vmatprep.subr.mxu1 %v18731_v27 }
 0x6ce   : > { %v3731_v28 = vpop.f32.mrf.mxu0  ;;  %18733 = vmatpush3.msra.mxu1 %v18731_v27  ;;  %18736 = vmatprep.mubr.msk.f32.mxu1 %vm1697_vm8, %v17725_v26 }
 0x6cf   : > { %18734 = vmatprep.subr.mxu1 %v3731_v28 }
 0x6d0   : > { %18735 = vmatpush3.msra.mxu1 %v3731_v28  ;;  %v18745_v36 = vpop.f32.mrf.mxu0 }
 0x6d1   : > { %18737 = vmatmul.mubr.msk.f32.vlgmr.msra.gmra.mxu1 %vm1697_vm8, %v17726_v31  ;;  %18746 = vmatprep.subr.mxu1 %v18745_v36  ;;  %v4641_v31 = vpop.permute.xlu0 %4640 }
 0x6d2   : > { %v3892_v5 = vpop.f32.mrf.mxu0  ;;  %18747 = vmatpush3.msra.mxu1 %v18745_v36  ;;  %18750 = vmatprep.mubr.msk.f32.mxu1 %vm1697_vm8, %v17731_v34  ;;  %v4657_v34 = vpop.permute.xlu1 %4656 }
 0x6d3   : > { %18748 = vmatprep.subr.mxu1 %v3892_v5 }
 0x6d4   : > { %18749 = vmatpush3.msra.mxu1 %v3892_v5  ;;  %v18759_v40 = vpop.f32.mrf.mxu0 }
 0x6d5   : > { %18751 = vmatmul.mubr.msk.f32.vlgmr.msra.gmra.mxu1 %vm1697_vm8, %v17732_v32  ;;  %18760 = vmatprep.subr.mxu1 %v18759_v40 }
 0x6d6   : > { %v4053_v6 = vpop.f32.mrf.mxu0  ;;  %18761 = vmatpush3.msra.mxu1 %v18759_v40  ;;  %18764 = vmatprep.mubr.msk.f32.mxu1 %vm1697_vm8, %v17737_v38 }
 0x6d7   : > { %18762 = vmatprep.subr.mxu1 %v4053_v6 }
 0x6d8   : > { %18763 = vmatpush3.msra.mxu1 %v4053_v6  ;;  %v18773_v43 = vpop.f32.mrf.mxu0 }
 0x6d9   : > { %18765 = vmatmul.mubr.msk.f32.vlgmr.msra.gmra.mxu1 %vm1697_vm8, %v17738_v41  ;;  %18774 = vmatprep.subr.mxu1 %v18773_v43 }
 0x6da   : > { %v4214_v44 = vpop.f32.mrf.mxu0  ;;  %18775 = vmatpush3.msra.mxu1 %v18773_v43  ;;  %18778 = vmatprep.mubr.msk.f32.mxu1 %vm1697_vm8, %v17743_v42 }
 0x6db   : > { %18776 = vmatprep.subr.mxu1 %v4214_v44 }
 0x6dc   : > { %18777 = vmatpush3.msra.mxu1 %v4214_v44  ;;  %v18787_v47 = vpop.f32.mrf.mxu0 }
 0x6dd   : > { %18779 = vmatmul.mubr.msk.f32.vlgmr.msra.gmra.mxu1 %vm1697_vm8, %v17744_v45  ;;  %18788 = vmatprep.subr.mxu1 %v18787_v47 }
 0x6de   : > { %v4375_v48 = vpop.f32.mrf.mxu0  ;;  %18789 = vmatpush3.msra.mxu1 %v18787_v47  ;;  %18792 = vmatprep.mubr.msk.f32.mxu1 %vm1697_vm8, %v17749_v46 }
 0x6df   : > { %18790 = vmatprep.subr.mxu1 %v4375_v48 }
 0x6e0   : > { %18791 = vmatpush3.msra.mxu1 %v4375_v48  ;;  %v18801_v50 = vpop.f32.mrf.mxu0 }
 0x6e1   : > { %18793 = vmatmul.mubr.msk.f32.vlgmr.msra.gmra.mxu1 %vm1697_vm8, %v17750_v49  ;;  %18802 = vmatprep.subr.mxu1 %v18801_v50 }
 0x6e2   : > { %v4536_v51 = vpop.f32.mrf.mxu0  ;;  %18803 = vmatpush3.msra.mxu1 %v18801_v50  ;;  %18806 = vmatprep.mubr.msk.f32.mxu1 %vm1697_vm8, %v17755_v33 }
 0x6e3   : > { %18804 = vmatprep.subr.mxu1 %v4536_v51 }
 0x6e4   : > { %18805 = vmatpush3.msra.mxu1 %v4536_v51  ;;  %v18813_v26 = vpop.f32.mrf.mxu0 }
 0x6e5   : > { %18807 = vmatmul.mubr.msk.f32.vlgmr.msra.gmra.mxu1 %vm1697_vm8, %v17756_v39  ;;  %18814 = vmatprep.subr.mxu1 %v4759_v52  ;;  %v4739_v40 = vadd.f32 %v18813_v26, %v4657_v34  ;;  %v20722_v26 = vld [vmem:[%s23293_s10 + $0x80] sm:$0xff] }
 0x6e6   : > { %18815 = vmatpush3.msra.mxu1 %v4759_v52  ;;  %v4733_v32 = vpop.f32.mrf.mxu0 }
 0x6e7   : > { %18816 = vmatprep.subr.mxu1 %v4758_v53  ;;  %v4734_v42 = vadd.f32 %v4733_v32, %v4652_v21  ;;  %v20699_v21 = vld [vmem:[%s23293_s10 + $0xa0] sm:$0xff] }
 0x6e8   : > { %18817 = vmatpush3.msra.mxu1 %v4758_v53 }
 0x6e9   : > { %18840 = vmatprep.subr.mxu1 %v20579_v55 }
 0x78d   : > { %v18724_v63 = vpop.f32.mrf.mxu1 }
 0x78e   : > { %v3664_v12 = vadd.f32 %v18724_v63, %v3501_v9  ;;  %v20613_v63 = vld [vmem:[%s23293_s10 + $0x70] sm:$0xff]  ;;  %v20643_v9 = vld [vmem:[%s23293_s10 + $0x48] sm:$0xff] }
 0x78f   : > { %v3654_v1 = vpop.f32.mrf.mxu1 }
 0x790   : > { %v3663_v29 = vadd.f32 %v3654_v1, %v3496_v11  ;;  %v20618_v1 = vld [vmem:[%s23293_s10 + $0x68] sm:$0xff]  ;;  %v20653_v11 = vld [vmem:[%s23293_s10 + $0x40] sm:$0xff] }
 0x791   : > { %v18738_v2 = vpop.f32.mrf.mxu1 }
 0x792   : > { %v3825_v30 = vadd.f32 %v18738_v2, %v3664_v12  ;;  %v20623_v2 = vld [vmem:[%s23293_s10 + $0x60] sm:$0xff] }
 0x793   : > { %v3815_v3 = vpop.f32.mrf.mxu1 }
 0x794   : > { %v3824_v16 = vadd.f32 %v3815_v3, %v3663_v29  ;;  %v20628_v3 = vld [vmem:[%s23293_s10 + $0x58] sm:$0xff] }
 0x795   : > { %v18752_v7 = vpop.f32.mrf.mxu1 }
 0x796   : > { %v3986_v17 = vadd.f32 %v18752_v7, %v3825_v30  ;;  %v20633_v7 = vld [vmem:[%s23293_s10 + $0x50] sm:$0xff]  ;;  %v17778_v30 = vld [vmem:[%s23294_s23 + $0x8] sm:$0xff] }
 0x797   : > { %v3976_v8 = vpop.f32.mrf.mxu1 }
 0x798   : > { %v3985_v19 = vadd.f32 %v3976_v8, %v3824_v16  ;;  %v20640_v8 = vld [vmem:[%s23293_s10 + $0x8] sm:$0xff] }
 0x799   : > { %v18766_v10 = vpop.f32.mrf.mxu1  ;;  %18833 = vmatprep.subr.mxu0 %v20640_v8 }
 0x79a   : > { %v4147_v20 = vadd.f32 %v18766_v10, %v3986_v17  ;;  %18834 = vmatpush3.msra.mxu0 %v20640_v8  ;;  %v20650_v10 = vld [vmem:[%s23293_s10] sm:$0xff] }
 0x79b   : > { %v4137_v15 = vpop.f32.mrf.mxu1  ;;  %18835 = vmatprep.subr.mxu0 %v20650_v10 }
 0x79c   : > { %v4146_v24 = vadd.f32 %v4137_v15, %v3985_v19  ;;  %18836 = vmatpush3.msra.mxu0 %v20650_v10  ;;  %v20685_v19 = vld [vmem:[%s23293_s10 + $0xb0] sm:$0xff] }
 0x79d   : > { %v18780_v14 = vpop.f32.mrf.mxu1  ;;  %18859 = vmatprep.subr.mxu0 %v23162_v0 }
 0x79e   : > { %v4308_v25 = vadd.f32 %v18780_v14, %v4147_v20  ;;  %v20679_v14 = vld [vmem:[%s23293_s10 + $0xb8] sm:$0xff]  ;;  %v20692_v20 = vld [vmem:[%s23293_s10 + $0xa8] sm:$0xff] }
 0x79f   : > { %v4298_v18 = vpop.f32.mrf.mxu1 }
 0x7a0   : > { %v4307_v27 = vadd.f32 %v4298_v18, %v4146_v24  ;;  %v4931_v18 = vld [vmem:[%s23294_s23] sm:$0xff]  ;;  %v20712_v24 = vld [vmem:[%s23293_s10 + $0x90] sm:$0xff] }
 0x7a1   : > { %v18794_v23 = vpop.f32.mrf.mxu1 }
 0x7a2   : > { %v4469_v28 = vadd.f32 %v18794_v23, %v4308_v25  ;;  %v20707_v23 = vld [vmem:[%s23293_s10 + $0x98] sm:$0xff]  ;;  %v20717_v25 = vld [vmem:[%s23293_s10 + $0x88] sm:$0xff] }
 0x7a3   : > { %v4459_v4 = vpop.f32.mrf.mxu1 }
 0x7a4   : > { %v4468_v36 = vadd.f32 %v4459_v4, %v4307_v27 }
 0x7a5   : > { %v18808_v22 = vpop.f32.mrf.mxu1 }
 0x7a6   : > { %v4630_v5 = vadd.f32 %v18808_v22, %v4469_v28 }
 0x7a7   : > { %v4620_v38 = vpop.f32.mrf.mxu1 }
 0x7a8   : > { %v4644_v6 = vadd.f32 %v4641_v31, %v4630_v5  ;;  %v4629_v41 = vadd.f32 %v4620_v38, %v4468_v36  ;;  %v17791_v36 = vld [vmem:[%s23294_s23 + $0x10] sm:$0xff]  ;;  %v20735_v5 = vld [vmem:[%s23293_s10 + $0xf8] sm:$0xff] }
 0x7a9   : > { %v20739_v38 = vld [vmem:[%s23293_s10 + $0xf0] sm:$0xff] }
 0x7aa   : > { %v4743_v43 = vadd.f32 %v4739_v40, %v4644_v6  ;;  %v4643_v44 = vadd.f32 %v4636_v13, %v4629_v41  ;;  %v20747_v40 = vld [vmem:[%s23293_s10 + $0xe8] sm:$0xff]  ;;  %v20752_v6 = vld [vmem:[%s23293_s10 + $0xe0] sm:$0xff]  ;;  %v20757_v41 = vld [vmem:[%s23293_s10 + $0xd8] sm:$0xff] }
 0x7ac   : > { %v4748_v45 = vmul.f32 1.442695, %v4743_v43  ;;  %v4742_v46 = vadd.f32 %v4734_v42, %v4643_v44  ;;  %vm4745_vm13 = vcmp.gt.f32.partialorder %v4743_v43, 0.0  ;;  %v20762_v42 = vld [vmem:[%s23293_s10 + $0xd0] sm:$0xff]  ;;  %v20772_v44 = vld [vmem:[%s23293_s10 + $0xc0] sm:$0xff] }
 0x7ae   : > { %19459 = vpow2.f32 %v4748_v45  ;;  %v4746_v47 = vmul.f32 1.442695, %v4742_v46  ;;  %vm4744_vm14 = vcmp.gt.f32.partialorder %v4742_v46, 0.0 }
 0x7b0   : > { %19461 = vpow2.f32 %v4746_v47 }
 0x7bb   : > { %v19460_v48 = vpop.eup %19459 }
 0x7bc   : > { %v17763_v49 = vadd.f32 -1.0, %v19460_v48 }
 0x7bd   : > { %v19462_v33 = vpop.eup %19461 }
 0x7be   : > { %v4753_v50 = vmul.f32 1.6732632, %v17763_v49  ;;  %v17762_v51 = vadd.f32 -1.0, %v19462_v33  ;;  %v17803_v49 = vld [vmem:[%s23294_s23 + $0x18] sm:$0xff] }
 0x7bf   : > { %v20785_v33 = vld [vmem:[%s23293_s10 + $0x138] sm:$0xff] }
 0x7c0   : > { %v4752_v39 = vmul.f32 1.6732632, %v17762_v51  ;;  %v4755_v52 = vsel %vm4745_vm13, %v4743_v43, %v4753_v50  ;;  %v20767_v43 = vld [vmem:[%s23293_s10 + $0xc8] sm:$0xff]  ;;  %v20789_v51 = vld [vmem:[%s23293_s10 + $0x130] sm:$0xff] }
 0x7c1   : > { %v4757_v62 = vmul.f32 1.050701, %v4755_v52  ;;  %v20802_v52 = vld [vmem:[%s23293_s10 + $0x120] sm:$0xff] }
 0x7c2   : > { %v4754_v53 = vsel %vm4744_vm14, %v4742_v46, %v4752_v39  ;;  %v20797_v39 = vld [vmem:[%s23293_s10 + $0x128] sm:$0xff] }
 0x7c3   : > { %v4756_v61 = vmul.f32 1.050701, %v4754_v53  ;;  %v20807_v53 = vld [vmem:[%s23293_s10 + $0x118] sm:$0xff] }
 0x7c5   : > { %18818 = vmatprep.mubr.msk.f32.mxu1 %vm1697_vm8, %v4756_v61  ;;  %v20812_v61 = vld [vmem:[%s23293_s10 + $0x110] sm:$0xff] }
 0x7c6   : > { %18819 = vmatmul.mubr.msk.f32.vlgmr.msra.gmra.mxu1 %vm1697_vm8, %v4757_v62  ;;  %v20817_v62 = vld [vmem:[%s23293_s10 + $0x108] sm:$0xff] }
 0x7c7   : > { %18841 = vmatpush3.msra.mxu1 %v20579_v55 }
 0x7c8   : > { %18842 = vmatprep.subr.mxu1 %v20613_v63 }
 0x7c9   : > { %18843 = vmatpush3.msra.mxu1 %v20613_v63 }
 0x7ca   : > { %18844 = vmatprep.subr.mxu1 %v20618_v1 }
 0x7cb   : > { %18845 = vmatpush3.msra.mxu1 %v20618_v1 }
 0x7cc   : > { %18846 = vmatprep.subr.mxu1 %v20623_v2 }
 0x7cd   : > { %18847 = vmatpush3.msra.mxu1 %v20623_v2 }
 0x7ce   : > { %18848 = vmatprep.subr.mxu1 %v20628_v3 }
 0x7cf   : > { %18849 = vmatpush3.msra.mxu1 %v20628_v3 }
 0x7d0   : > { %18850 = vmatprep.subr.mxu1 %v20633_v7 }
 0x7d1   : > { %18851 = vmatpush3.msra.mxu1 %v20633_v7 }
 0x7d2   : > { %18852 = vmatprep.subr.mxu1 %v20643_v9 }
 0x7d3   : > { %18853 = vmatpush3.msra.mxu1 %v20643_v9 }
 0x7d4   : > { %18854 = vmatprep.subr.mxu1 %v20653_v11 }
 0x7d5   : > { %18855 = vmatpush3.msra.mxu1 %v20653_v11 }
 0x7d6   : > { %18866 = vmatprep.subr.mxu1 %v23162_v0 }
 0x886   : > { %v20661_v12 = vpop.f32.mrf.mxu1 }
 0x888   : > { %v20663_v13 = vpop.f32.mrf.mxu1 }
 0x889   : > { %23295 = vst [vmem:[#allocation50_spill] sm:$0xff] %v20663_v13  ;;  %18837 = vmatprep.mubr.msk.f32.mxu0 %vm4849_vm15, %v20663_v13  ;;  %18856 = vmatprep.mubr.msk.f32.mxu1 %vm4849_vm15, %v20663_v13 }
 0x88a   : > { %18838 = vmatmul.mubr.msk.f32.vlgmr.msra.gmra.mxu0 %vm4849_vm15, %v20661_v12  ;;  %18857 = vmatmul.mubr.msk.f32.vlgmr.msra.gmra.mxu1 %vm4849_vm15, %v20661_v12 }
 0x88b   : > { %18863 = vmatprep.mubr.msk.f32.mxu0 %vm19816_vm0, %v23162_v0  ;;  %18870 = vmatprep.mubr.msk.f32.mxu1 %vm19816_vm0, %v23162_v0 }
 0x94a   : > { %v18839_v15 = vpop.f32.mrf.mxu0  ;;  %v18858_v29 = vpop.f32.mrf.mxu1 }
 0x94b   : > { %18860 = vmatpush3.msra.mxu0 %v18858_v29  ;;  %18867 = vmatpush3.msra.mxu1 %v18839_v15  ;;  %v20822_v15 = vld [vmem:[%s23293_s10 + $0x100] sm:$0xff] }
 0x94c   : > { %v4922_v16 = vpop.f32.mrf.mxu0  ;;  %v5007_v17 = vpop.f32.mrf.mxu1  ;;  %18861 = vmatprep.subr.mxu0 %v23162_v0  ;;  %18868 = vmatprep.subr.mxu1 %v23162_v0 }
 0x94d   : > { %18862 = vmatpush3.msra.mxu0 %v5007_v17  ;;  %18869 = vmatpush3.msra.mxu1 %v4922_v16 }
 0x94e   : > { %18864 = vmatmul.mubr.msk.f32.vlgmr.msra.gmra.mxu0 %vm1697_vm8, %v17778_v30  ;;  %18873 = vmatprep.subr.mxu0 %v20679_v14 }
 0x94f   : > { %18871 = vmatmul.mubr.msk.f32.vlgmr.msra.gmra.mxu1 %vm1697_vm8, %v4931_v18  ;;  %18874 = vmatpush3.msra.mxu0 %v20679_v14  ;;  %v17815_v18 = vld [vmem:[%s23294_s23 + $0x20] sm:$0xff] }
 0x950   : > { %18889 = vmatprep.mubr.msk.f32.mxu0 %vm4849_vm15, %v20663_v13  ;;  %18875 = vmatprep.subr.mxu0 %v20685_v19 }
 0x951   : > { %18876 = vmatpush3.msra.mxu0 %v20685_v19  ;;  %18892 = vmatprep.subr.mxu1 %v23162_v0 }
 0x952   : > { %18877 = vmatprep.subr.mxu0 %v20692_v20  ;;  %18896 = vmatprep.mubr.msk.f32.mxu1 %vm19816_vm0, %v23162_v0 }
 0x953   : > { %18878 = vmatpush3.msra.mxu0 %v20692_v20 }
 0x954   : > { %18879 = vmatprep.subr.mxu0 %v20699_v21 }
 0x955   : > { %18880 = vmatpush3.msra.mxu0 %v20699_v21 }
 0x956   : > { %18881 = vmatprep.subr.mxu0 %v20707_v23 }
 0x957   : > { %18882 = vmatpush3.msra.mxu0 %v20707_v23 }
 0x958   : > { %18883 = vmatprep.subr.mxu0 %v20712_v24 }
 0x959   : > { %18884 = vmatpush3.msra.mxu0 %v20712_v24 }
 0x95a   : > { %18885 = vmatprep.subr.mxu0 %v20717_v25 }
 0x95b   : > { %18886 = vmatpush3.msra.mxu0 %v20717_v25 }
 0x95c   : > { %18887 = vmatprep.subr.mxu0 %v20722_v26 }
 0x95d   : > { %18888 = vmatpush3.msra.mxu0 %v20722_v26 }
 0x95e   : > { %18890 = vmatmul.mubr.msk.f32.vlgmr.msra.gmra.mxu0 %vm4849_vm15, %v20661_v12  ;;  %18918 = vmatprep.subr.mxu0 %v23162_v0 }
 0x95f   : > { %18922 = vmatprep.mubr.msk.f32.mxu0 %vm19816_vm0, %v23162_v0 }
 0xa0e   : > { %v5087_v4 = vpop.f32.mrf.mxu0 }
 0xa0f   : > { %v5160_v27 = vpop.f32.mrf.mxu1 }
 0xa10   : > { %v5161_v28 = vadd.f32 %v5160_v27, %v5087_v4  ;;  %v18865_v22 = vpop.f32.mrf.mxu0  ;;  %v20835_v4 = vld [vmem:[%s23293_s10 + $0x178] sm:$0xff] }
 0xa11   : > { %v18872_v31 = vpop.f32.mrf.mxu1  ;;  %v20847_v22 = vld [vmem:[%s23293_s10 + $0x168] sm:$0xff] }
 0xa12   : > { %v20852_v31 = vld [vmem:[%s23293_s10 + $0x160] sm:$0xff] }
 0xa1e   : > { %v18891_v34 = vpop.f32.mrf.mxu0 }
 0xa1f   : > { %18893 = vmatpush3.msra.mxu1 %v18891_v34  ;;  %v20857_v34 = vld [vmem:[%s23293_s10 + $0x158] sm:$0xff] }
 0xa20   : > { %v5239_v32 = vpop.f32.mrf.mxu0  ;;  %18894 = vmatprep.subr.mxu1 %v23162_v0 }
 0xa21   : > { %18895 = vmatpush3.msra.mxu1 %v5239_v32  ;;  %v20867_v32 = vld [vmem:[%s23293_s10 + $0x148] sm:$0xff] }
 0xa22   : > { %18897 = vmatmul.mubr.msk.f32.vlgmr.msra.gmra.mxu1 %vm1697_vm8, %v17791_v36  ;;  %18899 = vmatprep.subr.mxu1 %v20735_v5  ;;  %v20862_v36 = vld [vmem:[%s23293_s10 + $0x150] sm:$0xff] }
 0xa23   : > { %18900 = vmatpush3.msra.mxu1 %v20735_v5  ;;  %18915 = vmatprep.mubr.msk.f32.mxu1 %vm4849_vm15, %v20663_v13 }
 0xa24   : > { %18901 = vmatprep.subr.mxu1 %v20739_v38 }
 0xa25   : > { %18902 = vmatpush3.msra.mxu1 %v20739_v38 }
 0xa26   : > { %18903 = vmatprep.subr.mxu1 %v20747_v40 }
 0xa27   : > { %18904 = vmatpush3.msra.mxu1 %v20747_v40 }
 0xa28   : > { %18905 = vmatprep.subr.mxu1 %v20752_v6 }
 0xa29   : > { %18906 = vmatpush3.msra.mxu1 %v20752_v6 }
 0xa2a   : > { %18907 = vmatprep.subr.mxu1 %v20757_v41 }
 0xa2b   : > { %18908 = vmatpush3.msra.mxu1 %v20757_v41 }
 0xa2c   : > { %18909 = vmatprep.subr.mxu1 %v20762_v42 }
 0xa2d   : > { %18910 = vmatpush3.msra.mxu1 %v20762_v42 }
 0xa2e   : > { %18911 = vmatprep.subr.mxu1 %v20767_v43 }
 0xa2f   : > { %18912 = vmatpush3.msra.mxu1 %v20767_v43 }
 0xa30   : > { %18913 = vmatprep.subr.mxu1 %v20772_v44 }
 0xa31   : > { %18914 = vmatpush3.msra.mxu1 %v20772_v44 }
 0xa32   : > { %18916 = vmatmul.mubr.msk.f32.vlgmr.msra.gmra.mxu1 %vm4849_vm15, %v20661_v12  ;;  %18944 = vmatprep.subr.mxu1 %v23162_v0 }
 0xa33   : > { %18948 = vmatprep.mubr.msk.f32.mxu1 %vm19816_vm0, %v23162_v0 }
 0xae2   : > { %v5319_v45 = vpop.f32.mrf.mxu1 }
 0xae3   : > { %v5323_v46 = vadd.f32 %v5319_v45, %v5161_v28  ;;  %v20839_v28 = vld [vmem:[%s23293_s10 + $0x170] sm:$0xff]  ;;  %v20872_v45 = vld [vmem:[%s23293_s10 + $0x140] sm:$0xff] }
 0xae4   : > { %v18898_v47 = vpop.f32.mrf.mxu1 }
 0xaf2   : > { %v18917_v48 = vpop.f32.mrf.mxu1 }
 0xaf3   : > { %18919 = vmatpush3.msra.mxu0 %v18917_v48 }
 0xaf4   : > { %v5399_v50 = vpop.f32.mrf.mxu1  ;;  %18920 = vmatprep.subr.mxu0 %v23162_v0 }
 0xaf5   : > { %18921 = vmatpush3.msra.mxu0 %v5399_v50  ;;  %v17827_v50 = vld [vmem:[%s23294_s23 + $0x28] sm:$0xff] }
 0xaf6   : > { %18923 = vmatmul.mubr.msk.f32.vlgmr.msra.gmra.mxu0 %vm1697_vm8, %v17803_v49  ;;  %18925 = vmatprep.subr.mxu0 %v20785_v33 }
 0xaf7   : > { %18926 = vmatpush3.msra.mxu0 %v20785_v33  ;;  %18941 = vmatprep.mubr.msk.f32.mxu0 %vm4849_vm15, %v20663_v13 }
 0xaf8   : > { %18927 = vmatprep.subr.mxu0 %v20789_v51 }
 0xaf9   : > { %18928 = vmatpush3.msra.mxu0 %v20789_v51 }
 0xafa   : > { %18929 = vmatprep.subr.mxu0 %v20797_v39 }
 0xafb   : > { %18930 = vmatpush3.msra.mxu0 %v20797_v39 }
 0xafc   : > { %18931 = vmatprep.subr.mxu0 %v20802_v52 }
 0xafd   : > { %18932 = vmatpush3.msra.mxu0 %v20802_v52 }
 0xafe   : > { %18933 = vmatprep.subr.mxu0 %v20807_v53 }
 0xaff   : > { %18934 = vmatpush3.msra.mxu0 %v20807_v53 }
 0xb00   : > { %18935 = vmatprep.subr.mxu0 %v20812_v61 }
 0xb01   : > { %18936 = vmatpush3.msra.mxu0 %v20812_v61 }
 0xb02   : > { %18937 = vmatprep.subr.mxu0 %v20817_v62 }
 0xb03   : > { %18938 = vmatpush3.msra.mxu0 %v20817_v62 }
 0xb04   : > { %18939 = vmatprep.subr.mxu0 %v20822_v15 }
 0xb05   : > { %18940 = vmatpush3.msra.mxu0 %v20822_v15 }
 0xb06   : > { %18942 = vmatmul.mubr.msk.f32.vlgmr.msra.gmra.mxu0 %vm4849_vm15, %v20661_v12  ;;  %18970 = vmatprep.subr.mxu0 %v23162_v0 }
 0xb07   : > { %18974 = vmatprep.mubr.msk.f32.mxu0 %vm19816_vm0, %v23162_v0 }
 0xbb6   : > { %v5479_v29 = vpop.f32.mrf.mxu0 }
 0xbb7   : > { %v5483_v30 = vadd.f32 %v5479_v29, %v5323_v46  ;;  %v20885_v29 = vld [vmem:[%s23293_s10 + $0x1b8] sm:$0xff] }
 0xbb8   : > { %v18924_v16 = vpop.f32.mrf.mxu0 }
 0xbc6   : > { %v18943_v17 = vpop.f32.mrf.mxu0 }
 0xbc7   : > { %18945 = vmatpush3.msra.mxu1 %v18943_v17  ;;  %v20889_v17 = vld [vmem:[%s23293_s10 + $0x1b0] sm:$0xff] }
 0xbc8   : > { %v5559_v27 = vpop.f32.mrf.mxu0  ;;  %18946 = vmatprep.subr.mxu1 %v23162_v0 }
 0xbc9   : > { %18947 = vmatpush3.msra.mxu1 %v5559_v27  ;;  %v20907_v27 = vld [vmem:[%s23293_s10 + $0x198] sm:$0xff] }
 0xbca   : > { %18949 = vmatmul.mubr.msk.f32.vlgmr.msra.gmra.mxu1 %vm1697_vm8, %v17815_v18  ;;  %18951 = vmatprep.subr.mxu1 %v20835_v4  ;;  %v20902_v18 = vld [vmem:[%s23293_s10 + $0x1a0] sm:$0xff]  ;;  %23296 = vst [vmem:[#allocation51_spill] sm:$0xff] %v20907_v27 }
 0xbcb   : > { %18952 = vmatpush3.msra.mxu1 %v20835_v4  ;;  %18967 = vmatprep.mubr.msk.f32.mxu1 %vm4849_vm15, %v20663_v13 }
 0xbcc   : > { %18953 = vmatprep.subr.mxu1 %v20839_v28 }
 0xbcd   : > { %18954 = vmatpush3.msra.mxu1 %v20839_v28 }
 0xbce   : > { %18955 = vmatprep.subr.mxu1 %v20847_v22 }
 0xbcf   : > { %18956 = vmatpush3.msra.mxu1 %v20847_v22 }
 0xbd0   : > { %18957 = vmatprep.subr.mxu1 %v20852_v31 }
 0xbd1   : > { %18958 = vmatpush3.msra.mxu1 %v20852_v31 }
 0xbd2   : > { %18959 = vmatprep.subr.mxu1 %v20857_v34 }
 0xbd3   : > { %18960 = vmatpush3.msra.mxu1 %v20857_v34 }
 0xbd4   : > { %18961 = vmatprep.subr.mxu1 %v20862_v36 }
 0xbd5   : > { %18962 = vmatpush3.msra.mxu1 %v20862_v36 }
 0xbd6   : > { %18963 = vmatprep.subr.mxu1 %v20867_v32 }
 0xbd7   : > { %18964 = vmatpush3.msra.mxu1 %v20867_v32 }
 0xbd8   : > { %18965 = vmatprep.subr.mxu1 %v20872_v45 }
 0xbd9   : > { %18966 = vmatpush3.msra.mxu1 %v20872_v45 }
 0xbda   : > { %18968 = vmatmul.mubr.msk.f32.vlgmr.msra.gmra.mxu1 %vm4849_vm15, %v20661_v12  ;;  %18996 = vmatprep.subr.mxu1 %v23162_v0 }
 0xbdb   : > { %19000 = vmatprep.mubr.msk.f32.mxu1 %vm19816_vm0, %v23162_v0 }
 0xc8a   : > { %v5639_v46 = vpop.f32.mrf.mxu1 }
 0xc8b   : > { %v5643_v47 = vadd.f32 %v5639_v46, %v5483_v30  ;;  %v20897_v30 = vld [vmem:[%s23293_s10 + $0x1a8] sm:$0xff]  ;;  %v20912_v46 = vld [vmem:[%s23293_s10 + $0x190] sm:$0xff] }
 0xc8c   : > { %v18950_v48 = vpop.f32.mrf.mxu1  ;;  %23297 = vst [vmem:[#allocation52_spill] sm:$0xff] %v20912_v46 }
 0xc8d   : > { %v20917_v48 = vld [vmem:[%s23293_s10 + $0x188] sm:$0xff] }
 0xc8e   : > { %23298 = vst [vmem:[#allocation53_spill] sm:$0xff] %v20917_v48 }
 0xc9a   : > { %v18969_v49 = vpop.f32.mrf.mxu1 }
 0xc9b   : > { %18971 = vmatpush3.msra.mxu0 %v18969_v49  ;;  %v20922_v49 = vld [vmem:[%s23293_s10 + $0x180] sm:$0xff] }
 0xc9c   : > { %v5719_v16 = vpop.f32.mrf.mxu1  ;;  %18972 = vmatprep.subr.mxu0 %v23162_v0  ;;  %23299 = vst [vmem:[#allocation54_spill] sm:$0xff] %v20922_v49 }
 0xc9d   : > { %18973 = vmatpush3.msra.mxu0 %v5719_v16 }
 0xc9e   : > { %18975 = vmatmul.mubr.msk.f32.vlgmr.msra.gmra.mxu0 %vm1697_vm8, %v17827_v50  ;;  %18977 = vmatprep.subr.mxu0 %v20885_v29 }
 0xc9f   : > { %18978 = vmatpush3.msra.mxu0 %v20885_v29  ;;  %18993 = vmatprep.mubr.msk.f32.mxu0 %vm4849_vm15, %v20663_v13 }
 0xca0   : > { %18979 = vmatprep.subr.mxu0 %v20889_v17 }
 0xca1   : > { %18980 = vmatpush3.msra.mxu0 %v20889_v17 }
 0xca2   : > { %18981 = vmatprep.subr.mxu0 %v20897_v30 }
 0xca3   : > { %18982 = vmatpush3.msra.mxu0 %v20897_v30 }
 0xca4   : > { %18983 = vmatprep.subr.mxu0 %v20902_v18 }
 0xca5   : > { %18984 = vmatpush3.msra.mxu0 %v20902_v18 }
 0xca6   : > { %18985 = vmatprep.subr.mxu0 %v20907_v27 }
 0xca7   : > { %18986 = vmatpush3.msra.mxu0 %v20907_v27  ;;  %v20939_v27 = vld [vmem:[%s23293_s10 + $0x1f0] sm:$0xff] }
 0xca8   : > { %18987 = vmatprep.subr.mxu0 %v20912_v46  ;;  %23301 = vst [vmem:[#allocation56_spill] sm:$0xff] %v20939_v27 }
 0xca9   : > { %18988 = vmatpush3.msra.mxu0 %v20912_v46  ;;  %v20935_v46 = vld [vmem:[%s23293_s10 + $0x1f8] sm:$0xff] }
 0xcaa   : > { %18989 = vmatprep.subr.mxu0 %v20917_v48  ;;  %23300 = vst [vmem:[#allocation55_spill] sm:$0xff] %v20935_v46 }
 0xcab   : > { %18990 = vmatpush3.msra.mxu0 %v20917_v48  ;;  %v17839_v48 = vld [vmem:[%s23294_s23 + $0x30] sm:$0xff] }
 0xcac   : > { %18991 = vmatprep.subr.mxu0 %v20922_v49 }
 0xcad   : > { %18992 = vmatpush3.msra.mxu0 %v20922_v49 }
 0xcae   : > { %18994 = vmatmul.mubr.msk.f32.vlgmr.msra.gmra.mxu0 %vm4849_vm15, %v20661_v12  ;;  %19022 = vmatprep.subr.mxu0 %v23162_v0 }
 0xcaf   : > { %19026 = vmatprep.mubr.msk.f32.mxu0 %vm19816_vm0, %v23162_v0 }
 0xd5e   : > { %v5799_v50 = vpop.f32.mrf.mxu0 }
 0xd5f   : > { %v5803_v16 = vadd.f32 %v5799_v50, %v5643_v47  ;;  %v20957_v47 = vld [vmem:[%s23293_s10 + $0x1d8] sm:$0xff]  ;;  %v20972_v50 = vld [vmem:[%s23293_s10 + $0x1c0] sm:$0xff] }
 0xd60   : > { %v18976_v37 = vpop.f32.mrf.mxu0  ;;  %23304 = vst [vmem:[#allocation59_spill] sm:$0xff] %v20957_v47  ;;  %23307 = vst [vmem:[#allocation62_spill] sm:$0xff] %v20972_v50 }
 0xd61   : > { %v20952_v37 = vld [vmem:[%s23293_s10 + $0x1e0] sm:$0xff] }
 0xd62   : > { %23303 = vst [vmem:[#allocation58_spill] sm:$0xff] %v20952_v37 }
 0xd6e   : > { %v18995_v35 = vpop.f32.mrf.mxu0 }
 0xd6f   : > { %18997 = vmatpush3.msra.mxu1 %v18995_v35  ;;  %v20947_v35 = vld [vmem:[%s23293_s10 + $0x1e8] sm:$0xff] }
 0xd70   : > { %v5879_v49 = vpop.f32.mrf.mxu0  ;;  %18998 = vmatprep.subr.mxu1 %v23162_v0  ;;  %23302 = vst [vmem:[#allocation57_spill] sm:$0xff] %v20947_v35 }
 0xd71   : > { %18999 = vmatpush3.msra.mxu1 %v5879_v49  ;;  %v20967_v49 = vld [vmem:[%s23293_s10 + $0x1c8] sm:$0xff] }
 0xd72   : > { %19001 = vmatmul.mubr.msk.f32.vlgmr.msra.gmra.mxu1 %vm1697_vm8, %v17839_v48  ;;  %19003 = vmatprep.subr.mxu1 %v20935_v46  ;;  %v20962_v48 = vld [vmem:[%s23293_s10 + $0x1d0] sm:$0xff]  ;;  %23306 = vst [vmem:[#allocation61_spill] sm:$0xff] %v20967_v49 }
 0xd73   : > { %19004 = vmatpush3.msra.mxu1 %v20935_v46  ;;  %19019 = vmatprep.mubr.msk.f32.mxu1 %vm4849_vm15, %v20663_v13  ;;  %23305 = vst [vmem:[#allocation60_spill] sm:$0xff] %v20962_v48  ;;  %v20989_v46 = vld [vmem:[%s23293_s10 + $0x230] sm:$0xff] }
 0xd74   : > { %19005 = vmatprep.subr.mxu1 %v20939_v27 }
 0xd75   : > { %19006 = vmatpush3.msra.mxu1 %v20939_v27  ;;  %v20985_v27 = vld [vmem:[%s23293_s10 + $0x238] sm:$0xff] }
 0xd76   : > { %19007 = vmatprep.subr.mxu1 %v20947_v35 }
 0xd77   : > { %19008 = vmatpush3.msra.mxu1 %v20947_v35 }
 0xd78   : > { %19009 = vmatprep.subr.mxu1 %v20952_v37 }
 0xd79   : > { %19010 = vmatpush3.msra.mxu1 %v20952_v37 }
 0xd7a   : > { %19011 = vmatprep.subr.mxu1 %v20957_v47 }
 0xd7b   : > { %19012 = vmatpush3.msra.mxu1 %v20957_v47 }
 0xd7c   : > { %19013 = vmatprep.subr.mxu1 %v20962_v48 }
 0xd7d   : > { %19014 = vmatpush3.msra.mxu1 %v20962_v48 }
 0xd7e   : > { %19015 = vmatprep.subr.mxu1 %v20967_v49 }
 0xd7f   : > { %19016 = vmatpush3.msra.mxu1 %v20967_v49  ;;  %v17851_v49 = vld [vmem:[%s23294_s23 + $0x38] sm:$0xff] }
 0xd80   : > { %19017 = vmatprep.subr.mxu1 %v20972_v50 }
 0xd81   : > { %19018 = vmatpush3.msra.mxu1 %v20972_v50 }
 0xd82   : > { %19020 = vmatmul.mubr.msk.f32.vlgmr.msra.gmra.mxu1 %vm4849_vm15, %v20661_v12  ;;  %19048 = vmatprep.subr.mxu1 %v23162_v0 }
 0xd83   : > { %19052 = vmatprep.mubr.msk.f32.mxu1 %vm19816_vm0, %v23162_v0 }
 0xe32   : > { %v5959_v48 = vpop.f32.mrf.mxu1 }
 0xe33   : > { %v5963_v47 = vadd.f32 %v5959_v48, %v5803_v16  ;;  %v20997_v16 = vld [vmem:[%s23293_s10 + $0x228] sm:$0xff]  ;;  %v21012_v48 = vld [vmem:[%s23293_s10 + $0x210] sm:$0xff] }
 0xe34   : > { %v19002_v37 = vpop.f32.mrf.mxu1 }
 0xe35   : > { %v21007_v37 = vld [vmem:[%s23293_s10 + $0x218] sm:$0xff] }
 0xe42   : > { %v19021_v35 = vpop.f32.mrf.mxu1 }
 0xe43   : > { %19023 = vmatpush3.msra.mxu0 %v19021_v35  ;;  %v21002_v35 = vld [vmem:[%s23293_s10 + $0x220] sm:$0xff] }
 0xe44   : > { %v6039_v50 = vpop.f32.mrf.mxu1  ;;  %19024 = vmatprep.subr.mxu0 %v23162_v0 }
 0xe45   : > { %19025 = vmatpush3.msra.mxu0 %v6039_v50  ;;  %v21022_v50 = vld [vmem:[%s23293_s10 + $0x200] sm:$0xff] }
 0xe46   : > { %19027 = vmatmul.mubr.msk.f32.vlgmr.msra.gmra.mxu0 %vm1697_vm8, %v17851_v49  ;;  %19029 = vmatprep.subr.mxu0 %v20985_v27  ;;  %v21017_v49 = vld [vmem:[%s23293_s10 + $0x208] sm:$0xff] }
 0xe47   : > { %19030 = vmatpush3.msra.mxu0 %v20985_v27  ;;  %19045 = vmatprep.mubr.msk.f32.mxu0 %vm4849_vm15, %v20663_v13 }
 0xe48   : > { %19031 = vmatprep.subr.mxu0 %v20989_v46 }
 0xe49   : > { %19032 = vmatpush3.msra.mxu0 %v20989_v46 }
 0xe4a   : > { %19033 = vmatprep.subr.mxu0 %v20997_v16 }
 0xe4b   : > { %19034 = vmatpush3.msra.mxu0 %v20997_v16 }
 0xe4c   : > { %19035 = vmatprep.subr.mxu0 %v21002_v35 }
 0xe4d   : > { %19036 = vmatpush3.msra.mxu0 %v21002_v35 }
 0xe4e   : > { %19037 = vmatprep.subr.mxu0 %v21007_v37 }
 0xe4f   : > { %19038 = vmatpush3.msra.mxu0 %v21007_v37 }
 0xe50   : > { %19039 = vmatprep.subr.mxu0 %v21012_v48 }
 0xe51   : > { %19040 = vmatpush3.msra.mxu0 %v21012_v48 }
 0xe52   : > { %19041 = vmatprep.subr.mxu0 %v21017_v49 }
 0xe53   : > { %19042 = vmatpush3.msra.mxu0 %v21017_v49 }
 0xe54   : > { %19043 = vmatprep.subr.mxu0 %v21022_v50 }
 0xe55   : > { %19044 = vmatpush3.msra.mxu0 %v21022_v50 }
 0xe56   : > { %19046 = vmatmul.mubr.msk.f32.vlgmr.msra.gmra.mxu0 %vm4849_vm15, %v20661_v12  ;;  %19074 = vmatprep.subr.mxu0 %v23162_v0 }
 0xe57   : > { %19075 = vmatpush3.msra.mxu0 %v20579_v55  ;;  %19090 = vmatprep.mubr.msk.f32.mxu0 %vm19816_vm0, %v23162_v0 }
 0xe58   : > { %19076 = vmatprep.subr.mxu0 %v23162_v0 }
 0xe59   : > { %19077 = vmatpush3.msra.mxu0 %v20613_v63 }
 0xe5a   : > { %19078 = vmatprep.subr.mxu0 %v23162_v0 }
 0xe5b   : > { %19079 = vmatpush3.msra.mxu0 %v20618_v1 }
 0xe5c   : > { %19080 = vmatprep.subr.mxu0 %v23162_v0 }
 0xe5d   : > { %19081 = vmatpush3.msra.mxu0 %v20623_v2 }
 0xe5e   : > { %19082 = vmatprep.subr.mxu0 %v23162_v0 }
 0xe5f   : > { %19083 = vmatpush3.msra.mxu0 %v20628_v3  ;;  %v17863_v3 = vld [vmem:[%s23294_s23 + $0x40] sm:$0xff] }
 0xe60   : > { %19084 = vmatprep.subr.mxu0 %v23162_v0 }
 0xe61   : > { %19085 = vmatpush3.msra.mxu0 %v20633_v7 }
 0xe62   : > { %19086 = vmatprep.subr.mxu0 %v23162_v0 }
 0xe63   : > { %19087 = vmatpush3.msra.mxu0 %v20643_v9 }
 0xe64   : > { %19088 = vmatprep.subr.mxu0 %v23162_v0 }
 0xe65   : > { %19089 = vmatpush3.msra.mxu0 %v20653_v11 }
 0xe66   : > { %19122 = vmatprep.subr.mxu0 %v23162_v0 }
 0xf06   : > { %v6119_v55 = vpop.f32.mrf.mxu0 }
 0xf07   : > { %v6123_v63 = vadd.f32 %v6119_v55, %v5963_v47 }
 0xf08   : > { %v19028_v1 = vpop.f32.mrf.mxu0 }
 0xf16   : > { %v19047_v2 = vpop.f32.mrf.mxu0 }
 0xf17   : > { %19049 = vmatpush3.msra.mxu1 %v19047_v2  ;;  %v6371_v2 = vld [vmem:[%s23308_s4] sm:$0xff] }
 0xf18   : > { %v6199_v13 = vpop.f32.mrf.mxu0  ;;  %19050 = vmatprep.subr.mxu1 %v23162_v0 }
 0xf19   : > { %19051 = vmatpush3.msra.mxu1 %v6199_v13 }
 0xf1a   : > { %19053 = vmatmul.mubr.msk.f32.vlgmr.msra.gmra.mxu1 %vm1697_vm8, %v17863_v3  ;;  %19055 = vmatprep.subr.mxu1 %v23162_v0 }
 0xf1b   : > { %19056 = vmatpush3.msra.mxu1 %v20576_v54  ;;  %19071 = vmatprep.mubr.msk.f32.mxu1 %vm19816_vm0, %v23162_v0 }
 0xf1c   : > { %19057 = vmatprep.subr.mxu1 %v23162_v0 }
 0xf1d   : > { %19058 = vmatpush3.msra.mxu1 %v20584_v56 }
 0xf1e   : > { %19059 = vmatprep.subr.mxu1 %v23162_v0 }
 0xf1f   : > { %19060 = vmatpush3.msra.mxu1 %v20589_v57  ;;  %v6288_v57 = vpop.permute.xlu0 %6287 }
 0xf20   : > { %19061 = vmatprep.subr.mxu1 %v23162_v0 }
 0xf21   : > { %19062 = vmatpush3.msra.mxu1 %v20594_v58 }
 0xf22   : > { %19063 = vmatprep.subr.mxu1 %v23162_v0 }
 0xf23   : > { %19064 = vmatpush3.msra.mxu1 %v20599_v59 }
 0xf24   : > { %19065 = vmatprep.subr.mxu1 %v23162_v0 }
 0xf25   : > { %19066 = vmatpush3.msra.mxu1 %v20604_v60 }
 0xf26   : > { %19067 = vmatprep.subr.mxu1 %v23162_v0 }
 0xf27   : > { %19068 = vmatpush3.msra.mxu1 %v20640_v8 }
 0xf28   : > { %19069 = vmatprep.subr.mxu1 %v23162_v0 }
 0xf29   : > { %19070 = vmatpush3.msra.mxu1 %v20650_v10  ;;  %v17868_v10 = vld [vmem:[%s23308_s4 + $0x8] sm:$0xff] }
 0xf2a   : > { %19093 = vmatprep.subr.mxu1 %v23162_v0 }
 0xfda   : > { %v6279_v54 = vpop.f32.mrf.mxu1 }
 0xfdb   : > { %v6283_v56 = vadd.f32 %v6279_v54, %v6123_v63  ;;  %v23314_v54 = vld [vmem:[#allocation56_spill] sm:$0xff] }
 0xfdc   : > { %v19054_v58 = vpop.f32.mrf.mxu1 }
 0xfdd   : > { %v6290_v59 = vadd.f32 %v6288_v57, %v6283_v56  ;;  %v23315_v56 = vld [vmem:[#allocation57_spill] sm:$0xff]  ;;  %v23316_v57 = vld [vmem:[#allocation58_spill] sm:$0xff]  ;;  %v23317_v58 = vld [vmem:[#allocation59_spill] sm:$0xff] }
 0xfdf   : > { %v6292_v7 = vmul.f32 1.442695, %v6290_v59  ;;  %vm6291_vm2 = vcmp.gt.f32.partialorder %v6290_v59, 0.0 }
 0xfe1   : > { %19463 = vpow2.f32 %v6292_v7  ;;  %v23319_v7 = vld [vmem:[#allocation61_spill] sm:$0xff] }
 0xfee   : > { %v19464_v9 = vpop.eup %19463 }
 0xfef   : > { %v17865_v60 = vadd.f32 -1.0, %v19464_v9  ;;  %v23320_v9 = vld [vmem:[#allocation62_spill] sm:$0xff] }
 0xff1   : > { %v6295_v11 = vmul.f32 1.6732632, %v17865_v60 }
 0xff3   : > { %v6296_v13 = vsel %vm6291_vm2, %v6290_v59, %v6295_v11  ;;  %v23318_v59 = vld [vmem:[#allocation60_spill] sm:$0xff]  ;;  %vm12526_vm2 = vcmask 793600  }
 0xff4   : > { %v21071_v8 = vmul.f32 1.050701, %v6296_v13 }
 0xff6   : > { %19072 = vmatmul.mubr.msk.f32.vlgmr.msra.gmra.mxu1 %vm4849_vm15, %v21071_v8  ;;  %19091 = vmatmul.mubr.msk.f32.vlgmr.msra.gmra.mxu0 %vm4849_vm15, %v21071_v8 }
 0xff7   : > { %19095 = vmatprep.mubr.msk.f32.mxu1 %vm19816_vm0, %v23162_v0  ;;  %19124 = vmatprep.mubr.msk.f32.mxu0 %vm19816_vm0, %v23162_v0 }
0x10b6   : > { %v6367_v47 = vpop.f32.mrf.mxu1  ;;  %v6438_v55 = vpop.f32.mrf.mxu0 }
0x10b7   : > { %19094 = vmatpush3.msra.mxu1 %v6438_v55 }
0x10b8   : > { %v19073_v63 = vpop.f32.mrf.mxu1  ;;  %v19092_v1 = vpop.f32.mrf.mxu0  ;;  %19096 = vmatmul.mubr.msk.f32.vlgmr.msra.gmra.mxu1 %vm6444_vm3, %v17868_v10  ;;  %19098 = vmatprep.subr.mxu1 %v23162_v0  ;;  %v17887_v10 = vld [vmem:[%s23308_s4 + $0x38] sm:$0xff] }
0x10b9   : > { %19099 = vmatpush3.msra.mxu1 %v6367_v47  ;;  %19100 = vmatprep.mubr.msk.f32.mxu1 %vm19816_vm0, %v23162_v0  ;;  %v23322_v63 = vld [vmem:[#allocation50_spill] sm:$0xff] }
0x10ba   : > { %19103 = vmatprep.subr.mxu1 %v23162_v0  ;;  %v7714_v1 = vld [vmem:[%s23321_s20 + $0x68] sm:$0xff] }
0x10bc   : > { %19101 = vmatmul.mubr.msk.f32.vlgmr.msra.gmra.mxu1 %vm6444_vm3, %v6371_v2  ;;  %v7713_v2 = vld [vmem:[%s23321_s20 + $0x60] sm:$0xff] }
0x10bd   : > { %19104 = vmatpush3.msra.mxu1 %v20679_v14  ;;  %19119 = vmatprep.mubr.msk.f32.mxu1 %vm19816_vm0, %v23162_v0 }
0x10be   : > { %19105 = vmatprep.subr.mxu1 %v23162_v0 }
0x10bf   : > { %19106 = vmatpush3.msra.mxu1 %v20685_v19 }
0x10c0   : > { %19107 = vmatprep.subr.mxu1 %v23162_v0 }
0x10c1   : > { %19108 = vmatpush3.msra.mxu1 %v20692_v20 }
0x10c2   : > { %19109 = vmatprep.subr.mxu1 %v23162_v0 }
0x10c3   : > { %19110 = vmatpush3.msra.mxu1 %v20699_v21 }
0x10c4   : > { %19111 = vmatprep.subr.mxu1 %v23162_v0 }
0x10c5   : > { %19112 = vmatpush3.msra.mxu1 %v20707_v23 }
0x10c6   : > { %19113 = vmatprep.subr.mxu1 %v23162_v0 }
0x10c7   : > { %19114 = vmatpush3.msra.mxu1 %v20712_v24  ;;  %v17872_v24 = vld [vmem:[%s23308_s4 + $0x10] sm:$0xff] }
0x10c8   : > { %19115 = vmatprep.subr.mxu1 %v23162_v0 }
0x10c9   : > { %19116 = vmatpush3.msra.mxu1 %v20717_v25 }
0x10ca   : > { %19117 = vmatprep.subr.mxu1 %v23162_v0 }
0x10cb   : > { %19118 = vmatpush3.msra.mxu1 %v20722_v26 }
0x10cc   : > { %19120 = vmatmul.mubr.msk.f32.vlgmr.msra.gmra.mxu1 %vm4849_vm15, %v21071_v8  ;;  %19146 = vmatprep.subr.mxu1 %v23162_v0 }
0x10cd   : > { %19148 = vmatprep.mubr.msk.f32.mxu1 %vm19816_vm0, %v23162_v0 }
0x1178   : > { %v6514_v14 = vpop.f32.mrf.mxu1 }
0x117a   : > { %v19097_v19 = vpop.f32.mrf.mxu1 }
0x117b   : > { %v7710_v19 = vld [vmem:[%s23321_s20 + $0x48] sm:$0xff] }
0x117c   : > { %v6587_v20 = vpop.f32.mrf.mxu1 }
0x117d   : > { %v6588_v21 = vadd.f32 %v6587_v20, %v6514_v14  ;;  %v7711_v14 = vld [vmem:[%s23321_s20 + $0x50] sm:$0xff]  ;;  %v7709_v20 = vld [vmem:[%s23321_s20 + $0x40] sm:$0xff] }
0x117e   : > { %v19102_v23 = vpop.f32.mrf.mxu1 }
0x117f   : > { %v7707_v23 = vld [vmem:[%s23321_s20 + $0x30] sm:$0xff] }
0x118c   : > { %v6657_v3 = vpop.f32.mrf.mxu1 }
0x118d   : > { %19123 = vmatpush3.msra.mxu0 %v6657_v3  ;;  %v7705_v3 = vld [vmem:[%s23321_s20 + $0x20] sm:$0xff] }
0x118e   : > { %v19121_v25 = vpop.f32.mrf.mxu1  ;;  %19125 = vmatmul.mubr.msk.f32.vlgmr.msra.gmra.mxu0 %vm6444_vm3, %v17872_v24  ;;  %19127 = vmatprep.subr.mxu0 %v23162_v0  ;;  %v7706_v24 = vld [vmem:[%s23321_s20 + $0x28] sm:$0xff] }
0x118f   : > { %19128 = vmatpush3.msra.mxu0 %v20735_v5  ;;  %19143 = vmatprep.mubr.msk.f32.mxu0 %vm19816_vm0, %v23162_v0  ;;  %v7704_v25 = vld [vmem:[%s23321_s20 + $0x18] sm:$0xff] }
0x1190   : > { %19129 = vmatprep.subr.mxu0 %v23162_v0 }
0x1191   : > { %19130 = vmatpush3.msra.mxu0 %v20739_v38 }
0x1192   : > { %19131 = vmatprep.subr.mxu0 %v23162_v0 }
0x1193   : > { %19132 = vmatpush3.msra.mxu0 %v20747_v40  ;;  %v17875_v40 = vld [vmem:[%s23308_s4 + $0x18] sm:$0xff] }
0x1194   : > { %19133 = vmatprep.subr.mxu0 %v23162_v0 }
0x1195   : > { %19134 = vmatpush3.msra.mxu0 %v20752_v6 }
0x1196   : > { %19135 = vmatprep.subr.mxu0 %v23162_v0 }
0x1197   : > { %19136 = vmatpush3.msra.mxu0 %v20757_v41 }
0x1198   : > { %19137 = vmatprep.subr.mxu0 %v23162_v0 }
0x1199   : > { %19138 = vmatpush3.msra.mxu0 %v20762_v42 }
0x119a   : > { %19139 = vmatprep.subr.mxu0 %v23162_v0 }
0x119b   : > { %19140 = vmatpush3.msra.mxu0 %v20767_v43 }
0x119c   : > { %19141 = vmatprep.subr.mxu0 %v23162_v0 }
0x119d   : > { %19142 = vmatpush3.msra.mxu0 %v20772_v44 }
0x119e   : > { %19144 = vmatmul.mubr.msk.f32.vlgmr.msra.gmra.mxu0 %vm4849_vm15, %v21071_v8  ;;  %19170 = vmatprep.subr.mxu0 %v23162_v0 }
0x119f   : > { %19172 = vmatprep.mubr.msk.f32.mxu0 %vm19816_vm0, %v23162_v0 }
0x124e   : > { %v6732_v26 = vpop.f32.mrf.mxu0 }
0x124f   : > { %v6736_v5 = vadd.f32 %v6732_v26, %v6588_v21  ;;  %v7708_v21 = vld [vmem:[%s23321_s20 + $0x38] sm:$0xff]  ;;  %v7703_v26 = vld [vmem:[%s23321_s20 + $0x10] sm:$0xff] }
0x1250   : > { %v19126_v38 = vpop.f32.mrf.mxu0 }
0x1251   : > { %v7701_v38 = vld [vmem:[%s23321_s20] sm:$0xff] }
0x125e   : > { %v6803_v6 = vpop.f32.mrf.mxu0 }
0x125f   : > { %19147 = vmatpush3.msra.mxu1 %v6803_v6 }
0x1260   : > { %v19145_v41 = vpop.f32.mrf.mxu0  ;;  %19149 = vmatmul.mubr.msk.f32.vlgmr.msra.gmra.mxu1 %vm6444_vm3, %v17875_v40  ;;  %19151 = vmatprep.subr.mxu1 %v23162_v0 }
0x1261   : > { %19152 = vmatpush3.msra.mxu1 %v20785_v33  ;;  %19167 = vmatprep.mubr.msk.f32.mxu1 %vm19816_vm0, %v23162_v0  ;;  %v17878_v33 = vld [vmem:[%s23308_s4 + $0x20] sm:$0xff] }
0x1262   : > { %19153 = vmatprep.subr.mxu1 %v23162_v0 }
0x1263   : > { %19154 = vmatpush3.msra.mxu1 %v20789_v51 }
0x1264   : > { %19155 = vmatprep.subr.mxu1 %v23162_v0 }
0x1265   : > { %19156 = vmatpush3.msra.mxu1 %v20797_v39 }
0x1266   : > { %19157 = vmatprep.subr.mxu1 %v23162_v0 }
0x1267   : > { %19158 = vmatpush3.msra.mxu1 %v20802_v52 }
0x1268   : > { %19159 = vmatprep.subr.mxu1 %v23162_v0 }
0x1269   : > { %19160 = vmatpush3.msra.mxu1 %v20807_v53 }
0x126a   : > { %19161 = vmatprep.subr.mxu1 %v23162_v0 }
0x126b   : > { %19162 = vmatpush3.msra.mxu1 %v20812_v61 }
0x126c   : > { %19163 = vmatprep.subr.mxu1 %v23162_v0 }
0x126d   : > { %19164 = vmatpush3.msra.mxu1 %v20817_v62  ;;  %v17881_v62 = vld [vmem:[%s23308_s4 + $0x28] sm:$0xff] }
0x126e   : > { %19165 = vmatprep.subr.mxu1 %v23162_v0 }
0x126f   : > { %19166 = vmatpush3.msra.mxu1 %v20822_v15 }
0x1270   : > { %19168 = vmatmul.mubr.msk.f32.vlgmr.msra.gmra.mxu1 %vm4849_vm15, %v21071_v8  ;;  %19194 = vmatprep.subr.mxu1 %v23162_v0 }
0x1271   : > { %19196 = vmatprep.mubr.msk.f32.mxu1 %vm19816_vm0, %v23162_v0 }
0x1320   : > { %v6878_v42 = vpop.f32.mrf.mxu1 }
0x1321   : > { %v6882_v43 = vadd.f32 %v6878_v42, %v6736_v5  ;;  %v7702_v5 = vld [vmem:[%s23321_s20 + $0x8] sm:$0xff]  ;;  %v7625_v42 = vpop.permute.xlu0 %7624 }
0x1322   : > { %v19150_v44 = vpop.f32.mrf.mxu1 }
0x1330   : > { %v6949_v51 = vpop.f32.mrf.mxu1 }
0x1331   : > { %19171 = vmatpush3.msra.mxu0 %v6949_v51 }
0x1332   : > { %v19169_v39 = vpop.f32.mrf.mxu1  ;;  %19173 = vmatmul.mubr.msk.f32.vlgmr.msra.gmra.mxu0 %vm6444_vm3, %v17878_v33  ;;  %19175 = vmatprep.subr.mxu0 %v23162_v0 }
0x1333   : > { %19176 = vmatpush3.msra.mxu0 %v20835_v4  ;;  %19191 = vmatprep.mubr.msk.f32.mxu0 %vm19816_vm0, %v23162_v0 }
0x1334   : > { %19177 = vmatprep.subr.mxu0 %v23162_v0 }
0x1335   : > { %19178 = vmatpush3.msra.mxu0 %v20839_v28  ;;  %v23309_v28 = vld [vmem:[#allocation51_spill] sm:$0xff] }
0x1336   : > { %19179 = vmatprep.subr.mxu0 %v23162_v0 }
0x1337   : > { %19180 = vmatpush3.msra.mxu0 %v20847_v22  ;;  %v23310_v22 = vld [vmem:[#allocation52_spill] sm:$0xff] }
0x1338   : > { %19181 = vmatprep.subr.mxu0 %v23162_v0 }
0x1339   : > { %19182 = vmatpush3.msra.mxu0 %v20852_v31  ;;  %v23311_v31 = vld [vmem:[#allocation53_spill] sm:$0xff] }
0x133a   : > { %19183 = vmatprep.subr.mxu0 %v23162_v0 }
0x133b   : > { %19184 = vmatpush3.msra.mxu0 %v20857_v34  ;;  %v23312_v34 = vld [vmem:[#allocation54_spill] sm:$0xff] }
0x133c   : > { %19185 = vmatprep.subr.mxu0 %v23162_v0 }
0x133d   : > { %19186 = vmatpush3.msra.mxu0 %v20862_v36 }
0x133e   : > { %19187 = vmatprep.subr.mxu0 %v23162_v0 }
0x133f   : > { %19188 = vmatpush3.msra.mxu0 %v20867_v32 }
0x1340   : > { %19189 = vmatprep.subr.mxu0 %v23162_v0 }
0x1341   : > { %19190 = vmatpush3.msra.mxu0 %v20872_v45 }
0x1342   : > { %19192 = vmatmul.mubr.msk.f32.vlgmr.msra.gmra.mxu0 %vm4849_vm15, %v21071_v8  ;;  %19218 = vmatprep.subr.mxu0 %v23162_v0 }
0x1343   : > { %19220 = vmatprep.mubr.msk.f32.mxu0 %vm19816_vm0, %v23162_v0 }
0x13f2   : > { %v7024_v52 = vpop.f32.mrf.mxu0 }
0x13f3   : > { %v7028_v53 = vadd.f32 %v7024_v52, %v6882_v43  ;;  %v7617_v43 = vpop.permute.xlu1 %7616 }
0x13f4   : > { %v19174_v61 = vpop.f32.mrf.mxu0 }
0x1402   : > { %v7095_v15 = vpop.f32.mrf.mxu0 }
0x1403   : > { %19195 = vmatpush3.msra.mxu1 %v7095_v15  ;;  %v23324_v15 = vld [vmem:[#allocation48_spill] sm:$0xff] }
0x1404   : > { %v19193_v4 = vpop.f32.mrf.mxu0  ;;  %19197 = vmatmul.mubr.msk.f32.vlgmr.msra.gmra.mxu1 %vm6444_vm3, %v17881_v62  ;;  %19199 = vmatprep.subr.mxu1 %v23162_v0  ;;  %v8688_v62 = vld [vmem:[%s23323_s28] sm:$0xf]  ;;  %s23327_s28 = smov 16  }
0x1405   : > { %19200 = vmatpush3.msra.mxu1 %v20885_v29  ;;  %19215 = vmatprep.mubr.msk.f32.mxu1 %vm19816_vm0, %v23162_v0  ;;  %v17884_v29 = vld [vmem:[%s23308_s4 + $0x30] sm:$0xff]  ;;  %v21325_v4 = vsub.s32 1, %v23324_v15 }
0x1406   : > { %19201 = vmatprep.subr.mxu1 %v23162_v0 }
0x1407   : > { %19202 = vmatpush3.msra.mxu1 %v20889_v17 }
0x1408   : > { %19203 = vmatprep.subr.mxu1 %v23162_v0 }
0x1409   : > { %19204 = vmatpush3.msra.mxu1 %v20897_v30 }
0x140a   : > { %19205 = vmatprep.subr.mxu1 %v23162_v0 }
0x140b   : > { %19206 = vmatpush3.msra.mxu1 %v20902_v18  ;;  %v23313_v18 = vld [vmem:[#allocation55_spill] sm:$0xff] }
0x140c   : > { %19207 = vmatprep.subr.mxu1 %v23162_v0 }
0x140d   : > { %19208 = vmatpush3.msra.mxu1 %v23309_v28  ;;  %v7828_v28 = vld [vmem:[#allocation10 + $0x2] sm:$0x3] }
0x140e   : > { %19209 = vmatprep.subr.mxu1 %v23162_v0 }
0x140f   : > { %19210 = vmatpush3.msra.mxu1 %v23310_v22 }
0x1410   : > { %19211 = vmatprep.subr.mxu1 %v23162_v0 }
0x1411   : > { %19212 = vmatpush3.msra.mxu1 %v23311_v31 }
0x1412   : > { %19213 = vmatprep.subr.mxu1 %v23162_v0 }
0x1413   : > { %19214 = vmatpush3.msra.mxu1 %v23312_v34  ;;  %v23326_v34 = vld [vmem:[#allocation49_spill] sm:$0xff] }
0x1414   : > { %19216 = vmatmul.mubr.msk.f32.vlgmr.msra.gmra.mxu1 %vm4849_vm15, %v21071_v8  ;;  %19242 = vmatprep.subr.mxu1 %v23162_v0 }
0x1415   : > { %19244 = vmatprep.mubr.msk.f32.mxu1 %vm19816_vm0, %v23162_v0 }
0x14c4   : > { %v7170_v36 = vpop.f32.mrf.mxu1 }
0x14c5   : > { %v7174_v32 = vadd.f32 %v7170_v36, %v7028_v53  ;;  %v21328_v36 = vrot.slane %v7828_v28, %v23326_v34 }
0x14c6   : > { %v19198_v45 = vpop.f32.mrf.mxu1 }
0x14c7   : > { %v7803_v45 = vld [vmem:[#allocation10] sm:$0x3] }
0x14d4   : > { %v7241_v17 = vpop.f32.mrf.mxu1 }
0x14d5   : > { %19219 = vmatpush3.msra.mxu0 %v7241_v17 }
0x14d6   : > { %v19217_v30 = vpop.f32.mrf.mxu1  ;;  %19221 = vmatmul.mubr.msk.f32.vlgmr.msra.gmra.mxu0 %vm6444_vm3, %v17884_v29  ;;  %19223 = vmatprep.subr.mxu0 %v23162_v0 }
0x14d7   : > { %19224 = vmatpush3.msra.mxu0 %v23313_v18  ;;  %19239 = vmatprep.mubr.msk.f32.mxu0 %vm19816_vm0, %v23162_v0 }
0x14d8   : > { %19225 = vmatprep.subr.mxu0 %v23162_v0 }
0x14d9   : > { %19226 = vmatpush3.msra.mxu0 %v23314_v54 }
0x14da   : > { %19227 = vmatprep.subr.mxu0 %v23162_v0 }
0x14db   : > { %19228 = vmatpush3.msra.mxu0 %v23315_v56 }
0x14dc   : > { %19229 = vmatprep.subr.mxu0 %v23162_v0 }
0x14dd   : > { %19230 = vmatpush3.msra.mxu0 %v23316_v57  ;;  %v21338_v57 = vrot.slane %v7803_v45, %v23326_v34 }
0x14de   : > { %19231 = vmatprep.subr.mxu0 %v23162_v0 }
0x14df   : > { %19232 = vmatpush3.msra.mxu0 %v23317_v58  ;;  %v21341_v58 = vrot.slane %v7803_v45, %v21325_v4 }
0x14e0   : > { %19233 = vmatprep.subr.mxu0 %v23162_v0 }
0x14e1   : > { %19234 = vmatpush3.msra.mxu0 %v23318_v59 }
0x14e2   : > { %19235 = vmatprep.subr.mxu0 %v23162_v0 }
0x14e3   : > { %19236 = vmatpush3.msra.mxu0 %v23319_v7  ;;  %v8003_v7 = vld [vmem:[#allocation10 + $0x4] sm:$0x3] }
0x14e4   : > { %19237 = vmatprep.subr.mxu0 %v23162_v0 }
0x14e5   : > { %19238 = vmatpush3.msra.mxu0 %v23320_v9 }
0x14e6   : > { %19240 = vmatmul.mubr.msk.f32.vlgmr.msra.gmra.mxu0 %vm4849_vm15, %v21071_v8  ;;  %19266 = vmatprep.subr.mxu0 %v23162_v0 }
0x14e7   : > { %19268 = vmatprep.mubr.msk.f32.mxu0 %vm19816_vm0, %v23162_v0 }
0x1596   : > { %v7316_v60 = vpop.f32.mrf.mxu0 }
0x1597   : > { %v7320_v11 = vadd.f32 %v7316_v60, %v7174_v32  ;;  %v21331_v32 = vrot.slane %v7828_v28, %v21325_v4 }
0x1598   : > { %v19222_v13 = vpop.f32.mrf.mxu0 }
0x15a6   : > { %v7387_v47 = vpop.f32.mrf.mxu0 }
0x15a7   : > { %19243 = vmatpush3.msra.mxu1 %v7387_v47 }
0x15a8   : > { %v19241_v55 = vpop.f32.mrf.mxu0  ;;  %19245 = vmatmul.mubr.msk.f32.vlgmr.msra.gmra.mxu1 %vm6444_vm3, %v17887_v10  ;;  %19247 = vmatprep.subr.mxu1 %v23162_v0 }
0x15a9   : > { %19248 = vmatpush3.msra.mxu1 %v20985_v27  ;;  %19263 = vmatprep.mubr.msk.f32.mxu1 %vm19816_vm0, %v23162_v0  ;;  %v21350_v55 = vrot.slane %v8003_v7, %v23326_v34 }
0x15aa   : > { %19249 = vmatprep.subr.mxu1 %v23162_v0 }
0x15ab   : > { %19250 = vmatpush3.msra.mxu1 %v20989_v46 }
0x15ac   : > { %19251 = vmatprep.subr.mxu1 %v23162_v0 }
0x15ad   : > { %19252 = vmatpush3.msra.mxu1 %v20997_v16 }
0x15ae   : > { %19253 = vmatprep.subr.mxu1 %v23162_v0 }
0x15af   : > { %19254 = vmatpush3.msra.mxu1 %v21002_v35  ;;  %v17890_v35 = vld [vmem:[%s23308_s4 + $0x40] sm:$0xff]  ;;  %s23332_s4 = smov 1  }
0x15b0   : > { %19255 = vmatprep.subr.mxu1 %v23162_v0 }
0x15b1   : > { %19256 = vmatpush3.msra.mxu1 %v21007_v37 }
0x15b2   : > { %19257 = vmatprep.subr.mxu1 %v23162_v0 }
0x15b3   : > { %19258 = vmatpush3.msra.mxu1 %v21012_v48 }
0x15b4   : > { %19259 = vmatprep.subr.mxu1 %v23162_v0 }
0x15b5   : > { %19260 = vmatpush3.msra.mxu1 %v21017_v49  ;;  %v7620_v49 = vld [vmem:[#allocation7] sm:$0xff] }
0x15b6   : > { %19261 = vmatprep.subr.mxu1 %v23162_v0 }
0x15b7   : > { %19262 = vmatpush3.msra.mxu1 %v21022_v50  ;;  %v7716_v50 = vld [vmem:[%s23321_s20 + $0x78] sm:$0xff] }
0x15b8   : > { %19264 = vmatmul.mubr.msk.f32.vlgmr.msra.gmra.mxu1 %vm4849_vm15, %v21071_v8  ;;  %v7715_v8 = vld [vmem:[%s23321_s20 + $0x70] sm:$0xff] }
0x15b9   : > { %7911 = vmatprep.mubr.f32.mxu1 %v23162_v0 }
0x1668   : > { %v7462_v27 = vpop.f32.mrf.mxu1 }
0x1669   : > { %v7466_v46 = vadd.f32 %v7462_v27, %v7320_v11  ;;  %v21353_v27 = vrot.slane %v8003_v7, %v21325_v4 }
0x166a   : > { %v19246_v16 = vpop.f32.mrf.mxu1 }
0x166b   : > { %v8106_v16 = vld [vmem:[#allocation10 + $0x6] sm:$0x3] }
0x1678   : > { %v7533_v37 = vpop.f32.mrf.mxu1 }
0x1679   : > { %19267 = vmatpush3.msra.mxu0 %v7533_v37 }
0x167a   : > { %v19265_v48 = vpop.f32.mrf.mxu1  ;;  %19269 = vmatmul.mubr.msk.f32.vlgmr.msra.gmra.mxu0 %vm6444_vm3, %v17890_v35  ;;  %19271 = vmatprep.subr.mxu0 %v23162_v0 }
0x167b   : > { %19272 = vmatpush3.msra.mxu0 %v20661_v12  ;;  %19275 = vmatprep.mubr.msk.f32.mxu0 %vm19816_vm0, %v23162_v0  ;;  %v7712_v12 = vld [vmem:[%s23321_s20 + $0x58] sm:$0xff]  ;;  %vm7798_vm0 = vcmask 138240  }
0x167c   : > { %19273 = vmatprep.subr.mxu0 %v23162_v0 }
0x167d   : > { %19274 = vmatpush3.msra.mxu0 %v23322_v63 }
0x167e   : > { %19276 = vmatmul.mubr.msk.f32.vlgmr.msra.gmra.mxu0 %vm1697_vm8, %v7620_v49  ;;  %7736 = vmatprep.subr.mxu0 %v7716_v50  ;;  %v8287_v50 = vld [vmem:[#allocation10 + $0xa] sm:$0x3] }
0x167f   : > { %7737 = vmatpush1.msra.mxu0 %v7715_v8  ;;  %7784 = vmatprep.mubr.f32.mxu0 %v23162_v0  ;;  %v8390_v8 = vld [vmem:[#allocation10 + $0xc] sm:$0x3] }
0x1680   : > { %7738 = vmatprep.subr.mxu0 %v7714_v1 }
0x1681   : > { %7739 = vmatpush1.msra.mxu0 %v7713_v2  ;;  %v21363_v2 = vrot.slane %v8106_v16, %v23326_v34 }
0x1682   : > { %7740 = vmatprep.subr.mxu0 %v7712_v12  ;;  %v21366_v12 = vrot.slane %v8106_v16, %v21325_v4 }
0x1683   : > { %7741 = vmatpush1.msra.mxu0 %v7711_v14 }
0x1684   : > { %7742 = vmatprep.subr.mxu0 %v7710_v19  ;;  %v21371_v19 = vrot.slane %v8287_v50, %v23326_v34 }
0x1685   : > { %7743 = vmatpush1.msra.mxu0 %v7709_v20 }
0x1686   : > { %7744 = vmatprep.subr.mxu0 %v7708_v21 }
0x1687   : > { %7745 = vmatpush1.msra.mxu0 %v7707_v23  ;;  %v21374_v23 = vrot.slane %v8390_v8, %v23326_v34 }
0x1688   : > { %7746 = vmatprep.subr.mxu0 %v7706_v24  ;;  %v21377_v24 = vrot.slane %v8287_v50, %v21325_v4 }
0x1689   : > { %7747 = vmatpush1.msra.mxu0 %v7705_v3 }
0x168a   : > { %7748 = vmatprep.subr.mxu0 %v7704_v25 }
0x168b   : > { %7749 = vmatpush1.msra.mxu0 %v7703_v26 }
0x168c   : > { %7750 = vmatprep.subr.mxu0 %v7702_v5  ;;  %v21383_v5 = vrot.slane %v8390_v8, %v21325_v4 }
0x168d   : > { %7751 = vmatpush1.msra.mxu0 %v7701_v38 }
0x173a   : > { %v7608_v40 = vpop.f32.mrf.mxu0 }
0x173b   : > { %v7612_v6 = vadd.f32 %v7608_v40, %v7466_v46 }
0x173c   : > { %v19270_v41 = vpop.f32.mrf.mxu0 }
0x173d   : > { %v7619_v33 = vadd.f32 %v7617_v43, %v7612_v6  ;;  %v8493_v41 = vld [vmem:[#allocation10 + $0xe] sm:$0x3] }
0x173e   : > { %v7696_v44 = vpop.f32.mrf.mxu0  ;;  %v21399_v28 = vrot.slane %v8493_v41, %v23326_v34  ;;  %v21405_v45 = vrot.slane %v8493_v41, %v21325_v4 }
0x173f   : > { %v7697_v51 = vadd.f32 %v7696_v44, %v7625_v42 }
0x1740   : > { %v19277_v39 = vpop.f32.mrf.mxu0 }
0x1741   : > { %v7700_v52 = vadd.f32 %v7697_v51, %v7619_v33 }
0x1743   : > { %17893 = vmatmul.mubr.msk.f32.vlgmr.msra.gmra.mxu0 %vm4849_vm15, %v7700_v52  ;;  %vm10998_vm15 = vcmask 252928  }
0x1744   : > { %8189 = vmatprep.mubr.f32.mxu0 %v23162_v0 }
0x1803   : > { %v21287_v53 = vpop.f32.mrf.mxu0 }
0x1804   : > { %8276 = vrot.lane.b32.xlu1 %v21287_v53, %s19818_s13  ;;  %7821 = vrot.lane.b32.xlu0 %v21287_v53, %s23141_s11 }
0x1805   : > { %v21293_v61 = vpop.f32.mrf.mxu0 }
0x1808   : > { %7796 = vrot.lane.b32.xlu0 %v21287_v53, %s23143_s22  ;;  %7818 = vrot.lane.b32.xlu1 %v21293_v61, %s23141_s11  ;;  %s23147_s11 = smov 113  }
0x180c   : > { %7995 = vrot.lane.b32.xlu0 %v21287_v53, %s23145_s5  ;;  %7792 = vrot.lane.b32.xlu1 %v21293_v61, %s23143_s22  ;;  %s23151_s22 = smov 112  }
0x1810   : > { %8098 = vrot.lane.b32.xlu0 %v21287_v53, %s23153_s15  ;;  %7992 = vrot.lane.b32.xlu1 %v21293_v61, %s23145_s5  ;;  %s23149_s5 = smov 111  }
0x1814   : > { %8278 = vrot.lane.b32.xlu0 %v21293_v61, %s19818_s13  ;;  %8095 = vrot.lane.b32.xlu1 %v21293_v61, %s23153_s15  ;;  %s23330_s15 = smov 17  }
0x1818   : > { %8381 = vrot.lane.b32.xlu0 %v21293_v61, %s23147_s11  ;;  %8379 = vrot.lane.b32.xlu1 %v21287_v53, %s23147_s11  ;;  %s23325_s11 = sld [smem:[#allocation35_spill]] }
0x181c   : > { %8484 = vrot.lane.b32.xlu0 %v21293_v61, %s23151_s22  ;;  %8482 = vrot.lane.b32.xlu1 %v21287_v53, %s23151_s22  ;;  %s23329_s22 = sld [smem:[#allocation39_spill]] }
0x181e   : > { %v17894_v59 = vld [vmem:[%s23325_s11 + $0x4] sm:$0xf]  ;;  %v7817_v46 = vld [vmem:[%s23325_s11] sm:$0xf]  ;;  %v17897_v14 = vld [vmem:[%s23325_s11 + $0x8] sm:$0xf] }
0x181f   : > { %v17899_v42 = vld [vmem:[%s23325_s11 + $0xc] sm:$0xf]  ;;  %v17901_v51 = vld [vmem:[%s23325_s11 + $0x10] sm:$0xf] }
0x1820   : > { %8587 = vrot.lane.b32.xlu0 %v21293_v61, %s23149_s5  ;;  %8585 = vrot.lane.b32.xlu1 %v21287_v53, %s23149_s5  ;;  %s23328_s5 = sld [smem:[#allocation38_spill]] }
0x1824   : > { %8691 = vperm.xlu1 %19450, %v8688_v62  }
0x1876   : > { %v8277_v22 = vpop.permute.xlu1 %8276  ;;  %v7822_v31 = vpop.permute.xlu0 %7821 }
0x187a   : > { %v7797_v29 = vpop.permute.xlu0 %7796  ;;  %v7819_v17 = vpop.permute.xlu1 %7818 }
0x187b   : > { %v7823_v30 = vsel %vm1697_vm8, %v7822_v31, %v7819_v17  ;;  %v7826_v18 = vsel %vm1697_vm8, %v7819_v17, %v7822_v31  ;;  %v8596_v17 = vld [vmem:[#allocation10 + $0x10] sm:$0x3] }
0x187c   : > { %v7840_v54 = vmul.f32 %v21328_v36, %v7826_v18  ;;  %v7841_v56 = vmul.f32 %v21331_v32, %v7823_v30 }
0x187e   : > { %v7996_v9 = vpop.permute.xlu0 %7995  ;;  %7877 = vmatprep.subr.mxu1 %v7841_v56  ;;  %v7793_v60 = vpop.permute.xlu1 %7792 }
0x187f   : > { %v7799_v11 = vsel %vm7798_vm0, %v7797_v29, %v7793_v60  ;;  %v7802_v13 = vsel %vm7798_vm0, %v7793_v60, %v7797_v29  ;;  %7878 = vmatpush1.msra.mxu1 %v7840_v54  ;;  %v17903_v29 = vld [vmem:[%s23325_s11 + $0x14] sm:$0xf]  ;;  %v17905_v54 = vld [vmem:[%s23325_s11 + $0x18] sm:$0xf]  ;;  %v21418_v60 = vrot.slane %v8596_v17, %v23326_v34 }
0x1880   : > { %v7815_v10 = vmul.f32 %v21338_v57, %v7802_v13  ;;  %17895 = vmatmul.mubr.msk.f32.vlgmr.msra.gmra.mxu1 %vm6444_vm3, %v17894_v59  ;;  %v7816_v47 = vmul.f32 %v21341_v58, %v7799_v11  ;;  %v21421_v11 = vrot.slane %v8596_v17, %v21325_v4  ;;  %v17907_v13 = vld [vmem:[%s23325_s11 + $0x1c] sm:$0xf] }
0x1881   : > { %7985 = vmatprep.mubr.f32.mxu1 %v23162_v0 }
0x1882   : > { %v8099_v35 = vpop.permute.xlu0 %8098  ;;  %7951 = vmatprep.subr.mxu1 %v7816_v47  ;;  %v7993_v37 = vpop.permute.xlu1 %7992 }
0x1883   : > { %v7998_v48 = vsel %vm7997_vm4, %v7996_v9, %v7993_v37  ;;  %v8001_v49 = vsel %vm7997_vm4, %v7993_v37, %v7996_v9  ;;  %7952 = vmatpush1.msra.mxu1 %v7815_v10 }
0x1884   : > { %v8015_v63 = vmul.f32 %v21350_v55, %v8001_v49  ;;  %17896 = vmatmul.mubr.msk.f32.vlgmr.msra.gmra.mxu1 %vm6444_vm3, %v7817_v46  ;;  %v8016_v1 = vmul.f32 %v21353_v27, %v7998_v48  ;;  %v17909_v48 = vld [vmem:[%s23325_s11 + $0x20] sm:$0xf] }
0x1885   : > { %8086 = vmatprep.mubr.f32.mxu1 %v23162_v0 }
0x1886   : > { %v8279_v20 = vpop.permute.xlu0 %8278  ;;  %8052 = vmatprep.subr.mxu1 %v8016_v1  ;;  %v8096_v21 = vpop.permute.xlu1 %8095 }
0x1887   : > { %v8285_v3 = vsel %vm8280_vm5, %v8279_v20, %v8277_v22  ;;  %v8101_v25 = vsel %vm8100_vm6, %v8099_v35, %v8096_v21  ;;  %v8104_v26 = vsel %vm8100_vm6, %v8096_v21, %v8099_v35  ;;  %8053 = vmatpush1.msra.mxu1 %v8015_v63  ;;  %v8281_v38 = vsel %vm8280_vm5, %v8277_v22, %v8279_v20 }
0x1888   : > { %v8118_v40 = vmul.f32 %v21363_v2, %v8104_v26  ;;  %17898 = vmatmul.mubr.msk.f32.vlgmr.msra.gmra.mxu1 %vm6444_vm3, %v17897_v14  ;;  %8233 = vmatprep.subr.mxu1 %v21293_v61  ;;  %v8119_v6 = vmul.f32 %v21366_v12, %v8101_v25  ;;  %v8300_v33 = vmul.f32 %v21377_v24, %v8285_v3 }
0x1889   : > { %8234 = vmatpush1.msra.mxu1 %v21287_v53  ;;  %8267 = vmatprep.mubr.f32.mxu1 %v23162_v0  ;;  %v8299_v39 = vmul.f32 %v21371_v19, %v8281_v38 }
0x188a   : > { %v8382_v43 = vpop.permute.xlu0 %8381  ;;  %8155 = vmatprep.subr.mxu0 %v8119_v6  ;;  %v8380_v44 = vpop.permute.xlu1 %8379 }
0x188b   : > { %v8384_v52 = vsel %vm8383_vm7, %v8380_v44, %v8382_v43  ;;  %v8388_v62 = vsel %vm8383_vm7, %v8382_v43, %v8380_v44  ;;  %8156 = vmatpush1.msra.mxu0 %v8118_v40 }
0x188c   : > { %v8402_v22 = vmul.f32 %v21374_v23, %v8384_v52  ;;  %17900 = vmatmul.mubr.msk.f32.vlgmr.msra.gmra.mxu0 %vm6444_vm3, %v17899_v42  ;;  %8336 = vmatprep.subr.mxu0 %v8300_v33  ;;  %v8403_v31 = vmul.f32 %v21383_v5, %v8388_v62 }
0x188d   : > { %8337 = vmatpush1.msra.mxu0 %v8299_v39  ;;  %17902 = vmatmul.mubr.msk.f32.vlgmr.msra.gmra.mxu1 %vm6444_vm3, %v17901_v51 }
0x188e   : > { %v8485_v30 = vpop.permute.xlu0 %8484  ;;  %8439 = vmatprep.subr.mxu1 %v8403_v31  ;;  %v8483_v18 = vpop.permute.xlu1 %8482  ;;  %8370 = vmatprep.mubr.f32.mxu0 %v23162_v0 }
0x188f   : > { %v8487_v56 = vsel %vm8486_vm11, %v8483_v18, %v8485_v30  ;;  %v8491_v59 = vsel %vm8486_vm11, %v8485_v30, %v8483_v18  ;;  %8440 = vmatpush1.msra.mxu1 %v8402_v22  ;;  %8473 = vmatprep.mubr.f32.mxu1 %v23162_v0 }
0x1890   : > { %v8505_v7 = vmul.f32 %v21399_v28, %v8487_v56  ;;  %17904 = vmatmul.mubr.msk.f32.vlgmr.msra.gmra.mxu0 %vm6444_vm3, %v17903_v29  ;;  %v8506_v9 = vmul.f32 %v21405_v45, %v8491_v59 }
0x1891   : > { %17906 = vmatmul.mubr.msk.f32.vlgmr.msra.gmra.mxu1 %vm6444_vm3, %v17905_v54  ;;  %8576 = vmatprep.mubr.f32.mxu0 %v23162_v0 }
0x1892   : > { %v8588_v10 = vpop.permute.xlu0 %8587  ;;  %8542 = vmatprep.subr.mxu0 %v8506_v9  ;;  %v8586_v47 = vpop.permute.xlu1 %8585  ;;  %8679 = vmatprep.mubr.f32.mxu1 %v23162_v0 }
0x1893   : > { %v8590_v46 = vsel %vm8589_vm12, %v8586_v47, %v8588_v10  ;;  %v8594_v16 = vsel %vm8589_vm12, %v8588_v10, %v8586_v47  ;;  %8543 = vmatpush1.msra.mxu0 %v8505_v7 }
0x1894   : > { %v8608_v35 = vmul.f32 %v21418_v60, %v8590_v46  ;;  %17908 = vmatmul.mubr.msk.f32.vlgmr.msra.gmra.mxu0 %vm6444_vm3, %v17907_v13  ;;  %v8609_v37 = vmul.f32 %v21421_v11, %v8594_v16 }
0x1895   : > { %8810 = vmatprep.mubr.f32.mxu0 %v23162_v0 }
0x1896   : > { %8645 = vmatprep.subr.mxu1 %v8609_v37 }
0x1897   : > { %8646 = vmatpush1.msra.mxu1 %v8608_v35 }
0x1898   : > { %17910 = vmatmul.mubr.msk.f32.vlgmr.msra.gmra.mxu1 %vm6444_vm3, %v17909_v48 }
0x1899   : > { %8890 = vmatprep.mubr.f32.mxu1 %v23162_v0 }
0x189f   : > { %v8692_v7 = vpop.permute.xlu1 %8691 }
0x1940   : > { %v7913_v49 = vpop.f32.mrf.mxu1 }
0x1942   : > { %v7915_v50 = vpop.f32.mrf.mxu1 }
0x1944   : > { %v7987_v8 = vpop.f32.mrf.mxu1 }
0x1945   : > { %v7988_v14 = vadd.f32 %v7987_v8, %v7913_v49 }
0x1946   : > { %v7989_v63 = vpop.f32.mrf.mxu1 }
0x1947   : > { %v7990_v21 = vadd.f32 %v7989_v63, %v7915_v50 }
0x1948   : > { %v8088_v1 = vpop.f32.mrf.mxu1 }
0x1949   : > { %v8093_v3 = vadd.f32 %v8088_v1, %v7988_v14 }
0x194a   : > { %v8090_v20 = vpop.f32.mrf.mxu1 }
0x194b   : > { %v8094_v26 = vadd.f32 %v8090_v20, %v7990_v21  ;;  %v9549_v21 = vld [vmem:[%s23328_s5] sm:$0xf]  ;;  %s19830_s5 = smov 96  }
0x194c   : > { %v8191_v25 = vpop.f32.mrf.mxu0 }
0x194d   : > { %v8196_v38 = vadd.f32 %v8191_v25, %v8093_v3  ;;  %v8269_v40 = vpop.f32.mrf.mxu1  ;;  %v9558_v3 = vld [vmem:[%s23329_s22] sm:$0xf]  ;;  %s19829_s22 = smov 97  }
0x194e   : > { %v8193_v6 = vpop.f32.mrf.mxu0 }
0x194f   : > { %v8197_v41 = vadd.f32 %v8193_v6, %v8094_v26  ;;  %v8274_v42 = vadd.f32 %v8269_v40, %v8196_v38  ;;  %v8271_v43 = vpop.f32.mrf.mxu1 }
0x1950   : > { %v8372_v44 = vpop.f32.mrf.mxu0 }
0x1951   : > { %v8275_v33 = vadd.f32 %v8271_v43, %v8197_v41  ;;  %v8377_v51 = vadd.f32 %v8372_v44, %v8274_v42  ;;  %v8475_v39 = vpop.f32.mrf.mxu1 }
0x1952   : > { %v8374_v52 = vpop.f32.mrf.mxu0 }
0x1953   : > { %v8378_v62 = vadd.f32 %v8374_v52, %v8275_v33  ;;  %v8480_v22 = vadd.f32 %v8475_v39, %v8377_v51  ;;  %v8477_v31 = vpop.f32.mrf.mxu1 }
0x1954   : > { %v8578_v29 = vpop.f32.mrf.mxu0 }
0x1955   : > { %v8481_v17 = vadd.f32 %v8477_v31, %v8378_v62  ;;  %v8583_v18 = vadd.f32 %v8578_v29, %v8480_v22 }
0x1956   : > { %v8580_v30 = vpop.f32.mrf.mxu0 }
0x1957   : > { %v8584_v56 = vadd.f32 %v8580_v30, %v8481_v17 }
0x1958   : > { %v8681_v54 = vpop.f32.mrf.mxu1 }
0x1959   : > { %v8686_v59 = vadd.f32 %v8681_v54, %v8583_v18 }
0x195a   : > { %v8683_v9 = vpop.f32.mrf.mxu1 }
0x195b   : > { %v8694_v13 = vadd.f32 %v8692_v7, %v8686_v59  ;;  %v8687_v10 = vadd.f32 %v8683_v9, %v8584_v56 }
0x195d   : > { %v8698_v47 = vmul.f32 1.442695, %v8694_v13  ;;  %v8695_v46 = vadd.f32 %v8692_v7, %v8687_v10  ;;  %vm8696_vm13 = vcmp.gt.f32.partialorder %v8694_v13, 0.0 }
0x195f   : > { %19465 = vpow2.f32 %v8698_v47  ;;  %v8700_v16 = vmul.f32 1.442695, %v8695_v46  ;;  %vm8697_vm14 = vcmp.gt.f32.partialorder %v8695_v46, 0.0 }
0x1961   : > { %19467 = vpow2.f32 %v8700_v16 }
0x196c   : > { %v19466_v35 = vpop.eup %19465 }
0x196d   : > { %v17911_v37 = vadd.f32 -1.0, %v19466_v35 }
0x196e   : > { %v19468_v48 = vpop.eup %19467 }
0x196f   : > { %v8704_v49 = vmul.f32 1.6732632, %v17911_v37  ;;  %v17912_v50 = vadd.f32 -1.0, %v19468_v48 }
0x1971   : > { %v8706_v8 = vsel %vm8696_vm13, %v8694_v13, %v8704_v49  ;;  %v8705_v63 = vmul.f32 1.6732632, %v17912_v50 }
0x1972   : > { %v21436_v1 = vmul.f32 1.050701, %v8706_v8 }
0x1973   : > { %v8707_v14 = vsel %vm8697_vm14, %v8695_v46, %v8705_v63 }
0x1974   : > { %9169 = vrot.lane.b32.xlu0 %v21436_v1, %s19818_s13  ;;  %8727 = vrot.lane.b32.xlu1 %v21436_v1, %s23327_s28  ;;  %v8709_v20 = vmul.f32 1.050701, %v8707_v14 }
0x1978   : > { %8724 = vrot.lane.b32.xlu0 %v8709_v20, %s23327_s28  ;;  %8715 = vrot.lane.b32.xlu1 %v21436_v1, %s23330_s15  ;;  %s23334_s28 = smov 112  }
0x197c   : > { %8711 = vrot.lane.b32.xlu0 %v8709_v20, %s23330_s15  ;;  %8900 = vrot.lane.b32.xlu1 %v21436_v1, %s23331_s2  ;;  %s23335_s15 = sld [smem:[#allocation37_spill]] }
0x1980   : > { %8897 = vrot.lane.b32.xlu0 %v8709_v20, %s23331_s2  ;;  %8995 = vrot.lane.b32.xlu1 %v21436_v1, %s23332_s4  ;;  %s19827_s2 = smov 33  }
0x1982   : > { %s23336_s8 = smov %s23335_s15  ;;  %v17913_v44 = vld [vmem:[%s23335_s15 + $0x4] sm:$0xf]  ;;  %s23346_s15 = sld [smem:[#allocation42_spill]] }
0x1983   : > { %v17924_v13 = vld [vmem:[%s23336_s8 + $0xc] sm:$0xf]  ;;  %v17936_v50 = vld [vmem:[%s23336_s8 + $0x18] sm:$0xf] }
0x1984   : > { %8992 = vrot.lane.b32.xlu0 %v8709_v20, %s23332_s4  ;;  %9171 = vrot.lane.b32.xlu1 %v8709_v20, %s19818_s13 }
0x1988   : > { %9264 = vrot.lane.b32.xlu0 %v21436_v1, %s23333_s7  ;;  %9266 = vrot.lane.b32.xlu1 %v8709_v20, %s23333_s7  ;;  %s23160_s7 = smov 31  }
0x198c   : > { %9359 = vrot.lane.b32.xlu0 %v21436_v1, %s23334_s28  ;;  %9361 = vrot.lane.b32.xlu1 %v8709_v20, %s23334_s28  ;;  %s19831_s28 = smov 95  }
0x1990   : > { %9454 = vrot.lane.b32.xlu0 %v21436_v1, %s23337_s9  ;;  %9456 = vrot.lane.b32.xlu1 %v8709_v20, %s23337_s9  ;;  %s19826_s9 = smov 32  }
0x1994   : > { %9552 = vperm.xlu0 %19449, %v9549_v21   ;;  %9561 = vperm.xlu1 %19450, %v9558_v3  }
0x19e6   : > { %v9170_v25 = vpop.permute.xlu0 %9169  ;;  %v8728_v26 = vpop.permute.xlu1 %8727 }
0x19ea   : > { %v8725_v38 = vpop.permute.xlu0 %8724  ;;  %v8716_v40 = vpop.permute.xlu1 %8715 }
0x19eb   : > { %v8729_v6 = vsel %vm1697_vm8, %v8728_v26, %v8725_v38  ;;  %v8732_v41 = vsel %vm1697_vm8, %v8725_v38, %v8728_v26  ;;  %v17944_v26 = vld [vmem:[%s23336_s8 + $0x20] sm:$0xf]  ;;  %v9557_v38 = vld [vmem:[#allocation9] sm:$0xf]  ;;  %vm10205_vm8 = vcmask 269312  }
0x19ec   : > { %v8733_v42 = vmul.f32 %v8732_v41, %v21328_v36  ;;  %v8734_v43 = vmul.f32 %v8729_v6, %v21331_v32  ;;  %v8723_v36 = vld [vmem:[%s23336_s8] sm:$0xf]  ;;  %v9755_v41 = vld [vmem:[#allocation12 + $0x398] sm:$0xff] }
0x19ed   : > { %v9762_v6 = vld [vmem:[#allocation12 + $0x3d0] sm:$0xff] }
0x19ee   : > { %v8712_v33 = vpop.permute.xlu0 %8711  ;;  %17914 = vmatprep.subr.msk.mxu0 %vm1856_vm10, %v8734_v43  ;;  %v8901_v51 = vpop.permute.xlu1 %8900  ;;  %v9745_v43 = vld [vmem:[#allocation12 + $0x348] sm:$0xff] }
0x19ef   : > { %v8717_v39 = vsel %vm7798_vm0, %v8716_v40, %v8712_v33  ;;  %v8720_v52 = vsel %vm7798_vm0, %v8712_v33, %v8716_v40  ;;  %17915 = vmatpush1.msk.msra.mxu0 %vm1856_vm10, %v8733_v42  ;;  %v9761_v40 = vld [vmem:[#allocation12 + $0x3c8] sm:$0xff]  ;;  %v9747_v42 = vld [vmem:[#allocation12 + $0x358] sm:$0xff]  ;;  %v9744_v33 = vld [vmem:[#allocation12 + $0x340] sm:$0xff]  ;;  %vm12932_vm0 = vcmask 785408  }
0x19f0   : > { %v8721_v62 = vmul.f32 %v8720_v52, %v21338_v57  ;;  %v8722_v22 = vmul.f32 %v8717_v39, %v21341_v58  ;;  %17916 = vmatmul.mubr.msk.f32.vlgmr.msra.gmra.mxu0 %vm1849_vm9, %v17913_v44  ;;  %v17920_v58 = vld [vmem:[%s23336_s8 + $0x8] sm:$0xf]  ;;  %v9737_v39 = vld [vmem:[#allocation12 + $0x308] sm:$0xff] }
0x19f1   : > { %8983 = vmatprep.mubr.f32.mxu0 %v23162_v0  ;;  %v9746_v44 = vld [vmem:[#allocation12 + $0x350] sm:$0xff] }
0x19f2   : > { %v8898_v32 = vpop.permute.xlu0 %8897  ;;  %17917 = vmatprep.subr.msk.mxu1 %vm1856_vm10, %v8722_v22  ;;  %v8996_v31 = vpop.permute.xlu1 %8995  ;;  %v9738_v52 = vld [vmem:[#allocation12 + $0x310] sm:$0xff]  ;;  %v9731_v22 = vld [vmem:[#allocation12 + $0x2d8] sm:$0xff] }
0x19f3   : > { %v8902_v29 = vsel %vm7997_vm4, %v8901_v51, %v8898_v32  ;;  %v8905_v17 = vsel %vm7997_vm4, %v8898_v32, %v8901_v51  ;;  %17918 = vmatpush1.msk.msra.mxu1 %vm1856_vm10, %v8721_v62  ;;  %v9739_v51 = vld [vmem:[#allocation12 + $0x318] sm:$0xff]  ;;  %v9736_v62 = vld [vmem:[#allocation12 + $0x300] sm:$0xff]  ;;  %v9730_v32 = vld [vmem:[#allocation12 + $0x2d0] sm:$0xff]  ;;  %vm13338_vm4 = vcmask 777216  }
0x19f4   : > { %v8906_v30 = vmul.f32 %v8905_v17, %v21350_v55  ;;  %v8907_v57 = vmul.f32 %v8902_v29, %v21353_v27  ;;  %17919 = vmatmul.mubr.msk.f32.vlgmr.msra.gmra.mxu1 %vm1849_vm9, %v8723_v36  ;;  %v9729_v36 = vld [vmem:[#allocation12 + $0x2c8] sm:$0xff]  ;;  %v9723_v29 = vld [vmem:[#allocation12 + $0x298] sm:$0xff] }
0x19f5   : > { %9078 = vmatprep.mubr.f32.mxu1 %v23162_v0  ;;  %v9721_v17 = vld [vmem:[#allocation12 + $0x288] sm:$0xff] }
0x19f6   : > { %v8993_v18 = vpop.permute.xlu0 %8992  ;;  %17921 = vmatprep.subr.msk.mxu0 %vm1856_vm10, %v8907_v57  ;;  %v9172_v54 = vpop.permute.xlu1 %9171  ;;  %v9720_v57 = vld [vmem:[#allocation12 + $0x280] sm:$0xff] }
0x19f7   : > { %v8997_v56 = vsel %vm8100_vm6, %v8996_v31, %v8993_v18  ;;  %v9000_v59 = vsel %vm8100_vm6, %v8993_v18, %v8996_v31  ;;  %v9177_v7 = vsel %vm8280_vm5, %v9172_v54, %v9170_v25  ;;  %17922 = vmatpush1.msk.msra.mxu0 %vm1856_vm10, %v8906_v30  ;;  %v9173_v9 = vsel %vm8280_vm5, %v9170_v25, %v9172_v54  ;;  %v9728_v31 = vld [vmem:[#allocation12 + $0x2c0] sm:$0xff]  ;;  %v9722_v30 = vld [vmem:[#allocation12 + $0x290] sm:$0xff]  ;;  %v9713_v18 = vld [vmem:[#allocation12 + $0x248] sm:$0xff] }
0x19f8   : > { %v9001_v55 = vmul.f32 %v9000_v59, %v21363_v2  ;;  %v9002_v27 = vmul.f32 %v8997_v56, %v21366_v12  ;;  %17923 = vmatmul.mubr.msk.f32.vlgmr.msra.gmra.mxu0 %vm1849_vm9, %v17920_v58  ;;  %17929 = vmatprep.subr.msk.mxu0 %vm1856_vm10, %v8709_v20  ;;  %v9179_v10 = vmul.f32 %v9177_v7, %v21377_v24  ;;  %v17928_v12 = vld [vmem:[%s23336_s8 + $0x10] sm:$0xf]  ;;  %v9714_v54 = vld [vmem:[#allocation12 + $0x250] sm:$0xff]  ;;  %v9705_v7 = vld [vmem:[#allocation12 + $0x208] sm:$0xff] }
0x19f9   : > { %9160 = vmatprep.mubr.f32.mxu0 %v23162_v0  ;;  %17930 = vmatpush1.msk.msra.mxu0 %vm1856_vm10, %v21436_v1  ;;  %v9178_v46 = vmul.f32 %v9173_v9, %v21371_v19  ;;  %v17932_v19 = vld [vmem:[%s23336_s8 + $0x14] sm:$0xf]  ;;  %v17940_v1 = vld [vmem:[%s23336_s8 + $0x1c] sm:$0xf]  ;;  %v9715_v58 = vld [vmem:[#allocation12 + $0x258] sm:$0xff] }
0x19fa   : > { %v9265_v47 = vpop.permute.xlu0 %9264  ;;  %17925 = vmatprep.subr.msk.mxu1 %vm1856_vm10, %v9002_v27  ;;  %v9267_v2 = vpop.permute.xlu1 %9266  ;;  %v9712_v56 = vld [vmem:[#allocation12 + $0x240] sm:$0xff]  ;;  %v9707_v59 = vld [vmem:[#allocation12 + $0x218] sm:$0xff] }
0x19fb   : > { %v9268_v16 = vsel %vm8383_vm7, %v9265_v47, %v9267_v2  ;;  %v9272_v35 = vsel %vm8383_vm7, %v9267_v2, %v9265_v47  ;;  %17926 = vmatpush1.msk.msra.mxu1 %vm1856_vm10, %v9001_v55  ;;  %v9706_v55 = vld [vmem:[#allocation12 + $0x210] sm:$0xff]  ;;  %v9704_v27 = vld [vmem:[#allocation12 + $0x200] sm:$0xff]  ;;  %v9699_v9 = vld [vmem:[#allocation12 + $0x1d8] sm:$0xff] }
0x19fc   : > { %v9273_v24 = vmul.f32 %v9268_v16, %v21374_v23  ;;  %v9274_v37 = vmul.f32 %v9272_v35, %v21383_v5  ;;  %17927 = vmatmul.mubr.msk.f32.vlgmr.msra.gmra.mxu1 %vm1849_vm9, %v17924_v13  ;;  %17933 = vmatprep.subr.msk.mxu1 %vm1856_vm10, %v9179_v10  ;;  %v9697_v13 = vld [vmem:[#allocation12 + $0x1c8] sm:$0xff]  ;;  %v9698_v10 = vld [vmem:[#allocation12 + $0x1d0] sm:$0xff]  ;;  %v9696_v47 = vld [vmem:[#allocation12 + $0x1c0] sm:$0xff] }
0x19fd   : > { %17934 = vmatpush1.msk.msra.mxu1 %vm1856_vm10, %v9178_v46  ;;  %17931 = vmatmul.mubr.msk.f32.vlgmr.msra.gmra.mxu0 %vm1849_vm9, %v17928_v12  ;;  %v9691_v2 = vld [vmem:[#allocation12 + $0x198] sm:$0xff]  ;;  %v9689_v12 = vld [vmem:[#allocation12 + $0x188] sm:$0xff]  ;;  %v9690_v46 = vld [vmem:[#allocation12 + $0x190] sm:$0xff] }
0x19fe   : > { %v9360_v48 = vpop.permute.xlu0 %9359  ;;  %17937 = vmatprep.subr.msk.mxu0 %vm1856_vm10, %v9274_v37  ;;  %v9362_v49 = vpop.permute.xlu1 %9361  ;;  %9255 = vmatprep.mubr.f32.mxu1 %v23162_v0  ;;  %v9688_v16 = vld [vmem:[#allocation12 + $0x180] sm:$0xff]  ;;  %v9683_v35 = vld [vmem:[#allocation12 + $0x158] sm:$0xff]  ;;  %v9682_v37 = vld [vmem:[#allocation12 + $0x150] sm:$0xff] }
0x19ff   : > { %v9363_v23 = vsel %vm8486_vm11, %v9360_v48, %v9362_v49  ;;  %v9367_v5 = vsel %vm8486_vm11, %v9362_v49, %v9360_v48  ;;  %17938 = vmatpush1.msk.msra.mxu0 %vm1856_vm10, %v9273_v24  ;;  %9350 = vmatprep.mubr.f32.mxu0 %v23162_v0  ;;  %v9681_v24 = vld [vmem:[#allocation12 + $0x148] sm:$0xff]  ;;  %v9675_v48 = vld [vmem:[#allocation12 + $0x118] sm:$0xff] }
0x1a00   : > { %v9368_v8 = vmul.f32 %v9363_v23, %v21399_v28  ;;  %v9369_v63 = vmul.f32 %v9367_v5, %v21405_v45  ;;  %17935 = vmatmul.mubr.msk.f32.vlgmr.msra.gmra.mxu1 %vm1849_vm9, %v17932_v19  ;;  %v9763_v45 = vld [vmem:[#allocation12 + $0x3d8] sm:$0xff]  ;;  %v9680_v19 = vld [vmem:[#allocation12 + $0x140] sm:$0xff]  ;;  %v9673_v49 = vld [vmem:[#allocation12 + $0x108] sm:$0xff] }
0x1a01   : > { %17939 = vmatmul.mubr.msk.f32.vlgmr.msra.gmra.mxu0 %vm1849_vm9, %v17936_v50  ;;  %9445 = vmatprep.mubr.f32.mxu1 %v23162_v0  ;;  %v9674_v50 = vld [vmem:[#allocation12 + $0x110] sm:$0xff]  ;;  %v9672_v23 = vld [vmem:[#allocation12 + $0x100] sm:$0xff]  ;;  %v9667_v5 = vld [vmem:[#allocation12 + $0xd8] sm:$0xff] }
0x1a02   : > { %v9455_v14 = vpop.permute.xlu0 %9454  ;;  %17941 = vmatprep.subr.msk.mxu1 %vm1856_vm10, %v9369_v63  ;;  %v9457_v20 = vpop.permute.xlu1 %9456  ;;  %9540 = vmatprep.mubr.f32.mxu0 %v23162_v0  ;;  %v9666_v63 = vld [vmem:[#allocation12 + $0xd0] sm:$0xff] }
0x1a03   : > { %v9458_v21 = vsel %vm8589_vm12, %v9455_v14, %v9457_v20  ;;  %v9462_v28 = vsel %vm8589_vm12, %v9457_v20, %v9455_v14  ;;  %17942 = vmatpush1.msk.msra.mxu1 %vm1856_vm10, %v9368_v8  ;;  %v9665_v8 = vld [vmem:[#allocation12 + $0xc8] sm:$0xff]  ;;  %v9659_v14 = vld [vmem:[#allocation12 + $0x98] sm:$0xff] }
0x1a04   : > { %v9463_v3 = vmul.f32 %v9458_v21, %v21418_v60  ;;  %v9464_v25 = vmul.f32 %v9462_v28, %v21421_v11  ;;  %17943 = vmatmul.mubr.msk.f32.vlgmr.msra.gmra.mxu1 %vm1849_vm9, %v17940_v1  ;;  %9597 = vmatprep.subr.mxu1 %v21293_v61  ;;  %v9760_v60 = vld [vmem:[#allocation12 + $0x3c0] sm:$0xff]  ;;  %v9753_v61 = vld [vmem:[#allocation12 + $0x388] sm:$0xff]  ;;  %v9754_v11 = vld [vmem:[#allocation12 + $0x390] sm:$0xff] }
0x1a05   : > { %9598 = vmatpush1.msra.mxu1 %v21287_v53  ;;  %9631 = vmatprep.mubr.f32.mxu1 %v23162_v0  ;;  %v9752_v53 = vld [vmem:[#allocation12 + $0x380] sm:$0xff]  ;;  %v9657_v20 = vld [vmem:[#allocation12 + $0x88] sm:$0xff]  ;;  %v9658_v21 = vld [vmem:[#allocation12 + $0x90] sm:$0xff] }
0x1a06   : > { %17945 = vmatprep.subr.msk.mxu0 %vm1856_vm10, %v9464_v25  ;;  %9967 = vmatprep.subr.mxu1 %v9763_v45  ;;  %v9664_v1 = vld [vmem:[#allocation12 + $0xc0] sm:$0xff]  ;;  %v9651_v45 = vld [vmem:[#allocation12 + $0x58] sm:$0xff]  ;;  %v9650_v25 = vld [vmem:[#allocation12 + $0x50] sm:$0xff] }
0x1a07   : > { %17946 = vmatpush1.msk.msra.mxu0 %vm1856_vm10, %v9463_v3  ;;  %v9656_v28 = vld [vmem:[#allocation12 + $0x80] sm:$0xff]  ;;  %v9649_v3 = vld [vmem:[#allocation12 + $0x48] sm:$0xff] }
0x1a08   : > { %17947 = vmatmul.mubr.msk.f32.vlgmr.msra.gmra.mxu0 %vm1849_vm9, %v17944_v26  ;;  %17948 = vmatmul.mubr.msk.f32.vlgmr.msra.gmra.mxu1 %vm6444_vm3, %v9557_v38  ;;  %v9648_v26 = vld [vmem:[#allocation12 + $0x40] sm:$0xff]  ;;  %v9643_v38 = vld [vmem:[#allocation12 + $0x18] sm:$0xff] }
0x1a09   : > { %9896 = vmatprep.subr.mxu0 %v9761_v40  ;;  %9968 = vmatpush1.msra.mxu1 %v9762_v6  ;;  %v9641_v40 = vld [vmem:[#allocation12 + $0x8] sm:$0xff]  ;;  %v9642_v6 = vld [vmem:[#allocation12 + $0x10] sm:$0xff] }
0x1a0a   : > { %9897 = vmatpush1.msra.mxu0 %v9760_v60  ;;  %9969 = vmatprep.subr.mxu1 %v9755_v41  ;;  %v9640_v60 = vld [vmem:[#allocation12] sm:$0xff]  ;;  %v9891_v41 = vld [vmem:[#allocation12 + $0x7d8] sm:$0xff] }
0x1a0b   : > { %9898 = vmatprep.subr.mxu0 %v9753_v61  ;;  %9970 = vmatpush1.msra.mxu1 %v9754_v11  ;;  %v9889_v61 = vld [vmem:[#allocation12 + $0x7c8] sm:$0xff]  ;;  %v9890_v11 = vld [vmem:[#allocation12 + $0x7d0] sm:$0xff] }
0x1a0c   : > { %9899 = vmatpush1.msra.mxu0 %v9752_v53  ;;  %9971 = vmatprep.subr.mxu1 %v9747_v42  ;;  %v9888_v53 = vld [vmem:[#allocation12 + $0x7c0] sm:$0xff]  ;;  %v9883_v42 = vld [vmem:[#allocation12 + $0x798] sm:$0xff] }
0x1a0d   : > { %9900 = vmatprep.subr.mxu0 %v9745_v43  ;;  %9972 = vmatpush1.msra.mxu1 %v9746_v44  ;;  %v9881_v43 = vld [vmem:[#allocation12 + $0x788] sm:$0xff]  ;;  %v9880_v44 = vld [vmem:[#allocation12 + $0x780] sm:$0xff] }
0x1a0e   : > { %9901 = vmatpush1.msra.mxu0 %v9744_v33  ;;  %9973 = vmatprep.subr.mxu1 %v9739_v51  ;;  %v9882_v33 = vld [vmem:[#allocation12 + $0x790] sm:$0xff]  ;;  %v9873_v51 = vld [vmem:[#allocation12 + $0x748] sm:$0xff] }
0x1a0f   : > { %9902 = vmatprep.subr.mxu0 %v9737_v39  ;;  %9974 = vmatpush1.msra.mxu1 %v9738_v52  ;;  %v9875_v39 = vld [vmem:[#allocation12 + $0x758] sm:$0xff]  ;;  %v9872_v52 = vld [vmem:[#allocation12 + $0x740] sm:$0xff] }
0x1a10   : > { %9903 = vmatpush1.msra.mxu0 %v9736_v62  ;;  %9975 = vmatprep.subr.mxu1 %v9731_v22  ;;  %v9874_v62 = vld [vmem:[#allocation12 + $0x750] sm:$0xff]  ;;  %v9865_v22 = vld [vmem:[#allocation12 + $0x708] sm:$0xff] }
0x1a11   : > { %9904 = vmatprep.subr.mxu0 %v9729_v36  ;;  %9976 = vmatpush1.msra.mxu1 %v9730_v32  ;;  %v9867_v36 = vld [vmem:[#allocation12 + $0x718] sm:$0xff]  ;;  %v9864_v32 = vld [vmem:[#allocation12 + $0x700] sm:$0xff] }
0x1a12   : > { %9905 = vmatpush1.msra.mxu0 %v9728_v31  ;;  %9977 = vmatprep.subr.mxu1 %v9723_v29  ;;  %v9866_v31 = vld [vmem:[#allocation12 + $0x710] sm:$0xff]  ;;  %v9857_v29 = vld [vmem:[#allocation12 + $0x6c8] sm:$0xff] }
0x1a13   : > { %9906 = vmatprep.subr.mxu0 %v9721_v17  ;;  %9978 = vmatpush1.msra.mxu1 %v9722_v30  ;;  %v9859_v17 = vld [vmem:[#allocation12 + $0x6d8] sm:$0xff]  ;;  %v9856_v30 = vld [vmem:[#allocation12 + $0x6c0] sm:$0xff] }
0x1a14   : > { %9907 = vmatpush1.msra.mxu0 %v9720_v57  ;;  %9979 = vmatprep.subr.mxu1 %v9715_v58  ;;  %v9858_v57 = vld [vmem:[#allocation12 + $0x6d0] sm:$0xff]  ;;  %v9849_v58 = vld [vmem:[#allocation12 + $0x688] sm:$0xff] }
0x1a15   : > { %9908 = vmatprep.subr.mxu0 %v9713_v18  ;;  %9980 = vmatpush1.msra.mxu1 %v9714_v54  ;;  %v9851_v18 = vld [vmem:[#allocation12 + $0x698] sm:$0xff]  ;;  %v9848_v54 = vld [vmem:[#allocation12 + $0x680] sm:$0xff] }
0x1a16   : > { %9909 = vmatpush1.msra.mxu0 %v9712_v56  ;;  %9981 = vmatprep.subr.mxu1 %v9707_v59  ;;  %v9850_v56 = vld [vmem:[#allocation12 + $0x690] sm:$0xff]  ;;  %v9841_v59 = vld [vmem:[#allocation12 + $0x648] sm:$0xff] }
0x1a17   : > { %9910 = vmatprep.subr.mxu0 %v9705_v7  ;;  %9982 = vmatpush1.msra.mxu1 %v9706_v55  ;;  %v9843_v7 = vld [vmem:[#allocation12 + $0x658] sm:$0xff]  ;;  %v9840_v55 = vld [vmem:[#allocation12 + $0x640] sm:$0xff] }
0x1a18   : > { %9911 = vmatpush1.msra.mxu0 %v9704_v27  ;;  %9983 = vmatprep.subr.mxu1 %v9699_v9  ;;  %v9842_v27 = vld [vmem:[#allocation12 + $0x650] sm:$0xff]  ;;  %v9833_v9 = vld [vmem:[#allocation12 + $0x608] sm:$0xff] }
0x1a19   : > { %9912 = vmatprep.subr.mxu0 %v9697_v13  ;;  %9984 = vmatpush1.msra.mxu1 %v9698_v10  ;;  %v9835_v13 = vld [vmem:[#allocation12 + $0x618] sm:$0xff]  ;;  %v9832_v10 = vld [vmem:[#allocation12 + $0x600] sm:$0xff] }
0x1a1a   : > { %9913 = vmatpush1.msra.mxu0 %v9696_v47  ;;  %9985 = vmatprep.subr.mxu1 %v9691_v2  ;;  %v9834_v47 = vld [vmem:[#allocation12 + $0x610] sm:$0xff]  ;;  %v9825_v2 = vld [vmem:[#allocation12 + $0x5c8] sm:$0xff] }
0x1a1b   : > { %9914 = vmatprep.subr.mxu0 %v9689_v12  ;;  %9986 = vmatpush1.msra.mxu1 %v9690_v46  ;;  %v9827_v12 = vld [vmem:[#allocation12 + $0x5d8] sm:$0xff]  ;;  %v9824_v46 = vld [vmem:[#allocation12 + $0x5c0] sm:$0xff] }
0x1a1c   : > { %9915 = vmatpush1.msra.mxu0 %v9688_v16  ;;  %9987 = vmatprep.subr.mxu1 %v9683_v35  ;;  %v9826_v16 = vld [vmem:[#allocation12 + $0x5d0] sm:$0xff]  ;;  %v9817_v35 = vld [vmem:[#allocation12 + $0x588] sm:$0xff] }
0x1a1d   : > { %9916 = vmatprep.subr.mxu0 %v9681_v24  ;;  %9988 = vmatpush1.msra.mxu1 %v9682_v37  ;;  %v9819_v24 = vld [vmem:[#allocation12 + $0x598] sm:$0xff]  ;;  %v9816_v37 = vld [vmem:[#allocation12 + $0x580] sm:$0xff] }
0x1a1e   : > { %9917 = vmatpush1.msra.mxu0 %v9680_v19  ;;  %9989 = vmatprep.subr.mxu1 %v9675_v48  ;;  %v9818_v19 = vld [vmem:[#allocation12 + $0x590] sm:$0xff]  ;;  %v9809_v48 = vld [vmem:[#allocation12 + $0x548] sm:$0xff] }
0x1a1f   : > { %9918 = vmatprep.subr.mxu0 %v9673_v49  ;;  %9990 = vmatpush1.msra.mxu1 %v9674_v50  ;;  %v9811_v49 = vld [vmem:[#allocation12 + $0x558] sm:$0xff]  ;;  %v9808_v50 = vld [vmem:[#allocation12 + $0x540] sm:$0xff] }
0x1a20   : > { %9919 = vmatpush1.msra.mxu0 %v9672_v23  ;;  %9991 = vmatprep.subr.mxu1 %v9667_v5  ;;  %v9810_v23 = vld [vmem:[#allocation12 + $0x550] sm:$0xff]  ;;  %v9801_v5 = vld [vmem:[#allocation12 + $0x508] sm:$0xff] }
0x1a21   : > { %9920 = vmatprep.subr.mxu0 %v9665_v8  ;;  %9992 = vmatpush1.msra.mxu1 %v9666_v63  ;;  %v9803_v8 = vld [vmem:[#allocation12 + $0x518] sm:$0xff]  ;;  %v9800_v63 = vld [vmem:[#allocation12 + $0x500] sm:$0xff] }
0x1a22   : > { %9921 = vmatpush1.msra.mxu0 %v9664_v1  ;;  %9993 = vmatprep.subr.mxu1 %v9659_v14  ;;  %v9802_v1 = vld [vmem:[#allocation12 + $0x510] sm:$0xff]  ;;  %v9793_v14 = vld [vmem:[#allocation12 + $0x4c8] sm:$0xff] }
0x1a23   : > { %9922 = vmatprep.subr.mxu0 %v9657_v20  ;;  %9994 = vmatpush1.msra.mxu1 %v9658_v21  ;;  %v9795_v20 = vld [vmem:[#allocation12 + $0x4d8] sm:$0xff]  ;;  %v9792_v21 = vld [vmem:[#allocation12 + $0x4c0] sm:$0xff] }
0x1a24   : > { %9923 = vmatpush1.msra.mxu0 %v9656_v28  ;;  %9995 = vmatprep.subr.mxu1 %v9651_v45  ;;  %v9794_v28 = vld [vmem:[#allocation12 + $0x4d0] sm:$0xff]  ;;  %v9785_v45 = vld [vmem:[#allocation12 + $0x488] sm:$0xff] }
0x1a25   : > { %9924 = vmatprep.subr.mxu0 %v9649_v3  ;;  %9996 = vmatpush1.msra.mxu1 %v9650_v25  ;;  %v9787_v3 = vld [vmem:[#allocation12 + $0x498] sm:$0xff]  ;;  %v9784_v25 = vld [vmem:[#allocation12 + $0x480] sm:$0xff] }
0x1a26   : > { %9925 = vmatpush1.msra.mxu0 %v9648_v26  ;;  %9997 = vmatprep.subr.mxu1 %v9643_v38  ;;  %v9786_v26 = vld [vmem:[#allocation12 + $0x490] sm:$0xff]  ;;  %v9777_v38 = vld [vmem:[#allocation12 + $0x448] sm:$0xff] }
0x1a27   : > { %9926 = vmatprep.subr.mxu0 %v9641_v40  ;;  %9998 = vmatpush1.msra.mxu1 %v9642_v6  ;;  %v9779_v40 = vld [vmem:[#allocation12 + $0x458] sm:$0xff]  ;;  %v9776_v6 = vld [vmem:[#allocation12 + $0x440] sm:$0xff] }
0x1a28   : > { %9927 = vmatpush1.msra.mxu0 %v9640_v60  ;;  %9999 = vmatprep.subr.mxu1 %v9891_v41  ;;  %v9778_v60 = vld [vmem:[#allocation12 + $0x450] sm:$0xff]  ;;  %v9769_v41 = vld [vmem:[#allocation12 + $0x408] sm:$0xff] }
0x1a29   : > { %9928 = vmatprep.subr.mxu0 %v9889_v61  ;;  %10000 = vmatpush2.msra.mxu1 %v9890_v11  ;;  %v9771_v61 = vld [vmem:[#allocation12 + $0x418] sm:$0xff]  ;;  %v9768_v11 = vld [vmem:[#allocation12 + $0x400] sm:$0xff] }
0x1a2a   : > { %9929 = vmatpush2.msra.mxu0 %v9888_v53  ;;  %10001 = vmatprep.subr.mxu1 %v9883_v42  ;;  %v9770_v53 = vld [vmem:[#allocation12 + $0x410] sm:$0xff]  ;;  %v9765_v42 = vld [vmem:[#allocation12 + $0x3e8] sm:$0xff] }
0x1a2b   : > { %9930 = vmatprep.subr.mxu0 %v9881_v43  ;;  %10002 = vmatpush2.msra.mxu1 %v9882_v33  ;;  %v9767_v43 = vld [vmem:[#allocation12 + $0x3f8] sm:$0xff] }
0x1a2c   : > { %9931 = vmatpush2.msra.mxu0 %v9880_v44  ;;  %10003 = vmatprep.subr.mxu1 %v9875_v39 }
0x1a2d   : > { %9932 = vmatprep.subr.mxu0 %v9873_v51  ;;  %10004 = vmatpush2.msra.mxu1 %v9874_v62 }
0x1a2e   : > { %9933 = vmatpush2.msra.mxu0 %v9872_v52  ;;  %10005 = vmatprep.subr.mxu1 %v9867_v36 }
0x1a2f   : > { %9934 = vmatprep.subr.mxu0 %v9865_v22  ;;  %10006 = vmatpush2.msra.mxu1 %v9866_v31 }
0x1a30   : > { %9935 = vmatpush2.msra.mxu0 %v9864_v32  ;;  %10007 = vmatprep.subr.mxu1 %v9859_v17 }
0x1a31   : > { %9936 = vmatprep.subr.mxu0 %v9857_v29  ;;  %10008 = vmatpush2.msra.mxu1 %v9858_v57 }
0x1a32   : > { %9937 = vmatpush2.msra.mxu0 %v9856_v30  ;;  %10009 = vmatprep.subr.mxu1 %v9851_v18 }
0x1a33   : > { %9938 = vmatprep.subr.mxu0 %v9849_v58  ;;  %10010 = vmatpush2.msra.mxu1 %v9850_v56 }
0x1a34   : > { %9939 = vmatpush2.msra.mxu0 %v9848_v54  ;;  %10011 = vmatprep.subr.mxu1 %v9843_v7 }
0x1a35   : > { %9940 = vmatprep.subr.mxu0 %v9841_v59  ;;  %10012 = vmatpush2.msra.mxu1 %v9842_v27 }
0x1a36   : > { %9941 = vmatpush2.msra.mxu0 %v9840_v55  ;;  %10013 = vmatprep.subr.mxu1 %v9835_v13 }
0x1a37   : > { %9942 = vmatprep.subr.mxu0 %v9833_v9  ;;  %10014 = vmatpush2.msra.mxu1 %v9834_v47 }
0x1a38   : > { %9943 = vmatpush2.msra.mxu0 %v9832_v10  ;;  %10015 = vmatprep.subr.mxu1 %v9827_v12 }
0x1a39   : > { %9944 = vmatprep.subr.mxu0 %v9825_v2  ;;  %10016 = vmatpush2.msra.mxu1 %v9826_v16 }
0x1a3a   : > { %9945 = vmatpush2.msra.mxu0 %v9824_v46  ;;  %10017 = vmatprep.subr.mxu1 %v9819_v24 }
0x1a3b   : > { %9946 = vmatprep.subr.mxu0 %v9817_v35  ;;  %10018 = vmatpush2.msra.mxu1 %v9818_v19 }
0x1a3c   : > { %9947 = vmatpush2.msra.mxu0 %v9816_v37  ;;  %10019 = vmatprep.subr.mxu1 %v9811_v49  ;;  %v9553_v49 = vpop.permute.xlu0 %9552 }
0x1a3d   : > { %9948 = vmatprep.subr.mxu0 %v9809_v48  ;;  %10020 = vmatpush2.msra.mxu1 %v9810_v23  ;;  %v9562_v23 = vpop.permute.xlu1 %9561 }
0x1a3e   : > { %9949 = vmatpush2.msra.mxu0 %v9808_v50  ;;  %10021 = vmatprep.subr.mxu1 %v9803_v8 }
0x1a3f   : > { %9950 = vmatprep.subr.mxu0 %v9801_v5  ;;  %10022 = vmatpush2.msra.mxu1 %v9802_v1 }
0x1a40   : > { %9951 = vmatpush2.msra.mxu0 %v9800_v63  ;;  %10023 = vmatprep.subr.mxu1 %v9795_v20 }
0x1a41   : > { %9952 = vmatprep.subr.mxu0 %v9793_v14  ;;  %10024 = vmatpush2.msra.mxu1 %v9794_v28  ;;  %v9766_v28 = vld [vmem:[#allocation12 + $0x3f0] sm:$0xff] }
0x1a42   : > { %9953 = vmatpush2.msra.mxu0 %v9792_v21  ;;  %10025 = vmatprep.subr.mxu1 %v9787_v3  ;;  %v9764_v21 = vld [vmem:[#allocation12 + $0x3e0] sm:$0xff]  ;;  %v9759_v3 = vld [vmem:[#allocation12 + $0x3b8] sm:$0xff] }
0x1a43   : > { %9954 = vmatprep.subr.mxu0 %v9785_v45  ;;  %10026 = vmatpush2.msra.mxu1 %v9786_v26  ;;  %v9757_v45 = vld [vmem:[#allocation12 + $0x3a8] sm:$0xff]  ;;  %v9758_v26 = vld [vmem:[#allocation12 + $0x3b0] sm:$0xff] }
0x1a44   : > { %9955 = vmatpush2.msra.mxu0 %v9784_v25  ;;  %10027 = vmatprep.subr.mxu1 %v9779_v40  ;;  %v9756_v25 = vld [vmem:[#allocation12 + $0x3a0] sm:$0xff]  ;;  %v9751_v40 = vld [vmem:[#allocation12 + $0x378] sm:$0xff] }
0x1a45   : > { %9956 = vmatprep.subr.mxu0 %v9777_v38  ;;  %10028 = vmatpush2.msra.mxu1 %v9778_v60  ;;  %v9749_v38 = vld [vmem:[#allocation12 + $0x368] sm:$0xff]  ;;  %v9750_v60 = vld [vmem:[#allocation12 + $0x370] sm:$0xff] }
0x1a46   : > { %9957 = vmatpush2.msra.mxu0 %v9776_v6  ;;  %10029 = vmatprep.subr.mxu1 %v9771_v61  ;;  %v9748_v6 = vld [vmem:[#allocation12 + $0x360] sm:$0xff]  ;;  %v9743_v61 = vld [vmem:[#allocation12 + $0x338] sm:$0xff] }
0x1a47   : > { %9958 = vmatprep.subr.mxu0 %v9769_v41  ;;  %10030 = vmatpush2.msra.mxu1 %v9770_v53  ;;  %v9741_v41 = vld [vmem:[#allocation12 + $0x328] sm:$0xff]  ;;  %v9742_v53 = vld [vmem:[#allocation12 + $0x330] sm:$0xff] }
0x1a48   : > { %9959 = vmatpush2.msra.mxu0 %v9768_v11  ;;  %10109 = vmatprep.subr.mxu1 %v9767_v43  ;;  %v9740_v11 = vld [vmem:[#allocation12 + $0x320] sm:$0xff]  ;;  %v9735_v43 = vld [vmem:[#allocation12 + $0x2f8] sm:$0xff] }
0x1a49   : > { %10038 = vmatprep.subr.mxu0 %v9765_v42  ;;  %v9733_v42 = vld [vmem:[#allocation12 + $0x2e8] sm:$0xff] }
0x1ab0   : > { %v8812_v44 = vpop.f32.mrf.mxu0 }
0x1ab2   : > { %v8814_v33 = vpop.f32.mrf.mxu0 }
0x1ab4   : > { %v8892_v51 = vpop.f32.mrf.mxu1 }
0x1ab5   : > { %v8893_v39 = vadd.f32 %v8892_v51, %v8812_v44  ;;  %v9732_v44 = vld [vmem:[#allocation12 + $0x2e0] sm:$0xff]  ;;  %v9725_v51 = vld [vmem:[#allocation12 + $0x2a8] sm:$0xff] }
0x1ab6   : > { %v8894_v52 = vpop.f32.mrf.mxu1 }
0x1ab7   : > { %v8895_v22 = vadd.f32 %v8894_v52, %v8814_v33  ;;  %v9734_v33 = vld [vmem:[#allocation12 + $0x2f0] sm:$0xff]  ;;  %v9724_v52 = vld [vmem:[#allocation12 + $0x2a0] sm:$0xff] }
0x1ab8   : > { %v8985_v62 = vpop.f32.mrf.mxu0 }
0x1ab9   : > { %v8990_v36 = vadd.f32 %v8985_v62, %v8893_v39  ;;  %v9727_v39 = vld [vmem:[#allocation12 + $0x2b8] sm:$0xff]  ;;  %v9726_v62 = vld [vmem:[#allocation12 + $0x2b0] sm:$0xff] }
0x1aba   : > { %v8987_v32 = vpop.f32.mrf.mxu0 }
0x1abb   : > { %v8991_v29 = vadd.f32 %v8987_v32, %v8895_v22  ;;  %v9717_v22 = vld [vmem:[#allocation12 + $0x268] sm:$0xff]  ;;  %v9716_v32 = vld [vmem:[#allocation12 + $0x260] sm:$0xff] }
0x1abc   : > { %v9080_v31 = vpop.f32.mrf.mxu1 }
0x1abd   : > { %v9085_v17 = vadd.f32 %v9080_v31, %v8990_v36  ;;  %v9162_v30 = vpop.f32.mrf.mxu0  ;;  %v9719_v36 = vld [vmem:[#allocation12 + $0x278] sm:$0xff]  ;;  %v9718_v31 = vld [vmem:[#allocation12 + $0x270] sm:$0xff] }
0x1abe   : > { %v9082_v57 = vpop.f32.mrf.mxu1 }
0x1abf   : > { %v9086_v58 = vadd.f32 %v9082_v57, %v8991_v29  ;;  %v9167_v18 = vadd.f32 %v9162_v30, %v9085_v17  ;;  %v9164_v54 = vpop.f32.mrf.mxu0  ;;  %v9709_v29 = vld [vmem:[#allocation12 + $0x228] sm:$0xff]  ;;  %v9711_v17 = vld [vmem:[#allocation12 + $0x238] sm:$0xff]  ;;  %v9708_v30 = vld [vmem:[#allocation12 + $0x220] sm:$0xff] }
0x1ac0   : > { %v9257_v56 = vpop.f32.mrf.mxu1  ;;  %v9710_v57 = vld [vmem:[#allocation12 + $0x230] sm:$0xff] }
0x1ac1   : > { %v9168_v59 = vadd.f32 %v9164_v54, %v9086_v58  ;;  %v9262_v7 = vadd.f32 %v9257_v56, %v9167_v18  ;;  %v9352_v55 = vpop.f32.mrf.mxu0  ;;  %v9701_v58 = vld [vmem:[#allocation12 + $0x1e8] sm:$0xff]  ;;  %v9703_v18 = vld [vmem:[#allocation12 + $0x1f8] sm:$0xff]  ;;  %v9700_v54 = vld [vmem:[#allocation12 + $0x1e0] sm:$0xff] }
0x1ac2   : > { %v9259_v27 = vpop.f32.mrf.mxu1  ;;  %v9702_v56 = vld [vmem:[#allocation12 + $0x1f0] sm:$0xff] }
0x1ac3   : > { %v9263_v9 = vadd.f32 %v9259_v27, %v9168_v59  ;;  %v9357_v13 = vadd.f32 %v9352_v55, %v9262_v7  ;;  %v9354_v10 = vpop.f32.mrf.mxu0  ;;  %v9693_v59 = vld [vmem:[#allocation12 + $0x1a8] sm:$0xff]  ;;  %v9695_v7 = vld [vmem:[#allocation12 + $0x1b8] sm:$0xff]  ;;  %v9692_v55 = vld [vmem:[#allocation12 + $0x1a0] sm:$0xff] }
0x1ac4   : > { %v9447_v47 = vpop.f32.mrf.mxu1  ;;  %v9694_v27 = vld [vmem:[#allocation12 + $0x1b0] sm:$0xff] }
0x1ac5   : > { %v9358_v2 = vadd.f32 %v9354_v10, %v9263_v9  ;;  %v9452_v46 = vadd.f32 %v9447_v47, %v9357_v13  ;;  %v9685_v9 = vld [vmem:[#allocation12 + $0x168] sm:$0xff]  ;;  %v9687_v13 = vld [vmem:[#allocation12 + $0x178] sm:$0xff]  ;;  %v9684_v10 = vld [vmem:[#allocation12 + $0x160] sm:$0xff] }
0x1ac6   : > { %v9449_v12 = vpop.f32.mrf.mxu1  ;;  %v9686_v47 = vld [vmem:[#allocation12 + $0x170] sm:$0xff] }
0x1ac7   : > { %v9453_v24 = vadd.f32 %v9449_v12, %v9358_v2  ;;  %v9677_v2 = vld [vmem:[#allocation12 + $0x128] sm:$0xff]  ;;  %v9679_v12 = vld [vmem:[#allocation12 + $0x138] sm:$0xff] }
0x1ac8   : > { %v9542_v16 = vpop.f32.mrf.mxu0  ;;  %v9633_v35 = vpop.f32.mrf.mxu1 }
0x1ac9   : > { %v9547_v37 = vadd.f32 %v9542_v16, %v9452_v46  ;;  %v9634_v1 = vadd.f32 %v9633_v35, %v9562_v23  ;;  %v9676_v46 = vld [vmem:[#allocation12 + $0x120] sm:$0xff]  ;;  %v9678_v16 = vld [vmem:[#allocation12 + $0x130] sm:$0xff]  ;;  %v9669_v35 = vld [vmem:[#allocation12 + $0xe8] sm:$0xff] }
0x1aca   : > { %v9544_v19 = vpop.f32.mrf.mxu0  ;;  %v9635_v48 = vpop.f32.mrf.mxu1 }
0x1acb   : > { %v9548_v50 = vadd.f32 %v9544_v19, %v9453_v24  ;;  %v9555_v5 = vadd.f32 %v9553_v49, %v9547_v37  ;;  %v9636_v63 = vadd.f32 %v9635_v48, %v9562_v23  ;;  %v9671_v24 = vld [vmem:[#allocation12 + $0xf8] sm:$0xff]  ;;  %v9668_v37 = vld [vmem:[#allocation12 + $0xe0] sm:$0xff]  ;;  %v9670_v19 = vld [vmem:[#allocation12 + $0xf0] sm:$0xff] }
0x1acc   : > { %v9661_v48 = vld [vmem:[#allocation12 + $0xa8] sm:$0xff]  ;;  %v9662_v23 = vld [vmem:[#allocation12 + $0xb0] sm:$0xff] }
0x1acd   : > { %v9556_v8 = vadd.f32 %v9553_v49, %v9548_v50  ;;  %v21544_v20 = vadd.f32 %v9634_v1, %v9555_v5  ;;  %v9663_v49 = vld [vmem:[#allocation12 + $0xb8] sm:$0xff]  ;;  %v9660_v50 = vld [vmem:[#allocation12 + $0xa0] sm:$0xff]  ;;  %v9653_v5 = vld [vmem:[#allocation12 + $0x68] sm:$0xff] }
0x1ace   : > { %v9654_v1 = vld [vmem:[#allocation12 + $0x70] sm:$0xff] }
0x1acf   : > { %v9639_v14 = vadd.f32 %v9636_v63, %v9556_v8  ;;  %v9655_v8 = vld [vmem:[#allocation12 + $0x78] sm:$0xff]  ;;  %v9652_v63 = vld [vmem:[#allocation12 + $0x60] sm:$0xff] }
0x1ad1   : > { %9960 = vmatprep.mubr.f32.mxu0 %v9639_v14  ;;  %10031 = vmatprep.mubr.f32.mxu1 %v9639_v14 }
0x1ad2   : > { %9961 = vmatmul.mubr.f32.vlgmr.msra.gmra.mxu0 %v21544_v20  ;;  %10032 = vmatmul.mubr.f32.vlgmr.msra.gmra.mxu1 %v21544_v20 }
0x1ad3   : > { %10039 = vmatpush1.msra.mxu0 %v9764_v21  ;;  %10110 = vmatpush1.msra.mxu1 %v9766_v28  ;;  %v9647_v21 = vld [vmem:[#allocation12 + $0x38] sm:$0xff]  ;;  %v9644_v28 = vld [vmem:[#allocation12 + $0x20] sm:$0xff] }
0x1ad4   : > { %10040 = vmatprep.subr.mxu0 %v9757_v45  ;;  %10102 = vmatprep.mubr.f32.mxu0 %v9639_v14  ;;  %v9646_v45 = vld [vmem:[#allocation12 + $0x30] sm:$0xff] }
0x1ad5   : > { %10111 = vmatprep.subr.mxu1 %v9759_v3  ;;  %10173 = vmatprep.mubr.f32.mxu1 %v9639_v14  ;;  %v9645_v14 = vld [vmem:[#allocation12 + $0x28] sm:$0xff] }
0x1ad6   : > { %10041 = vmatpush1.msra.mxu0 %v9756_v25  ;;  %10112 = vmatpush1.msra.mxu1 %v9758_v26  ;;  %v9893_v3 = vld [vmem:[#allocation12 + $0x7e8] sm:$0xff]  ;;  %v9895_v25 = vld [vmem:[#allocation12 + $0x7f8] sm:$0xff]  ;;  %v9892_v26 = vld [vmem:[#allocation12 + $0x7e0] sm:$0xff] }
0x1ad7   : > { %10042 = vmatprep.subr.mxu0 %v9749_v38  ;;  %10113 = vmatprep.subr.mxu1 %v9751_v40  ;;  %v9894_v38 = vld [vmem:[#allocation12 + $0x7f0] sm:$0xff]  ;;  %v9885_v40 = vld [vmem:[#allocation12 + $0x7a8] sm:$0xff] }
0x1ad8   : > { %10043 = vmatpush1.msra.mxu0 %v9748_v6  ;;  %10114 = vmatpush1.msra.mxu1 %v9750_v60  ;;  %v9887_v6 = vld [vmem:[#allocation12 + $0x7b8] sm:$0xff]  ;;  %v9884_v60 = vld [vmem:[#allocation12 + $0x7a0] sm:$0xff] }
0x1ad9   : > { %10044 = vmatprep.subr.mxu0 %v9741_v41  ;;  %10115 = vmatprep.subr.mxu1 %v9743_v61  ;;  %v9886_v41 = vld [vmem:[#allocation12 + $0x7b0] sm:$0xff]  ;;  %v9877_v61 = vld [vmem:[#allocation12 + $0x768] sm:$0xff] }
0x1ada   : > { %10045 = vmatpush1.msra.mxu0 %v9740_v11  ;;  %10116 = vmatpush1.msra.mxu1 %v9742_v53  ;;  %v9879_v11 = vld [vmem:[#allocation12 + $0x778] sm:$0xff]  ;;  %v9876_v53 = vld [vmem:[#allocation12 + $0x760] sm:$0xff] }
0x1adb   : > { %10046 = vmatprep.subr.mxu0 %v9733_v42  ;;  %10117 = vmatprep.subr.mxu1 %v9735_v43  ;;  %v9878_v42 = vld [vmem:[#allocation12 + $0x770] sm:$0xff]  ;;  %v9869_v43 = vld [vmem:[#allocation12 + $0x728] sm:$0xff] }
0x1adc   : > { %10047 = vmatpush1.msra.mxu0 %v9732_v44  ;;  %10118 = vmatpush1.msra.mxu1 %v9734_v33  ;;  %v9871_v44 = vld [vmem:[#allocation12 + $0x738] sm:$0xff]  ;;  %v9868_v33 = vld [vmem:[#allocation12 + $0x720] sm:$0xff] }
0x1add   : > { %10048 = vmatprep.subr.mxu0 %v9725_v51  ;;  %10119 = vmatprep.subr.mxu1 %v9727_v39  ;;  %v9870_v51 = vld [vmem:[#allocation12 + $0x730] sm:$0xff]  ;;  %v9861_v39 = vld [vmem:[#allocation12 + $0x6e8] sm:$0xff] }
0x1ade   : > { %10049 = vmatpush1.msra.mxu0 %v9724_v52  ;;  %10120 = vmatpush1.msra.mxu1 %v9726_v62  ;;  %v9863_v52 = vld [vmem:[#allocation12 + $0x6f8] sm:$0xff]  ;;  %v9860_v62 = vld [vmem:[#allocation12 + $0x6e0] sm:$0xff] }
0x1adf   : > { %10050 = vmatprep.subr.mxu0 %v9717_v22  ;;  %10121 = vmatprep.subr.mxu1 %v9719_v36  ;;  %v9862_v22 = vld [vmem:[#allocation12 + $0x6f0] sm:$0xff]  ;;  %v9853_v36 = vld [vmem:[#allocation12 + $0x6a8] sm:$0xff] }
0x1ae0   : > { %10051 = vmatpush1.msra.mxu0 %v9716_v32  ;;  %10122 = vmatpush1.msra.mxu1 %v9718_v31  ;;  %v9855_v32 = vld [vmem:[#allocation12 + $0x6b8] sm:$0xff]  ;;  %v9852_v31 = vld [vmem:[#allocation12 + $0x6a0] sm:$0xff] }
0x1ae1   : > { %10052 = vmatprep.subr.mxu0 %v9709_v29  ;;  %10123 = vmatprep.subr.mxu1 %v9711_v17  ;;  %v9854_v29 = vld [vmem:[#allocation12 + $0x6b0] sm:$0xff]  ;;  %v9845_v17 = vld [vmem:[#allocation12 + $0x668] sm:$0xff] }
0x1ae2   : > { %10053 = vmatpush1.msra.mxu0 %v9708_v30  ;;  %10124 = vmatpush1.msra.mxu1 %v9710_v57  ;;  %v9847_v30 = vld [vmem:[#allocation12 + $0x678] sm:$0xff]  ;;  %v9844_v57 = vld [vmem:[#allocation12 + $0x660] sm:$0xff] }
0x1ae3   : > { %10054 = vmatprep.subr.mxu0 %v9701_v58  ;;  %10125 = vmatprep.subr.mxu1 %v9703_v18  ;;  %v9846_v58 = vld [vmem:[#allocation12 + $0x670] sm:$0xff]  ;;  %v9837_v18 = vld [vmem:[#allocation12 + $0x628] sm:$0xff] }
0x1ae4   : > { %10055 = vmatpush1.msra.mxu0 %v9700_v54  ;;  %10126 = vmatpush1.msra.mxu1 %v9702_v56  ;;  %v9839_v54 = vld [vmem:[#allocation12 + $0x638] sm:$0xff]  ;;  %v9836_v56 = vld [vmem:[#allocation12 + $0x620] sm:$0xff] }
0x1ae5   : > { %10056 = vmatprep.subr.mxu0 %v9693_v59  ;;  %10127 = vmatprep.subr.mxu1 %v9695_v7  ;;  %v9838_v59 = vld [vmem:[#allocation12 + $0x630] sm:$0xff]  ;;  %v9829_v7 = vld [vmem:[#allocation12 + $0x5e8] sm:$0xff] }
0x1ae6   : > { %10057 = vmatpush1.msra.mxu0 %v9692_v55  ;;  %10128 = vmatpush1.msra.mxu1 %v9694_v27  ;;  %v9831_v55 = vld [vmem:[#allocation12 + $0x5f8] sm:$0xff]  ;;  %v9828_v27 = vld [vmem:[#allocation12 + $0x5e0] sm:$0xff] }
0x1ae7   : > { %10058 = vmatprep.subr.mxu0 %v9685_v9  ;;  %10129 = vmatprep.subr.mxu1 %v9687_v13  ;;  %v9830_v9 = vld [vmem:[#allocation12 + $0x5f0] sm:$0xff]  ;;  %v9821_v13 = vld [vmem:[#allocation12 + $0x5a8] sm:$0xff] }
0x1ae8   : > { %10059 = vmatpush1.msra.mxu0 %v9684_v10  ;;  %10130 = vmatpush1.msra.mxu1 %v9686_v47  ;;  %v9823_v10 = vld [vmem:[#allocation12 + $0x5b8] sm:$0xff]  ;;  %v9820_v47 = vld [vmem:[#allocation12 + $0x5a0] sm:$0xff] }
0x1ae9   : > { %10060 = vmatprep.subr.mxu0 %v9677_v2  ;;  %10131 = vmatprep.subr.mxu1 %v9679_v12  ;;  %v9822_v2 = vld [vmem:[#allocation12 + $0x5b0] sm:$0xff]  ;;  %v9813_v12 = vld [vmem:[#allocation12 + $0x568] sm:$0xff] }
0x1aea   : > { %10061 = vmatpush1.msra.mxu0 %v9676_v46  ;;  %10132 = vmatpush1.msra.mxu1 %v9678_v16  ;;  %v9815_v46 = vld [vmem:[#allocation12 + $0x578] sm:$0xff]  ;;  %v9812_v16 = vld [vmem:[#allocation12 + $0x560] sm:$0xff] }
0x1aeb   : > { %10062 = vmatprep.subr.mxu0 %v9669_v35  ;;  %10133 = vmatprep.subr.mxu1 %v9671_v24  ;;  %v9814_v35 = vld [vmem:[#allocation12 + $0x570] sm:$0xff]  ;;  %v9805_v24 = vld [vmem:[#allocation12 + $0x528] sm:$0xff] }
0x1aec   : > { %10063 = vmatpush1.msra.mxu0 %v9668_v37  ;;  %10134 = vmatpush1.msra.mxu1 %v9670_v19  ;;  %v9807_v37 = vld [vmem:[#allocation12 + $0x538] sm:$0xff]  ;;  %v9804_v19 = vld [vmem:[#allocation12 + $0x520] sm:$0xff] }
0x1aed   : > { %10064 = vmatprep.subr.mxu0 %v9661_v48  ;;  %10135 = vmatprep.subr.mxu1 %v9663_v49  ;;  %v9806_v48 = vld [vmem:[#allocation12 + $0x530] sm:$0xff]  ;;  %v9797_v49 = vld [vmem:[#allocation12 + $0x4e8] sm:$0xff] }
0x1aee   : > { %10065 = vmatpush1.msra.mxu0 %v9660_v50  ;;  %10136 = vmatpush1.msra.mxu1 %v9662_v23  ;;  %v9799_v50 = vld [vmem:[#allocation12 + $0x4f8] sm:$0xff]  ;;  %v9796_v23 = vld [vmem:[#allocation12 + $0x4e0] sm:$0xff] }
0x1aef   : > { %10066 = vmatprep.subr.mxu0 %v9653_v5  ;;  %10137 = vmatprep.subr.mxu1 %v9655_v8  ;;  %v9798_v5 = vld [vmem:[#allocation12 + $0x4f0] sm:$0xff]  ;;  %v9789_v8 = vld [vmem:[#allocation12 + $0x4a8] sm:$0xff] }
0x1af0   : > { %10067 = vmatpush1.msra.mxu0 %v9652_v63  ;;  %10138 = vmatpush1.msra.mxu1 %v9654_v1  ;;  %v9791_v63 = vld [vmem:[#allocation12 + $0x4b8] sm:$0xff]  ;;  %v9788_v1 = vld [vmem:[#allocation12 + $0x4a0] sm:$0xff] }
0x1af1   : > { %10068 = vmatprep.subr.mxu0 %v9645_v14  ;;  %10139 = vmatprep.subr.mxu1 %v9647_v21  ;;  %v9790_v14 = vld [vmem:[#allocation12 + $0x4b0] sm:$0xff]  ;;  %v9781_v21 = vld [vmem:[#allocation12 + $0x468] sm:$0xff] }
0x1af2   : > { %10069 = vmatpush1.msra.mxu0 %v9644_v28  ;;  %10140 = vmatpush1.msra.mxu1 %v9646_v45  ;;  %v9783_v28 = vld [vmem:[#allocation12 + $0x478] sm:$0xff]  ;;  %v9780_v45 = vld [vmem:[#allocation12 + $0x460] sm:$0xff] }
0x1af3   : > { %10070 = vmatprep.subr.mxu0 %v9893_v3  ;;  %10141 = vmatprep.subr.mxu1 %v9895_v25  ;;  %v9782_v3 = vld [vmem:[#allocation12 + $0x470] sm:$0xff]  ;;  %v9773_v25 = vld [vmem:[#allocation12 + $0x428] sm:$0xff] }
0x1af4   : > { %10071 = vmatpush2.msra.mxu0 %v9892_v26  ;;  %10142 = vmatpush2.msra.mxu1 %v9894_v38  ;;  %v9775_v26 = vld [vmem:[#allocation12 + $0x438] sm:$0xff]  ;;  %v9772_v38 = vld [vmem:[#allocation12 + $0x420] sm:$0xff] }
0x1af5   : > { %10072 = vmatprep.subr.mxu0 %v9885_v40  ;;  %10143 = vmatprep.subr.mxu1 %v9887_v6  ;;  %v9774_v40 = vld [vmem:[#allocation12 + $0x430] sm:$0xff] }
0x1af6   : > { %10073 = vmatpush2.msra.mxu0 %v9884_v60  ;;  %10144 = vmatpush2.msra.mxu1 %v9886_v41 }
0x1af7   : > { %10074 = vmatprep.subr.mxu0 %v9877_v61  ;;  %10145 = vmatprep.subr.mxu1 %v9879_v11 }
0x1af8   : > { %10075 = vmatpush2.msra.mxu0 %v9876_v53  ;;  %10146 = vmatpush2.msra.mxu1 %v9878_v42 }
0x1af9   : > { %10076 = vmatprep.subr.mxu0 %v9869_v43  ;;  %10147 = vmatprep.subr.mxu1 %v9871_v44 }
0x1afa   : > { %10077 = vmatpush2.msra.mxu0 %v9868_v33  ;;  %10148 = vmatpush2.msra.mxu1 %v9870_v51 }
0x1afb   : > { %10078 = vmatprep.subr.mxu0 %v9861_v39  ;;  %10149 = vmatprep.subr.mxu1 %v9863_v52 }
0x1afc   : > { %10079 = vmatpush2.msra.mxu0 %v9860_v62  ;;  %10150 = vmatpush2.msra.mxu1 %v9862_v22  ;;  %v21685_v62 = vsub.s32 3, %v23324_v15  ;;  %v21692_v22 = vld [vmem:[%s20015_s6 + $0x8] sm:$0xff] }
0x1afd   : > { %10080 = vmatprep.subr.mxu0 %v9853_v36  ;;  %10151 = vmatprep.subr.mxu1 %v9855_v32 }
0x1afe   : > { %10081 = vmatpush2.msra.mxu0 %v9852_v31  ;;  %10152 = vmatpush2.msra.mxu1 %v9854_v29  ;;  %v21700_v31 = vrot.slane %v21692_v22, %v21685_v62 }
0x1aff   : > { %10082 = vmatprep.subr.mxu0 %v9845_v17  ;;  %10153 = vmatprep.subr.mxu1 %v9847_v30 }
0x1b00   : > { %10083 = vmatpush2.msra.mxu0 %v9844_v57  ;;  %10154 = vmatpush2.msra.mxu1 %v9846_v58 }
0x1b01   : > { %10084 = vmatprep.subr.mxu0 %v9837_v18  ;;  %10155 = vmatprep.subr.mxu1 %v9839_v54  ;;  %v21718_v18 = vsub.s32 2, %v23324_v15 }
0x1b02   : > { %10085 = vmatpush2.msra.mxu0 %v9836_v56  ;;  %10156 = vmatpush2.msra.mxu1 %v9838_v59  ;;  %v13728_v56 = vld [vmem:[%s23346_s15] sm:$0xff]  ;;  %v21729_v59 = vrot.slane %v21692_v22, %v21325_v4  ;;  %s23410_s15 = smov 31  }
0x1b03   : > { %10086 = vmatprep.subr.mxu0 %v9829_v7  ;;  %10157 = vmatprep.subr.mxu1 %v9831_v55  ;;  %v21733_v7 = vrot.slane %v21692_v22, %v21718_v18 }
0x1b04   : > { %10087 = vmatpush2.msra.mxu0 %v9828_v27  ;;  %10158 = vmatpush2.msra.mxu1 %v9830_v9 }
0x1b05   : > { %10088 = vmatprep.subr.mxu0 %v9821_v13  ;;  %10159 = vmatprep.subr.mxu1 %v9823_v10 }
0x1b06   : > { %10089 = vmatpush2.msra.mxu0 %v9820_v47  ;;  %10160 = vmatpush2.msra.mxu1 %v9822_v2 }
0x1b07   : > { %10090 = vmatprep.subr.mxu0 %v9813_v12  ;;  %10161 = vmatprep.subr.mxu1 %v9815_v46 }
0x1b08   : > { %10091 = vmatpush2.msra.mxu0 %v9812_v16  ;;  %10162 = vmatpush2.msra.mxu1 %v9814_v35 }
0x1b09   : > { %10092 = vmatprep.subr.mxu0 %v9805_v24  ;;  %10163 = vmatprep.subr.mxu1 %v9807_v37 }
0x1b0a   : > { %10093 = vmatpush2.msra.mxu0 %v9804_v19  ;;  %10164 = vmatpush2.msra.mxu1 %v9806_v48 }
0x1b0b   : > { %10094 = vmatprep.subr.mxu0 %v9797_v49  ;;  %10165 = vmatprep.subr.mxu1 %v9799_v50  ;;  %v21773_v50 = vsub.s32 7, %v23324_v15 }
0x1b0c   : > { %10095 = vmatpush2.msra.mxu0 %v9796_v23  ;;  %10166 = vmatpush2.msra.mxu1 %v9798_v5 }
0x1b0d   : > { %10096 = vmatprep.subr.mxu0 %v9789_v8  ;;  %10167 = vmatprep.subr.mxu1 %v9791_v63  ;;  %v21779_v8 = vrot.slane %v21692_v22, %v23326_v34  ;;  %v21783_v63 = vrot.slane %v21692_v22, %v21773_v50 }
0x1b0e   : > { %10097 = vmatpush2.msra.mxu0 %v9788_v1  ;;  %10168 = vmatpush2.msra.mxu1 %v9790_v14  ;;  %v21786_v1 = vsub.s32 5, %v23324_v15  ;;  %v21789_v14 = vsub.s32 6, %v23324_v15 }
0x1b0f   : > { %10098 = vmatprep.subr.mxu0 %v9781_v21  ;;  %10169 = vmatprep.subr.mxu1 %v9783_v28  ;;  %23348 = vst [vmem:[#allocation59_spill] sm:$0xff] %v21779_v8  ;;  %23349 = vst [vmem:[#allocation60_spill] sm:$0xff] %v21783_v63  ;;  %v21792_v21 = vsub.s32 4, %v23324_v15  ;;  %v10222_v28 = vld [vmem:[%s20015_s6] sm:$0xff] }
0x1b10   : > { %10099 = vmatpush2.msra.mxu0 %v9780_v45  ;;  %10170 = vmatpush2.msra.mxu1 %v9782_v3  ;;  %v21806_v15 = vrot.slane %v21692_v22, %v21789_v14 }
0x1b11   : > { %10100 = vmatprep.subr.mxu0 %v9773_v25  ;;  %10171 = vmatprep.subr.mxu1 %v9775_v26 }
0x1b12   : > { %10101 = vmatpush2.msra.mxu0 %v9772_v38  ;;  %10172 = vmatpush2.msra.mxu1 %v9774_v40  ;;  %23351 = vst [vmem:[#allocation62_spill] sm:$0xff] %v21806_v15 }
0x1b13   : > { %10103 = vmatmul.mubr.f32.vlgmr.msra.gmra.mxu0 %v21544_v20  ;;  %10174 = vmatmul.mubr.f32.vlgmr.msra.gmra.mxu1 %v21544_v20 }
0x1b14   : > { %10521 = vmatprep.mubr.f32.mxu1 %v23162_v0  ;;  %10450 = vmatprep.mubr.f32.mxu0 %v23162_v0 }
0x1b92   : > { %v21552_v6 = vpop.f32.mrf.mxu0  ;;  %v21554_v60 = vpop.f32.mrf.mxu1 }
0x1b93   : > { %23338 = vst [vmem:[#allocation51_spill] sm:$0xff] %v21552_v6  ;;  %23339 = vst [vmem:[#allocation52_spill] sm:$0xff] %v21554_v60  ;;  %10280 = vrot.lane.b32.xlu0 %v21554_v60, %s19826_s9  ;;  %10276 = vrot.lane.b32.xlu1 %v21552_v6, %s19826_s9 }
0x1b94   : > { %v21572_v20 = vpop.f32.mrf.mxu1  ;;  %v21586_v41 = vpop.f32.mrf.mxu0 }
0x1b95   : > { %23340 = vst [vmem:[#allocation53_spill] sm:$0xff] %v21572_v20  ;;  %23341 = vst [vmem:[#allocation54_spill] sm:$0xff] %v21586_v41 }
0x1b97   : > { %10195 = vrot.lane.b32.xlu0 %v21554_v60, %s19827_s2  ;;  %10191 = vrot.lane.b32.xlu1 %v21552_v6, %s19827_s2 }
0x1b9b   : > { %10988 = vrot.lane.b32.xlu0 %v21554_v60, %s23160_s7  ;;  %10984 = vrot.lane.b32.xlu1 %v21552_v6, %s23160_s7 }
0x1b9f   : > { %11394 = vrot.lane.b32.xlu0 %v21554_v60, %s23332_s4  ;;  %11390 = vrot.lane.b32.xlu1 %v21552_v6, %s23332_s4 }
0x1ba3   : > { %12109 = vrot.lane.b32.xlu0 %v21554_v60, %s19818_s13  ;;  %10282 = vrot.lane.b32.xlu1 %v21572_v20, %s19826_s9 }
0x1ba7   : > { %12105 = vrot.lane.b32.xlu0 %v21552_v6, %s19818_s13  ;;  %10197 = vrot.lane.b32.xlu1 %v21572_v20, %s19827_s2 }
0x1bab   : > { %12514 = vrot.lane.b32.xlu0 %v21554_v60, %s19829_s22  ;;  %10990 = vrot.lane.b32.xlu1 %v21572_v20, %s23160_s7 }
0x1baf   : > { %11396 = vrot.lane.b32.xlu1 %v21572_v20, %s23332_s4  ;;  %10278 = vrot.lane.b32.xlu0 %v21586_v41, %s19826_s9 }
0x1bb3   : > { %12107 = vrot.lane.b32.xlu1 %v21586_v41, %s19818_s13  ;;  %10193 = vrot.lane.b32.xlu0 %v21586_v41, %s19827_s2 }
0x1bb7   : > { %12512 = vrot.lane.b32.xlu1 %v21586_v41, %s19829_s22  ;;  %10986 = vrot.lane.b32.xlu0 %v21586_v41, %s23160_s7 }
0x1bbb   : > { %11392 = vrot.lane.b32.xlu0 %v21586_v41, %s23332_s4 }
0x1bbf   : > { %12111 = vrot.lane.b32.xlu0 %v21572_v20, %s19818_s13 }
0x1bc3   : > { %12516 = vrot.lane.b32.xlu0 %v21572_v20, %s19829_s22 }
0x1bd3   : > { %v21606_v61 = vpop.f32.mrf.mxu1  ;;  %v21612_v11 = vpop.f32.mrf.mxu0 }
0x1bd4   : > { %23342 = vst [vmem:[#allocation55_spill] sm:$0xff] %v21606_v61  ;;  %10288 = vrot.lane.b32.xlu1 %v21606_v61, %s19826_s9  ;;  %12117 = vrot.lane.b32.xlu0 %v21606_v61, %s19818_s13  ;;  %23343 = vst [vmem:[#allocation56_spill] sm:$0xff] %v21612_v11 }
0x1bd5   : > { %v21614_v53 = vpop.f32.mrf.mxu1  ;;  %v21620_v42 = vpop.f32.mrf.mxu0 }
0x1bd6   : > { %23344 = vst [vmem:[#allocation57_spill] sm:$0xff] %v21614_v53  ;;  %23345 = vst [vmem:[#allocation58_spill] sm:$0xff] %v21620_v42 }
0x1bd8   : > { %10273 = vrot.lane.b32.xlu0 %v21614_v53, %s19826_s9  ;;  %10284 = vrot.lane.b32.xlu1 %v21612_v11, %s19826_s9 }
0x1bdc   : > { %10203 = vrot.lane.b32.xlu1 %v21606_v61, %s19827_s2  ;;  %10286 = vrot.lane.b32.xlu0 %v21620_v42, %s19826_s9 }
0x1be0   : > { %10199 = vrot.lane.b32.xlu1 %v21612_v11, %s19827_s2  ;;  %10181 = vrot.lane.b32.xlu0 %v21614_v53, %s19827_s2 }
0x1be4   : > { %10996 = vrot.lane.b32.xlu1 %v21606_v61, %s23160_s7  ;;  %10201 = vrot.lane.b32.xlu0 %v21620_v42, %s19827_s2 }
0x1be8   : > { %10992 = vrot.lane.b32.xlu1 %v21612_v11, %s23160_s7  ;;  %10981 = vrot.lane.b32.xlu0 %v21614_v53, %s23160_s7 }
0x1bec   : > { %11402 = vrot.lane.b32.xlu1 %v21606_v61, %s23332_s4  ;;  %10994 = vrot.lane.b32.xlu0 %v21620_v42, %s23160_s7  ;;  %s23347_s7 = sld [smem:[#allocation41_spill]] }
0x1bf0   : > { %11398 = vrot.lane.b32.xlu1 %v21612_v11, %s23332_s4  ;;  %11387 = vrot.lane.b32.xlu0 %v21614_v53, %s23332_s4 }
0x1bf2   : > { %v21743_v47 = vld [vmem:[%s23347_s7 + $0x8] sm:$0xff] }
0x1bf4   : > { %12113 = vrot.lane.b32.xlu1 %v21612_v11, %s19818_s13  ;;  %11400 = vrot.lane.b32.xlu0 %v21620_v42, %s23332_s4 }
0x1bf8   : > { %12518 = vrot.lane.b32.xlu1 %v21612_v11, %s19829_s22  ;;  %12510 = vrot.lane.b32.xlu0 %v21552_v6, %s19829_s22 }
0x1bfc   : > { %12924 = vrot.lane.b32.xlu1 %v21612_v11, %s19830_s5  ;;  %12522 = vrot.lane.b32.xlu0 %v21606_v61, %s19829_s22 }
0x1c00   : > { %12918 = vrot.lane.b32.xlu1 %v21586_v41, %s19830_s5  ;;  %12922 = vrot.lane.b32.xlu0 %v21572_v20, %s19830_s5 }
0x1c04   : > { %13330 = vrot.lane.b32.xlu1 %v21612_v11, %s19831_s28  ;;  %12920 = vrot.lane.b32.xlu0 %v21554_v60, %s19830_s5 }
0x1c05   : > { %v10281_v43 = vpop.permute.xlu0 %10280  ;;  %v21666_v44 = vpop.permute.xlu1 %10276 }
0x1c08   : > { %13324 = vrot.lane.b32.xlu1 %v21586_v41, %s19831_s28  ;;  %12916 = vrot.lane.b32.xlu0 %v21552_v6, %s19830_s5 }
0x1c09   : > { %v21672_v33 = vpop.permute.xlu0 %10195  ;;  %v21674_v51 = vpop.permute.xlu1 %10191 }
0x1c0c   : > { %12119 = vrot.lane.b32.xlu1 %v21614_v53, %s19818_s13  ;;  %12928 = vrot.lane.b32.xlu0 %v21606_v61, %s19830_s5 }
0x1c0d   : > { %v21680_v39 = vpop.permute.xlu0 %10988  ;;  %v21682_v52 = vpop.permute.xlu1 %10984 }
0x1c10   : > { %12115 = vrot.lane.b32.xlu1 %v21620_v42, %s19818_s13  ;;  %13328 = vrot.lane.b32.xlu0 %v21572_v20, %s19831_s28 }
0x1c11   : > { %v21694_v36 = vpop.permute.xlu0 %11394  ;;  %v21696_v32 = vpop.permute.xlu1 %11390 }
0x1c14   : > { %12524 = vrot.lane.b32.xlu1 %v21614_v53, %s19829_s22  ;;  %13326 = vrot.lane.b32.xlu0 %v21554_v60, %s19831_s28 }
0x1c15   : > { %v21706_v29 = vpop.permute.xlu0 %12109  ;;  %v10283_v17 = vpop.permute.xlu1 %10282 }
0x1c16   : > { %v10292_v30 = vsel %vm1269_vm1, %v10281_v43, %v10283_v17 }
0x1c17   : > { %v10352_v57 = vmul.f32 %v21700_v31, %v10292_v30  ;;  %v21809_v30 = vrot.slane %v10222_v28, %v21685_v62 }
0x1c18   : > { %12520 = vrot.lane.b32.xlu1 %v21620_v42, %s19829_s22  ;;  %13322 = vrot.lane.b32.xlu0 %v21552_v6, %s19831_s28 }
0x1c19   : > { %v21714_v58 = vpop.permute.xlu0 %12105  ;;  %17954 = vmatprep.subr.msk.mxu1 %vm1856_vm10, %v10352_v57  ;;  %v21754_v2 = vpop.permute.xlu1 %10197  ;;  %23352 = vst [vmem:[#allocation50_spill] sm:$0xff] %v21809_v30  ;;  %v21812_v57 = vrot.slane %v10222_v28, %v21325_v4 }
0x1c1b   : > { %23353 = vst [vmem:[#allocation48_spill] sm:$0xff] %v21812_v57 }
0x1c1c   : > { %12930 = vrot.lane.b32.xlu1 %v21614_v53, %s19830_s5  ;;  %13334 = vrot.lane.b32.xlu0 %v21606_v61, %s19831_s28 }
0x1c1d   : > { %v21724_v54 = vpop.permute.xlu0 %12514  ;;  %v21756_v46 = vpop.permute.xlu1 %10990 }
0x1c20   : > { %12926 = vrot.lane.b32.xlu1 %v21620_v42, %s19830_s5  ;;  %13731 = vperm.xlu0 %19449, %v13728_v56   ;;  %v21819_v56 = vld [vmem:[%s20015_s6 + $0x10] sm:$0xff] }
0x1c21   : > { %v10279_v55 = vpop.permute.xlu0 %10278  ;;  %v21760_v35 = vpop.permute.xlu1 %11396 }
0x1c22   : > { %v10290_v27 = vsel %vm1269_vm1, %v21666_v44, %v10279_v55  ;;  %v10291_v9 = vsel %vm1269_vm1, %v10279_v55, %v10281_v43  ;;  %v21802_v43 = vrot.slane %v21692_v22, %v21786_v1  ;;  %v21822_v55 = vrot.slane %v10222_v28, %v21718_v18 }
0x1c23   : > { %v10350_v13 = vmul.f32 %v21729_v59, %v10290_v27  ;;  %v10351_v10 = vmul.f32 %v21733_v7, %v10291_v9 }
0x1c24   : > { %13336 = vrot.lane.b32.xlu1 %v21614_v53, %s19831_s28  ;;  %23350 = vst [vmem:[#allocation61_spill] sm:$0xff] %v21802_v43  ;;  %23355 = vst [vmem:[#allocation63_spill] sm:$0xff] %v21822_v55 }
0x1c25   : > { %17951 = vmatprep.subr.msk.mxu0 %vm1856_vm10, %v10350_v13  ;;  %17955 = vmatpush1.msk.msra.mxu1 %vm1856_vm10, %v10351_v10  ;;  %v10194_v12 = vpop.permute.xlu0 %10193  ;;  %v21764_v37 = vpop.permute.xlu1 %12107  ;;  %v21828_v10 = vrot.slane %v10222_v28, %v23326_v34 }
0x1c26   : > { %17956 = vmatmul.mubr.msk.f32.vlgmr.msra.gmra.mxu1 %vm1849_vm9, %v21743_v47 }
0x1c27   : > { %10663 = vmatprep.mubr.f32.mxu1 %v23162_v0  ;;  %23356 = vst [vmem:[#allocation64_spill] sm:$0xff] %v21828_v10  ;;  %v21844_v0 = vrot.slane %v10222_v28, %v21773_v50 }
0x1c28   : > { %13332 = vrot.lane.b32.xlu1 %v21620_v42, %s19831_s28 }
0x1c29   : > { %v21758_v16 = vpop.permute.xlu0 %10986  ;;  %v21768_v48 = vpop.permute.xlu1 %12512  ;;  %23357 = vst [vmem:[#allocation65_spill] sm:$0xff] %v21844_v0 }
0x1c2d   : > { %v21762_v24 = vpop.permute.xlu0 %11392 }
0x1c31   : > { %v21766_v19 = vpop.permute.xlu0 %12111 }
0x1c35   : > { %v21770_v49 = vpop.permute.xlu0 %12516 }
0x1c46   : > { %v10289_v23 = vpop.permute.xlu1 %10288  ;;  %v21775_v5 = vpop.permute.xlu0 %12117 }
0x1c4a   : > { %v10274_v45 = vpop.permute.xlu0 %10273  ;;  %v10285_v3 = vpop.permute.xlu1 %10284 }
0x1c4b   : > { %v10296_v25 = vsel %vm1269_vm1, %v10289_v23, %v10274_v45  ;;  %v10305_v26 = vsel %vm1269_vm1, %v10274_v45, %v21666_v44  ;;  %v21816_v44 = vrot.slane %v21692_v22, %v21792_v21  ;;  %v10293_v27 = vsel %vm1269_vm1, %v10283_v17, %v10285_v3 }
0x1c4c   : > { %v10349_v38 = vmul.f32 %v21779_v8, %v10305_v26  ;;  %v10356_v40 = vmul.f32 %v21783_v63, %v10296_v25  ;;  %v10208_v22 = vsel %vm10205_vm8, %v21672_v33, %v21754_v2  ;;  %v10206_v45 = vsel %vm10205_vm8, %v21674_v51, %v10194_v12 }
0x1c4d   : > { %23354 = vst [vmem:[#allocation49_spill] sm:$0xff] %v21816_v44  ;;  %v10207_v26 = vsel %vm10205_vm8, %v10194_v12, %v21672_v33  ;;  %v23358_v63 = vmov 0.0   ;;  %v10267_v33 = vmul.f32 %v21809_v30, %v10208_v22  ;;  %v10265_v12 = vmul.f32 %v21812_v57, %v10206_v45 }
0x1c4e   : > { %17952 = vmatpush1.msk.msra.mxu0 %vm1856_vm10, %v10349_v38  ;;  %17960 = vmatprep.subr.msk.mxu1 %vm1856_vm10, %v10356_v40  ;;  %v10204_v9 = vpop.permute.xlu1 %10203  ;;  %v10287_v13 = vpop.permute.xlu0 %10286 }
0x1c4f   : > { %v10294_v25 = vsel %vm1269_vm1, %v10285_v3, %v10287_v13  ;;  %v10295_v17 = vsel %vm1269_vm1, %v10287_v13, %v10289_v23  ;;  %17953 = vmatmul.mubr.msk.f32.vlgmr.msra.gmra.mxu0 %vm1849_vm9, %v21743_v47  ;;  %v21849_v3 = vrot.slane %v21819_v56, %v21685_v62  ;;  %v21853_v23 = vrot.slane %v21819_v56, %v21325_v4 }
0x1c50   : > { %v10354_v38 = vmul.f32 %v21802_v43, %v10294_v25  ;;  %v10355_v40 = vmul.f32 %v21806_v15, %v10295_v17  ;;  %10592 = vmatprep.mubr.f32.mxu0 %v23358_v63  ;;  %v10353_v13 = vmul.f32 %v21816_v44, %v10293_v27  ;;  %v21861_v15 = vrot.slane %v10222_v28, %v21786_v1 }
0x1c51   : > { %23359 = vst [vmem:[#allocation66_spill] sm:$0xff] %v21849_v3  ;;  %23360 = vst [vmem:[#allocation67_spill] sm:$0xff] %v21853_v23  ;;  %v10266_v43 = vmul.f32 %v21822_v55, %v10207_v26  ;;  %v21876_v26 = vrot.slane %v10222_v28, %v21789_v14 }
0x1c52   : > { %v10200_v25 = vpop.permute.xlu1 %10199  ;;  %17957 = vmatprep.subr.msk.mxu0 %vm1856_vm10, %v10354_v38  ;;  %17961 = vmatpush1.msk.msra.mxu1 %vm1856_vm10, %v10355_v40  ;;  %v10182_v17 = vpop.permute.xlu0 %10181  ;;  %23361 = vst [vmem:[#allocation68_spill] sm:$0xff] %v21861_v15  ;;  %v21883_v38 = vrot.slane %v10222_v28, %v21792_v21  ;;  %v21890_v40 = vrot.slane %v21819_v56, %v23326_v34 }
0x1c53   : > { %v10212_v8 = vsel %vm10205_vm8, %v10204_v9, %v10182_v17  ;;  %v10221_v27 = vsel %vm10205_vm8, %v10182_v17, %v21674_v51  ;;  %17958 = vmatpush1.msk.msra.mxu0 %vm1856_vm10, %v10353_v13  ;;  %17962 = vmatmul.mubr.msk.f32.vlgmr.msra.gmra.mxu1 %vm1849_vm9, %v21743_v47  ;;  %23362 = vst [vmem:[#allocation69_spill] sm:$0xff] %v21876_v26  ;;  %v21896_v13 = vld [vmem:[%s20015_s6 + $0x18] sm:$0xff] }
0x1c54   : > { %v10264_v22 = vmul.f32 %v21828_v10, %v10221_v27  ;;  %v10271_v45 = vmul.f32 %v21844_v0, %v10212_v8  ;;  %17966 = vmatprep.subr.msk.mxu1 %vm1856_vm10, %v10267_v33  ;;  %17959 = vmatmul.mubr.msk.f32.vlgmr.msra.gmra.mxu0 %vm1849_vm9, %v21743_v47  ;;  %v21880_v51 = vrot.slane %v21819_v56, %v21718_v18  ;;  %v10272_v8 = vld [vmem:[%s23347_s7] sm:$0xff] }
0x1c55   : > { %23364 = vst [vmem:[#allocation71_spill] sm:$0xff] %v21883_v38  ;;  %17963 = vmatprep.subr.msk.mxu0 %vm1856_vm10, %v10265_v12  ;;  %17967 = vmatpush1.msk.msra.mxu1 %vm1856_vm10, %v10266_v43  ;;  %23365 = vst [vmem:[#allocation72_spill] sm:$0xff] %v21890_v40  ;;  %v11001_v47 = vsel %vm10998_vm15, %v21680_v39, %v21756_v46  ;;  %v10209_v33 = vsel %vm10205_vm8, %v21754_v2, %v10200_v25 }
0x1c56   : > { %23363 = vst [vmem:[#allocation70_spill] sm:$0xff] %v21880_v51  ;;  %v10997_v28 = vpop.permute.xlu1 %10996  ;;  %17964 = vmatpush1.msk.msra.mxu0 %vm1856_vm10, %v10264_v22  ;;  %10832 = vmatprep.mubr.f32.mxu1 %v23358_v63  ;;  %v10202_v43 = vpop.permute.xlu0 %10201  ;;  %v21904_v12 = vrot.slane %v21819_v56, %v21773_v50  ;;  %v10999_v17 = vsel %vm10998_vm15, %v21682_v52, %v21758_v16 }
0x1c57   : > { %17972 = vmatprep.subr.msk.mxu1 %vm1856_vm10, %v10271_v45  ;;  %v10210_v27 = vsel %vm10205_vm8, %v10200_v25, %v10202_v43  ;;  %v10211_v2 = vsel %vm10205_vm8, %v10202_v43, %v10204_v9  ;;  %10761 = vmatprep.mubr.f32.mxu0 %v23358_v63  ;;  %v11000_v22 = vsel %vm10998_vm15, %v21758_v16, %v21680_v39 }
0x1c58   : > { %23366 = vst [vmem:[#allocation73_spill] sm:$0xff] %v21904_v12  ;;  %v10269_v0 = vmul.f32 %v21861_v15, %v10210_v27  ;;  %v10270_v10 = vmul.f32 %v21876_v26, %v10211_v2  ;;  %17968 = vmatmul.mubr.msk.f32.vlgmr.msra.gmra.mxu1 %vm1849_vm9, %v10272_v8  ;;  %17965 = vmatmul.mubr.msk.f32.vlgmr.msra.gmra.mxu0 %vm1849_vm9, %v10272_v8 }
0x1c59   : > { %v11061_v45 = vmul.f32 %v21849_v3, %v11001_v47  ;;  %v21923_v25 = vrot.slane %v21896_v13, %v21685_v62  ;;  %v10268_v9 = vmul.f32 %v21883_v38, %v10209_v33  ;;  %10974 = vmatprep.mubr.f32.mxu1 %v23358_v63  ;;  %10903 = vmatprep.mubr.f32.mxu0 %v23358_v63 }
0x1c5a   : > { %v11059_v39 = vmul.f32 %v21853_v23, %v10999_v17  ;;  %v21931_v16 = vrot.slane %v21896_v13, %v21325_v4  ;;  %v10993_v43 = vpop.permute.xlu1 %10992  ;;  %17969 = vmatprep.subr.msk.mxu0 %vm1856_vm10, %v10269_v0  ;;  %17973 = vmatpush1.msk.msra.mxu1 %vm1856_vm10, %v10270_v10  ;;  %v10982_v47 = vpop.permute.xlu0 %10981  ;;  %v21937_v33 = vrot.slane %v21819_v56, %v21786_v1 }
0x1c5b   : > { %23367 = vst [vmem:[#allocation74_spill] sm:$0xff] %v21923_v25  ;;  %v11060_v27 = vmul.f32 %v21880_v51, %v11000_v22  ;;  %v11005_v2 = vsel %vm10998_vm15, %v10997_v28, %v10982_v47  ;;  %v11014_v17 = vsel %vm10998_vm15, %v10982_v47, %v21682_v52  ;;  %17970 = vmatpush1.msk.msra.mxu0 %vm1856_vm10, %v10268_v9 }
0x1c5c   : > { %23368 = vst [vmem:[#allocation75_spill] sm:$0xff] %v21931_v16  ;;  %23369 = vst [vmem:[#allocation76_spill] sm:$0xff] %v21937_v33  ;;  %17980 = vmatprep.subr.msk.mxu1 %vm1856_vm10, %v11061_v45  ;;  %v11058_v0 = vmul.f32 %v21890_v40, %v11014_v17  ;;  %v11065_v10 = vmul.f32 %v21904_v12, %v11005_v2  ;;  %17974 = vmatmul.mubr.msk.f32.vlgmr.msra.gmra.mxu1 %vm1849_vm9, %v10272_v8  ;;  %v17976_v45 = vld [vmem:[%s23347_s7 + $0x10] sm:$0xff] }
0x1c5d   : > { %17971 = vmatmul.mubr.msk.f32.vlgmr.msra.gmra.mxu0 %vm1849_vm9, %v10272_v8  ;;  %v21951_v22 = vrot.slane %v21819_v56, %v21789_v14  ;;  %v21955_v51 = vrot.slane %v21896_v13, %v21718_v18  ;;  %v21959_v52 = vrot.slane %v21819_v56, %v21792_v21  ;;  %17977 = vmatprep.subr.msk.mxu0 %vm1856_vm10, %v11059_v39 }
0x1c5e   : > { %17981 = vmatpush1.msk.msra.mxu1 %vm1856_vm10, %v11060_v27  ;;  %v21966_v8 = vrot.slane %v21896_v13, %v23326_v34  ;;  %v11406_v9 = vsel %vm8100_vm6, %v21694_v36, %v21760_v35  ;;  %v11002_v47 = vsel %vm10998_vm15, %v21756_v46, %v10993_v43  ;;  %v11403_v2 = vpop.permute.xlu1 %11402  ;;  %17978 = vmatpush1.msk.msra.mxu0 %vm1856_vm10, %v11058_v0  ;;  %v10995_v56 = vpop.permute.xlu0 %10994 }
0x1c5f   : > { %23370 = vst [vmem:[#allocation77_spill] sm:$0xff] %v21951_v22  ;;  %23371 = vst [vmem:[#allocation78_spill] sm:$0xff] %v21955_v51  ;;  %11230 = vmatprep.mubr.f32.mxu1 %v23358_v63  ;;  %v21977_v39 = vrot.slane %v21896_v13, %v21773_v50  ;;  %v11404_v27 = vsel %vm8100_vm6, %v21696_v32, %v21762_v24  ;;  %17986 = vmatprep.subr.msk.mxu1 %vm1856_vm10, %v11065_v10 }
0x1c60   : > { %23372 = vst [vmem:[#allocation79_spill] sm:$0xff] %v21959_v52  ;;  %23373 = vst [vmem:[#allocation80_spill] sm:$0xff] %v21966_v8  ;;  %v11003_v17 = vsel %vm10998_vm15, %v10993_v43, %v10995_v56  ;;  %v11004_v46 = vsel %vm10998_vm15, %v10995_v56, %v10997_v28  ;;  %11159 = vmatprep.mubr.f32.mxu0 %v23358_v63  ;;  %v11405_v0 = vsel %vm8100_vm6, %v21762_v24, %v21694_v36 }
0x1c61   : > { %23374 = vst [vmem:[#allocation81_spill] sm:$0xff] %v21977_v39  ;;  %v11063_v12 = vmul.f32 %v21937_v33, %v11003_v17  ;;  %v11064_v40 = vmul.f32 %v21951_v22, %v11004_v46  ;;  %17982 = vmatmul.mubr.msk.f32.vlgmr.msra.gmra.mxu1 %vm1849_vm9, %v17976_v45  ;;  %17979 = vmatmul.mubr.msk.f32.vlgmr.msra.gmra.mxu0 %vm1849_vm9, %v17976_v45 }
0x1c62   : > { %v11466_v10 = vmul.f32 %v21923_v25, %v11406_v9  ;;  %v11062_v43 = vmul.f32 %v21959_v52, %v11002_v47  ;;  %11372 = vmatprep.mubr.f32.mxu1 %v23358_v63  ;;  %11301 = vmatprep.mubr.f32.mxu0 %v23358_v63  ;;  %v11464_v28 = vmul.f32 %v21931_v16, %v11404_v27  ;;  %v11399_v56 = vpop.permute.xlu1 %11398  ;;  %v11388_v36 = vpop.permute.xlu0 %11387 }
0x1c63   : > { %17983 = vmatprep.subr.msk.mxu0 %vm1856_vm10, %v11063_v12  ;;  %17987 = vmatpush1.msk.msra.mxu1 %vm1856_vm10, %v11064_v40  ;;  %v22002_v24 = vrot.slane %v21896_v13, %v21786_v1  ;;  %v11465_v9 = vmul.f32 %v21955_v51, %v11405_v0  ;;  %v11410_v47 = vsel %vm8100_vm6, %v11403_v2, %v11388_v36 }
0x1c64   : > { %v11419_v17 = vsel %vm8100_vm6, %v11388_v36, %v21696_v32  ;;  %17984 = vmatpush1.msk.msra.mxu0 %vm1856_vm10, %v11062_v43  ;;  %17994 = vmatprep.subr.msk.mxu1 %vm1856_vm10, %v11466_v10  ;;  %v11470_v40 = vmul.f32 %v21977_v39, %v11410_v47  ;;  %v22016_v27 = vrot.slane %v21896_v13, %v21789_v14  ;;  %v17990_v32 = vld [vmem:[%s23347_s7 + $0x18] sm:$0xff] }
0x1c65   : > { %23375 = vst [vmem:[#allocation82_spill] sm:$0xff] %v22002_v24  ;;  %v11463_v12 = vmul.f32 %v21966_v8, %v11419_v17  ;;  %17988 = vmatmul.mubr.msk.f32.vlgmr.msra.gmra.mxu1 %vm1849_vm9, %v17976_v45  ;;  %17985 = vmatmul.mubr.msk.f32.vlgmr.msra.gmra.mxu0 %vm1849_vm9, %v17976_v45  ;;  %v22020_v46 = vrot.slane %v21896_v13, %v21792_v21 }
0x1c66   : > { %23376 = vst [vmem:[#allocation83_spill] sm:$0xff] %v22016_v27  ;;  %17991 = vmatprep.subr.msk.mxu0 %vm1856_vm10, %v11464_v28  ;;  %17995 = vmatpush1.msk.msra.mxu1 %vm1856_vm10, %v11465_v9  ;;  %v11407_v0 = vsel %vm8100_vm6, %v21760_v35, %v11399_v56  ;;  %v22027_v10 = vpop.permute.xlu1 %12113  ;;  %v11401_v45 = vpop.permute.xlu0 %11400 }
0x1c67   : > { %23377 = vst [vmem:[#allocation84_spill] sm:$0xff] %v22020_v46  ;;  %17992 = vmatpush1.msk.msra.mxu0 %vm1856_vm10, %v11463_v12  ;;  %11635 = vmatprep.mubr.f32.mxu1 %v23358_v63  ;;  %v11408_v13 = vsel %vm8100_vm6, %v11399_v56, %v11401_v45  ;;  %v11409_v43 = vsel %vm8100_vm6, %v11401_v45, %v11403_v2  ;;  %v22043_v56 = vld [vmem:[%s20015_s6 + $0x28] sm:$0xff] }
0x1c68   : > { %18000 = vmatprep.subr.msk.mxu1 %vm1856_vm10, %v11470_v40  ;;  %11564 = vmatprep.mubr.f32.mxu0 %v23358_v63  ;;  %v11468_v28 = vmul.f32 %v22002_v24, %v11408_v13  ;;  %v11469_v35 = vmul.f32 %v22016_v27, %v11409_v43  ;;  %v11467_v36 = vmul.f32 %v22020_v46, %v11407_v0  ;;  %v18003_v40 = vld [vmem:[%s23347_s7 + $0x20] sm:$0xff] }
0x1c69   : > { %17996 = vmatmul.mubr.msk.f32.vlgmr.msra.gmra.mxu1 %vm1849_vm9, %v17990_v32  ;;  %17993 = vmatmul.mubr.msk.f32.vlgmr.msra.gmra.mxu0 %vm1849_vm9, %v17990_v32  ;;  %v22056_v47 = vrot.slane %v22043_v56, %v21685_v62  ;;  %v22062_v17 = vrot.slane %v22043_v56, %v21325_v4  ;;  %v12124_v12 = vsel %vm8280_vm5, %v21766_v19, %v22027_v10 }
0x1c6a   : > { %11777 = vmatprep.mubr.f32.mxu1 %v23358_v63  ;;  %11706 = vmatprep.mubr.f32.mxu0 %v23358_v63  ;;  %v22045_v2 = vpop.permute.xlu1 %12518  ;;  %v22049_v9 = vpop.permute.xlu0 %12510  ;;  %v12122_v0 = vsel %vm8280_vm5, %v21764_v37, %v21706_v29  ;;  %v22085_v13 = vrot.slane %v22043_v56, %v21718_v18  ;;  %v22092_v43 = vrot.slane %v22043_v56, %v23326_v34 }
0x1c6b   : > { %17997 = vmatprep.subr.msk.mxu0 %vm1856_vm10, %v11468_v28  ;;  %18001 = vmatpush1.msk.msra.mxu1 %vm1856_vm10, %v11469_v35  ;;  %23378 = vst [vmem:[#allocation85_spill] sm:$0xff] %v22056_v47  ;;  %23379 = vst [vmem:[#allocation86_spill] sm:$0xff] %v22062_v17  ;;  %v12123_v28 = vsel %vm8280_vm5, %v21706_v29, %v21766_v19  ;;  %v12184_v35 = vmul.f32 %v22056_v47, %v12124_v12 }
0x1c6c   : > { %17998 = vmatpush1.msk.msra.mxu0 %vm1856_vm10, %v11467_v36  ;;  %18007 = vmatprep.subr.msk.mxu1 %vm1856_vm10, %v21572_v20  ;;  %23380 = vst [vmem:[#allocation87_spill] sm:$0xff] %v22085_v13  ;;  %23381 = vst [vmem:[#allocation88_spill] sm:$0xff] %v22092_v43  ;;  %v12121_v36 = vsel %vm8280_vm5, %v21714_v58, %v21764_v37  ;;  %v12183_v12 = vmul.f32 %v22085_v13, %v12123_v28 }
0x1c6d   : > { %18002 = vmatmul.mubr.msk.f32.vlgmr.msra.gmra.mxu1 %vm1849_vm9, %v17990_v32  ;;  %17999 = vmatmul.mubr.msk.f32.vlgmr.msra.gmra.mxu0 %vm1849_vm9, %v17990_v32  ;;  %v12181_v37 = vmul.f32 %v22092_v43, %v12121_v36  ;;  %v22144_v36 = vrot.slane %v22043_v56, %v21789_v14  ;;  %v22168_v43 = vrot.slane %v22043_v56, %v21792_v21 }
0x1c6e   : > { %18004 = vmatprep.subr.msk.mxu0 %vm1856_vm10, %v21586_v41  ;;  %18008 = vmatpush1.msk.msra.mxu1 %vm1856_vm10, %v21554_v60  ;;  %v22079_v32 = vpop.permute.xlu1 %12924  ;;  %v22081_v45 = vpop.permute.xlu0 %12522  ;;  %v12529_v13 = vsel %vm12526_vm2, %v21724_v54, %v21770_v49  ;;  %v22177_v46 = vrot.slane %v22043_v56, %v21786_v1 }
0x1c6f   : > { %18005 = vmatpush1.msk.msra.mxu0 %vm1856_vm10, %v21552_v6  ;;  %18013 = vmatprep.subr.msk.mxu1 %vm1856_vm10, %v21614_v53  ;;  %v12182_v53 = vmul.f32 %v22062_v17, %v12122_v0  ;;  %v22123_v0 = vld [vmem:[%s23347_s7 + $0x28] sm:$0xff]  ;;  %23382 = vst [vmem:[#allocation89_spill] sm:$0xff] %v22144_v36  ;;  %v12530_v6 = vsel %vm12526_vm2, %v21770_v49, %v22045_v2  ;;  %23386 = vst [vmem:[#allocation93_spill] sm:$0xff] %v22168_v43 }
0x1c70   : > { %11948 = vmatprep.mubr.f32.mxu1 %v23358_v63  ;;  %18010 = vmatprep.subr.msk.mxu0 %vm1856_vm10, %v21620_v42  ;;  %23387 = vst [vmem:[#allocation94_spill] sm:$0xff] %v22177_v46 }
0x1c71   : > { %11877 = vmatprep.mubr.f32.mxu0 %v23358_v63  ;;  %18009 = vmatmul.mubr.msk.f32.vlgmr.msra.gmra.mxu1 %vm1849_vm9, %v18003_v40 }
0x1c72   : > { %18014 = vmatpush1.msk.msra.mxu1 %vm1856_vm10, %v21606_v61  ;;  %18006 = vmatmul.mubr.msk.f32.vlgmr.msra.gmra.mxu0 %vm1849_vm9, %v18003_v40  ;;  %v22110_v29 = vpop.permute.xlu1 %12918  ;;  %v22112_v19 = vpop.permute.xlu0 %12922 }
0x1c73   : > { %18011 = vmatpush1.msk.msra.mxu0 %vm1856_vm10, %v21612_v11  ;;  %18021 = vmatprep.subr.msk.mxu1 %vm1856_vm10, %v12184_v35 }
0x1c74   : > { %18018 = vmatprep.subr.msk.mxu0 %vm1856_vm10, %v12182_v53  ;;  %12090 = vmatprep.mubr.f32.mxu1 %v23358_v63 }
0x1c75   : > { %12019 = vmatprep.mubr.f32.mxu0 %v23358_v63  ;;  %18015 = vmatmul.mubr.msk.f32.vlgmr.msra.gmra.mxu1 %vm1849_vm9, %v18003_v40 }
0x1c76   : > { %18022 = vmatpush1.msk.msra.mxu1 %vm1856_vm10, %v12183_v12  ;;  %18012 = vmatmul.mubr.msk.f32.vlgmr.msra.gmra.mxu0 %vm1849_vm9, %v18003_v40  ;;  %v22126_v28 = vpop.permute.xlu1 %13330  ;;  %v22129_v53 = vpop.permute.xlu0 %12920  ;;  %v22148_v12 = vrot.slane %v22043_v56, %v21773_v50 }
0x1c77   : > { %18019 = vmatpush1.msk.msra.mxu0 %vm1856_vm10, %v12181_v37  ;;  %12353 = vmatprep.mubr.f32.mxu1 %v23358_v63  ;;  %v18030_v37 = vld [vmem:[%s20015_s6 + $0x30] sm:$0xff] }
0x1c78   : > { %12282 = vmatprep.mubr.f32.mxu0 %v23358_v63  ;;  %23383 = vst [vmem:[#allocation90_spill] sm:$0xff] %v22148_v12  ;;  %v22152_v61 = vrot.slane %v18030_v37, %v21718_v18  ;;  %v22155_v11 = vrot.slane %v18030_v37, %v21685_v62  ;;  %v22180_v27 = vrot.slane %v18030_v37, %v21325_v4 }
0x1c79   : > { %18023 = vmatmul.mubr.msk.f32.vlgmr.msra.gmra.mxu1 %vm1849_vm9, %v22123_v0  ;;  %v22188_v49 = vrot.slane %v18030_v37, %v21789_v14 }
0x1c7a   : > { %18020 = vmatmul.mubr.msk.f32.vlgmr.msra.gmra.mxu0 %vm1849_vm9, %v22123_v0  ;;  %12495 = vmatprep.mubr.f32.mxu1 %v23358_v63  ;;  %v22137_v40 = vpop.permute.xlu1 %13324  ;;  %v22139_v35 = vpop.permute.xlu0 %12916  ;;  %23384 = vst [vmem:[#allocation91_spill] sm:$0xff] %v22152_v61  ;;  %23385 = vst [vmem:[#allocation92_spill] sm:$0xff] %v22155_v11 }
0x1c7b   : > { %12424 = vmatprep.mubr.f32.mxu0 %v23358_v63  ;;  %23388 = vst [vmem:[#allocation95_spill] sm:$0xff] %v22180_v27  ;;  %23390 = vst [vmem:[#allocation97_spill] sm:$0xff] %v22188_v49 }
0x1c7e   : > { %v12120_v42 = vpop.permute.xlu1 %12119  ;;  %v22157_v60 = vpop.permute.xlu0 %12928 }
0x1c7f   : > { %v12127_v20 = vsel %vm8280_vm5, %v21775_v5, %v12120_v42  ;;  %v12137_v41 = vsel %vm8280_vm5, %v12120_v42, %v21714_v58  ;;  %v12590_v42 = vmul.f32 %v22155_v11, %v12530_v6  ;;  %v22184_v58 = vrot.slane %v18030_v37, %v23326_v34 }
0x1c80   : > { %v12187_v17 = vmul.f32 %v22144_v36, %v12127_v20  ;;  %v12188_v47 = vmul.f32 %v22148_v12, %v12137_v41  ;;  %v12589_v20 = vmul.f32 %v22152_v61, %v12529_v13  ;;  %v22192_v41 = vld [vmem:[%s20015_s6 + $0x38] sm:$0xff]  ;;  %v22200_v6 = vrot.slane %v18030_v37, %v21773_v50 }
0x1c81   : > { %23389 = vst [vmem:[#allocation96_spill] sm:$0xff] %v22184_v58 }
0x1c82   : > { %v12116_v24 = vpop.permute.xlu1 %12115  ;;  %18027 = vmatprep.subr.msk.mxu1 %vm1856_vm10, %v12188_v47  ;;  %23391 = vst [vmem:[#allocation98_spill] sm:$0xff] %v22200_v6  ;;  %v12528_v47 = vsel %vm12526_vm2, %v21768_v48, %v21724_v54  ;;  %v22207_v11 = vpop.permute.xlu0 %13328  ;;  %v22219_v54 = vrot.slane %v22192_v41, %v21685_v62 }
0x1c83   : > { %v12125_v56 = vsel %vm8280_vm5, %v22027_v10, %v12116_v24  ;;  %v12126_v36 = vsel %vm8280_vm5, %v12116_v24, %v21775_v5  ;;  %18028 = vmatpush1.msk.msra.mxu1 %vm1856_vm10, %v12187_v17  ;;  %v12527_v5 = vsel %vm12526_vm2, %v22049_v9, %v21768_v48  ;;  %v22223_v24 = vrot.slane %v22192_v41, %v21718_v18  ;;  %v18031_v17 = vld [vmem:[%s23347_s7 + $0x30] sm:$0xff] }
0x1c84   : > { %v12185_v13 = vmul.f32 %v22168_v43, %v12125_v56  ;;  %v12186_v61 = vmul.f32 %v22177_v46, %v12126_v36  ;;  %18029 = vmatmul.mubr.msk.f32.vlgmr.msra.gmra.mxu1 %vm1849_vm9, %v22123_v0  ;;  %18035 = vmatprep.subr.msk.mxu1 %vm1856_vm10, %v12590_v42  ;;  %23392 = vst [vmem:[#allocation99_spill] sm:$0xff] %v22219_v54 }
0x1c85   : > { %18036 = vmatpush1.msk.msra.mxu1 %vm1856_vm10, %v12589_v20  ;;  %12759 = vmatprep.mubr.f32.mxu1 %v23358_v63  ;;  %23393 = vst [vmem:[#allocation100_spill] sm:$0xff] %v22223_v24  ;;  %v22228_v36 = vrot.slane %v18030_v37, %v21792_v21  ;;  %v12588_v48 = vmul.f32 %v22180_v27, %v12528_v47 }
0x1c86   : > { %v12525_v10 = vpop.permute.xlu1 %12524  ;;  %18024 = vmatprep.subr.msk.mxu0 %vm1856_vm10, %v12186_v61  ;;  %v12936_v42 = vsel %vm12932_vm0, %v22112_v19, %v22079_v32  ;;  %v12587_v61 = vmul.f32 %v22184_v58, %v12527_v5  ;;  %v22245_v47 = vrot.slane %v18030_v37, %v21786_v1  ;;  %v22249_v27 = vrot.slane %v22192_v41, %v21325_v4  ;;  %v22262_v37 = vld [vmem:[%s20015_s6 + $0x40] sm:$0xff]  ;;  %v13327_v5 = vpop.permute.xlu0 %13326 }
0x1c87   : > { %23394 = vst [vmem:[#allocation101_spill] sm:$0xff] %v22228_v36  ;;  %v12533_v20 = vsel %vm12526_vm2, %v22081_v45, %v12525_v10  ;;  %v12543_v56 = vsel %vm12526_vm2, %v12525_v10, %v22049_v9  ;;  %18025 = vmatpush1.msk.msra.mxu0 %vm1856_vm10, %v12185_v13  ;;  %v12935_v9 = vsel %vm12932_vm0, %v22129_v53, %v22112_v19 }
0x1c88   : > { %v12593_v46 = vmul.f32 %v22188_v49, %v12533_v20  ;;  %v12594_v43 = vmul.f32 %v22200_v6, %v12543_v56  ;;  %18026 = vmatmul.mubr.msk.f32.vlgmr.msra.gmra.mxu0 %vm1849_vm9, %v22123_v0  ;;  %23395 = vst [vmem:[#allocation102_spill] sm:$0xff] %v22245_v47  ;;  %23396 = vst [vmem:[#allocation103_spill] sm:$0xff] %v22249_v27  ;;  %v22256_v13 = vrot.slane %v22192_v41, %v23326_v34 }
0x1c89   : > { %18032 = vmatprep.subr.msk.mxu0 %vm1856_vm10, %v12588_v48  ;;  %18037 = vmatmul.mubr.msk.f32.vlgmr.msra.gmra.mxu1 %vm1849_vm9, %v18031_v17  ;;  %v12996_v0 = vmul.f32 %v22219_v54, %v12936_v42  ;;  %v22268_v19 = vrot.slane %v22192_v41, %v21789_v14  ;;  %v22272_v20 = vrot.slane %v22192_v41, %v21773_v50 }
0x1c8a   : > { %23397 = vst [vmem:[#allocation104_spill] sm:$0xff] %v22256_v13  ;;  %18033 = vmatpush1.msk.msra.mxu0 %vm1856_vm10, %v12587_v61  ;;  %v12521_v10 = vpop.permute.xlu1 %12520  ;;  %18041 = vmatprep.subr.msk.mxu1 %vm1856_vm10, %v12594_v43  ;;  %v12934_v48 = vsel %vm12932_vm0, %v22110_v29, %v22129_v53  ;;  %v12995_v43 = vmul.f32 %v22223_v24, %v12935_v9 }
0x1c8b   : > { %23398 = vst [vmem:[#allocation105_spill] sm:$0xff] %v22268_v19  ;;  %23399 = vst [vmem:[#allocation106_spill] sm:$0xff] %v22272_v20  ;;  %v12531_v42 = vsel %vm12526_vm2, %v22045_v2, %v12521_v10  ;;  %v12532_v56 = vsel %vm12526_vm2, %v12521_v10, %v22081_v45  ;;  %12688 = vmatprep.mubr.f32.mxu0 %v23358_v63  ;;  %18042 = vmatpush1.msk.msra.mxu1 %vm1856_vm10, %v12593_v46 }
0x1c8c   : > { %v12591_v61 = vmul.f32 %v22228_v36, %v12531_v42  ;;  %v12592_v54 = vmul.f32 %v22245_v47, %v12532_v56  ;;  %12901 = vmatprep.mubr.f32.mxu1 %v23358_v63  ;;  %18034 = vmatmul.mubr.msk.f32.vlgmr.msra.gmra.mxu0 %vm1849_vm9, %v18031_v17  ;;  %v12933_v2 = vsel %vm12932_vm0, %v22139_v35, %v22110_v29  ;;  %v18045_v29 = vld [vmem:[%s23347_s7 + $0x38] sm:$0xff]  ;;  %v13323_v42 = vpop.permute.xlu0 %13322 }
0x1c8d   : > { %v22293_v45 = vrot.slane %v22262_v37, %v21685_v62  ;;  %v22297_v46 = vrot.slane %v22262_v37, %v21718_v18  ;;  %18043 = vmatmul.mubr.msk.f32.vlgmr.msra.gmra.mxu1 %vm1849_vm9, %v18031_v17  ;;  %18049 = vmatprep.subr.msk.mxu1 %vm1856_vm10, %v12996_v0  ;;  %v12994_v53 = vmul.f32 %v22249_v27, %v12934_v48 }
0x1c8e   : > { %18050 = vmatpush1.msk.msra.mxu1 %vm1856_vm10, %v12995_v43  ;;  %v12931_v9 = vpop.permute.xlu1 %12930  ;;  %18038 = vmatprep.subr.msk.mxu0 %vm1856_vm10, %v12592_v54  ;;  %v22307_v62 = vrot.slane %v22192_v41, %v21792_v21  ;;  %v22311_v18 = vrot.slane %v22192_v41, %v21786_v1  ;;  %v13342_v0 = vsel %vm13338_vm4, %v22207_v11, %v22126_v28 }
0x1c8f   : > { %23400 = vst [vmem:[#allocation107_spill] sm:$0xff] %v22293_v45  ;;  %23401 = vst [vmem:[#allocation108_spill] sm:$0xff] %v22297_v46  ;;  %v12939_v10 = vsel %vm12932_vm0, %v22157_v60, %v12931_v9  ;;  %v12949_v48 = vsel %vm12932_vm0, %v12931_v9, %v22139_v35  ;;  %18039 = vmatpush1.msk.msra.mxu0 %vm1856_vm10, %v12591_v61  ;;  %12830 = vmatprep.mubr.f32.mxu0 %v23358_v63 }
0x1c90   : > { %23402 = vst [vmem:[#allocation109_spill] sm:$0xff] %v22307_v62  ;;  %23403 = vst [vmem:[#allocation110_spill] sm:$0xff] %v22311_v18  ;;  %v12993_v54 = vmul.f32 %v22256_v13, %v12933_v2  ;;  %v12999_v41 = vmul.f32 %v22268_v19, %v12939_v10  ;;  %v13000_v56 = vmul.f32 %v22272_v20, %v12949_v48  ;;  %13165 = vmatprep.mubr.f32.mxu1 %v23358_v63  ;;  %v18059_v10 = vld [vmem:[%s23347_s7 + $0x40] sm:$0xff] }
0x1c91   : > { %18040 = vmatmul.mubr.msk.f32.vlgmr.msra.gmra.mxu0 %vm1849_vm9, %v18031_v17  ;;  %v22329_v43 = vrot.slane %v22262_v37, %v21325_v4  ;;  %v13341_v35 = vsel %vm13338_vm4, %v13327_v5, %v22207_v11  ;;  %v22335_v61 = vrot.slane %v22262_v37, %v23326_v34  ;;  %18046 = vmatprep.subr.msk.mxu0 %vm1856_vm10, %v12994_v53 }
0x1c92   : > { %18051 = vmatmul.mubr.msk.f32.vlgmr.msra.gmra.mxu1 %vm1849_vm9, %v18045_v29  ;;  %v13402_v2 = vmul.f32 %v22293_v45, %v13342_v0  ;;  %18047 = vmatpush1.msk.msra.mxu0 %vm1856_vm10, %v12993_v54  ;;  %v12927_v17 = vpop.permute.xlu1 %12926  ;;  %v22344_v4 = vrot.slane %v22262_v37, %v21789_v14  ;;  %v22348_v11 = vrot.slane %v22262_v37, %v21773_v50 }
0x1c93   : > { %23404 = vst [vmem:[#allocation111_spill] sm:$0xff] %v22329_v43  ;;  %23405 = vst [vmem:[#allocation112_spill] sm:$0xff] %v22335_v61  ;;  %18055 = vmatprep.subr.msk.mxu1 %vm1856_vm10, %v13000_v56  ;;  %v13340_v34 = vsel %vm13338_vm4, %v22137_v40, %v13327_v5  ;;  %v12937_v53 = vsel %vm12932_vm0, %v22079_v32, %v12927_v17  ;;  %v12938_v9 = vsel %vm12932_vm0, %v12927_v17, %v22157_v60  ;;  %v13335_v60 = vpop.permute.xlu0 %13334 }
0x1c94   : > { %23406 = vst [vmem:[#allocation113_spill] sm:$0xff] %v22344_v4  ;;  %23407 = vst [vmem:[#allocation114_spill] sm:$0xff] %v22348_v11  ;;  %13094 = vmatprep.mubr.f32.mxu0 %v23358_v63  ;;  %18056 = vmatpush1.msk.msra.mxu1 %vm1856_vm10, %v12999_v41  ;;  %v13401_v14 = vmul.f32 %v22297_v46, %v13341_v35  ;;  %v12997_v0 = vmul.f32 %v22307_v62, %v12937_v53 }
0x1c95   : > { %v12998_v50 = vmul.f32 %v22311_v18, %v12938_v9  ;;  %13307 = vmatprep.mubr.f32.mxu1 %v23358_v63  ;;  %18048 = vmatmul.mubr.msk.f32.vlgmr.msra.gmra.mxu0 %vm1849_vm9, %v18045_v29  ;;  %v13339_v32 = vsel %vm13338_vm4, %v13323_v42, %v22137_v40  ;;  %v22372_v48 = vrot.slane %v22262_v37, %v21792_v21 }
0x1c96   : > { %18057 = vmatmul.mubr.msk.f32.vlgmr.msra.gmra.mxu1 %vm1849_vm9, %v18045_v29  ;;  %18063 = vmatprep.subr.msk.mxu1 %vm1856_vm10, %v13402_v2  ;;  %v13337_v5 = vpop.permute.xlu1 %13336  ;;  %v22376_v54 = vrot.slane %v22262_v37, %v21786_v1  ;;  %v13400_v40 = vmul.f32 %v22329_v43, %v13340_v34  ;;  %v13399_v35 = vmul.f32 %v22335_v61, %v13339_v32 }
0x1c97   : > { %18064 = vmatpush1.msk.msra.mxu1 %vm1856_vm10, %v13401_v14  ;;  %18052 = vmatprep.subr.msk.mxu0 %vm1856_vm10, %v12998_v50  ;;  %23408 = vst [vmem:[#allocation115_spill] sm:$0xff] %v22372_v48  ;;  %v13345_v41 = vsel %vm13338_vm4, %v13335_v60, %v13337_v5  ;;  %v13355_v56 = vsel %vm13338_vm4, %v13337_v5, %v13323_v42 }
0x1c98   : > { %23409 = vst [vmem:[#allocation116_spill] sm:$0xff] %v22376_v54  ;;  %18053 = vmatpush1.msk.msra.mxu0 %vm1856_vm10, %v12997_v0  ;;  %13236 = vmatprep.mubr.f32.mxu0 %v23358_v63  ;;  %v13405_v2 = vmul.f32 %v22344_v4, %v13345_v41  ;;  %v13406_v21 = vmul.f32 %v22348_v11, %v13355_v56 }
0x1c99   : > { %13571 = vmatprep.mubr.f32.mxu1 %v23358_v63  ;;  %18054 = vmatmul.mubr.msk.f32.vlgmr.msra.gmra.mxu0 %vm1849_vm9, %v18045_v29 }
0x1c9a   : > { %18060 = vmatprep.subr.msk.mxu0 %vm1856_vm10, %v13400_v40  ;;  %18065 = vmatmul.mubr.msk.f32.vlgmr.msra.gmra.mxu1 %vm1849_vm9, %v18059_v10  ;;  %v13333_v1 = vpop.permute.xlu1 %13332 }
0x1c9b   : > { %18061 = vmatpush1.msk.msra.mxu0 %vm1856_vm10, %v13399_v35  ;;  %18069 = vmatprep.subr.msk.mxu1 %vm1856_vm10, %v13406_v21  ;;  %v13343_v37 = vsel %vm13338_vm4, %v22126_v28, %v13333_v1  ;;  %v13344_v42 = vsel %vm13338_vm4, %v13333_v1, %v13335_v60 }
0x1c9c   : > { %13500 = vmatprep.mubr.f32.mxu0 %v23358_v63  ;;  %18070 = vmatpush1.msk.msra.mxu1 %vm1856_vm10, %v13405_v2  ;;  %v13403_v29 = vmul.f32 %v22372_v48, %v13343_v37  ;;  %v13404_v17 = vmul.f32 %v22376_v54, %v13344_v42 }
0x1c9d   : > { %13713 = vmatprep.mubr.f32.mxu1 %v23358_v63  ;;  %18062 = vmatmul.mubr.msk.f32.vlgmr.msra.gmra.mxu0 %vm1849_vm9, %v18059_v10 }
0x1c9e   : > { %18071 = vmatmul.mubr.msk.f32.vlgmr.msra.gmra.mxu1 %vm1849_vm9, %v18059_v10  ;;  %13642 = vmatprep.mubr.f32.mxu0 %v23358_v63 }
0x1c9f   : > { %18066 = vmatprep.subr.msk.mxu0 %vm1856_vm10, %v13404_v17  ;;  %14029 = vmatprep.mubr.f32.mxu1 %v23358_v63 }
0x1ca0   : > { %18067 = vmatpush1.msk.msra.mxu0 %vm1856_vm10, %v13403_v29 }
0x1ca1   : > { %18068 = vmatmul.mubr.msk.f32.vlgmr.msra.gmra.mxu0 %vm1849_vm9, %v18059_v10 }
0x1ca2   : > { %13958 = vmatprep.mubr.f32.mxu0 %v23358_v63 }
0x1ce6   : > { %v10523_v28 = vpop.f32.mrf.mxu1 }
0x1ce8   : > { %v10525_v53 = vpop.f32.mrf.mxu1 }
0x1d0f   : > { %v10452_v34 = vpop.f32.mrf.mxu0 }
0x1d11   : > { %v22408_v9 = vpop.f32.mrf.mxu0 }
0x1d13   : > { %v22410_v14 = vpop.f32.mrf.mxu1 }
0x1d14   : > { %v10594_v0 = vpop.f32.mrf.mxu0 }
0x1d15   : > { %v10667_v50 = vpop.f32.mrf.mxu1 }
0x1d16   : > { %v10596_v32 = vpop.f32.mrf.mxu0 }
0x1d18   : > { %v10834_v60 = vpop.f32.mrf.mxu1  ;;  %v10763_v5 = vpop.f32.mrf.mxu0 }
0x1d19   : > { %v10764_v58 = vadd.f32 %v10763_v5, %v10452_v34  ;;  %v10835_v39 = vadd.f32 %v10834_v60, %v10523_v28 }
0x1d1a   : > { %v10836_v40 = vpop.f32.mrf.mxu1  ;;  %v22412_v41 = vpop.f32.mrf.mxu0 }
0x1d1b   : > { %v10837_v16 = vadd.f32 %v10836_v40, %v10525_v53 }
0x1d1c   : > { %v10976_v56 = vpop.f32.mrf.mxu1 }
0x1d1d   : > { %v10905_v35 = vpop.f32.mrf.mxu0  ;;  %v10977_v3 = vadd.f32 %v10976_v56, %v22410_v14 }
0x1d1e   : > { %v10906_v10 = vadd.f32 %v10905_v35, %v10594_v0  ;;  %v10978_v2 = vpop.f32.mrf.mxu1 }
0x1d1f   : > { %v10907_v21 = vpop.f32.mrf.mxu0  ;;  %v10979_v1 = vadd.f32 %v10978_v2, %v10667_v50 }
0x1d20   : > { %v10908_v37 = vadd.f32 %v10907_v21, %v10596_v32 }
0x1d21   : > { %v11232_v42 = vpop.f32.mrf.mxu1  ;;  %v11161_v29 = vpop.f32.mrf.mxu0 }
0x1d22   : > { %v11381_v52 = vadd.f32 %v11232_v42, %v10835_v39  ;;  %v11379_v33 = vadd.f32 %v11161_v29, %v10764_v58 }
0x1d23   : > { %v11234_v17 = vpop.f32.mrf.mxu1  ;;  %v22414_v48 = vpop.f32.mrf.mxu0 }
0x1d24   : > { %v11382_v23 = vadd.f32 %v11234_v17, %v10837_v16 }
0x1d25   : > { %v11374_v4 = vpop.f32.mrf.mxu1  ;;  %v11303_v54 = vpop.f32.mrf.mxu0 }
0x1d26   : > { %v22416_v11 = vadd.f32 %v11303_v54, %v10906_v10  ;;  %v11385_v5 = vadd.f32 %v11374_v4, %v10977_v3 }
0x1d27   : > { %v11376_v43 = vpop.f32.mrf.mxu1  ;;  %v11305_v61 = vpop.f32.mrf.mxu0 }
0x1d28   : > { %v11386_v46 = vadd.f32 %v11376_v43, %v10979_v1  ;;  %v11384_v45 = vadd.f32 %v11305_v61, %v10908_v37 }
0x1d29   : > { %v11637_v18 = vpop.f32.mrf.mxu1  ;;  %v11566_v62 = vpop.f32.mrf.mxu0 }
0x1d2a   : > { %v11786_v38 = vadd.f32 %v11637_v18, %v11381_v52  ;;  %v11784_v28 = vadd.f32 %v11566_v62, %v11379_v33 }
0x1d2b   : > { %v11639_v0 = vpop.f32.mrf.mxu1  ;;  %v22418_v35 = vpop.f32.mrf.mxu0 }
0x1d2c   : > { %v11787_v55 = vadd.f32 %v11639_v0, %v11382_v23 }
0x1d2d   : > { %v11779_v50 = vpop.f32.mrf.mxu1  ;;  %v22420_v32 = vpop.f32.mrf.mxu0 }
0x1d2e   : > { %v11790_v42 = vadd.f32 %v11779_v50, %v11385_v5 }
0x1d2f   : > { %v11781_v2 = vpop.f32.mrf.mxu1  ;;  %v11710_v21 = vpop.f32.mrf.mxu0 }
0x1d30   : > { %v22422_v19 = vadd.f32 %v11781_v2, %v11386_v46  ;;  %v22424_v20 = vadd.f32 %v11710_v21, %v11384_v45 }
0x1d31   : > { %v11950_v54 = vpop.f32.mrf.mxu1 }
0x1d32   : > { %v11879_v10 = vpop.f32.mrf.mxu0  ;;  %v12099_v57 = vadd.f32 %v11950_v54, %v11786_v38 }
0x1d33   : > { %v11952_v13 = vpop.f32.mrf.mxu1  ;;  %v12097_v18 = vadd.f32 %v11879_v10, %v11784_v28 }
0x1d34   : > { %v22426_v24 = vpop.f32.mrf.mxu0  ;;  %v12100_v53 = vadd.f32 %v11952_v13, %v11787_v55  ;;  %v10766_v13 = vadd.f32 %v22412_v41, %v22408_v9 }
0x1d35   : > { %v12092_v43 = vpop.f32.mrf.mxu1 }
0x1d36   : > { %v22428_v61 = vpop.f32.mrf.mxu0  ;;  %v12103_v30 = vadd.f32 %v12092_v43, %v11790_v42  ;;  %v11380_v10 = vadd.f32 %v22414_v48, %v10766_v13 }
0x1d37   : > { %v22430_v1 = vpop.f32.mrf.mxu1 }
0x1d38   : > { %v22432_v37 = vpop.f32.mrf.mxu0 }
0x1d39   : > { %v12355_v27 = vpop.f32.mrf.mxu1 }
0x1d3a   : > { %v12284_v47 = vpop.f32.mrf.mxu0  ;;  %v12504_v39 = vadd.f32 %v12355_v27, %v12099_v57  ;;  %v22453_v57 = vpop.permute.xlu0 %13731 }
0x1d3b   : > { %v12357_v36 = vpop.f32.mrf.mxu1  ;;  %v12502_v38 = vadd.f32 %v12284_v47, %v12097_v18 }
0x1d3c   : > { %v22434_v46 = vpop.f32.mrf.mxu0  ;;  %v12505_v29 = vadd.f32 %v12357_v36, %v12100_v53 }
0x1d44   : > { %v12497_v49 = vpop.f32.mrf.mxu1 }
0x1d45   : > { %v12508_v33 = vadd.f32 %v12497_v49, %v12103_v30 }
0x1d46   : > { %v22436_v45 = vpop.f32.mrf.mxu1 }
0x1d48   : > { %v22438_v2 = vpop.f32.mrf.mxu0 }
0x1d49   : > { %v12761_v21 = vpop.f32.mrf.mxu1 }
0x1d4a   : > { %v22440_v6 = vpop.f32.mrf.mxu0  ;;  %v12910_v16 = vadd.f32 %v12761_v21, %v12504_v39 }
0x1d4b   : > { %v12763_v12 = vpop.f32.mrf.mxu1 }
0x1d4c   : > { %v12690_v8 = vpop.f32.mrf.mxu0  ;;  %v12911_v44 = vadd.f32 %v12763_v12, %v12505_v29 }
0x1d4d   : > { %v12903_v51 = vpop.f32.mrf.mxu1  ;;  %v12908_v27 = vadd.f32 %v12690_v8, %v12502_v38 }
0x1d4e   : > { %v12692_v22 = vpop.f32.mrf.mxu0  ;;  %v12914_v4 = vadd.f32 %v12903_v51, %v12508_v33  ;;  %v11785_v51 = vadd.f32 %v22418_v35, %v11380_v10  ;;  %v12104_v35 = vadd.f32 %v22430_v1, %v22422_v19 }
0x1d4f   : > { %v22442_v25 = vpop.f32.mrf.mxu1 }
0x1d50   : > { %v12098_v28 = vadd.f32 %v22426_v24, %v11785_v51  ;;  %v12509_v24 = vadd.f32 %v22436_v45, %v12104_v35 }
0x1d51   : > { %v22444_v26 = vpop.f32.mrf.mxu0 }
0x1d52   : > { %v13167_v15 = vpop.f32.mrf.mxu1  ;;  %v12503_v5 = vadd.f32 %v22434_v46, %v12098_v28 }
0x1d53   : > { %v22447_v34 = vpop.f32.mrf.mxu0  ;;  %v13316_v14 = vadd.f32 %v13167_v15, %v12910_v16 }
0x1d54   : > { %v13169_v60 = vpop.f32.mrf.mxu1  ;;  %v12909_v48 = vadd.f32 %v12692_v22, %v12503_v5  ;;  %v11788_v22 = vadd.f32 %v22420_v32, %v22416_v11 }
0x1d55   : > { %v13096_v40 = vpop.f32.mrf.mxu0  ;;  %v13317_v62 = vadd.f32 %v13169_v60, %v12911_v44 }
0x1d56   : > { %v13309_v58 = vpop.f32.mrf.mxu1  ;;  %v13314_v50 = vadd.f32 %v13096_v40, %v12908_v27  ;;  %v12101_v45 = vadd.f32 %v22428_v61, %v11788_v22 }
0x1d57   : > { %v13098_v52 = vpop.f32.mrf.mxu0  ;;  %v13320_v54 = vadd.f32 %v13309_v58, %v12914_v4 }
0x1d58   : > { %v13311_v17 = vpop.f32.mrf.mxu1  ;;  %v13315_v40 = vadd.f32 %v13098_v52, %v12909_v48  ;;  %v12915_v52 = vadd.f32 %v22442_v25, %v12509_v24  ;;  %v12506_v25 = vadd.f32 %v22438_v2, %v12101_v45 }
0x1d59   : > { %v22449_v23 = vpop.f32.mrf.mxu0 }
0x1d5a   : > { %v13573_v56 = vpop.f32.mrf.mxu1  ;;  %v13321_v1 = vadd.f32 %v13311_v17, %v12915_v52 }
0x1d5b   : > { %v13722_v3 = vadd.f32 %v13573_v56, %v13316_v14  ;;  %v22451_v55 = vpop.f32.mrf.mxu0 }
0x1d5c   : > { %v13575_v36 = vpop.f32.mrf.mxu1 }
0x1d5d   : > { %v13736_v12 = vadd.f32 %v22453_v57, %v13722_v3  ;;  %v13723_v15 = vadd.f32 %v13575_v36, %v13317_v62  ;;  %v13502_v0 = vpop.f32.mrf.mxu0  ;;  %v12912_v36 = vadd.f32 %v22444_v26, %v12506_v25 }
0x1d5e   : > { %v13715_v47 = vpop.f32.mrf.mxu1  ;;  %v13720_v49 = vadd.f32 %v13502_v0, %v13314_v50 }
0x1d5f   : > { %v13754_v30 = vmul.f32 1.442695, %v13736_v12  ;;  %v13737_v44 = vadd.f32 %v22453_v57, %v13723_v15  ;;  %v13726_v43 = vadd.f32 %v13715_v47, %v13320_v54  ;;  %v13504_v39 = vpop.f32.mrf.mxu0  ;;  %vm13744_vm7 = vcmp.gt.f32.partialorder %v13736_v12, 0.0 }
0x1d60   : > { %v22461_v9 = vadd.f32 %v22453_v57, %v13720_v49  ;;  %v13721_v18 = vadd.f32 %v13504_v39, %v13315_v40  ;;  %v13717_v19 = vpop.f32.mrf.mxu1  ;;  %v13318_v2 = vadd.f32 %v22449_v23, %v12912_v36 }
0x1d61   : > { %19469 = vpow2.f32 %v13754_v30  ;;  %v13756_v8 = vmul.f32 1.442695, %v13737_v44  ;;  %v13740_v41 = vadd.f32 %v22453_v57, %v13726_v43  ;;  %vm13745_vm11 = vcmp.gt.f32.partialorder %v13737_v44, 0.0  ;;  %v13644_v4 = vpop.f32.mrf.mxu0 }
0x1d62   : > { %v13750_v21 = vmul.f32 1.442695, %v22461_v9  ;;  %v13735_v33 = vadd.f32 %v22453_v57, %v13721_v18  ;;  %v13727_v3 = vadd.f32 %v13717_v19, %v13321_v1  ;;  %v13724_v50 = vadd.f32 %v13644_v4, %v13318_v2 }
0x1d63   : > { %19471 = vpow2.f32 %v13756_v8  ;;  %v13762_v60 = vmul.f32 1.442695, %v13740_v41  ;;  %vm13742_vm12 = vcmp.gt.f32.partialorder %v22461_v9, 0.0  ;;  %vm13748_vm13 = vcmp.gt.f32.partialorder %v13740_v41, 0.0  ;;  %v13646_v30 = vpop.f32.mrf.mxu0 }
0x1d64   : > { %19473 = vpow2.f32 %v13750_v21  ;;  %v13752_v32 = vmul.f32 1.442695, %v13735_v33  ;;  %v13741_v61 = vadd.f32 %v22453_v57, %v13727_v3  ;;  %vm13743_vm14 = vcmp.gt.f32.partialorder %v13735_v33, 0.0  ;;  %v17107_v3 = vld [vmem:[%s20025_s3] sm:$0x7] }
0x1d65   : > { %19475 = vpow2.f32 %v13762_v60 }
0x1d66   : > { %19477 = vpow2.f32 %v13752_v32  ;;  %v13764_v26 = vmul.f32 1.442695, %v13741_v61 }
0x1d68   : > { %19479 = vpow2.f32 %v13764_v26 }
0x1d6e   : > { %v19470_v53 = vpop.eup %19469 }
0x1d6f   : > { %v18074_v58 = vadd.f32 -1.0, %v19470_v53 }
0x1d70   : > { %v19472_v42 = vpop.eup %19471 }
0x1d71   : > { %v13776_v29 = vmul.f32 1.6732632, %v18074_v58  ;;  %v18075_v16 = vadd.f32 -1.0, %v19472_v42  ;;  %v19474_v11 = vpop.eup %19473 }
0x1d72   : > { %v19476_v27 = vpop.eup %19475  ;;  %v18072_v13 = vadd.f32 -1.0, %v19474_v11 }
0x1d73   : > { %v13784_v14 = vsel %vm13744_vm7, %v13736_v12, %v13776_v29  ;;  %v13777_v38 = vmul.f32 1.6732632, %v18075_v16  ;;  %v18078_v17 = vadd.f32 -1.0, %v19476_v27  ;;  %v12102_v12 = vadd.f32 %v22432_v37, %v22424_v20  ;;  %v19478_v8 = vpop.eup %19477 }
0x1d74   : > { %v22473_v46 = vmul.f32 1.050701, %v13784_v14  ;;  %v13774_v15 = vmul.f32 1.6732632, %v18072_v13  ;;  %v13738_v37 = vadd.f32 %v22453_v57, %v13724_v50  ;;  %v18073_v43 = vadd.f32 -1.0, %v19478_v8 }
0x1d75   : > { %v13785_v56 = vsel %vm13745_vm11, %v13737_v44, %v13777_v38  ;;  %v13780_v0 = vmul.f32 1.6732632, %v18078_v17  ;;  %v12507_v47 = vadd.f32 %v22440_v6, %v12102_v12  ;;  %vm13749_vm7 = vcmp.gt.f32.partialorder %v13741_v61, 0.0 }
0x1d76   : > { %15442 = vrot.lane.b32.xlu0 %v22473_v46, %s19818_s13  ;;  %13855 = vrot.lane.b32.xlu1 %v22473_v46, %s19826_s9  ;;  %v22482_v62 = vmul.f32 1.050701, %v13785_v56  ;;  %v13782_v23 = vsel %vm13742_vm12, %v22461_v9, %v13774_v15  ;;  %v13758_v49 = vmul.f32 1.442695, %v13738_v37  ;;  %vm13746_vm11 = vcmp.gt.f32.partialorder %v13738_v37, 0.0 }
0x1d77   : > { %v12913_v54 = vadd.f32 %v22447_v34, %v12507_v47  ;;  %v13788_v20 = vsel %vm13748_vm13, %v13740_v41, %v13780_v0  ;;  %v22512_v44 = vmul.f32 1.050701, %v13782_v23  ;;  %v19480_v41 = vpop.eup %19479 }
0x1d78   : > { %v22514_v34 = vmul.f32 1.050701, %v13788_v20  ;;  %19481 = vpow2.f32 %v13758_v49  ;;  %v18079_v28 = vadd.f32 -1.0, %v19480_v41 }
0x1d79   : > { %v13319_v6 = vadd.f32 %v22451_v55, %v12913_v54  ;;  %v13775_v55 = vmul.f32 1.6732632, %v18073_v43 }
0x1d7a   : > { %13857 = vrot.lane.b32.xlu0 %v22482_v62, %s19826_s9  ;;  %13813 = vrot.lane.b32.xlu1 %v22473_v46, %s19827_s2  ;;  %v13781_v60 = vmul.f32 1.6732632, %v18079_v28 }
0x1d7b   : > { %v13725_v10 = vadd.f32 %v13646_v30, %v13319_v6  ;;  %v13783_v21 = vsel %vm13743_vm14, %v13735_v33, %v13775_v55  ;;  %v23415_v55 = vld [vmem:[#allocation60_spill] sm:$0xff] }
0x1d7c   : > { %v13789_v48 = vsel %vm13749_vm7, %v13741_v61, %v13781_v60 }
0x1d7d   : > { %v13739_v9 = vadd.f32 %v22453_v57, %v13725_v10  ;;  %v22533_v57 = vmul.f32 1.050701, %v13783_v21  ;;  %v22543_v39 = vmul.f32 1.050701, %v13789_v48 }
0x1d7e   : > { %13815 = vrot.lane.b32.xlu0 %v22482_v62, %s19827_s2  ;;  %14472 = vrot.lane.b32.xlu1 %v22473_v46, %s23410_s15 }
0x1d7f   : > { %v13760_v51 = vmul.f32 1.442695, %v13739_v9  ;;  %vm13747_vm12 = vcmp.gt.f32.partialorder %v13739_v9, 0.0 }
0x1d81   : > { %19483 = vpow2.f32 %v13760_v51 }
0x1d82   : > { %14474 = vrot.lane.b32.xlu0 %v22482_v62, %s23410_s15  ;;  %14810 = vrot.lane.b32.xlu1 %v22473_v46, %s23332_s4 }
0x1d85   : > { %v19482_v5 = vpop.eup %19481 }
0x1d86   : > { %14812 = vrot.lane.b32.xlu0 %v22482_v62, %s23332_s4  ;;  %15444 = vrot.lane.b32.xlu1 %v22482_v62, %s19818_s13  ;;  %v18076_v53 = vadd.f32 -1.0, %v19482_v5 }
0x1d88   : > { %v13778_v40 = vmul.f32 1.6732632, %v18076_v53 }
0x1d8a   : > { %13863 = vrot.lane.b32.xlu0 %v22514_v34, %s19826_s9  ;;  %13851 = vrot.lane.b32.xlu1 %v22512_v44, %s19826_s9  ;;  %v13786_v42 = vsel %vm13746_vm11, %v13738_v37, %v13778_v40 }
0x1d8b   : > { %v22553_v29 = vmul.f32 1.050701, %v13786_v42 }
0x1d8e   : > { %13821 = vrot.lane.b32.xlu0 %v22514_v34, %s19827_s2  ;;  %13809 = vrot.lane.b32.xlu1 %v22512_v44, %s19827_s2  ;;  %v19484_v58 = vpop.eup %19483 }
0x1d8f   : > { %v18077_v35 = vadd.f32 -1.0, %v19484_v58 }
0x1d91   : > { %v13779_v16 = vmul.f32 1.6732632, %v18077_v35 }
0x1d92   : > { %14480 = vrot.lane.b32.xlu0 %v22514_v34, %s23410_s15  ;;  %14468 = vrot.lane.b32.xlu1 %v22512_v44, %s23410_s15 }
0x1d93   : > { %v13787_v18 = vsel %vm13747_vm12, %v13739_v9, %v13779_v16  ;;  %v23414_v9 = vld [vmem:[#allocation59_spill] sm:$0xff] }
0x1d94   : > { %v22563_v24 = vmul.f32 1.050701, %v13787_v18 }
0x1d96   : > { %14818 = vrot.lane.b32.xlu0 %v22514_v34, %s23332_s4  ;;  %14806 = vrot.lane.b32.xlu1 %v22512_v44, %s23332_s4 }
0x1d9a   : > { %13853 = vrot.lane.b32.xlu0 %v22533_v57, %s19826_s9  ;;  %15438 = vrot.lane.b32.xlu1 %v22512_v44, %s19818_s13 }
0x1d9e   : > { %13811 = vrot.lane.b32.xlu0 %v22533_v57, %s19827_s2  ;;  %15440 = vrot.lane.b32.xlu1 %v22533_v57, %s19818_s13 }
0x1da2   : > { %14470 = vrot.lane.b32.xlu0 %v22533_v57, %s23410_s15  ;;  %13848 = vrot.lane.b32.xlu1 %v22543_v39, %s19826_s9 }
0x1da6   : > { %14808 = vrot.lane.b32.xlu0 %v22533_v57, %s23332_s4  ;;  %13799 = vrot.lane.b32.xlu1 %v22543_v39, %s19827_s2 }
0x1daa   : > { %13859 = vrot.lane.b32.xlu0 %v22553_v29, %s19826_s9  ;;  %14465 = vrot.lane.b32.xlu1 %v22543_v39, %s23410_s15 }
0x1dae   : > { %13817 = vrot.lane.b32.xlu0 %v22553_v29, %s19827_s2  ;;  %14803 = vrot.lane.b32.xlu1 %v22543_v39, %s23332_s4 }
0x1db2   : > { %14476 = vrot.lane.b32.xlu0 %v22553_v29, %s23410_s15  ;;  %13861 = vrot.lane.b32.xlu1 %v22563_v24, %s19826_s9  ;;  %s23413_s9 = sld [smem:[#allocation43_spill]] }
0x1db6   : > { %14814 = vrot.lane.b32.xlu0 %v22553_v29, %s23332_s4  ;;  %15450 = vrot.lane.b32.xlu1 %v22514_v34, %s19818_s13 }
0x1db8   : > { %v18080_v37 = vld [vmem:[%s23413_s9 + $0x8] sm:$0xff] }
0x1dba   : > { %15446 = vrot.lane.b32.xlu0 %v22553_v29, %s19818_s13  ;;  %13819 = vrot.lane.b32.xlu1 %v22563_v24, %s19827_s2  ;;  %s23474_s2 = sld [smem:[#allocation45_spill]] }
0x1dbe   : > { %15452 = vrot.lane.b32.xlu0 %v22543_v39, %s19818_s13  ;;  %15778 = vrot.lane.b32.xlu1 %v22533_v57, %s19829_s22 }
0x1dc2   : > { %15780 = vrot.lane.b32.xlu0 %v22473_v46, %s19829_s22  ;;  %14478 = vrot.lane.b32.xlu1 %v22563_v24, %s23410_s15 }
0x1dc6   : > { %15784 = vrot.lane.b32.xlu0 %v22553_v29, %s19829_s22  ;;  %15782 = vrot.lane.b32.xlu1 %v22482_v62, %s19829_s22 }
0x1dca   : > { %15790 = vrot.lane.b32.xlu0 %v22543_v39, %s19829_s22  ;;  %14816 = vrot.lane.b32.xlu1 %v22563_v24, %s23332_s4  ;;  %s23411_s4 = sld [smem:[#allocation46_spill]] }
0x1dce   : > { %16118 = vrot.lane.b32.xlu0 %v22473_v46, %s19830_s5  ;;  %15776 = vrot.lane.b32.xlu1 %v22512_v44, %s19829_s22 }
0x1dd0   : > { %v16805_v45 = vld [vmem:[%s23411_s4] sm:$0xff] }
0x1dd2   : > { %16122 = vrot.lane.b32.xlu0 %v22553_v29, %s19830_s5  ;;  %15788 = vrot.lane.b32.xlu1 %v22514_v34, %s19829_s22 }
0x1dd6   : > { %16128 = vrot.lane.b32.xlu0 %v22543_v39, %s19830_s5  ;;  %16116 = vrot.lane.b32.xlu1 %v22533_v57, %s19830_s5 }
0x1dda   : > { %15448 = vrot.lane.b32.xlu0 %v22563_v24, %s19818_s13  ;;  %16120 = vrot.lane.b32.xlu1 %v22482_v62, %s19830_s5  ;;  %s23412_s13 = sld [smem:[#allocation44_spill]] }
0x1dde   : > { %16456 = vrot.lane.b32.xlu0 %v22473_v46, %s19831_s28  ;;  %16114 = vrot.lane.b32.xlu1 %v22512_v44, %s19830_s5 }
0x1de0   : > { %v16790_v11 = vld [vmem:[%s23412_s13] sm:$0xff] }
0x1de2   : > { %15786 = vrot.lane.b32.xlu0 %v22563_v24, %s19829_s22  ;;  %16126 = vrot.lane.b32.xlu1 %v22514_v34, %s19830_s5  ;;  %s23501_s22 = sld [smem:[#allocation47_spill]] }
0x1de6   : > { %16460 = vrot.lane.b32.xlu0 %v22553_v29, %s19831_s28  ;;  %16454 = vrot.lane.b32.xlu1 %v22533_v57, %s19831_s28 }
0x1de8   : > { %v22621_v14 = vpop.permute.xlu0 %15442  ;;  %v13856_v38 = vpop.permute.xlu1 %13855 }
0x1dea   : > { %16124 = vrot.lane.b32.xlu0 %v22563_v24, %s19830_s5  ;;  %16458 = vrot.lane.b32.xlu1 %v22482_v62, %s19831_s28  ;;  %s18142_s5 = sshll.u32 %s23507_s26, 5 }
0x1dec   : > { %v13858_v22 = vpop.permute.xlu0 %13857  ;;  %v22627_v52 = vpop.permute.xlu1 %13813 }
0x1ded   : > { %v13867_v56 = vsel %vm1269_vm1, %v13856_v38, %v13858_v22 }
0x1dee   : > { %v13884_v33 = vmul.f32 %v13867_v56, %v21700_v31  ;;  %16462 = vrot.lane.b32.xlu0 %v22563_v24, %s19831_s28  ;;  %16452 = vrot.lane.b32.xlu1 %v22512_v44, %s19831_s28 }
0x1df0   : > { %v22635_v19 = vpop.permute.xlu0 %13815  ;;  %13995 = vmatprep.subr.mxu1 %v13884_v33  ;;  %v22637_v1 = vpop.permute.xlu1 %14472  ;;  %v23417_v33 = vld [vmem:[#allocation62_spill] sm:$0xff] }
0x1df1   : > { %v13825_v58 = vsel %vm10205_vm8, %v22627_v52, %v22635_v19 }
0x1df2   : > { %16466 = vrot.lane.b32.xlu0 %v22543_v39, %s19831_s28  ;;  %16464 = vrot.lane.b32.xlu1 %v22514_v34, %s19831_s28  ;;  %s1262_s28 = scalar_lea.vmem %s23501_s22, %s18142_s5 }
0x1df4   : > { %v22645_v31 = vpop.permute.xlu0 %14474  ;;  %v22647_v32 = vpop.permute.xlu1 %14810 }
0x1df6   : > { %16808 = vperm.xlu0 %19449, %v16805_v45   ;;  %16793 = vperm.xlu1 %19450, %v16790_v11  }
0x1df8   : > { %v22650_v27 = vpop.permute.xlu0 %14812  ;;  %v22652_v25 = vpop.permute.xlu1 %15444 }
0x1df9   : > { %v22657_v36 = vsel %vm8280_vm5, %v22621_v14, %v22652_v25 }
0x1dfa   : > { %17110 = vperm.xlu1 %19450, %v17107_v3   ;;  %v23418_v3 = vld [vmem:[#allocation49_spill] sm:$0xff] }
0x1dfc   : > { %v13864_v13 = vpop.permute.xlu0 %13863  ;;  %v13852_v17 = vpop.permute.xlu1 %13851 }
0x1e00   : > { %v22659_v61 = vpop.permute.xlu0 %13821  ;;  %v13810_v4 = vpop.permute.xlu1 %13809 }
0x1e04   : > { %v22661_v2 = vpop.permute.xlu0 %14480  ;;  %v22663_v12 = vpop.permute.xlu1 %14468 }
0x1e08   : > { %v22665_v15 = vpop.permute.xlu0 %14818  ;;  %v22667_v0 = vpop.permute.xlu1 %14806 }
0x1e0c   : > { %v13854_v26 = vpop.permute.xlu0 %13853  ;;  %v22669_v50 = vpop.permute.xlu1 %15438 }
0x1e0d   : > { %v13865_v47 = vsel %vm1269_vm1, %v13852_v17, %v13854_v26  ;;  %v13866_v54 = vsel %vm1269_vm1, %v13854_v26, %v13856_v38  ;;  %v23416_v38 = vld [vmem:[#allocation61_spill] sm:$0xff]  ;;  %v23419_v26 = vld [vmem:[#allocation50_spill] sm:$0xff] }
0x1e0e   : > { %v13882_v23 = vmul.f32 %v13865_v47, %v21729_v59  ;;  %v13883_v20 = vmul.f32 %v13866_v54, %v21733_v7  ;;  %v13842_v47 = vmul.f32 %v13825_v58, %v23419_v26 }
0x1e10   : > { %13996 = vmatpush1.msra.mxu1 %v13883_v20  ;;  %v13812_v30 = vpop.permute.xlu0 %13811  ;;  %13924 = vmatprep.subr.mxu0 %v13882_v23  ;;  %v22676_v6 = vpop.permute.xlu1 %15440  ;;  %v23420_v23 = vld [vmem:[#allocation48_spill] sm:$0xff] }
0x1e11   : > { %18082 = vmatmul.mubr.msk.f32.vlgmr.msra.gmra.mxu1 %vm6444_vm3, %v18080_v37  ;;  %v13823_v16 = vsel %vm10205_vm8, %v13810_v4, %v13812_v30  ;;  %v13824_v18 = vsel %vm10205_vm8, %v13812_v30, %v22627_v52  ;;  %v14484_v52 = vsel %vm10998_vm15, %v22637_v1, %v22645_v31  ;;  %v23421_v30 = vld [vmem:[#allocation63_spill] sm:$0xff] }
0x1e12   : > { %14171 = vmatprep.mubr.f32.mxu1 %v23358_v63  ;;  %v13840_v20 = vmul.f32 %v13823_v16, %v23420_v23  ;;  %v23426_v16 = vld [vmem:[#allocation69_spill] sm:$0xff] }
0x1e14   : > { %v14471_v49 = vpop.permute.xlu0 %14470  ;;  %v13849_v10 = vpop.permute.xlu1 %13848 }
0x1e15   : > { %v13871_v8 = vsel %vm1269_vm1, %v13864_v13, %v13849_v10  ;;  %v13880_v43 = vsel %vm1269_vm1, %v13849_v10, %v13852_v17  ;;  %v13841_v10 = vmul.f32 %v13824_v18, %v23421_v30 }
0x1e16   : > { %v13881_v59 = vmul.f32 %v13880_v43, %v23414_v9  ;;  %v13888_v7 = vmul.f32 %v13871_v8, %v23415_v55  ;;  %v23423_v43 = vld [vmem:[#allocation65_spill] sm:$0xff]  ;;  %v23424_v55 = vld [vmem:[#allocation66_spill] sm:$0xff] }
0x1e18   : > { %v22684_v51 = vpop.permute.xlu0 %14808  ;;  %13925 = vmatpush1.msra.mxu0 %v13881_v59  ;;  %14137 = vmatprep.subr.mxu1 %v13888_v7  ;;  %v13800_v41 = vpop.permute.xlu1 %13799  ;;  %v13847_v59 = vld [vmem:[%s23413_s9] sm:$0xff]  ;;  %v14501_v7 = vmul.f32 %v14484_v52, %v23424_v55 }
0x1e19   : > { %18081 = vmatmul.mubr.msk.f32.vlgmr.msra.gmra.mxu0 %vm6444_vm3, %v18080_v37  ;;  %v13829_v45 = vsel %vm10205_vm8, %v22659_v61, %v13800_v41  ;;  %v13838_v11 = vsel %vm10205_vm8, %v13800_v41, %v13810_v4  ;;  %v23422_v4 = vld [vmem:[#allocation64_spill] sm:$0xff]  ;;  %v23432_v52 = vld [vmem:[#allocation74_spill] sm:$0xff]  ;;  %v23434_v55 = vld [vmem:[#allocation77_spill] sm:$0xff] }
0x1e1a   : > { %14100 = vmatprep.mubr.f32.mxu0 %v23358_v63  ;;  %v13839_v8 = vmul.f32 %v13838_v11, %v23422_v4  ;;  %v13846_v9 = vmul.f32 %v13829_v45, %v23423_v43  ;;  %v23430_v11 = vld [vmem:[#allocation72_spill] sm:$0xff]  ;;  %v14820_v4 = vsel %vm8100_vm6, %v22667_v0, %v22684_v51 }
0x1e1c   : > { %v13860_v21 = vpop.permute.xlu0 %13859  ;;  %v14466_v28 = vpop.permute.xlu1 %14465 }
0x1e1d   : > { %v13868_v48 = vsel %vm1269_vm1, %v13858_v22, %v13860_v21 }
0x1e1e   : > { %v13885_v17 = vmul.f32 %v13868_v48, %v23418_v3 }
0x1e20   : > { %v13818_v60 = vpop.permute.xlu0 %13817  ;;  %v22688_v5 = vpop.permute.xlu1 %14803 }
0x1e21   : > { %v13826_v41 = vsel %vm10205_vm8, %v22635_v19, %v13818_v60  ;;  %v14483_v19 = vsel %vm10998_vm15, %v14471_v49, %v22637_v1 }
0x1e24   : > { %v22691_v53 = vpop.permute.xlu0 %14476  ;;  %v13862_v40 = vpop.permute.xlu1 %13861 }
0x1e25   : > { %v13869_v42 = vsel %vm1269_vm1, %v13860_v21, %v13862_v40  ;;  %v13870_v35 = vsel %vm1269_vm1, %v13862_v40, %v13864_v13  ;;  %v14482_v40 = vsel %vm10998_vm15, %v22663_v12, %v14471_v49 }
0x1e26   : > { %v13886_v56 = vmul.f32 %v13869_v42, %v23416_v38  ;;  %v13887_v22 = vmul.f32 %v13870_v35, %v23417_v33  ;;  %v23425_v42 = vld [vmem:[#allocation68_spill] sm:$0xff]  ;;  %v14488_v38 = vsel %vm10998_vm15, %v22661_v2, %v14466_v28  ;;  %v14822_v33 = vsel %vm8100_vm6, %v22647_v32, %v22650_v27 }
0x1e27   : > { %v14839_v23 = vmul.f32 %v14822_v33, %v23432_v52  ;;  %v23440_v33 = vld [vmem:[#allocation82_spill] sm:$0xff]  ;;  %v23445_v52 = vld [vmem:[#allocation87_spill] sm:$0xff] }
0x1e28   : > { %v22708_v13 = vpop.permute.xlu0 %14814  ;;  %14066 = vmatprep.subr.mxu0 %v13886_v56  ;;  %14138 = vmatpush1.msra.mxu1 %v13887_v22  ;;  %v22710_v54 = vpop.permute.xlu1 %15450  ;;  %v23428_v22 = vld [vmem:[#allocation67_spill] sm:$0xff] }
0x1e29   : > { %14067 = vmatpush1.msra.mxu0 %v13885_v17  ;;  %18084 = vmatmul.mubr.msk.f32.vlgmr.msra.gmra.mxu1 %vm6444_vm3, %v18080_v37  ;;  %v14499_v45 = vmul.f32 %v14482_v40, %v23428_v22  ;;  %v23431_v17 = vld [vmem:[#allocation73_spill] sm:$0xff]  ;;  %v23436_v40 = vld [vmem:[#allocation75_spill] sm:$0xff] }
0x1e2a   : > { %14282 = vmatprep.subr.mxu1 %v13842_v47  ;;  %18083 = vmatmul.mubr.msk.f32.vlgmr.msra.gmra.mxu0 %vm6444_vm3, %v18080_v37  ;;  %v14505_v26 = vmul.f32 %v14488_v38, %v23431_v17  ;;  %v18089_v47 = vld [vmem:[%s23413_s9 + $0x10] sm:$0xff]  ;;  %v15455_v17 = vsel %vm8280_vm5, %v22676_v6, %v22621_v14 }
0x1e2b   : > { %14211 = vmatprep.subr.mxu0 %v13840_v20  ;;  %14283 = vmatpush1.msra.mxu1 %v13841_v10  ;;  %v14485_v20 = vsel %vm10998_vm15, %v22645_v31, %v22691_v53  ;;  %v14821_v31 = vsel %vm8100_vm6, %v22684_v51, %v22647_v32 }
0x1e2c   : > { %14212 = vmatpush1.msra.mxu0 %v13839_v8  ;;  %14424 = vmatprep.subr.mxu1 %v13846_v9  ;;  %v22725_v21 = vpop.permute.xlu0 %15446  ;;  %v13820_v48 = vpop.permute.xlu1 %13819  ;;  %v23433_v9 = vld [vmem:[#allocation76_spill] sm:$0xff] }
0x1e2d   : > { %14316 = vmatprep.mubr.f32.mxu1 %v23358_v63  ;;  %v13827_v37 = vsel %vm10205_vm8, %v13818_v60, %v13820_v48  ;;  %v13828_v58 = vsel %vm10205_vm8, %v13820_v48, %v22659_v61  ;;  %14245 = vmatprep.mubr.f32.mxu0 %v23358_v63  ;;  %v14497_v60 = vsel %vm10998_vm15, %v14466_v28, %v22663_v12  ;;  %v23427_v61 = vld [vmem:[#allocation71_spill] sm:$0xff]  ;;  %v23429_v12 = vld [vmem:[#allocation70_spill] sm:$0xff] }
0x1e2e   : > { %v13844_v35 = vmul.f32 %v13827_v37, %v23425_v42  ;;  %v13845_v18 = vmul.f32 %v13828_v58, %v23426_v16  ;;  %18086 = vmatmul.mubr.msk.f32.vlgmr.msra.gmra.mxu1 %vm6444_vm3, %v13847_v59  ;;  %18085 = vmatmul.mubr.msk.f32.vlgmr.msra.gmra.mxu0 %vm6444_vm3, %v13847_v59  ;;  %v13843_v56 = vmul.f32 %v13826_v41, %v23427_v61  ;;  %v23435_v41 = vld [vmem:[#allocation79_spill] sm:$0xff]  ;;  %v23437_v58 = vld [vmem:[#allocation78_spill] sm:$0xff]  ;;  %v23439_v42 = vld [vmem:[#allocation81_spill] sm:$0xff] }
0x1e2f   : > { %14458 = vmatprep.mubr.f32.mxu1 %v23358_v63  ;;  %14387 = vmatprep.mubr.f32.mxu0 %v23358_v63  ;;  %v14500_v28 = vmul.f32 %v14483_v19, %v23429_v12  ;;  %v14498_v3 = vmul.f32 %v14497_v60, %v23430_v11  ;;  %v14502_v48 = vmul.f32 %v14485_v20, %v23435_v41  ;;  %v18094_v16 = vld [vmem:[%s23413_s9 + $0x18] sm:$0xff]  ;;  %v23447_v20 = vld [vmem:[#allocation90_spill] sm:$0xff] }
0x1e30   : > { %v22747_v1 = vpop.permute.xlu0 %15452  ;;  %14353 = vmatprep.subr.mxu0 %v13844_v35  ;;  %14425 = vmatpush1.msra.mxu1 %v13845_v18  ;;  %v22749_v49 = vpop.permute.xlu1 %15778  ;;  %v14837_v37 = vmul.f32 %v14820_v4, %v23436_v40  ;;  %v14838_v19 = vmul.f32 %v14821_v31, %v23437_v58  ;;  %v14823_v18 = vsel %vm8100_vm6, %v22650_v27, %v22708_v13  ;;  %v23442_v27 = vld [vmem:[#allocation84_spill] sm:$0xff] }
0x1e31   : > { %14354 = vmatpush1.msra.mxu0 %v13843_v56  ;;  %14612 = vmatprep.subr.mxu1 %v14501_v7  ;;  %v15457_v11 = vsel %vm8280_vm5, %v22652_v25, %v22725_v21  ;;  %v15470_v14 = vsel %vm8280_vm5, %v22747_v1, %v22669_v50  ;;  %v23451_v41 = vld [vmem:[#allocation92_spill] sm:$0xff] }
0x1e32   : > { %18088 = vmatmul.mubr.msk.f32.vlgmr.msra.gmra.mxu1 %vm6444_vm3, %v13847_v59  ;;  %18087 = vmatmul.mubr.msk.f32.vlgmr.msra.gmra.mxu0 %vm6444_vm3, %v13847_v59 }
0x1e33   : > { %14541 = vmatprep.subr.mxu0 %v14499_v45  ;;  %14613 = vmatpush1.msra.mxu1 %v14500_v28  ;;  %v23441_v45 = vld [vmem:[#allocation83_spill] sm:$0xff]  ;;  %v14840_v28 = vmul.f32 %v14823_v18, %v23442_v27 }
0x1e34   : > { %14542 = vmatpush1.msra.mxu0 %v14498_v3  ;;  %14754 = vmatprep.subr.mxu1 %v14505_v26  ;;  %v22765_v30 = vpop.permute.xlu0 %15780  ;;  %v14479_v10 = vpop.permute.xlu1 %14478  ;;  %v18099_v3 = vld [vmem:[%s23413_s9 + $0x20] sm:$0xff] }
0x1e35   : > { %14646 = vmatprep.mubr.f32.mxu1 %v23358_v63  ;;  %v14486_v8 = vsel %vm10998_vm15, %v22691_v53, %v14479_v10  ;;  %v14487_v43 = vsel %vm10998_vm15, %v14479_v10, %v22661_v2  ;;  %14575 = vmatprep.mubr.f32.mxu0 %v23358_v63  ;;  %v14826_v53 = vsel %vm8100_vm6, %v22665_v15, %v22688_v5 }
0x1e36   : > { %v14503_v59 = vmul.f32 %v14486_v8, %v23433_v9  ;;  %v14504_v7 = vmul.f32 %v14487_v43, %v23434_v55  ;;  %18091 = vmatmul.mubr.msk.f32.vlgmr.msra.gmra.mxu1 %vm6444_vm3, %v18089_v47  ;;  %18090 = vmatmul.mubr.msk.f32.vlgmr.msra.gmra.mxu0 %vm6444_vm3, %v18089_v47  ;;  %v14835_v2 = vsel %vm8100_vm6, %v22688_v5, %v22667_v0  ;;  %v23438_v0 = vld [vmem:[#allocation80_spill] sm:$0xff]  ;;  %v18104_v8 = vld [vmem:[%s23413_s9 + $0x28] sm:$0xff] }
0x1e37   : > { %14788 = vmatprep.mubr.f32.mxu1 %v23358_v63  ;;  %14717 = vmatprep.mubr.f32.mxu0 %v23358_v63  ;;  %v14836_v5 = vmul.f32 %v14835_v2, %v23438_v0  ;;  %v14843_v35 = vmul.f32 %v14826_v53, %v23439_v42  ;;  %v15793_v2 = vsel %vm12526_vm2, %v22749_v49, %v22765_v30  ;;  %v23455_v42 = vld [vmem:[#allocation98_spill] sm:$0xff] }
0x1e38   : > { %v22792_v32 = vpop.permute.xlu0 %15784  ;;  %14683 = vmatprep.subr.mxu0 %v14503_v59  ;;  %14755 = vmatpush1.msra.mxu1 %v14504_v7  ;;  %v22794_v51 = vpop.permute.xlu1 %15782  ;;  %v23449_v59 = vld [vmem:[#allocation93_spill] sm:$0xff]  ;;  %v23450_v7 = vld [vmem:[#allocation94_spill] sm:$0xff] }
0x1e39   : > { %14684 = vmatpush1.msra.mxu0 %v14502_v48  ;;  %14950 = vmatprep.subr.mxu1 %v14839_v23  ;;  %v23446_v23 = vld [vmem:[#allocation88_spill] sm:$0xff] }
0x1e3a   : > { %18093 = vmatmul.mubr.msk.f32.vlgmr.msra.gmra.mxu1 %vm6444_vm3, %v18089_v47  ;;  %18092 = vmatmul.mubr.msk.f32.vlgmr.msra.gmra.mxu0 %vm6444_vm3, %v18089_v47 }
0x1e3b   : > { %14879 = vmatprep.subr.mxu0 %v14837_v37  ;;  %14951 = vmatpush1.msra.mxu1 %v14838_v19  ;;  %v23453_v19 = vld [vmem:[#allocation91_spill] sm:$0xff] }
0x1e3c   : > { %14880 = vmatpush1.msra.mxu0 %v14836_v5  ;;  %15092 = vmatprep.subr.mxu1 %v14843_v35  ;;  %v22806_v38 = vpop.permute.xlu0 %15790  ;;  %v14817_v60 = vpop.permute.xlu1 %14816 }
0x1e3d   : > { %14984 = vmatprep.mubr.f32.mxu1 %v23358_v63  ;;  %v14824_v61 = vsel %vm8100_vm6, %v22708_v13, %v14817_v60  ;;  %v14825_v56 = vsel %vm8100_vm6, %v14817_v60, %v22665_v15  ;;  %14913 = vmatprep.mubr.f32.mxu0 %v23358_v63 }
0x1e3e   : > { %v14841_v22 = vmul.f32 %v14824_v61, %v23440_v33  ;;  %v14842_v12 = vmul.f32 %v14825_v56, %v23441_v45  ;;  %18096 = vmatmul.mubr.msk.f32.vlgmr.msra.gmra.mxu1 %vm6444_vm3, %v18094_v16  ;;  %18095 = vmatmul.mubr.msk.f32.vlgmr.msra.gmra.mxu0 %vm6444_vm3, %v18094_v16  ;;  %v18109_v56 = vld [vmem:[%s23413_s9 + $0x30] sm:$0xff] }
0x1e3f   : > { %15126 = vmatprep.mubr.f32.mxu1 %v23358_v63  ;;  %15055 = vmatprep.mubr.f32.mxu0 %v23358_v63 }
0x1e40   : > { %v22821_v13 = vpop.permute.xlu0 %16118  ;;  %15021 = vmatprep.subr.mxu0 %v14841_v22  ;;  %15093 = vmatpush1.msra.mxu1 %v14842_v12  ;;  %v15777_v15 = vpop.permute.xlu1 %15776  ;;  %v23456_v22 = vld [vmem:[#allocation97_spill] sm:$0xff] }
0x1e41   : > { %15022 = vmatpush1.msra.mxu0 %v14840_v28  ;;  %15247 = vmatprep.subr.mxu1 %v22482_v62  ;;  %v15792_v48 = vsel %vm12526_vm2, %v15777_v15, %v22749_v49  ;;  %v15808_v40 = vsel %vm12526_vm2, %v22806_v38, %v15777_v15  ;;  %v23454_v49 = vld [vmem:[#allocation96_spill] sm:$0xff]  ;;  %v23457_v12 = vld [vmem:[#allocation101_spill] sm:$0xff]  ;;  %v23458_v28 = vld [vmem:[#allocation102_spill] sm:$0xff] }
0x1e42   : > { %18098 = vmatmul.mubr.msk.f32.vlgmr.msra.gmra.mxu1 %vm6444_vm3, %v18094_v16  ;;  %18097 = vmatmul.mubr.msk.f32.vlgmr.msra.gmra.mxu0 %vm6444_vm3, %v18094_v16  ;;  %v15809_v5 = vmul.f32 %v15792_v48, %v23454_v49  ;;  %v15816_v35 = vmul.f32 %v15808_v40, %v23455_v42  ;;  %v23469_v48 = vld [vmem:[#allocation112_spill] sm:$0xff] }
0x1e43   : > { %15176 = vmatprep.subr.mxu0 %v22533_v57  ;;  %15248 = vmatpush1.msra.mxu1 %v22473_v46  ;;  %v23443_v57 = vld [vmem:[#allocation85_spill] sm:$0xff]  ;;  %v15454_v46 = vsel %vm8280_vm5, %v22669_v50, %v22676_v6  ;;  %v15473_v6 = vmul.f32 %v22657_v36, %v23445_v52  ;;  %v15795_v36 = vsel %vm12526_vm2, %v22794_v51, %v22792_v32  ;;  %v23462_v52 = vld [vmem:[#allocation104_spill] sm:$0xff] }
0x1e44   : > { %15177 = vmatpush1.msra.mxu0 %v22512_v44  ;;  %15389 = vmatprep.subr.mxu1 %v22543_v39  ;;  %v22837_v62 = vpop.permute.xlu0 %16122  ;;  %v22839_v26 = vpop.permute.xlu1 %15788  ;;  %v15474_v25 = vmul.f32 %v15457_v11, %v23443_v57  ;;  %v23444_v44 = vld [vmem:[#allocation86_spill] sm:$0xff]  ;;  %v15471_v50 = vmul.f32 %v15454_v46, %v23446_v23 }
0x1e45   : > { %15281 = vmatprep.mubr.f32.mxu1 %v23358_v63  ;;  %15318 = vmatprep.subr.mxu0 %v22563_v24  ;;  %v15472_v39 = vmul.f32 %v15455_v17, %v23444_v44  ;;  %v15798_v16 = vsel %vm12526_vm2, %v22839_v26, %v22806_v38 }
0x1e46   : > { %15210 = vmatprep.mubr.f32.mxu0 %v23358_v63  ;;  %18101 = vmatmul.mubr.msk.f32.vlgmr.msra.gmra.mxu1 %vm6444_vm3, %v18099_v3  ;;  %v15815_v45 = vmul.f32 %v15798_v16, %v23456_v22  ;;  %v23476_v22 = vld [vmem:[#allocation54_spill] sm:$0xff] }
0x1e47   : > { %15390 = vmatpush1.msra.mxu1 %v22514_v34  ;;  %18100 = vmatmul.mubr.msk.f32.vlgmr.msra.gmra.mxu0 %vm6444_vm3, %v18099_v3  ;;  %v15478_v34 = vmul.f32 %v15470_v14, %v23447_v20 }
0x1e48   : > { %15319 = vmatpush1.msra.mxu0 %v22553_v29  ;;  %15585 = vmatprep.subr.mxu1 %v15474_v25  ;;  %v22856_v24 = vpop.permute.xlu0 %16128  ;;  %v22858_v47 = vpop.permute.xlu1 %16116  ;;  %v15460_v29 = vsel %vm8280_vm5, %v22710_v54, %v22747_v1  ;;  %v23448_v1 = vld [vmem:[#allocation89_spill] sm:$0xff] }
0x1e49   : > { %15514 = vmatprep.subr.mxu0 %v15472_v39  ;;  %15423 = vmatprep.mubr.f32.mxu1 %v23358_v63  ;;  %v15477_v9 = vmul.f32 %v15460_v29, %v23448_v1  ;;  %v16131_v11 = vsel %vm12932_vm0, %v22858_v47, %v22821_v13  ;;  %v23461_v39 = vld [vmem:[#allocation100_spill] sm:$0xff]  ;;  %v23466_v1 = vld [vmem:[#allocation110_spill] sm:$0xff] }
0x1e4a   : > { %15352 = vmatprep.mubr.f32.mxu0 %v23358_v63  ;;  %18103 = vmatmul.mubr.msk.f32.vlgmr.msra.gmra.mxu1 %vm6444_vm3, %v18099_v3  ;;  %v18114_v29 = vld [vmem:[%s23413_s9 + $0x38] sm:$0xff] }
0x1e4b   : > { %15586 = vmatpush1.msra.mxu1 %v15473_v6  ;;  %18102 = vmatmul.mubr.msk.f32.vlgmr.msra.gmra.mxu0 %vm6444_vm3, %v18099_v3  ;;  %v23459_v3 = vld [vmem:[#allocation99_spill] sm:$0xff]  ;;  %v23463_v6 = vld [vmem:[#allocation106_spill] sm:$0xff] }
0x1e4c   : > { %15515 = vmatpush1.msra.mxu0 %v15471_v50  ;;  %15727 = vmatprep.subr.mxu1 %v15478_v34  ;;  %v15449_v10 = vpop.permute.xlu0 %15448  ;;  %v16121_v4 = vpop.permute.xlu1 %16120 }
0x1e4d   : > { %v15458_v43 = vsel %vm8280_vm5, %v22725_v21, %v15449_v10  ;;  %v15459_v31 = vsel %vm8280_vm5, %v15449_v10, %v22710_v54  ;;  %15619 = vmatprep.mubr.f32.mxu1 %v23358_v63  ;;  %15548 = vmatprep.mubr.f32.mxu0 %v23358_v63  ;;  %v15794_v21 = vsel %vm12526_vm2, %v22765_v30, %v22794_v51  ;;  %v23452_v30 = vld [vmem:[#allocation95_spill] sm:$0xff] }
0x1e4e   : > { %v15475_v55 = vmul.f32 %v15458_v43, %v23449_v59  ;;  %v15476_v53 = vmul.f32 %v15459_v31, %v23450_v7  ;;  %v15812_v54 = vmul.f32 %v15795_v36, %v23451_v41  ;;  %18106 = vmatmul.mubr.msk.f32.vlgmr.msra.gmra.mxu1 %vm6444_vm3, %v18104_v8  ;;  %v15810_v51 = vmul.f32 %v15793_v2, %v23452_v30  ;;  %v23465_v43 = vld [vmem:[#allocation109_spill] sm:$0xff] }
0x1e4f   : > { %18105 = vmatmul.mubr.msk.f32.vlgmr.msra.gmra.mxu0 %vm6444_vm3, %v18104_v8  ;;  %15728 = vmatpush1.msra.mxu1 %v15477_v9  ;;  %v15811_v0 = vmul.f32 %v15794_v21, %v23453_v19  ;;  %v16133_v18 = vsel %vm12932_vm0, %v16121_v4, %v22837_v62 }
0x1e50   : > { %v22897_v37 = vpop.permute.xlu0 %16456  ;;  %15656 = vmatprep.subr.mxu0 %v15476_v53  ;;  %v16115_v58 = vpop.permute.xlu1 %16114  ;;  %15923 = vmatprep.subr.mxu1 %v15812_v54  ;;  %v16150_v17 = vmul.f32 %v16133_v18, %v23459_v3  ;;  %v23468_v53 = vld [vmem:[#allocation108_spill] sm:$0xff]  ;;  %v23483_v3 = vld [vmem:[#allocation55_spill] sm:$0xff] }
0x1e51   : > { %15761 = vmatprep.mubr.f32.mxu1 %v23358_v63  ;;  %15657 = vmatpush1.msra.mxu0 %v15475_v55  ;;  %v16146_v57 = vsel %vm12932_vm0, %v22856_v24, %v16115_v58  ;;  %v23467_v55 = vld [vmem:[#allocation107_spill] sm:$0xff]  ;;  %v23472_v18 = vld [vmem:[#allocation116_spill] sm:$0xff] }
0x1e52   : > { %15690 = vmatprep.mubr.f32.mxu0 %v23358_v63  ;;  %18108 = vmatmul.mubr.msk.f32.vlgmr.msra.gmra.mxu1 %vm6444_vm3, %v18104_v8  ;;  %v16154_v23 = vmul.f32 %v16146_v57, %v23463_v6 }
0x1e53   : > { %18107 = vmatmul.mubr.msk.f32.vlgmr.msra.gmra.mxu0 %vm6444_vm3, %v18104_v8  ;;  %15924 = vmatpush1.msra.mxu1 %v15811_v0  ;;  %v18119_v0 = vld [vmem:[%s23413_s9 + $0x40] sm:$0xff] }
0x1e54   : > { %15852 = vmatprep.subr.mxu0 %v15810_v51  ;;  %v15787_v60 = vpop.permute.xlu0 %15786  ;;  %v16127_v61 = vpop.permute.xlu1 %16126  ;;  %16065 = vmatprep.subr.mxu1 %v15816_v35  ;;  %v23471_v35 = vld [vmem:[#allocation114_spill] sm:$0xff] }
0x1e55   : > { %15853 = vmatpush1.msra.mxu0 %v15809_v5  ;;  %v15796_v33 = vsel %vm12526_vm2, %v22792_v32, %v15787_v60  ;;  %v15797_v38 = vsel %vm12526_vm2, %v15787_v60, %v22839_v26  ;;  %15957 = vmatprep.mubr.f32.mxu1 %v23358_v63  ;;  %v16132_v32 = vsel %vm12932_vm0, %v22821_v13, %v16121_v4  ;;  %v23460_v13 = vld [vmem:[#allocation103_spill] sm:$0xff] }
0x1e56   : > { %v15813_v27 = vmul.f32 %v15796_v33, %v23457_v12  ;;  %v15814_v15 = vmul.f32 %v15797_v38, %v23458_v28  ;;  %15886 = vmatprep.mubr.f32.mxu0 %v23358_v63  ;;  %18111 = vmatmul.mubr.msk.f32.vlgmr.msra.gmra.mxu1 %vm6444_vm3, %v18109_v56  ;;  %v16130_v26 = vsel %vm12932_vm0, %v16115_v58, %v22858_v47  ;;  %v23470_v58 = vld [vmem:[#allocation111_spill] sm:$0xff]  ;;  %v23479_v28 = vld [vmem:[#allocation52_spill] sm:$0xff] }
0x1e57   : > { %18110 = vmatmul.mubr.msk.f32.vlgmr.msra.gmra.mxu0 %vm6444_vm3, %v18109_v56  ;;  %16066 = vmatpush1.msra.mxu1 %v15815_v45  ;;  %v16148_v44 = vmul.f32 %v16131_v11, %v23460_v13  ;;  %v16149_v14 = vmul.f32 %v16132_v32, %v23461_v39  ;;  %v16147_v47 = vmul.f32 %v16130_v26, %v23462_v52  ;;  %v23475_v33 = vld [vmem:[#allocation115_spill] sm:$0xff]  ;;  %v23477_v45 = vld [vmem:[#allocation53_spill] sm:$0xff]  ;;  %v23482_v32 = vld [vmem:[#allocation56_spill] sm:$0xff] }
0x1e58   : > { %v16461_v25 = vpop.permute.xlu0 %16460  ;;  %15994 = vmatprep.subr.mxu0 %v15814_v15  ;;  %v16455_v46 = vpop.permute.xlu1 %16454  ;;  %16261 = vmatprep.subr.mxu1 %v16150_v17  ;;  %v16136_v50 = vsel %vm12932_vm0, %v16127_v61, %v22856_v24  ;;  %v23464_v24 = vld [vmem:[#allocation105_spill] sm:$0xff]  ;;  %v23478_v12 = vld [vmem:[#allocation51_spill] sm:$0xff]  ;;  %v23480_v15 = vld [vmem:[#allocation58_spill] sm:$0xff] }
0x1e59   : > { %16099 = vmatprep.mubr.f32.mxu1 %v23358_v63  ;;  %15995 = vmatpush1.msra.mxu0 %v15813_v27  ;;  %v16153_v8 = vmul.f32 %v16136_v50, %v23464_v24  ;;  %v16804_v27 = vld [vmem:[%s23474_s2] sm:$0xff] }
0x1e5a   : > { %16028 = vmatprep.mubr.f32.mxu0 %v23358_v63  ;;  %18113 = vmatmul.mubr.msk.f32.vlgmr.msra.gmra.mxu1 %vm6444_vm3, %v18109_v56  ;;  %v23481_v11 = vld [vmem:[#allocation57_spill] sm:$0xff] }
0x1e5b   : > { %18112 = vmatmul.mubr.msk.f32.vlgmr.msra.gmra.mxu0 %vm6444_vm3, %v18109_v56  ;;  %16262 = vmatpush1.msra.mxu1 %v16149_v14 }
0x1e5c   : > { %16190 = vmatprep.subr.mxu0 %v16148_v44  ;;  %v16125_v20 = vpop.permute.xlu0 %16124  ;;  %v16459_v34 = vpop.permute.xlu1 %16458  ;;  %16403 = vmatprep.subr.mxu1 %v16154_v23 }
0x1e5d   : > { %16191 = vmatpush1.msra.mxu0 %v16147_v47  ;;  %v16134_v36 = vsel %vm12932_vm0, %v22837_v62, %v16125_v20  ;;  %v16135_v10 = vsel %vm12932_vm0, %v16125_v20, %v16127_v61  ;;  %v16470_v4 = vsel %vm13338_vm4, %v22897_v37, %v16459_v34  ;;  %16295 = vmatprep.mubr.f32.mxu1 %v23358_v63  ;;  %v23473_v61 = vld [vmem:[#allocation113_spill] sm:$0xff] }
0x1e5e   : > { %v16151_v31 = vmul.f32 %v16134_v36, %v23465_v43  ;;  %v16152_v9 = vmul.f32 %v16135_v10, %v23466_v1  ;;  %v16471_v59 = vsel %vm13338_vm4, %v16459_v34, %v16461_v25  ;;  %16224 = vmatprep.mubr.f32.mxu0 %v23358_v63  ;;  %18116 = vmatmul.mubr.msk.f32.vlgmr.msra.gmra.mxu1 %vm6444_vm3, %v18114_v29 }
0x1e5f   : > { %v16488_v7 = vmul.f32 %v16471_v59, %v23467_v55  ;;  %v16469_v62 = vsel %vm13338_vm4, %v16455_v46, %v22897_v37  ;;  %v16487_v2 = vmul.f32 %v16470_v4, %v23468_v53  ;;  %16404 = vmatpush1.msra.mxu1 %v16153_v8  ;;  %18115 = vmatmul.mubr.msk.f32.vlgmr.msra.gmra.mxu0 %vm6444_vm3, %v18114_v29 }
0x1e60   : > { %v16463_v21 = vpop.permute.xlu0 %16462  ;;  %v16453_v41 = vpop.permute.xlu1 %16452  ;;  %16332 = vmatprep.subr.mxu0 %v16152_v9  ;;  %16437 = vmatprep.mubr.f32.mxu1 %v23358_v63  ;;  %v16486_v30 = vmul.f32 %v16469_v62, %v23470_v58 }
0x1e61   : > { %v16468_v54 = vsel %vm13338_vm4, %v16453_v41, %v16455_v46  ;;  %16599 = vmatprep.subr.mxu1 %v16488_v7  ;;  %16333 = vmatpush1.msra.mxu0 %v16151_v31  ;;  %v16472_v37 = vsel %vm13338_vm4, %v16461_v25, %v16463_v21 }
0x1e62   : > { %v16485_v40 = vmul.f32 %v16468_v54, %v23469_v48  ;;  %16366 = vmatprep.mubr.f32.mxu0 %v23358_v63  ;;  %18118 = vmatmul.mubr.msk.f32.vlgmr.msra.gmra.mxu1 %vm6444_vm3, %v18114_v29  ;;  %v16489_v38 = vmul.f32 %v16472_v37, %v23475_v33 }
0x1e63   : > { %16600 = vmatpush1.msra.mxu1 %v16487_v2  ;;  %18117 = vmatmul.mubr.msk.f32.vlgmr.msra.gmra.mxu0 %vm6444_vm3, %v18114_v29 }
0x1e64   : > { %v16467_v51 = vpop.permute.xlu0 %16466  ;;  %v16465_v19 = vpop.permute.xlu1 %16464  ;;  %16528 = vmatprep.subr.mxu0 %v16486_v30  ;;  %16633 = vmatprep.mubr.f32.mxu1 %v23358_v63 }
0x1e65   : > { %v16484_v49 = vsel %vm13338_vm4, %v16467_v51, %v16453_v41  ;;  %v16473_v5 = vsel %vm13338_vm4, %v16463_v21, %v16465_v19  ;;  %v16474_v42 = vsel %vm13338_vm4, %v16465_v19, %v16467_v51  ;;  %16529 = vmatpush1.msra.mxu0 %v16485_v40  ;;  %16562 = vmatprep.mubr.f32.mxu0 %v23358_v63 }
0x1e66   : > { %v16492_v16 = vmul.f32 %v16484_v49, %v23471_v35  ;;  %v16490_v60 = vmul.f32 %v16473_v5, %v23472_v18  ;;  %v16491_v56 = vmul.f32 %v16474_v42, %v23473_v61  ;;  %18121 = vmatmul.mubr.msk.f32.vlgmr.msra.gmra.mxu1 %vm6444_vm3, %v18119_v0 }
0x1e67   : > { %18120 = vmatmul.mubr.msk.f32.vlgmr.msra.gmra.mxu0 %vm6444_vm3, %v18119_v0  ;;  %16775 = vmatprep.mubr.f32.mxu1 %v23358_v63 }
0x1e68   : > { %16670 = vmatprep.subr.mxu0 %v16490_v60  ;;  %16741 = vmatprep.subr.mxu1 %v16492_v16 }
0x1e69   : > { %16671 = vmatpush1.msra.mxu0 %v16489_v38  ;;  %16704 = vmatprep.mubr.f32.mxu0 %v23358_v63 }
0x1e6a   : > { %16742 = vmatpush1.msra.mxu1 %v16491_v56  ;;  %18124 = vmatprep.subr.msk.mxu0 %vm1856_vm10, %v23476_v22 }
0x1e6b   : > { %18122 = vmatmul.mubr.msk.f32.vlgmr.msra.gmra.mxu0 %vm6444_vm3, %v18119_v0  ;;  %18123 = vmatmul.mubr.msk.f32.vlgmr.msra.gmra.mxu1 %vm6444_vm3, %v18119_v0 }
0x1e6c   : > { %18127 = vmatprep.subr.msk.mxu1 %vm1856_vm10, %v23477_v45  ;;  %18125 = vmatpush1.msk.msra.mxu0 %vm1856_vm10, %v23478_v12 }
0x1e6d   : > { %18128 = vmatpush1.msk.msra.mxu1 %vm1856_vm10, %v23479_v28  ;;  %18130 = vmatprep.subr.msk.mxu0 %vm1856_vm10, %v23480_v15 }
0x1e6e   : > { %18133 = vmatprep.subr.msk.mxu1 %vm1856_vm10, %v23481_v11  ;;  %16878 = vmatprep.mubr.f32.mxu0 %v23358_v63 }
0x1e6f   : > { %16949 = vmatprep.mubr.f32.mxu1 %v23358_v63  ;;  %18126 = vmatmul.mubr.msk.f32.vlgmr.msra.gmra.mxu0 %vm1849_vm9, %v16804_v27 }
0x1e70   : > { %18129 = vmatmul.mubr.msk.f32.vlgmr.msra.gmra.mxu1 %vm1849_vm9, %v16804_v27  ;;  %18131 = vmatpush1.msk.msra.mxu0 %vm1856_vm10, %v23482_v32 }
0x1e71   : > { %18134 = vmatpush1.msk.msra.mxu1 %vm1856_vm10, %v23483_v3  ;;  %17020 = vmatprep.mubr.f32.mxu0 %v23358_v63 }
0x1e72   : > { %17091 = vmatprep.mubr.f32.mxu1 %v23358_v63 }
0x1e73   : > { %18132 = vmatmul.mubr.msk.f32.vlgmr.msra.gmra.mxu0 %vm1849_vm9, %v16804_v27 }
0x1e74   : > { %18135 = vmatmul.mubr.msk.f32.vlgmr.msra.gmra.mxu1 %vm1849_vm9, %v16804_v27  ;;  %17180 = vmatprep.mubr.f32.mxu0 %v23358_v63 }
0x1e75   : > { %17251 = vmatprep.mubr.f32.mxu1 %v23358_v63 }
0x1ed1   : > { %v23013_v17 = vpop.f32.mrf.mxu1 }
0x1ed3   : > { %v14033_v57 = vpop.f32.mrf.mxu1 }
0x1ed9   : > { %v13960_v26 = vpop.f32.mrf.mxu0 }
0x1edb   : > { %v13962_v25 = vpop.f32.mrf.mxu0 }
0x1ee9   : > { %v23015_v46 = vpop.f32.mrf.mxu1 }
0x1eea   : > { %v23017_v13 = vpop.f32.mrf.mxu0 }
0x1eeb   : > { %v23019_v44 = vpop.f32.mrf.mxu1 }
0x1eec   : > { %v23021_v39 = vpop.f32.mrf.mxu0 }
0x1eee   : > { %v14318_v14 = vpop.f32.mrf.mxu1  ;;  %v14247_v52 = vpop.f32.mrf.mxu0 }
0x1eef   : > { %v14248_v27 = vadd.f32 %v14247_v52, %v13960_v26 }
0x1ef0   : > { %v14320_v47 = vpop.f32.mrf.mxu1  ;;  %v14249_v6 = vpop.f32.mrf.mxu0 }
0x1ef1   : > { %v14250_v15 = vadd.f32 %v14249_v6, %v13962_v25  ;;  %v14321_v32 = vadd.f32 %v14320_v47, %v14033_v57 }
0x1ef2   : > { %v14460_v23 = vpop.f32.mrf.mxu1  ;;  %v14389_v50 = vpop.f32.mrf.mxu0 }
0x1ef3   : > { %v14390_v57 = vadd.f32 %v14389_v50, %v23017_v13 }
0x1ef4   : > { %v14462_v20 = vpop.f32.mrf.mxu1  ;;  %v14391_v34 = vpop.f32.mrf.mxu0 }
0x1ef5   : > { %v14463_v47 = vadd.f32 %v14462_v20, %v23019_v44 }
0x1ef6   : > { %v14648_v29 = vpop.f32.mrf.mxu1  ;;  %v14577_v36 = vpop.f32.mrf.mxu0 }
0x1ef7   : > { %v14795_v3 = vadd.f32 %v14577_v36, %v14248_v27 }
0x1ef8   : > { %v14650_v10 = vpop.f32.mrf.mxu1  ;;  %v14579_v4 = vpop.f32.mrf.mxu0 }
0x1efa   : > { %v14790_v24 = vpop.f32.mrf.mxu1  ;;  %v23023_v8 = vpop.f32.mrf.mxu0 }
0x1efc   : > { %v23025_v43 = vpop.f32.mrf.mxu1  ;;  %v14721_v31 = vpop.f32.mrf.mxu0 }
0x1efe   : > { %v14986_v1 = vpop.f32.mrf.mxu1  ;;  %v14915_v9 = vpop.f32.mrf.mxu0 }
0x1f00   : > { %v14988_v59 = vpop.f32.mrf.mxu1  ;;  %v14917_v55 = vpop.f32.mrf.mxu0 }
0x1f02   : > { %v15128_v7 = vpop.f32.mrf.mxu1  ;;  %v23027_v62 = vpop.f32.mrf.mxu0 }
0x1f04   : > { %v23029_v53 = vpop.f32.mrf.mxu1  ;;  %v15059_v2 = vpop.f32.mrf.mxu0 }
0x1f06   : > { %v15283_v21 = vpop.f32.mrf.mxu1 }
0x1f07   : > { %v15212_v41 = vpop.f32.mrf.mxu0 }
0x1f08   : > { %v15285_v54 = vpop.f32.mrf.mxu1 }
0x1f09   : > { %v15214_v48 = vpop.f32.mrf.mxu0 }
0x1f0a   : > { %v23031_v40 = vpop.f32.mrf.mxu1 }
0x1f0b   : > { %v23033_v58 = vpop.f32.mrf.mxu0 }
0x1f0c   : > { %v23035_v30 = vpop.f32.mrf.mxu1 }
0x1f0d   : > { %v15356_v37 = vpop.f32.mrf.mxu0 }
0x1f0e   : > { %v15621_v51 = vpop.f32.mrf.mxu1 }
0x1f0f   : > { %v15550_v19 = vpop.f32.mrf.mxu0 }
0x1f10   : > { %v15623_v0 = vpop.f32.mrf.mxu1 }
0x1f11   : > { %v15552_v49 = vpop.f32.mrf.mxu0 }
0x1f12   : > { %v23037_v5 = vpop.f32.mrf.mxu1 }
0x1f13   : > { %v23039_v42 = vpop.f32.mrf.mxu0 }
0x1f14   : > { %23484 = vst [vmem:[#allocation59_spill] sm:$0xff] %v23039_v42  ;;  %v23041_v35 = vpop.f32.mrf.mxu1  ;;  %v14796_v42 = vadd.f32 %v14579_v4, %v14250_v15  ;;  %v14799_v15 = vadd.f32 %v23023_v8, %v14390_v57 }
0x1f15   : > { %23485 = vst [vmem:[#allocation60_spill] sm:$0xff] %v23041_v35  ;;  %v23043_v16 = vpop.f32.mrf.mxu0  ;;  %v14319_v35 = vadd.f32 %v14318_v14, %v23013_v17 }
0x1f16   : > { %23486 = vst [vmem:[#allocation61_spill] sm:$0xff] %v23043_v16  ;;  %v23045_v18 = vpop.f32.mrf.mxu1  ;;  %v15134_v52 = vadd.f32 %v14917_v55, %v14796_v42  ;;  %v15137_v20 = vadd.f32 %v23027_v62, %v14799_v15 }
0x1f17   : > { %23487 = vst [vmem:[#allocation62_spill] sm:$0xff] %v23045_v18  ;;  %v15888_v60 = vpop.f32.mrf.mxu0  ;;  %v14797_v26 = vadd.f32 %v14648_v29, %v14319_v35 }
0x1f18   : > { %v15961_v61 = vpop.f32.mrf.mxu1 }
0x1f19   : > { %v15890_v56 = vpop.f32.mrf.mxu0 }
0x1f1a   : > { %v23047_v33 = vpop.f32.mrf.mxu1 }
0x1f1b   : > { %23488 = vst [vmem:[#allocation49_spill] sm:$0xff] %v23047_v33  ;;  %v23049_v38 = vpop.f32.mrf.mxu0  ;;  %v14798_v33 = vadd.f32 %v14650_v10, %v14321_v32  ;;  %v15135_v10 = vadd.f32 %v14986_v1, %v14797_v26 }
0x1f1c   : > { %23489 = vst [vmem:[#allocation50_spill] sm:$0xff] %v23049_v38  ;;  %v23051_v22 = vpop.f32.mrf.mxu1  ;;  %v15133_v38 = vadd.f32 %v14915_v9, %v14795_v3  ;;  %v15431_v9 = vadd.f32 %v15214_v48, %v15134_v52  ;;  %v16809_v3 = vpop.permute.xlu0 %16808 }
0x1f1d   : > { %23490 = vst [vmem:[#allocation48_spill] sm:$0xff] %v23051_v22  ;;  %v23053_v45 = vpop.f32.mrf.mxu0  ;;  %v14461_v22 = vadd.f32 %v14460_v23, %v23015_v46  ;;  %v15136_v6 = vadd.f32 %v14988_v59, %v14798_v33  ;;  %v14802_v46 = vadd.f32 %v23025_v43, %v14463_v47  ;;  %v15432_v13 = vadd.f32 %v15283_v21, %v15135_v10  ;;  %v23492_v42 = vld [vmem:[#allocation61_spill] sm:$0xff]  ;;  %v23494_v33 = vld [vmem:[#allocation59_spill] sm:$0xff] }
0x1f1e   : > { %v23055_v12 = vpop.f32.mrf.mxu1  ;;  %v15430_v17 = vadd.f32 %v15212_v41, %v15133_v38  ;;  %v15769_v50 = vadd.f32 %v15552_v49, %v15431_v9 }
0x1f1f   : > { %23491 = vst [vmem:[#allocation63_spill] sm:$0xff] %v23055_v12  ;;  %v16226_v28 = vpop.f32.mrf.mxu0  ;;  %v14392_v12 = vadd.f32 %v14391_v34, %v23021_v39  ;;  %v14801_v36 = vadd.f32 %v14790_v24, %v14461_v22  ;;  %v15433_v39 = vadd.f32 %v15285_v54, %v15136_v6  ;;  %v15140_v24 = vadd.f32 %v23029_v53, %v14802_v46 }
0x1f20   : > { %v16299_v11 = vpop.f32.mrf.mxu1  ;;  %v15768_v23 = vadd.f32 %v15550_v19, %v15430_v17  ;;  %v15770_v48 = vadd.f32 %v15621_v51, %v15432_v13  ;;  %v16107_v43 = vadd.f32 %v15890_v56, %v15769_v50  ;;  %v15434_v54 = vadd.f32 %v23033_v58, %v15137_v20  ;;  %v16794_v17 = vpop.permute.xlu1 %16793 }
0x1f21   : > { %v16228_v63 = vpop.f32.mrf.mxu0  ;;  %v14800_v4 = vadd.f32 %v14721_v31, %v14392_v12  ;;  %v15139_v29 = vadd.f32 %v15128_v7, %v14801_v36  ;;  %v15771_v31 = vadd.f32 %v15623_v0, %v15433_v39  ;;  %v15437_v7 = vadd.f32 %v23035_v30, %v15140_v24  ;;  %v23493_v0 = vld [vmem:[#allocation62_spill] sm:$0xff] }
0x1f22   : > { %v23058_v18 = vpop.f32.mrf.mxu1  ;;  %v16106_v1 = vadd.f32 %v15888_v60, %v15768_v23  ;;  %v16108_v35 = vadd.f32 %v23493_v0, %v15770_v48  ;;  %v16445_v60 = vadd.f32 %v16228_v63, %v16107_v43  ;;  %v23496_v30 = vld [vmem:[#allocation49_spill] sm:$0xff] }
0x1f23   : > { %v23060_v16 = vpop.f32.mrf.mxu0  ;;  %v15138_v55 = vadd.f32 %v15059_v2, %v14800_v4  ;;  %v15436_v41 = vadd.f32 %v23031_v40, %v15139_v29  ;;  %v16109_v2 = vadd.f32 %v15961_v61, %v15771_v31  ;;  %v15772_v40 = vadd.f32 %v23494_v33, %v15434_v54  ;;  %v23498_v26 = vld [vmem:[#allocation50_spill] sm:$0xff] }
0x1f24   : > { %v16441_v25 = vpop.f32.mrf.mxu1  ;;  %v16444_v21 = vadd.f32 %v16226_v28, %v16106_v1  ;;  %v23499_v57 = vld [vmem:[#allocation48_spill] sm:$0xff]  ;;  %v17111_v33 = vpop.permute.xlu1 %17110 }
0x1f25   : > { %v16370_v14 = vpop.f32.mrf.mxu0  ;;  %v15435_v8 = vadd.f32 %v15356_v37, %v15138_v55  ;;  %v15774_v62 = vadd.f32 %v23037_v5, %v15436_v41  ;;  %v23495_v37 = vld [vmem:[#allocation60_spill] sm:$0xff]  ;;  %v16447_v56 = vadd.f32 %v16299_v11, %v16109_v2  ;;  %v16110_v52 = vadd.f32 %v23498_v26, %v15772_v40 }
0x1f26   : > { %v16635_v27 = vpop.f32.mrf.mxu1  ;;  %v15775_v51 = vadd.f32 %v23495_v37, %v15437_v7  ;;  %v23497_v28 = vld [vmem:[#allocation63_spill] sm:$0xff] }
0x1f27   : > { %v16564_v34 = vpop.f32.mrf.mxu0  ;;  %v15773_v53 = vadd.f32 %v23492_v42, %v15435_v8  ;;  %v16112_v61 = vadd.f32 %v23496_v30, %v15774_v62  ;;  %v16446_v32 = vadd.f32 %v23497_v28, %v16108_v35  ;;  %v16448_v9 = vadd.f32 %v23060_v16, %v16110_v52  ;;  %v17106_v8 = vld [vmem:[#allocation13] sm:$0x7] }
0x1f28   : > { %v16637_v44 = vpop.f32.mrf.mxu1  ;;  %v16782_v38 = vadd.f32 %v16564_v34, %v16444_v21  ;;  %v16113_v63 = vadd.f32 %v23499_v57, %v15775_v51  ;;  %v23500_v35 = vmov 0.0  }
0x1f29   : > { %v16566_v59 = vpop.f32.mrf.mxu0  ;;  %v16111_v12 = vadd.f32 %v23053_v45, %v15773_v53  ;;  %v16785_v47 = vadd.f32 %v16637_v44, %v16447_v56  ;;  %v16450_v11 = vadd.f32 %v23058_v18, %v16112_v61  ;;  %v16784_v4 = vadd.f32 %v16635_v27, %v16446_v32 }
0x1f2a   : > { %v16783_v5 = vadd.f32 %v16566_v59, %v16445_v60  ;;  %v16451_v15 = vadd.f32 %v16441_v25, %v16113_v63  ;;  %v16796_v45 = vadd.f32 %v16794_v17, %v16782_v38 }
0x1f2b   : > { %v16706_v19 = vpop.f32.mrf.mxu0  ;;  %v16777_v49 = vpop.f32.mrf.mxu1  ;;  %v16449_v36 = vadd.f32 %v16370_v14, %v16111_v12  ;;  %v16799_v50 = vadd.f32 %v16794_v17, %v16785_v47  ;;  %v16798_v18 = vadd.f32 %v16794_v17, %v16784_v4 }
0x1f2c   : > { %v16797_v23 = vadd.f32 %v16794_v17, %v16783_v5  ;;  %v16786_v44 = vadd.f32 %v16706_v19, %v16448_v9  ;;  %v16788_v14 = vadd.f32 %v16777_v49, %v16450_v11 }
0x1f2d   : > { %v16708_v58 = vpop.f32.mrf.mxu0  ;;  %v16779_v22 = vpop.f32.mrf.mxu1 }
0x1f2e   : > { %v16787_v34 = vadd.f32 %v16708_v58, %v16449_v36  ;;  %v16789_v20 = vadd.f32 %v16779_v22, %v16451_v15  ;;  %v16800_v21 = vadd.f32 %v16794_v17, %v16786_v44  ;;  %v16802_v42 = vadd.f32 %v16794_v17, %v16788_v14 }
0x1f2f   : > { %v16880_v6 = vpop.f32.mrf.mxu0 }
0x1f30   : > { %v16951_v10 = vpop.f32.mrf.mxu1  ;;  %v16881_v46 = vadd.f32 %v16880_v6, %v16809_v3  ;;  %v16801_v48 = vadd.f32 %v16794_v17, %v16787_v34  ;;  %v16803_v19 = vadd.f32 %v16794_v17, %v16789_v20 }
0x1f31   : > { %v16882_v39 = vpop.f32.mrf.mxu0  ;;  %v16952_v29 = vadd.f32 %v16951_v10, %v16809_v3 }
0x1f32   : > { %v16883_v55 = vadd.f32 %v16882_v39, %v16809_v3  ;;  %v16953_v13 = vpop.f32.mrf.mxu1  ;;  %v17098_v59 = vadd.f32 %v16881_v46, %v16796_v45 }
0x1f33   : > { %v16954_v24 = vadd.f32 %v16953_v13, %v16809_v3  ;;  %v17022_v31 = vpop.f32.mrf.mxu0  ;;  %v17100_v43 = vadd.f32 %v16952_v29, %v16798_v18 }
0x1f34   : > { %v17099_v27 = vadd.f32 %v16883_v55, %v16797_v23  ;;  %v17093_v1 = vpop.f32.mrf.mxu1  ;;  %v17023_v25 = vadd.f32 %v17022_v31, %v16809_v3 }
0x1f35   : > { %v17101_v16 = vadd.f32 %v16954_v24, %v16799_v50  ;;  %v17024_v41 = vpop.f32.mrf.mxu0  ;;  %v17094_v54 = vadd.f32 %v17093_v1, %v16809_v3 }
0x1f36   : > { %v17025_v7 = vadd.f32 %v17024_v41, %v16809_v3  ;;  %v17095_v2 = vpop.f32.mrf.mxu1  ;;  %17146 = vmatprep.subr.mxu0 %v17099_v27  ;;  %v17102_v53 = vadd.f32 %v17023_v25, %v16800_v21 }
0x1f37   : > { %v17096_v62 = vadd.f32 %v17095_v2, %v16809_v3  ;;  %17217 = vmatprep.subr.mxu1 %v17101_v16  ;;  %17147 = vmatpush1.msra.mxu0 %v17098_v59  ;;  %v17104_v60 = vadd.f32 %v17094_v54, %v16802_v42 }
0x1f38   : > { %v17103_v49 = vadd.f32 %v17025_v7, %v16801_v48  ;;  %17218 = vmatpush1.msra.mxu1 %v17100_v43  ;;  %18136 = vmatmul.mubr.msk.f32.vlgmr.msra.gmra.mxu0 %vm6444_vm3, %v17106_v8 }
0x1f39   : > { %v17105_v0 = vadd.f32 %v17096_v62, %v16803_v19  ;;  %18137 = vmatmul.mubr.msk.f32.vlgmr.msra.gmra.mxu1 %vm6444_vm3, %v17106_v8  ;;  %17322 = vmatprep.mubr.f32.mxu0 %v23500_v35 }
0x1f3a   : > { %17288 = vmatprep.subr.mxu0 %v17103_v49  ;;  %17393 = vmatprep.mubr.f32.mxu1 %v23500_v35 }
0x1f3b   : > { %17359 = vmatprep.subr.mxu1 %v17105_v0  ;;  %17289 = vmatpush1.msra.mxu0 %v17102_v53 }
0x1f3c   : > { %17360 = vmatpush1.msra.mxu1 %v17104_v60  ;;  %18138 = vmatmul.mubr.msk.f32.vlgmr.msra.gmra.mxu0 %vm6444_vm3, %v17106_v8 }
0x1f3d   : > { %18139 = vmatmul.mubr.msk.f32.vlgmr.msra.gmra.mxu1 %vm6444_vm3, %v17106_v8 }
0x1ff8   : > { %v17182_v40 = vpop.f32.mrf.mxu0 }
0x1ff9   : > { %v17183_v37 = vadd.f32 %v17182_v40, %v17111_v33  ;;  %v17253_v51 = vpop.f32.mrf.mxu1 }
0x1ffa   : > { %v17254_v56 = vadd.f32 %v17253_v51, %v17111_v33  ;;  %v17184_v38 = vpop.f32.mrf.mxu0 }
0x1ffb   : > { %19485 = vtanh.f32 %v17183_v37  ;;  %v17185_v58 = vadd.f32 %v17184_v38, %v17111_v33  ;;  %v17255_v22 = vpop.f32.mrf.mxu1 }
0x1ffc   : > { %19487 = vtanh.f32 %v17254_v56  ;;  %v17256_v30 = vadd.f32 %v17255_v22, %v17111_v33  ;;  %v17324_v61 = vpop.f32.mrf.mxu0 }
0x1ffd   : > { %19489 = vtanh.f32 %v17185_v58  ;;  %v17325_v12 = vadd.f32 %v17324_v61, %v17111_v33  ;;  %v17395_v28 = vpop.f32.mrf.mxu1 }
0x1ffe   : > { %19491 = vtanh.f32 %v17256_v30  ;;  %v17396_v32 = vadd.f32 %v17395_v28, %v17111_v33  ;;  %v17326_v5 = vpop.f32.mrf.mxu0 }
0x1fff   : > { %19493 = vtanh.f32 %v17325_v12  ;;  %v17327_v3 = vadd.f32 %v17326_v5, %v17111_v33  ;;  %v17397_v26 = vpop.f32.mrf.mxu1 }
0x2000   : > { %19495 = vtanh.f32 %v17396_v32  ;;  %v17398_v52 = vadd.f32 %v17397_v26, %v17111_v33 }
0x2001   : > { %19497 = vtanh.f32 %v17327_v3 }
0x2002   : > { %19499 = vtanh.f32 %v17398_v52 }
0x2008   : > { %v19486_v57 = vpop.eup %19485 }
0x2009   : > { %v19488_v63 = vpop.eup %19487 }
0x200a   : > { %v19490_v47 = vpop.eup %19489 }
0x200b   : > { %v19492_v6 = vpop.eup %19491  ;;  %v17416_v17 = vcombine.low %v19486_v57, %v19490_v47 }
0x200c   : > { %v19494_v11 = vpop.eup %19493  ;;  %v17417_v36 = vcombine.low %v19488_v63, %v19492_v6 }
0x200d   : > { %v19496_v4 = vpop.eup %19495  ;;  %17424 = vst [vmem:[%s1262_s28] sm:$0x77] %v17416_v17 }
0x200e   : > { %v19498_v10 = vpop.eup %19497  ;;  %17425 = vst [vmem:[%s1262_s28 + $0x8] sm:$0x77] %v17417_v36 }
0x200f   : > { %v19500_v9 = vpop.eup %19499  ;;  %v17418_v15 = vcombine.low %v19494_v11, %v19498_v10 }
0x2010   : > { %v17419_v45 = vcombine.low %v19496_v4, %v19500_v9 }
0x2011   : > { %17426 = vst [vmem:[%s1262_s28 + $0x10] sm:$0x77] %v17418_v15 }
0x2012   : > { %17427 = vst [vmem:[%s1262_s28 + $0x18] sm:$0x77] %v17419_v45 }
0x2013 PF: > { %p91_p5 = scmp.ge.s32.totalorder %s20119_s0, 6   ;;  %s23502_s15 = smov %s19753_s16 }
0x2014   : > { %s23503_s16 = smov %s19757_s18  ;;  %s23504_s18 = smov %s20130_s1 }
0x2015   : > { %s23505_s22 = smov %s20119_s0  ;;  %93 = sbr.rel (!%p91_p5) target bundleno = 82 (0x52), region = 375 }
0x201a   :  { %17449 = vsyncpa [#allocation3], 1 }
0x201b   :  { %17451 = vsyncpa [#allocation3 + $0x1], 1 }
0x201c   :  { %17452 = vsyncpa [#allocation5], 1 }
0x201d   :  { %17453 = vsyncpa [#allocation8], 1 }
0x201e   :  { %17454 = vsyncpa [#allocation11], 1 }
0x201f   :  { %17455 = vsyncpa [#allocation14], 1 }

</bundles_post_ra>
